<compile_context>
chip_gen: v6e
topology: v6e:2x2x1
jax: 0.10.0
libtpu: 0.0.40
codegen_flags: <defaults>
</compile_context>

<pallas_src>
import functools
import math

import jax
import jax.numpy as jnp
from jax.experimental import pallas as pl
from jax.experimental.pallas import tpu as pltpu

_EPS = 1e-5          # torch.nn.BatchNorm2d default eps
_LANE = 128
_MIB = 1024 * 1024


def _round_up(x, m):
    return -(-x // m) * m


# ---------------------------------------------------------------------------
# Pallas kernels
# ---------------------------------------------------------------------------

def _conv_stats_kernel(*refs, ho, wo, stride, cinp, with_shortcut):
    """3x3 conv (pad 1) of one batch tile from in-VMEM shifted windows.

    refs = (x, w [, wsc], y [, ysc], stats [, stats_sc]).
      x     : (BT, Hp, Wp, cinp)  bf16  spatially padded input tile
      w     : (9*cinp, cpad)      bf16  tap-major (di, dj, cin) weight matrix
      wsc   : (cinp, cpad)        bf16  fused 1x1 shortcut (= conv1 centre tap)
      y     : (BT, Ho*Wo, cpad)   bf16  raw conv output (no bias -- BN cancels it)
      stats : (1, 2, cpad)        f32   per-tile per-channel [sum; sum-of-squares]
    """
    if with_shortcut:
        x_ref, w_ref, wsc_ref, y_ref, ysc_ref, st_ref, stsc_ref = refs
    else:
        x_ref, w_ref, y_ref, st_ref = refs

    bt = x_ref.shape[0]
    rows = bt * ho * wo

    def window(di, dj):
        # x[b, oh*stride + di, ow*stride + dj, :] for all (oh, ow), flattened.
        if stride == 1:
            v = x_ref[:, di:di + ho, dj:dj + wo, :]
        else:
            # Phase-select via reshapes (no strided slicing needed).
            v = x_ref[:, di:di + stride * ho, dj:dj + stride * wo, :]
            v = v.reshape(bt, ho, stride, stride * wo, cinp)[:, :, 0]
            v = v.reshape(bt, ho, wo, stride, cinp)[:, :, :, 0]
        return v.reshape(rows, cinp)

    def emit(y_out_ref, st_out_ref, acc):
        # Statistics from the f32 accumulator *before* the bf16 cast.
        st_out_ref[0, 0:1, :] = jnp.sum(acc, axis=0, keepdims=True)
        st_out_ref[0, 1:2, :] = jnp.sum(acc * acc, axis=0, keepdims=True)
        y_out_ref[...] = acc.reshape(y_out_ref.shape).astype(y_out_ref.dtype)

    acc = None
    for di in range(3):                       # one MXU dot per kernel row, K = 3*cinp
        taps = jnp.concatenate([window(di, 0), window(di, 1), window(di, 2)], axis=-1)
        part = jnp.dot(taps, w_ref[di * 3 * cinp:(di + 1) * 3 * cinp, :],
                       preferred_element_type=jnp.float32)
        acc = part if acc is None else acc + part
    emit(y_ref, st_ref, acc)

    if with_shortcut:
        ysc = jnp.dot(window(1, 1), wsc_ref[...], preferred_element_type=jnp.float32)
        emit(ysc_ref, stsc_ref, ysc)


def _bn_relu_pad_kernel(y_ref, s_ref, b_ref, h_ref, *, ho, wo):
    """h = relu(y*scale + shift), written in spatially padded bf16 NHWC layout
    (zero border) so conv2 can consume it directly with no XLA pad/copy."""
    bt, _, cpad = y_ref.shape
    v = y_ref[...].astype(jnp.float32) * s_ref[...] + b_ref[...]
    v = jnp.maximum(v, 0.0)
    h_ref[...] = jnp.zeros_like(h_ref)
    h_ref[:, 1:ho + 1, 1:wo + 1, :] = v.reshape(bt, ho, wo, cpad).astype(h_ref.dtype)


def _bn_add_relu_kernel(y2_ref, s2_ref, b2_ref, ysc_ref, ssc_ref, bsc_ref, o_ref):
    """out = relu(bn2(conv2) + bn_sc(shortcut)) -- one per-channel FMA per term."""
    v = (y2_ref[...].astype(jnp.float32) * s2_ref[...] + b2_ref[...]
         + ysc_ref[...].astype(jnp.float32) * ssc_ref[...] + bsc_ref[...])
    o_ref[...] = jnp.maximum(v, 0.0).astype(o_ref.dtype)


# ---------------------------------------------------------------------------
# pallas_call wrappers
# ---------------------------------------------------------------------------

def _compiler_params(est_vmem_bytes):
    # Explicit scoped-VMEM limit derived from the estimated footprint; clamp so
    # it is valid on v7x (64 MiB physical) as well as v5e/v6e (128 MiB).
    limit = int(min(48 * _MIB, max(32 * _MIB, 2 * est_vmem_bytes)))
    return pltpu.CompilerParams(dimension_semantics=("parallel",),
                                vmem_limit_bytes=limit)


def _pick_batch_tile(n, per_image_bytes, budget=6 * _MIB, min_steps=8):
    """Largest divisor of n whose per-step working set fits `budget`, preferring
    enough grid steps (>= 8) to feed both TensorCores on v7x."""
    divs = [d for d in range(1, n + 1) if n % d == 0 and d * per_image_bytes <= budget]
    if not divs:
        divs = [1]
    for want in (min_steps, 2, 1):
        ok = [d for d in divs if n // d >= want]
        if ok:
            return max(ok)
    return 1


def _conv_stats(xp, wmat, wscmat, *, ho, wo, stride, b_tile):
    """xp: (N, Hp, Wp, cinp) bf16 padded input; wmat: (9*cinp, cpad) bf16;
    wscmat: (cinp, cpad) bf16 or None.  Returns [(y, stats), ...]."""
    n, hp, wp, cinp = xp.shape
    kdim, cpad = wmat.shape
    p_img = ho * wo
    steps = n // b_tile
    with_sc = wscmat is not None
    n_out = 2 if with_sc else 1

    inputs = [xp, wmat] + ([wscmat] if with_sc else [])
    in_specs = [
        pl.BlockSpec((b_tile, hp, wp, cinp), lambda i: (i, 0, 0, 0)),
        # Grid-invariant weight block.  TODO(synk): single-buffer (Buffered(1)).
        pl.BlockSpec((kdim, cpad), lambda i: (0, 0)),
    ]
    if with_sc:
        in_specs.append(pl.BlockSpec((cinp, cpad), lambda i: (0, 0)))

    out_shape = ([jax.ShapeDtypeStruct((n, p_img, cpad), jnp.bfloat16)] * n_out
                 + [jax.ShapeDtypeStruct((steps, 2, cpad), jnp.float32)] * n_out)
    out_specs = ([pl.BlockSpec((b_tile, p_img, cpad), lambda i: (i, 0, 0))] * n_out
                 + [pl.BlockSpec((1, 2, cpad), lambda i: (i, 0, 0))] * n_out)

    flops = 2 * n * p_img * cpad * (9 * cinp + (cinp if with_sc else 0))
    bytes_accessed = (xp.size * 2 + wmat.size * 2
                      + (wscmat.size * 2 if with_sc else 0)
                      + n_out * (n * p_img * cpad * 2 + steps * 2 * cpad * 4))

    block_bytes = b_tile * hp * wp * cinp * 2 + n_out * b_tile * p_img * cpad * 2
    w_bytes = (wmat.size + (wscmat.size if with_sc else 0)) * 2
    interm_bytes = b_tile * p_img * (3 * cinp * 2 + 2 * cpad * 4)
    est_vmem = 2 * block_bytes + 2 * w_bytes + interm_bytes

    outs = pl.pallas_call(
        functools.partial(_conv_stats_kernel, ho=ho, wo=wo, stride=stride,
                          cinp=cinp, with_shortcut=with_sc),
        out_shape=tuple(out_shape),
        grid=(steps,),
        in_specs=in_specs,
        out_specs=tuple(out_specs),
        compiler_params=_compiler_params(est_vmem),
        cost_estimate=pl.CostEstimate(flops=int(flops), transcendentals=0,
                                      bytes_accessed=int(bytes_accessed)),
    )(*inputs)
    ys, stats = outs[:n_out], outs[n_out:]
    return list(zip(ys, stats))


def _bn_relu_pad(y, scale, shift, *, ho, wo, b_tile):
    """y: (N, Ho*Wo, cpad) bf16 -> padded h: (N, Ho+2, Wo+2, cpad) bf16."""
    n, p_img, cpad = y.shape
    steps = n // b_tile
    block_bytes = b_tile * (p_img * cpad * 2 + (ho + 2) * (wo + 2) * cpad * 2)
    est_vmem = 2 * block_bytes + b_tile * p_img * cpad * 4
    return pl.pallas_call(
        functools.partial(_bn_relu_pad_kernel, ho=ho, wo=wo),
        out_shape=jax.ShapeDtypeStruct((n, ho + 2, wo + 2, cpad), jnp.bfloat16),
        grid=(steps,),
        in_specs=[pl.BlockSpec((b_tile, p_img, cpad), lambda i: (i, 0, 0)),
                  pl.BlockSpec((1, cpad), lambda i: (0, 0)),
                  pl.BlockSpec((1, cpad), lambda i: (0, 0))],
        out_specs=pl.BlockSpec((b_tile, ho + 2, wo + 2, cpad), lambda i: (i, 0, 0, 0)),
        compiler_params=_compiler_params(est_vmem),
        cost_estimate=pl.CostEstimate(
            flops=int(3 * n * p_img * cpad), transcendentals=0,
            bytes_accessed=int(y.size * 2 + n * (ho + 2) * (wo + 2) * cpad * 2)),
    )(y, scale, shift)


def _bn_add_relu(y2, s2, b2, ysc, ssc, bsc, *, b_tile, out_dtype):
    n, p_img, cpad = y2.shape
    steps = n // b_tile
    out_isz = jnp.dtype(out_dtype).itemsize
    block_bytes = b_tile * p_img * cpad * (2 + 2 + out_isz)
    est_vmem = 2 * block_bytes + b_tile * p_img * cpad * 4
    return pl.pallas_call(
        _bn_add_relu_kernel,
        out_shape=jax.ShapeDtypeStruct((n, p_img, cpad), out_dtype),
        grid=(steps,),
        in_specs=[pl.BlockSpec((b_tile, p_img, cpad), lambda i: (i, 0, 0)),
                  pl.BlockSpec((1, cpad), lambda i: (0, 0)),
                  pl.BlockSpec((1, cpad), lambda i: (0, 0)),
                  pl.BlockSpec((b_tile, p_img, cpad), lambda i: (i, 0, 0)),
                  pl.BlockSpec((1, cpad), lambda i: (0, 0)),
                  pl.BlockSpec((1, cpad), lambda i: (0, 0))],
        out_specs=pl.BlockSpec((b_tile, p_img, cpad), lambda i: (i, 0, 0)),
        compiler_params=_compiler_params(est_vmem),
        cost_estimate=pl.CostEstimate(
            flops=int(7 * n * p_img * cpad), transcendentals=0,
            bytes_accessed=int(y2.size * 2 + ysc.size * 2 + n * p_img * cpad * out_isz)),
    )(y2, s2, b2, ysc, ssc, bsc)


# ---------------------------------------------------------------------------
# Glue (plain JAX): weight packing, channel padding, BN scale/shift from stats
# ---------------------------------------------------------------------------

def _conv_weight_mat(w, cinp, cpad):
    """(Cout, Cin, KH, KW) torch layout -> (KH*KW*cinp, cpad) bf16, tap-major rows."""
    co, ci, kh, kw = w.shape
    wt = jnp.transpose(jnp.asarray(w, jnp.float32), (2, 3, 1, 0))     # (KH,KW,Cin,Cout)
    wt = jnp.pad(wt, ((0, 0), (0, 0), (0, cinp - ci), (0, cpad - co)))
    return wt.reshape(kh * kw * cinp, cpad).astype(jnp.bfloat16)


def _pad_channels(v, cpad):
    v = jnp.asarray(v, jnp.float32)
    return jnp.pad(v, (0, cpad - v.shape[0]))


def _bn_scale_shift(stats, count, gamma, beta):
    """Per-tile (sum, sumsq) -> per-channel (scale, shift) so BN is one FMA/elem.
    Biased variance (torch training-mode).  E[y^2]-E[y]^2 in f32 is adequate here
    because the conv outputs are (nearly) zero-mean; clamped at 0 for safety."""
    total = jnp.sum(stats, axis=0)                               # (2, cpad)
    mean = total[0] / count
    var = jnp.maximum(total[1] / count - mean * mean, 0.0)
    scale = gamma * jax.lax.rsqrt(var + _EPS)
    shift = beta - mean * scale
    return scale.reshape(1, -1), shift.reshape(1, -1)


# ---------------------------------------------------------------------------
# ResBlock forward
# ---------------------------------------------------------------------------

def resblock_forward(x_nchw, params, stride=1, out_dtype=jnp.float32):
    """ResBlock forward; x_nchw: (N, Cin, H, W) (PyTorch layout), training-mode BN."""
    x = jnp.transpose(x_nchw, (0, 2, 3, 1))                      # NHWC
    n, h, w, cin = x.shape
    cout = params["w1"].shape[0]
    cinp = _round_up(cin, _LANE)
    cpad = _round_up(cout, _LANE)

    ho = (h + 2 - 3) // stride + 1
    wo = (w + 2 - 3) // stride + 1
    p_img = ho * wo
    count = n * p_img                                            # true BN sample count

    # Spatially padded (+stride slack), channel-padded bf16 input -- the only
    # XLA-side materialization feeding conv1 / shortcut (no 9x im2col taps).
    hp = max(h + 2, stride * ho + 2)
    wp = max(w + 2, stride * wo + 2)
    xp = jnp.pad(x.astype(jnp.bfloat16),
                 ((0, 0), (1, hp - h - 1), (1, wp - w - 1), (0, cinp - cin)))

    w1 = _conv_weight_mat(params["w1"], cinp, cpad)              # (9*cinp, cpad)
    w2 = _conv_weight_mat(params["w2"], cpad, cpad)              # (9*cpad, cpad)
    wsc = jnp.pad(jnp.asarray(params["wsc"], jnp.float32)[:, :, 0, 0].T,
                  ((0, cinp - cin), (0, cpad - cout))).astype(jnp.bfloat16)
    # NOTE: conv biases (b1/b2/bsc) are intentionally not applied in the kernels:
    # training-mode BatchNorm subtracts the batch mean, cancelling them exactly.

    # ---- pass 1: conv1 (3x3, stride, pad 1) fused with the 1x1 shortcut ----
    img1 = (hp * wp * cinp * 2 + 2 * p_img * cpad * 2
            + p_img * (3 * cinp * 2 + 2 * cpad * 4))
    bt1 = _pick_batch_tile(n, img1)
    (y1, st1), (ysc, stsc) = _conv_stats(xp, w1, wsc, ho=ho, wo=wo,
                                         stride=stride, b_tile=bt1)

    s1, t1 = _bn_scale_shift(st1, count, _pad_channels(params["g1"], cpad),
                             _pad_channels(params["be1"], cpad))
    ssc, tsc = _bn_scale_shift(stsc, count, _pad_channels(params["gsc"], cpad),
                               _pad_channels(params["besc"], cpad))

    # ---- pass 2: h = relu(bn1(y1)), written directly in padded bf16 layout ----
    img2 = p_img * cpad * 2 + (ho + 2) * (wo + 2) * cpad * 2 + p_img * cpad * 4
    bt2 = _pick_batch_tile(n, img2)
    hpad = _bn_relu_pad(y1, s1, t1, ho=ho, wo=wo, b_tile=bt2)    # (N, Ho+2, Wo+2, cpad)

    # ---- pass 3: conv2 (3x3, stride 1, pad 1) ----
    img3 = ((ho + 2) * (wo + 2) * cpad * 2 + p_img * cpad * 2
            + p_img * (3 * cpad * 2 + 2 * cpad * 4))
    bt3 = _pick_batch_tile(n, img3)
    ((y2, st2),) = _conv_stats(hpad, w2, None, ho=ho, wo=wo, stride=1, b_tile=bt3)
    s2, t2 = _bn_scale_shift(st2, count, _pad_channels(params["g2"], cpad),
                             _pad_channels(params["be2"], cpad))

    # ---- pass 4: out = relu(bn2(y2) + bn_sc(ysc)) ----
    out_isz = jnp.dtype(out_dtype).itemsize
    img4 = p_img * cpad * (2 + 2 + out_isz)
    bt4 = _pick_batch_tile(n, img4)
    out = _bn_add_relu(y2, s2, t2, ysc, ssc, tsc, b_tile=bt4, out_dtype=out_dtype)

    out = out[:, :, :cout].reshape(n, ho, wo, cout)
    # TODO(synk): a downstream consumer that accepts NHWC (and/or bf16) can skip
    # this final layout round-trip entirely.
    return jnp.transpose(out, (0, 3, 1, 2))                      # NHWC -> NCHW


# ---------------------------------------------------------------------------
# Parameter init (matches the torch module's __init__) and pure-JAX reference
# ---------------------------------------------------------------------------

def init_resblock_params(key, in_channels, out_channels):
    """kaiming_normal_(fan_out, relu) conv weights, default conv bias, BN gamma=1 beta=0."""
    ks = jax.random.split(key, 6)

    def conv_w(k, co, ci, kh, kw):
        fan_out = co * kh * kw
        std = math.sqrt(2.0 / fan_out)
        return jax.random.normal(k, (co, ci, kh, kw), jnp.float32) * std

    def conv_b(k, co, ci, kh, kw):
        fan_in = ci * kh * kw
        bound = 1.0 / math.sqrt(fan_in)
        return jax.random.uniform(k, (co,), jnp.float32, -bound, bound)

    return {
        "w1": conv_w(ks[0], out_channels, in_channels, 3, 3),
        "b1": conv_b(ks[1], out_channels, in_channels, 3, 3),
        "w2": conv_w(ks[2], out_channels, out_channels, 3, 3),
        "b2": conv_b(ks[3], out_channels, out_channels, 3, 3),
        "wsc": conv_w(ks[4], out_channels, in_channels, 1, 1),
        "bsc": conv_b(ks[5], out_channels, in_channels, 1, 1),
        "g1": jnp.ones((out_channels,), jnp.float32),
        "be1": jnp.zeros((out_channels,), jnp.float32),
        "g2": jnp.ones((out_channels,), jnp.float32),
        "be2": jnp.zeros((out_channels,), jnp.float32),
        "gsc": jnp.ones((out_channels,), jnp.float32),
        "besc": jnp.zeros((out_channels,), jnp.float32),
    }


def _reference_resblock(x_nchw, params, stride=1):
    """Pure-JAX reference (conv+bias, training-mode BN with biased variance)."""
    def conv(x, w, b, s, pad):
        y = jax.lax.conv_general_dilated(
            x, w, window_strides=(s, s), padding=((pad, pad), (pad, pad)),
            dimension_numbers=("NCHW", "OIHW", "NCHW"))
        return y + b.reshape(1, -1, 1, 1)

    def bn(y, g, b):
        mean = jnp.mean(y, axis=(0, 2, 3), keepdims=True)
        var = jnp.mean(jnp.square(y - mean), axis=(0, 2, 3), keepdims=True)
        return (y - mean) * jax.lax.rsqrt(var + _EPS) * g.reshape(1, -1, 1, 1) \
            + b.reshape(1, -1, 1, 1)

    h = jax.nn.relu(bn(conv(x_nchw, params["w1"], params["b1"], stride, 1),
                       params["g1"], params["be1"]))
    sc = bn(conv(x_nchw, params["wsc"], params["bsc"], stride, 0),
            params["gsc"], params["besc"])
    out = bn(conv(h, params["w2"], params["b2"], 1, 1), params["g2"], params["be2"]) + sc
    return jax.nn.relu(out)


if __name__ == "__main__":
    key = jax.random.PRNGKey(0)
    kx, kp = jax.random.split(key)

    N, Cin, H, W = 2, 4, 16, 16
    Cout = 8
    stride = 1

    x = jax.random.normal(kx, (N, Cin, H, W), jnp.float32)       # PyTorch-style NCHW input
    params = init_resblock_params(kp, Cin, Cout)

    fwd = jax.jit(functools.partial(resblock_forward, stride=stride))
    out = jax.block_until_ready(fwd(x, params))

    assert out.shape == (N, Cout, H // stride, W // stride), out.shape
    assert bool(jnp.all(out >= 0.0))                             # final ReLU
    assert bool(jnp.all(jnp.isfinite(out)))

    ref = _reference_resblock(x, params, stride=stride)
    max_err = float(jnp.max(jnp.abs(out - ref)))
    mean_err = float(jnp.mean(jnp.abs(out - ref)))
    assert max_err < 1e-1, f"max abs error vs reference: {max_err}"
    assert mean_err < 2.5e-2, f"mean abs error vs reference: {mean_err}"
    print("KERNEL_OK")
</pallas_src>

<mosaic_0001>
module attributes {stable_mosaic.version = 11 : i64} {
  func.func @_conv_stats_kernel(%arg0: i32, %arg1: memref<1x18x18x128xbf16, #tpu.memory_space<vmem>>, %arg2: memref<1152x128xbf16, #tpu.memory_space<vmem>>, %arg3: memref<128x128xbf16, #tpu.memory_space<vmem>>, %arg4: memref<1x256x128xbf16, #tpu.memory_space<vmem>>, %arg5: memref<1x256x128xbf16, #tpu.memory_space<vmem>>, %arg6: memref<1x2x128xf32, #tpu.memory_space<vmem>>, %arg7: memref<1x2x128xf32, #tpu.memory_space<vmem>>) attributes {dimension_semantics = [#tpu.dimension_semantics<parallel>], iteration_bounds = array<i64: 2>, scalar_prefetch = 0 : i64, scratch_operands = 0 : i64, tpu.core_type = #tpu.core_type<tc>, window_params = [{transform_indices = @transform_0, window_bounds = array<i64: 1, 18, 18, 128>}, {pipeline_mode = #tpu.pipeline_mode<synchronous>, transform_indices = @transform_1, window_bounds = array<i64: 1152, 128>}, {pipeline_mode = #tpu.pipeline_mode<synchronous>, transform_indices = @transform_2, window_bounds = array<i64: 128, 128>}, {transform_indices = @transform_3, window_bounds = array<i64: 1, 256, 128>}, {transform_indices = @transform_4, window_bounds = array<i64: 1, 256, 128>}, {transform_indices = @transform_5, window_bounds = array<i64: 1, 2, 128>}, {transform_indices = @transform_6, window_bounds = array<i64: 1, 2, 128>}]} {
    %c0 = arith.constant 0 : index
    %c0_0 = arith.constant 0 : index
    %c0_1 = arith.constant 0 : index
    %c0_2 = arith.constant 0 : index
    %0 = vector.load %arg1[%c0, %c0_0, %c0_1, %c0_2] : memref<1x18x18x128xbf16, #tpu.memory_space<vmem>>, vector<1x16x16x128xbf16>
    %1 = vector.shape_cast %0 : vector<1x16x16x128xbf16> to vector<256x128xbf16>
    %c0_3 = arith.constant 0 : index
    %c0_4 = arith.constant 0 : index
    %c1 = arith.constant 1 : index
    %c0_5 = arith.constant 0 : index
    %2 = vector.load %arg1[%c0_3, %c0_4, %c1, %c0_5] : memref<1x18x18x128xbf16, #tpu.memory_space<vmem>>, vector<1x16x16x128xbf16>
    %3 = vector.shape_cast %2 : vector<1x16x16x128xbf16> to vector<256x128xbf16>
    %c0_6 = arith.constant 0 : index
    %c0_7 = arith.constant 0 : index
    %c2 = arith.constant 2 : index
    %c0_8 = arith.constant 0 : index
    %4 = vector.load %arg1[%c0_6, %c0_7, %c2, %c0_8] : memref<1x18x18x128xbf16, #tpu.memory_space<vmem>>, vector<1x16x16x128xbf16>
    %5 = vector.shape_cast %4 : vector<1x16x16x128xbf16> to vector<256x128xbf16>
    %6 = tpu.concatenate %1, %3, %5 in 1 : vector<256x128xbf16>, vector<256x128xbf16>, vector<256x128xbf16> -> vector<256x384xbf16>
    %c0_9 = arith.constant 0 : index
    %c0_10 = arith.constant 0 : index
    %7 = vector.load %arg2[%c0_9, %c0_10] : memref<1152x128xbf16, #tpu.memory_space<vmem>>, vector<384x128xbf16>
    %cst = arith.constant dense<0.000000e+00> : vector<256x128xf32>
    %8 = tpu.matmul %6, %7, %cst {dimension_numbers = #tpu.dot_dimension_numbers<[1], [0], [0], [1], [0, 0, 1, 1], [], []>} : vector<256x384xbf16>, vector<384x128xbf16>, vector<256x128xf32> -> vector<256x128xf32>
    %c0_11 = arith.constant 0 : index
    %c1_12 = arith.constant 1 : index
    %c0_13 = arith.constant 0 : index
    %c0_14 = arith.constant 0 : index
    %9 = vector.load %arg1[%c0_11, %c1_12, %c0_13, %c0_14] : memref<1x18x18x128xbf16, #tpu.memory_space<vmem>>, vector<1x16x16x128xbf16>
    %10 = vector.shape_cast %9 : vector<1x16x16x128xbf16> to vector<256x128xbf16>
    %c0_15 = arith.constant 0 : index
    %c1_16 = arith.constant 1 : index
    %c1_17 = arith.constant 1 : index
    %c0_18 = arith.constant 0 : index
    %11 = vector.load %arg1[%c0_15, %c1_16, %c1_17, %c0_18] : memref<1x18x18x128xbf16, #tpu.memory_space<vmem>>, vector<1x16x16x128xbf16>
    %12 = vector.shape_cast %11 : vector<1x16x16x128xbf16> to vector<256x128xbf16>
    %c0_19 = arith.constant 0 : index
    %c1_20 = arith.constant 1 : index
    %c2_21 = arith.constant 2 : index
    %c0_22 = arith.constant 0 : index
    %13 = vector.load %arg1[%c0_19, %c1_20, %c2_21, %c0_22] : memref<1x18x18x128xbf16, #tpu.memory_space<vmem>>, vector<1x16x16x128xbf16>
    %14 = vector.shape_cast %13 : vector<1x16x16x128xbf16> to vector<256x128xbf16>
    %15 = tpu.concatenate %10, %12, %14 in 1 : vector<256x128xbf16>, vector<256x128xbf16>, vector<256x128xbf16> -> vector<256x384xbf16>
    %c384 = arith.constant 384 : index
    %c0_23 = arith.constant 0 : index
    %16 = vector.load %arg2[%c384, %c0_23] : memref<1152x128xbf16, #tpu.memory_space<vmem>>, vector<384x128xbf16>
    %cst_24 = arith.constant dense<0.000000e+00> : vector<256x128xf32>
    %17 = tpu.matmul %15, %16, %cst_24 {dimension_numbers = #tpu.dot_dimension_numbers<[1], [0], [0], [1], [0, 0, 1, 1], [], []>} : vector<256x384xbf16>, vector<384x128xbf16>, vector<256x128xf32> -> vector<256x128xf32>
    %18 = arith.addf %8, %17 : vector<256x128xf32>
    %c0_25 = arith.constant 0 : index
    %c2_26 = arith.constant 2 : index
    %c0_27 = arith.constant 0 : index
    %c0_28 = arith.constant 0 : index
    %19 = vector.load %arg1[%c0_25, %c2_26, %c0_27, %c0_28] : memref<1x18x18x128xbf16, #tpu.memory_space<vmem>>, vector<1x16x16x128xbf16>
    %20 = vector.shape_cast %19 : vector<1x16x16x128xbf16> to vector<256x128xbf16>
    %c0_29 = arith.constant 0 : index
    %c2_30 = arith.constant 2 : index
    %c1_31 = arith.constant 1 : index
    %c0_32 = arith.constant 0 : index
    %21 = vector.load %arg1[%c0_29, %c2_30, %c1_31, %c0_32] : memref<1x18x18x128xbf16, #tpu.memory_space<vmem>>, vector<1x16x16x128xbf16>
    %22 = vector.shape_cast %21 : vector<1x16x16x128xbf16> to vector<256x128xbf16>
    %c0_33 = arith.constant 0 : index
    %c2_34 = arith.constant 2 : index
    %c2_35 = arith.constant 2 : index
    %c0_36 = arith.constant 0 : index
    %23 = vector.load %arg1[%c0_33, %c2_34, %c2_35, %c0_36] : memref<1x18x18x128xbf16, #tpu.memory_space<vmem>>, vector<1x16x16x128xbf16>
    %24 = vector.shape_cast %23 : vector<1x16x16x128xbf16> to vector<256x128xbf16>
    %25 = tpu.concatenate %20, %22, %24 in 1 : vector<256x128xbf16>, vector<256x128xbf16>, vector<256x128xbf16> -> vector<256x384xbf16>
    %c768 = arith.constant 768 : index
    %c0_37 = arith.constant 0 : index
    %26 = vector.load %arg2[%c768, %c0_37] : memref<1152x128xbf16, #tpu.memory_space<vmem>>, vector<384x128xbf16>
    %cst_38 = arith.constant dense<0.000000e+00> : vector<256x128xf32>
    %27 = tpu.matmul %25, %26, %cst_38 {dimension_numbers = #tpu.dot_dimension_numbers<[1], [0], [0], [1], [0, 0, 1, 1], [], []>} : vector<256x384xbf16>, vector<384x128xbf16>, vector<256x128xf32> -> vector<256x128xf32>
    %28 = arith.addf %18, %27 : vector<256x128xf32>
    %cst_39 = arith.constant dense<0.000000e+00> : vector<128xf32>
    %29 = vector.multi_reduction <add>, %28, %cst_39 [0] : vector<256x128xf32> to vector<128xf32>
    %30 = vector.shape_cast %29 : vector<128xf32> to vector<1x128xf32>
    %c0_40 = arith.constant 0 : index
    %c0_41 = arith.constant 0 : index
    %c0_42 = arith.constant 0 : index
    %31 = vector.load %arg6[%c0_40, %c0_41, %c0_42] : memref<1x2x128xf32, #tpu.memory_space<vmem>>, vector<1x1x128xf32>
    %32 = vector.shape_cast %31 : vector<1x1x128xf32> to vector<1x128xf32>
    %33 = vector.shape_cast %30 : vector<1x128xf32> to vector<1x1x128xf32>
    tpu.vector_store %arg6[%c0_40, %c0_41, %c0_42], %33 {strides = array<i32>} : memref<1x2x128xf32, #tpu.memory_space<vmem>>, vector<1x1x128xf32>,
    %34 = arith.mulf %28, %28 : vector<256x128xf32>
    %cst_43 = arith.constant dense<0.000000e+00> : vector<128xf32>
    %35 = vector.multi_reduction <add>, %34, %cst_43 [0] : vector<256x128xf32> to vector<128xf32>
    %36 = vector.shape_cast %35 : vector<128xf32> to vector<1x128xf32>
    %c0_44 = arith.constant 0 : index
    %c1_45 = arith.constant 1 : index
    %c0_46 = arith.constant 0 : index
    %37 = vector.load %arg6[%c0_44, %c1_45, %c0_46] : memref<1x2x128xf32, #tpu.memory_space<vmem>>, vector<1x1x128xf32>
    %38 = vector.shape_cast %37 : vector<1x1x128xf32> to vector<1x128xf32>
    %39 = vector.shape_cast %36 : vector<1x128xf32> to vector<1x1x128xf32>
    tpu.vector_store %arg6[%c0_44, %c1_45, %c0_46], %39 {strides = array<i32>} : memref<1x2x128xf32, #tpu.memory_space<vmem>>, vector<1x1x128xf32>,
    %40 = vector.shape_cast %28 : vector<256x128xf32> to vector<1x256x128xf32>
    %41 = arith.truncf %40 : vector<1x256x128xf32> to vector<1x256x128xbf16>
    %c0_47 = arith.constant 0 : index
    %c0_48 = arith.constant 0 : index
    %c0_49 = arith.constant 0 : index
    %42 = vector.load %arg4[%c0_47, %c0_48, %c0_49] : memref<1x256x128xbf16, #tpu.memory_space<vmem>>, vector<1x256x128xbf16>
    tpu.vector_store %arg4[%c0_47, %c0_48, %c0_49], %41 {strides = array<i32>} : memref<1x256x128xbf16, #tpu.memory_space<vmem>>, vector<1x256x128xbf16>,
    %c0_50 = arith.constant 0 : index
    %c1_51 = arith.constant 1 : index
    %c1_52 = arith.constant 1 : index
    %c0_53 = arith.constant 0 : index
    %43 = vector.load %arg1[%c0_50, %c1_51, %c1_52, %c0_53] : memref<1x18x18x128xbf16, #tpu.memory_space<vmem>>, vector<1x16x16x128xbf16>
    %44 = vector.shape_cast %43 : vector<1x16x16x128xbf16> to vector<256x128xbf16>
    %c0_54 = arith.constant 0 : index
    %c0_55 = arith.constant 0 : index
    %45 = vector.load %arg3[%c0_54, %c0_55] : memref<128x128xbf16, #tpu.memory_space<vmem>>, vector<128x128xbf16>
    %cst_56 = arith.constant dense<0.000000e+00> : vector<256x128xf32>
    %46 = tpu.matmul %44, %45, %cst_56 {dimension_numbers = #tpu.dot_dimension_numbers<[1], [0], [0], [1], [0, 0, 1, 1], [], []>} : vector<256x128xbf16>, vector<128x128xbf16>, vector<256x128xf32> -> vector<256x128xf32>
    %cst_57 = arith.constant dense<0.000000e+00> : vector<128xf32>
    %47 = vector.multi_reduction <add>, %46, %cst_57 [0] : vector<256x128xf32> to vector<128xf32>
    %48 = vector.shape_cast %47 : vector<128xf32> to vector<1x128xf32>
    %c0_58 = arith.constant 0 : index
    %c0_59 = arith.constant 0 : index
    %c0_60 = arith.constant 0 : index
    %49 = vector.load %arg7[%c0_58, %c0_59, %c0_60] : memref<1x2x128xf32, #tpu.memory_space<vmem>>, vector<1x1x128xf32>
    %50 = vector.shape_cast %49 : vector<1x1x128xf32> to vector<1x128xf32>
    %51 = vector.shape_cast %48 : vector<1x128xf32> to vector<1x1x128xf32>
    tpu.vector_store %arg7[%c0_58, %c0_59, %c0_60], %51 {strides = array<i32>} : memref<1x2x128xf32, #tpu.memory_space<vmem>>, vector<1x1x128xf32>,
    %52 = arith.mulf %46, %46 : vector<256x128xf32>
    %cst_61 = arith.constant dense<0.000000e+00> : vector<128xf32>
    %53 = vector.multi_reduction <add>, %52, %cst_61 [0] : vector<256x128xf32> to vector<128xf32>
    %54 = vector.shape_cast %53 : vector<128xf32> to vector<1x128xf32>
    %c0_62 = arith.constant 0 : index
    %c1_63 = arith.constant 1 : index
    %c0_64 = arith.constant 0 : index
    %55 = vector.load %arg7[%c0_62, %c1_63, %c0_64] : memref<1x2x128xf32, #tpu.memory_space<vmem>>, vector<1x1x128xf32>
    %56 = vector.shape_cast %55 : vector<1x1x128xf32> to vector<1x128xf32>
    %57 = vector.shape_cast %54 : vector<1x128xf32> to vector<1x1x128xf32>
    tpu.vector_store %arg7[%c0_62, %c1_63, %c0_64], %57 {strides = array<i32>} : memref<1x2x128xf32, #tpu.memory_space<vmem>>, vector<1x1x128xf32>,
    %58 = vector.shape_cast %46 : vector<256x128xf32> to vector<1x256x128xf32>
    %59 = arith.truncf %58 : vector<1x256x128xf32> to vector<1x256x128xbf16>
    %c0_65 = arith.constant 0 : index
    %c0_66 = arith.constant 0 : index
    %c0_67 = arith.constant 0 : index
    %60 = vector.load %arg5[%c0_65, %c0_66, %c0_67] : memref<1x256x128xbf16, #tpu.memory_space<vmem>>, vector<1x256x128xbf16>
    tpu.vector_store %arg5[%c0_65, %c0_66, %c0_67], %59 {strides = array<i32>} : memref<1x256x128xbf16, #tpu.memory_space<vmem>>, vector<1x256x128xbf16>,
    return
  }
  func.func @transform_0(%arg0: i32) -> (i32, i32, i32, i32) {
    %c0_i32 = arith.constant 0 : i32
    %c0_i32_0 = arith.constant 0 : i32
    %c0_i32_1 = arith.constant 0 : i32
    %c0_i32_2 = arith.constant 0 : i32
    return %arg0, %c0_i32, %c0_i32_0, %c0_i32_1 : i32, i32, i32, i32
  }
  func.func @transform_1(%arg0: i32) -> (i32, i32) {
    %c0_i32 = arith.constant 0 : i32
    %c0_i32_0 = arith.constant 0 : i32
    %c0_i32_1 = arith.constant 0 : i32
    return %c0_i32, %c0_i32_0 : i32, i32
  }
  func.func @transform_2(%arg0: i32) -> (i32, i32) {
    %c0_i32 = arith.constant 0 : i32
    %c0_i32_0 = arith.constant 0 : i32
    %c0_i32_1 = arith.constant 0 : i32
    return %c0_i32, %c0_i32_0 : i32, i32
  }
  func.func @transform_3(%arg0: i32) -> (i32, i32, i32) {
    %c0_i32 = arith.constant 0 : i32
    %c0_i32_0 = arith.constant 0 : i32
    %c0_i32_1 = arith.constant 0 : i32
    return %arg0, %c0_i32, %c0_i32_0 : i32, i32, i32
  }
  func.func @transform_4(%arg0: i32) -> (i32, i32, i32) {
    %c0_i32 = arith.constant 0 : i32
    %c0_i32_0 = arith.constant 0 : i32
    %c0_i32_1 = arith.constant 0 : i32
    return %arg0, %c0_i32, %c0_i32_0 : i32, i32, i32
  }
  func.func @transform_5(%arg0: i32) -> (i32, i32, i32) {
    %c0_i32 = arith.constant 0 : i32
    %c0_i32_0 = arith.constant 0 : i32
    %c0_i32_1 = arith.constant 0 : i32
    return %arg0, %c0_i32, %c0_i32_0 : i32, i32, i32
  }
  func.func @transform_6(%arg0: i32) -> (i32, i32, i32) {
    %c0_i32 = arith.constant 0 : i32
    %c0_i32_0 = arith.constant 0 : i32
    %c0_i32_1 = arith.constant 0 : i32
    return %arg0, %c0_i32, %c0_i32_0 : i32, i32, i32
  }
}

module attributes {stable_mosaic.version = 11 : i64} {
  func.func @_bn_relu_pad_kernel(%arg0: i32, %arg1: memref<1x256x128xbf16, #tpu.memory_space<vmem>>, %arg2: memref<1x128xf32, #tpu.memory_space<vmem>>, %arg3: memref<1x128xf32, #tpu.memory_space<vmem>>, %arg4: memref<1x18x18x128xbf16, #tpu.memory_space<vmem>>) attributes {dimension_semantics = [#tpu.dimension_semantics<parallel>], iteration_bounds = array<i64: 2>, scalar_prefetch = 0 : i64, scratch_operands = 0 : i64, tpu.core_type = #tpu.core_type<tc>, window_params = [{transform_indices = @transform_0, window_bounds = array<i64: 1, 256, 128>}, {pipeline_mode = #tpu.pipeline_mode<synchronous>, transform_indices = @transform_1, window_bounds = array<i64: 1, 128>}, {pipeline_mode = #tpu.pipeline_mode<synchronous>, transform_indices = @transform_2, window_bounds = array<i64: 1, 128>}, {transform_indices = @transform_3, window_bounds = array<i64: 1, 18, 18, 128>}]} {
    %c0 = arith.constant 0 : index
    %c0_0 = arith.constant 0 : index
    %c0_1 = arith.constant 0 : index
    %0 = vector.load %arg1[%c0, %c0_0, %c0_1] : memref<1x256x128xbf16, #tpu.memory_space<vmem>>, vector<1x256x128xbf16>
    %1 = arith.extf %0 : vector<1x256x128xbf16> to vector<1x256x128xf32>
    %c0_2 = arith.constant 0 : index
    %c0_3 = arith.constant 0 : index
    %2 = vector.load %arg2[%c0_2, %c0_3] : memref<1x128xf32, #tpu.memory_space<vmem>>, vector<1x128xf32>
    %3 = vector.shape_cast %2 : vector<1x128xf32> to vector<1x1x128xf32>
    %4 = vector.broadcast %3 : vector<1x1x128xf32> to vector<1x256x128xf32>
    %5 = arith.mulf %1, %4 : vector<1x256x128xf32>
    %c0_4 = arith.constant 0 : index
    %c0_5 = arith.constant 0 : index
    %6 = vector.load %arg3[%c0_4, %c0_5] : memref<1x128xf32, #tpu.memory_space<vmem>>, vector<1x128xf32>
    %7 = vector.shape_cast %6 : vector<1x128xf32> to vector<1x1x128xf32>
    %8 = vector.broadcast %7 : vector<1x1x128xf32> to vector<1x256x128xf32>
    %9 = arith.addf %5, %8 : vector<1x256x128xf32>
    %cst = arith.constant 0.000000e+00 : f32
    %10 = vector.broadcast %cst : f32 to vector<1x256x128xf32>
    %11 = arith.maximumf %9, %10 : vector<1x256x128xf32>
    %cst_6 = arith.constant 0.000000e+00 : bf16
    %12 = vector.broadcast %cst_6 : bf16 to vector<1x18x18x128xbf16>
    %c0_7 = arith.constant 0 : index
    %c0_8 = arith.constant 0 : index
    %c0_9 = arith.constant 0 : index
    %c0_10 = arith.constant 0 : index
    %13 = vector.load %arg4[%c0_7, %c0_8, %c0_9, %c0_10] : memref<1x18x18x128xbf16, #tpu.memory_space<vmem>>, vector<1x18x18x128xbf16>
    tpu.vector_store %arg4[%c0_7, %c0_8, %c0_9, %c0_10], %12 {strides = array<i32>} : memref<1x18x18x128xbf16, #tpu.memory_space<vmem>>, vector<1x18x18x128xbf16>,
    %14 = vector.shape_cast %11 : vector<1x256x128xf32> to vector<1x16x16x128xf32>
    %15 = arith.truncf %14 : vector<1x16x16x128xf32> to vector<1x16x16x128xbf16>
    %c0_11 = arith.constant 0 : index
    %c1 = arith.constant 1 : index
    %c1_12 = arith.constant 1 : index
    %c0_13 = arith.constant 0 : index
    %16 = vector.load %arg4[%c0_11, %c1, %c1_12, %c0_13] : memref<1x18x18x128xbf16, #tpu.memory_space<vmem>>, vector<1x16x16x128xbf16>
    tpu.vector_store %arg4[%c0_11, %c1, %c1_12, %c0_13], %15 {strides = array<i32>} : memref<1x18x18x128xbf16, #tpu.memory_space<vmem>>, vector<1x16x16x128xbf16>,
    return
  }
  func.func @transform_0(%arg0: i32) -> (i32, i32, i32) {
    %c0_i32 = arith.constant 0 : i32
    %c0_i32_0 = arith.constant 0 : i32
    %c0_i32_1 = arith.constant 0 : i32
    return %arg0, %c0_i32, %c0_i32_0 : i32, i32, i32
  }
  func.func @transform_1(%arg0: i32) -> (i32, i32) {
    %c0_i32 = arith.constant 0 : i32
    %c0_i32_0 = arith.constant 0 : i32
    %c0_i32_1 = arith.constant 0 : i32
    return %c0_i32, %c0_i32_0 : i32, i32
  }
  func.func @transform_2(%arg0: i32) -> (i32, i32) {
    %c0_i32 = arith.constant 0 : i32
    %c0_i32_0 = arith.constant 0 : i32
    %c0_i32_1 = arith.constant 0 : i32
    return %c0_i32, %c0_i32_0 : i32, i32
  }
  func.func @transform_3(%arg0: i32) -> (i32, i32, i32, i32) {
    %c0_i32 = arith.constant 0 : i32
    %c0_i32_0 = arith.constant 0 : i32
    %c0_i32_1 = arith.constant 0 : i32
    %c0_i32_2 = arith.constant 0 : i32
    return %arg0, %c0_i32, %c0_i32_0, %c0_i32_1 : i32, i32, i32, i32
  }
}

module attributes {stable_mosaic.version = 11 : i64} {
  func.func @_conv_stats_kernel(%arg0: i32, %arg1: memref<1x18x18x128xbf16, #tpu.memory_space<vmem>>, %arg2: memref<1152x128xbf16, #tpu.memory_space<vmem>>, %arg3: memref<1x256x128xbf16, #tpu.memory_space<vmem>>, %arg4: memref<1x2x128xf32, #tpu.memory_space<vmem>>) attributes {dimension_semantics = [#tpu.dimension_semantics<parallel>], iteration_bounds = array<i64: 2>, scalar_prefetch = 0 : i64, scratch_operands = 0 : i64, tpu.core_type = #tpu.core_type<tc>, window_params = [{transform_indices = @transform_0, window_bounds = array<i64: 1, 18, 18, 128>}, {pipeline_mode = #tpu.pipeline_mode<synchronous>, transform_indices = @transform_1, window_bounds = array<i64: 1152, 128>}, {transform_indices = @transform_2, window_bounds = array<i64: 1, 256, 128>}, {transform_indices = @transform_3, window_bounds = array<i64: 1, 2, 128>}]} {
    %c0 = arith.constant 0 : index
    %c0_0 = arith.constant 0 : index
    %c0_1 = arith.constant 0 : index
    %c0_2 = arith.constant 0 : index
    %0 = vector.load %arg1[%c0, %c0_0, %c0_1, %c0_2] : memref<1x18x18x128xbf16, #tpu.memory_space<vmem>>, vector<1x16x16x128xbf16>
    %1 = vector.shape_cast %0 : vector<1x16x16x128xbf16> to vector<256x128xbf16>
    %c0_3 = arith.constant 0 : index
    %c0_4 = arith.constant 0 : index
    %c1 = arith.constant 1 : index
    %c0_5 = arith.constant 0 : index
    %2 = vector.load %arg1[%c0_3, %c0_4, %c1, %c0_5] : memref<1x18x18x128xbf16, #tpu.memory_space<vmem>>, vector<1x16x16x128xbf16>
    %3 = vector.shape_cast %2 : vector<1x16x16x128xbf16> to vector<256x128xbf16>
    %c0_6 = arith.constant 0 : index
    %c0_7 = arith.constant 0 : index
    %c2 = arith.constant 2 : index
    %c0_8 = arith.constant 0 : index
    %4 = vector.load %arg1[%c0_6, %c0_7, %c2, %c0_8] : memref<1x18x18x128xbf16, #tpu.memory_space<vmem>>, vector<1x16x16x128xbf16>
    %5 = vector.shape_cast %4 : vector<1x16x16x128xbf16> to vector<256x128xbf16>
    %6 = tpu.concatenate %1, %3, %5 in 1 : vector<256x128xbf16>, vector<256x128xbf16>, vector<256x128xbf16> -> vector<256x384xbf16>
    %c0_9 = arith.constant 0 : index
    %c0_10 = arith.constant 0 : index
    %7 = vector.load %arg2[%c0_9, %c0_10] : memref<1152x128xbf16, #tpu.memory_space<vmem>>, vector<384x128xbf16>
    %cst = arith.constant dense<0.000000e+00> : vector<256x128xf32>
    %8 = tpu.matmul %6, %7, %cst {dimension_numbers = #tpu.dot_dimension_numbers<[1], [0], [0], [1], [0, 0, 1, 1], [], []>} : vector<256x384xbf16>, vector<384x128xbf16>, vector<256x128xf32> -> vector<256x128xf32>
    %c0_11 = arith.constant 0 : index
    %c1_12 = arith.constant 1 : index
    %c0_13 = arith.constant 0 : index
    %c0_14 = arith.constant 0 : index
    %9 = vector.load %arg1[%c0_11, %c1_12, %c0_13, %c0_14] : memref<1x18x18x128xbf16, #tpu.memory_space<vmem>>, vector<1x16x16x128xbf16>
    %10 = vector.shape_cast %9 : vector<1x16x16x128xbf16> to vector<256x128xbf16>
    %c0_15 = arith.constant 0 : index
    %c1_16 = arith.constant 1 : index
    %c1_17 = arith.constant 1 : index
    %c0_18 = arith.constant 0 : index
    %11 = vector.load %arg1[%c0_15, %c1_16, %c1_17, %c0_18] : memref<1x18x18x128xbf16, #tpu.memory_space<vmem>>, vector<1x16x16x128xbf16>
    %12 = vector.shape_cast %11 : vector<1x16x16x128xbf16> to vector<256x128xbf16>
    %c0_19 = arith.constant 0 : index
    %c1_20 = arith.constant 1 : index
    %c2_21 = arith.constant 2 : index
    %c0_22 = arith.constant 0 : index
    %13 = vector.load %arg1[%c0_19, %c1_20, %c2_21, %c0_22] : memref<1x18x18x128xbf16, #tpu.memory_space<vmem>>, vector<1x16x16x128xbf16>
    %14 = vector.shape_cast %13 : vector<1x16x16x128xbf16> to vector<256x128xbf16>
    %15 = tpu.concatenate %10, %12, %14 in 1 : vector<256x128xbf16>, vector<256x128xbf16>, vector<256x128xbf16> -> vector<256x384xbf16>
    %c384 = arith.constant 384 : index
    %c0_23 = arith.constant 0 : index
    %16 = vector.load %arg2[%c384, %c0_23] : memref<1152x128xbf16, #tpu.memory_space<vmem>>, vector<384x128xbf16>
    %cst_24 = arith.constant dense<0.000000e+00> : vector<256x128xf32>
    %17 = tpu.matmul %15, %16, %cst_24 {dimension_numbers = #tpu.dot_dimension_numbers<[1], [0], [0], [1], [0, 0, 1, 1], [], []>} : vector<256x384xbf16>, vector<384x128xbf16>, vector<256x128xf32> -> vector<256x128xf32>
    %18 = arith.addf %8, %17 : vector<256x128xf32>
    %c0_25 = arith.constant 0 : index
    %c2_26 = arith.constant 2 : index
    %c0_27 = arith.constant 0 : index
    %c0_28 = arith.constant 0 : index
    %19 = vector.load %arg1[%c0_25, %c2_26, %c0_27, %c0_28] : memref<1x18x18x128xbf16, #tpu.memory_space<vmem>>, vector<1x16x16x128xbf16>
    %20 = vector.shape_cast %19 : vector<1x16x16x128xbf16> to vector<256x128xbf16>
    %c0_29 = arith.constant 0 : index
    %c2_30 = arith.constant 2 : index
    %c1_31 = arith.constant 1 : index
    %c0_32 = arith.constant 0 : index
    %21 = vector.load %arg1[%c0_29, %c2_30, %c1_31, %c0_32] : memref<1x18x18x128xbf16, #tpu.memory_space<vmem>>, vector<1x16x16x128xbf16>
    %22 = vector.shape_cast %21 : vector<1x16x16x128xbf16> to vector<256x128xbf16>
    %c0_33 = arith.constant 0 : index
    %c2_34 = arith.constant 2 : index
    %c2_35 = arith.constant 2 : index
    %c0_36 = arith.constant 0 : index
    %23 = vector.load %arg1[%c0_33, %c2_34, %c2_35, %c0_36] : memref<1x18x18x128xbf16, #tpu.memory_space<vmem>>, vector<1x16x16x128xbf16>
    %24 = vector.shape_cast %23 : vector<1x16x16x128xbf16> to vector<256x128xbf16>
    %25 = tpu.concatenate %20, %22, %24 in 1 : vector<256x128xbf16>, vector<256x128xbf16>, vector<256x128xbf16> -> vector<256x384xbf16>
    %c768 = arith.constant 768 : index
    %c0_37 = arith.constant 0 : index
    %26 = vector.load %arg2[%c768, %c0_37] : memref<1152x128xbf16, #tpu.memory_space<vmem>>, vector<384x128xbf16>
    %cst_38 = arith.constant dense<0.000000e+00> : vector<256x128xf32>
    %27 = tpu.matmul %25, %26, %cst_38 {dimension_numbers = #tpu.dot_dimension_numbers<[1], [0], [0], [1], [0, 0, 1, 1], [], []>} : vector<256x384xbf16>, vector<384x128xbf16>, vector<256x128xf32> -> vector<256x128xf32>
    %28 = arith.addf %18, %27 : vector<256x128xf32>
    %cst_39 = arith.constant dense<0.000000e+00> : vector<128xf32>
    %29 = vector.multi_reduction <add>, %28, %cst_39 [0] : vector<256x128xf32> to vector<128xf32>
    %30 = vector.shape_cast %29 : vector<128xf32> to vector<1x128xf32>
    %c0_40 = arith.constant 0 : index
    %c0_41 = arith.constant 0 : index
    %c0_42 = arith.constant 0 : index
    %31 = vector.load %arg4[%c0_40, %c0_41, %c0_42] : memref<1x2x128xf32, #tpu.memory_space<vmem>>, vector<1x1x128xf32>
    %32 = vector.shape_cast %31 : vector<1x1x128xf32> to vector<1x128xf32>
    %33 = vector.shape_cast %30 : vector<1x128xf32> to vector<1x1x128xf32>
    tpu.vector_store %arg4[%c0_40, %c0_41, %c0_42], %33 {strides = array<i32>} : memref<1x2x128xf32, #tpu.memory_space<vmem>>, vector<1x1x128xf32>,
    %34 = arith.mulf %28, %28 : vector<256x128xf32>
    %cst_43 = arith.constant dense<0.000000e+00> : vector<128xf32>
    %35 = vector.multi_reduction <add>, %34, %cst_43 [0] : vector<256x128xf32> to vector<128xf32>
    %36 = vector.shape_cast %35 : vector<128xf32> to vector<1x128xf32>
    %c0_44 = arith.constant 0 : index
    %c1_45 = arith.constant 1 : index
    %c0_46 = arith.constant 0 : index
    %37 = vector.load %arg4[%c0_44, %c1_45, %c0_46] : memref<1x2x128xf32, #tpu.memory_space<vmem>>, vector<1x1x128xf32>
    %38 = vector.shape_cast %37 : vector<1x1x128xf32> to vector<1x128xf32>
    %39 = vector.shape_cast %36 : vector<1x128xf32> to vector<1x1x128xf32>
    tpu.vector_store %arg4[%c0_44, %c1_45, %c0_46], %39 {strides = array<i32>} : memref<1x2x128xf32, #tpu.memory_space<vmem>>, vector<1x1x128xf32>,
    %40 = vector.shape_cast %28 : vector<256x128xf32> to vector<1x256x128xf32>
    %41 = arith.truncf %40 : vector<1x256x128xf32> to vector<1x256x128xbf16>
    %c0_47 = arith.constant 0 : index
    %c0_48 = arith.constant 0 : index
    %c0_49 = arith.constant 0 : index
    %42 = vector.load %arg3[%c0_47, %c0_48, %c0_49] : memref<1x256x128xbf16, #tpu.memory_space<vmem>>, vector<1x256x128xbf16>
    tpu.vector_store %arg3[%c0_47, %c0_48, %c0_49], %41 {strides = array<i32>} : memref<1x256x128xbf16, #tpu.memory_space<vmem>>, vector<1x256x128xbf16>,
    return
  }
  func.func @transform_0(%arg0: i32) -> (i32, i32, i32, i32) {
    %c0_i32 = arith.constant 0 : i32
    %c0_i32_0 = arith.constant 0 : i32
    %c0_i32_1 = arith.constant 0 : i32
    %c0_i32_2 = arith.constant 0 : i32
    return %arg0, %c0_i32, %c0_i32_0, %c0_i32_1 : i32, i32, i32, i32
  }
  func.func @transform_1(%arg0: i32) -> (i32, i32) {
    %c0_i32 = arith.constant 0 : i32
    %c0_i32_0 = arith.constant 0 : i32
    %c0_i32_1 = arith.constant 0 : i32
    return %c0_i32, %c0_i32_0 : i32, i32
  }
  func.func @transform_2(%arg0: i32) -> (i32, i32, i32) {
    %c0_i32 = arith.constant 0 : i32
    %c0_i32_0 = arith.constant 0 : i32
    %c0_i32_1 = arith.constant 0 : i32
    return %arg0, %c0_i32, %c0_i32_0 : i32, i32, i32
  }
  func.func @transform_3(%arg0: i32) -> (i32, i32, i32) {
    %c0_i32 = arith.constant 0 : i32
    %c0_i32_0 = arith.constant 0 : i32
    %c0_i32_1 = arith.constant 0 : i32
    return %arg0, %c0_i32, %c0_i32_0 : i32, i32, i32
  }
}

module attributes {stable_mosaic.version = 11 : i64} {
  func.func @_bn_add_relu_kernel(%arg0: i32, %arg1: memref<1x256x128xbf16, #tpu.memory_space<vmem>>, %arg2: memref<1x128xf32, #tpu.memory_space<vmem>>, %arg3: memref<1x128xf32, #tpu.memory_space<vmem>>, %arg4: memref<1x256x128xbf16, #tpu.memory_space<vmem>>, %arg5: memref<1x128xf32, #tpu.memory_space<vmem>>, %arg6: memref<1x128xf32, #tpu.memory_space<vmem>>, %arg7: memref<1x256x128xf32, #tpu.memory_space<vmem>>) attributes {dimension_semantics = [#tpu.dimension_semantics<parallel>], iteration_bounds = array<i64: 2>, scalar_prefetch = 0 : i64, scratch_operands = 0 : i64, tpu.core_type = #tpu.core_type<tc>, window_params = [{transform_indices = @transform_0, window_bounds = array<i64: 1, 256, 128>}, {pipeline_mode = #tpu.pipeline_mode<synchronous>, transform_indices = @transform_1, window_bounds = array<i64: 1, 128>}, {pipeline_mode = #tpu.pipeline_mode<synchronous>, transform_indices = @transform_2, window_bounds = array<i64: 1, 128>}, {transform_indices = @transform_3, window_bounds = array<i64: 1, 256, 128>}, {pipeline_mode = #tpu.pipeline_mode<synchronous>, transform_indices = @transform_4, window_bounds = array<i64: 1, 128>}, {pipeline_mode = #tpu.pipeline_mode<synchronous>, transform_indices = @transform_5, window_bounds = array<i64: 1, 128>}, {transform_indices = @transform_6, window_bounds = array<i64: 1, 256, 128>}]} {
    %c0 = arith.constant 0 : index
    %c0_0 = arith.constant 0 : index
    %c0_1 = arith.constant 0 : index
    %0 = vector.load %arg1[%c0, %c0_0, %c0_1] : memref<1x256x128xbf16, #tpu.memory_space<vmem>>, vector<1x256x128xbf16>
    %1 = arith.extf %0 : vector<1x256x128xbf16> to vector<1x256x128xf32>
    %c0_2 = arith.constant 0 : index
    %c0_3 = arith.constant 0 : index
    %2 = vector.load %arg2[%c0_2, %c0_3] : memref<1x128xf32, #tpu.memory_space<vmem>>, vector<1x128xf32>
    %3 = vector.shape_cast %2 : vector<1x128xf32> to vector<1x1x128xf32>
    %4 = vector.broadcast %3 : vector<1x1x128xf32> to vector<1x256x128xf32>
    %5 = arith.mulf %1, %4 : vector<1x256x128xf32>
    %c0_4 = arith.constant 0 : index
    %c0_5 = arith.constant 0 : index
    %6 = vector.load %arg3[%c0_4, %c0_5] : memref<1x128xf32, #tpu.memory_space<vmem>>, vector<1x128xf32>
    %7 = vector.shape_cast %6 : vector<1x128xf32> to vector<1x1x128xf32>
    %8 = vector.broadcast %7 : vector<1x1x128xf32> to vector<1x256x128xf32>
    %9 = arith.addf %5, %8 : vector<1x256x128xf32>
    %c0_6 = arith.constant 0 : index
    %c0_7 = arith.constant 0 : index
    %c0_8 = arith.constant 0 : index
    %10 = vector.load %arg4[%c0_6, %c0_7, %c0_8] : memref<1x256x128xbf16, #tpu.memory_space<vmem>>, vector<1x256x128xbf16>
    %11 = arith.extf %10 : vector<1x256x128xbf16> to vector<1x256x128xf32>
    %c0_9 = arith.constant 0 : index
    %c0_10 = arith.constant 0 : index
    %12 = vector.load %arg5[%c0_9, %c0_10] : memref<1x128xf32, #tpu.memory_space<vmem>>, vector<1x128xf32>
    %13 = vector.shape_cast %12 : vector<1x128xf32> to vector<1x1x128xf32>
    %14 = vector.broadcast %13 : vector<1x1x128xf32> to vector<1x256x128xf32>
    %15 = arith.mulf %11, %14 : vector<1x256x128xf32>
    %16 = arith.addf %9, %15 : vector<1x256x128xf32>
    %c0_11 = arith.constant 0 : index
    %c0_12 = arith.constant 0 : index
    %17 = vector.load %arg6[%c0_11, %c0_12] : memref<1x128xf32, #tpu.memory_space<vmem>>, vector<1x128xf32>
    %18 = vector.shape_cast %17 : vector<1x128xf32> to vector<1x1x128xf32>
    %19 = vector.broadcast %18 : vector<1x1x128xf32> to vector<1x256x128xf32>
    %20 = arith.addf %16, %19 : vector<1x256x128xf32>
    %cst = arith.constant 0.000000e+00 : f32
    %21 = vector.broadcast %cst : f32 to vector<1x256x128xf32>
    %22 = arith.maximumf %20, %21 : vector<1x256x128xf32>
    %c0_13 = arith.constant 0 : index
    %c0_14 = arith.constant 0 : index
    %c0_15 = arith.constant 0 : index
    %23 = vector.load %arg7[%c0_13, %c0_14, %c0_15] : memref<1x256x128xf32, #tpu.memory_space<vmem>>, vector<1x256x128xf32>
    tpu.vector_store %arg7[%c0_13, %c0_14, %c0_15], %22 {strides = array<i32>} : memref<1x256x128xf32, #tpu.memory_space<vmem>>, vector<1x256x128xf32>,
    return
  }
  func.func @transform_0(%arg0: i32) -> (i32, i32, i32) {
    %c0_i32 = arith.constant 0 : i32
    %c0_i32_0 = arith.constant 0 : i32
    %c0_i32_1 = arith.constant 0 : i32
    return %arg0, %c0_i32, %c0_i32_0 : i32, i32, i32
  }
  func.func @transform_1(%arg0: i32) -> (i32, i32) {
    %c0_i32 = arith.constant 0 : i32
    %c0_i32_0 = arith.constant 0 : i32
    %c0_i32_1 = arith.constant 0 : i32
    return %c0_i32, %c0_i32_0 : i32, i32
  }
  func.func @transform_2(%arg0: i32) -> (i32, i32) {
    %c0_i32 = arith.constant 0 : i32
    %c0_i32_0 = arith.constant 0 : i32
    %c0_i32_1 = arith.constant 0 : i32
    return %c0_i32, %c0_i32_0 : i32, i32
  }
  func.func @transform_3(%arg0: i32) -> (i32, i32, i32) {
    %c0_i32 = arith.constant 0 : i32
    %c0_i32_0 = arith.constant 0 : i32
    %c0_i32_1 = arith.constant 0 : i32
    return %arg0, %c0_i32, %c0_i32_0 : i32, i32, i32
  }
  func.func @transform_4(%arg0: i32) -> (i32, i32) {
    %c0_i32 = arith.constant 0 : i32
    %c0_i32_0 = arith.constant 0 : i32
    %c0_i32_1 = arith.constant 0 : i32
    return %c0_i32, %c0_i32_0 : i32, i32
  }
  func.func @transform_5(%arg0: i32) -> (i32, i32) {
    %c0_i32 = arith.constant 0 : i32
    %c0_i32_0 = arith.constant 0 : i32
    %c0_i32_1 = arith.constant 0 : i32
    return %c0_i32, %c0_i32_0 : i32, i32
  }
  func.func @transform_6(%arg0: i32) -> (i32, i32, i32) {
    %c0_i32 = arith.constant 0 : i32
    %c0_i32_0 = arith.constant 0 : i32
    %c0_i32_1 = arith.constant 0 : i32
    return %arg0, %c0_i32, %c0_i32_0 : i32, i32, i32
  }
}

</mosaic_0001>

<bundles_post_ra>
// kernel: resblock_forward.7
= control target key start
LH: loop header
LB: loop body
LE: loop exit
PB: predicated region body
PF: predicated region fallthrough
CT: control target
= control target key end

     0   :  { %s948_s21 = smov 0   ;;  %s1190_s0 = inlined_call_operand.vmem [shape: bf16[2,256,128], index: 0, kind: input, shape index: {}]   ;;  %s1191_s1 = inlined_call_operand.vmem [shape: f32[1,128], index: 1, kind: input, shape index: {}]   ;;  %s1192_s2 = inlined_call_operand.vmem [shape: f32[1,128], index: 2, kind: input, shape index: {}]   ;;  %s1193_s3 = inlined_call_operand.vmem [shape: bf16[2,256,128], index: 3, kind: input, shape index: {}]   ;;  %s1194_s4 = inlined_call_operand.vmem [shape: f32[1,128], index: 4, kind: input, shape index: {}]   ;;  %s1195_s5 = inlined_call_operand.vmem [shape: f32[1,128], index: 5, kind: input, shape index: {}]   ;;  %s1196_s6 = inlined_call_operand.vmem [shape: f32[2,256,128], index: 6, kind: output, shape index: {}]  }
   0x1 LB: > { %s719_s22 = sadd.s32 4294967295, %s911_s21   ;;  %p723_p0 = scmp.ge.s32.totalorder %s911_s21, 1  ;;  %s911_s21 = sphi %s948_s21, %s16_s21  }
   0x2   : > { %p222_p1 = scmp.lt.s32.totalorder %s911_s21, 3 }
   0x4   : > { %p223_p2 = pnand %p723_p0, %p222_p1 }
   0x5   : > { %p257_p3 = scmp.lt.s32.totalorder (!%p223_p2), %s719_s22, 1 }
   0x6   : > { %226 = sbr.rel (%p223_p2) target bundleno = 87 (0x57), region = 44 }
   0xb   : > { %s1198_s22 = smov (!%p257_p3, %s719_s22), 1  ;;  %v972_v0 = vld [vmem:[%s1191_s1] ss:$0 sm:$0xff] }
   0xc   : > { %s736_s23 = sshll.u32 %s1198_s22, 7  ;;  %v977_v1 = vld [vmem:[%s1194_s4] ss:$0 sm:$0xff]  ;;  %s738_s14 = sshll.u32 %s1198_s22, 8 }
   0xd   : > { %s962_s26 = scalar_lea.vmem %s1190_s0, %s736_s23  ;;  %s967_s29 = scalar_lea.vmem %s1193_s3, %s736_s23  ;;  %v986_v10 = vld [vmem:[%s1192_s2] ss:$0 sm:$0xff] }
   0xe   : > { %v740_v2 = vld [vmem:[%s962_s26] sm:$0xff]   ;;  %v867_v4 = vld [vmem:[%s962_s26 + $0x8] sm:$0xff]   ;;  %v868_v15 = vld [vmem:[%s962_s26 + $0x10] sm:$0xff]   ;;  %s1020_s17 = scalar_lea.vmem %s1196_s6, %s738_s14 }
   0xf   : > { %v804_v3 = vld [vmem:[%s967_s29] sm:$0xff]   ;;  %v741_v5 = vunpack.c.l.bf16 %v740_v2  ;;  %v742_v7 = vunpack.c.h.bf16 %v740_v2  ;;  %v882_v9 = vld [vmem:[%s967_s29 + $0x8] sm:$0xff]   ;;  %v745_v11 = vunpack.c.l.bf16 %v867_v4  ;;  %v746_v13 = vunpack.c.h.bf16 %v867_v4  ;;  %v883_v16 = vld [vmem:[%s967_s29 + $0x10] sm:$0xff]  }
  0x10   : > { %v805_v6 = vunpack.c.l.bf16 %v804_v3  ;;  %v806_v8 = vunpack.c.h.bf16 %v804_v3  ;;  %v809_v12 = vunpack.c.l.bf16 %v882_v9  ;;  %v810_v14 = vunpack.c.h.bf16 %v882_v9  ;;  %v1003_v29 = vld [vmem:[%s1195_s5] ss:$0 sm:$0xff]  ;;  %v869_v34 = vld [vmem:[%s962_s26 + $0x18] sm:$0xff]  }
  0x11   : > { %v343_v17 = vmul.f32 %v741_v5, %v972_v0  ;;  %v344_v19 = vmul.f32 %v742_v7, %v972_v0  ;;  %v345_v21 = vmul.f32 %v745_v11, %v972_v0  ;;  %v346_v23 = vmul.f32 %v746_v13, %v972_v0  ;;  %v884_v39 = vld [vmem:[%s967_s29 + $0x18] sm:$0xff]   ;;  %v870_v56 = vld [vmem:[%s962_s26 + $0x20] sm:$0xff]  }
  0x12   : > { %v485_v18 = vmul.f32 %v805_v6, %v977_v1  ;;  %v486_v20 = vmul.f32 %v806_v8, %v977_v1  ;;  %v487_v22 = vmul.f32 %v809_v12, %v977_v1  ;;  %v488_v24 = vmul.f32 %v810_v14, %v977_v1  ;;  %v885_v57 = vld [vmem:[%s967_s29 + $0x20] sm:$0xff]   ;;  %v871_v8 = vld [vmem:[%s962_s26 + $0x28] sm:$0xff]  }
  0x13   : > { %v382_v25 = vadd.f32 %v986_v10, %v343_v17  ;;  %v383_v26 = vadd.f32 %v986_v10, %v344_v19  ;;  %v749_v27 = vunpack.c.l.bf16 %v868_v15  ;;  %v813_v28 = vunpack.c.l.bf16 %v883_v16  ;;  %v886_v14 = vld [vmem:[%s967_s29 + $0x28] sm:$0xff]  }
  0x14   : > { %v384_v30 = vadd.f32 %v986_v10, %v345_v21  ;;  %v385_v31 = vadd.f32 %v986_v10, %v346_v23  ;;  %v750_v32 = vunpack.c.h.bf16 %v868_v15  ;;  %v814_v33 = vunpack.c.h.bf16 %v883_v16 }
  0x15   : > { %v517_v35 = vadd.f32 %v485_v18, %v382_v25  ;;  %v518_v36 = vadd.f32 %v486_v20, %v383_v26  ;;  %v347_v37 = vmul.f32 %v749_v27, %v972_v0  ;;  %v489_v38 = vmul.f32 %v813_v28, %v977_v1  ;;  %v872_v27 = vld [vmem:[%s962_s26 + $0x30] sm:$0xff]  }
  0x16   : > { %v519_v40 = vadd.f32 %v487_v22, %v384_v30  ;;  %v520_v41 = vadd.f32 %v488_v24, %v385_v31  ;;  %v348_v42 = vmul.f32 %v750_v32, %v972_v0  ;;  %v490_v43 = vmul.f32 %v814_v33, %v977_v1  ;;  %v887_v33 = vld [vmem:[%s967_s29 + $0x30] sm:$0xff]  }
  0x17   : > { %v556_v44 = vadd.f32 %v1003_v29, %v517_v35  ;;  %v557_v45 = vadd.f32 %v1003_v29, %v518_v36  ;;  %v386_v46 = vadd.f32 %v986_v10, %v347_v37  ;;  %v753_v47 = vunpack.c.l.bf16 %v869_v34 }
  0x18   : > { %v558_v48 = vadd.f32 %v1003_v29, %v519_v40  ;;  %v559_v49 = vadd.f32 %v1003_v29, %v520_v41  ;;  %v387_v50 = vadd.f32 %v986_v10, %v348_v42  ;;  %v817_v51 = vunpack.c.l.bf16 %v884_v39 }
  0x19   : > { %v588_v52 = vmax.f32 %v556_v44, 0.0  ;;  %v589_v53 = vmax.f32 %v557_v45, 0.0  ;;  %v521_v54 = vadd.f32 %v489_v38, %v386_v46  ;;  %v349_v55 = vmul.f32 %v753_v47, %v972_v0 }
  0x1a   : > { %v590_v58 = vmax.f32 %v558_v48, 0.0  ;;  %v591_v59 = vmax.f32 %v559_v49, 0.0  ;;  %v522_v60 = vadd.f32 %v490_v43, %v387_v50  ;;  %v491_v61 = vmul.f32 %v817_v51, %v977_v1  ;;  %v873_v50 = vld [vmem:[%s962_s26 + $0x38] sm:$0xff]  }
  0x1b   : > { %620 = vst [vmem:[%s1020_s17] sm:$0xff] %v588_v52  ;;  %621 = vst [vmem:[%s1020_s17 + $0x8] sm:$0xff] %v589_v53  ;;  %v560_v62 = vadd.f32 %v1003_v29, %v521_v54  ;;  %v388_v63 = vadd.f32 %v986_v10, %v349_v55  ;;  %v754_v2 = vunpack.c.h.bf16 %v869_v34  ;;  %v818_v3 = vunpack.c.h.bf16 %v884_v39  ;;  %v888_v51 = vld [vmem:[%s967_s29 + $0x38] sm:$0xff]  }
  0x1c   : > { %622 = vst [vmem:[%s1020_s17 + $0x10] sm:$0xff] %v590_v58  ;;  %623 = vst [vmem:[%s1020_s17 + $0x18] sm:$0xff] %v591_v59  ;;  %v561_v4 = vadd.f32 %v1003_v29, %v522_v60  ;;  %v757_v5 = vunpack.c.l.bf16 %v870_v56  ;;  %v821_v6 = vunpack.c.l.bf16 %v885_v57  ;;  %v758_v7 = vunpack.c.h.bf16 %v870_v56 }
  0x1d   : > { %v592_v9 = vmax.f32 %v560_v62, 0.0  ;;  %v523_v11 = vadd.f32 %v491_v61, %v388_v63  ;;  %v350_v12 = vmul.f32 %v754_v2, %v972_v0  ;;  %v492_v13 = vmul.f32 %v818_v3, %v977_v1  ;;  %v874_v2 = vld [vmem:[%s962_s26 + $0x40] sm:$0xff]  }
  0x1e   : > { %v593_v15 = vmax.f32 %v561_v4, 0.0  ;;  %v351_v16 = vmul.f32 %v757_v5, %v972_v0  ;;  %v493_v17 = vmul.f32 %v821_v6, %v977_v1  ;;  %v352_v18 = vmul.f32 %v758_v7, %v972_v0  ;;  %v889_v7 = vld [vmem:[%s967_s29 + $0x40] sm:$0xff]  }
  0x1f   : > { %624 = vst [vmem:[%s1020_s17 + $0x20] sm:$0xff] %v592_v9  ;;  %v562_v19 = vadd.f32 %v1003_v29, %v523_v11  ;;  %v389_v20 = vadd.f32 %v986_v10, %v350_v12  ;;  %v822_v21 = vunpack.c.h.bf16 %v885_v57  ;;  %v761_v22 = vunpack.c.l.bf16 %v871_v8 }
  0x20   : > { %625 = vst [vmem:[%s1020_s17 + $0x28] sm:$0xff] %v593_v15  ;;  %v390_v23 = vadd.f32 %v986_v10, %v351_v16  ;;  %v391_v24 = vadd.f32 %v986_v10, %v352_v18  ;;  %v825_v25 = vunpack.c.l.bf16 %v886_v14  ;;  %v762_v26 = vunpack.c.h.bf16 %v871_v8 }
  0x21   : > { %v594_v28 = vmax.f32 %v562_v19, 0.0  ;;  %v524_v30 = vadd.f32 %v492_v13, %v389_v20  ;;  %v494_v31 = vmul.f32 %v822_v21, %v977_v1  ;;  %v353_v32 = vmul.f32 %v761_v22, %v972_v0  ;;  %v875_v21 = vld [vmem:[%s962_s26 + $0x48] sm:$0xff]  }
  0x22   : > { %v525_v34 = vadd.f32 %v493_v17, %v390_v23  ;;  %v495_v35 = vmul.f32 %v825_v25, %v977_v1  ;;  %v354_v36 = vmul.f32 %v762_v26, %v972_v0  ;;  %v826_v37 = vunpack.c.h.bf16 %v886_v14  ;;  %v890_v26 = vld [vmem:[%s967_s29 + $0x48] sm:$0xff]  }
  0x23   : > { %626 = vst [vmem:[%s1020_s17 + $0x30] sm:$0xff] %v594_v28  ;;  %v563_v38 = vadd.f32 %v1003_v29, %v524_v30  ;;  %v526_v39 = vadd.f32 %v494_v31, %v391_v24  ;;  %v392_v40 = vadd.f32 %v986_v10, %v353_v32  ;;  %v765_v41 = vunpack.c.l.bf16 %v872_v27 }
  0x24   : > { %v564_v42 = vadd.f32 %v1003_v29, %v525_v34  ;;  %v393_v43 = vadd.f32 %v986_v10, %v354_v36  ;;  %v496_v44 = vmul.f32 %v826_v37, %v977_v1  ;;  %v829_v45 = vunpack.c.l.bf16 %v887_v33 }
  0x25   : > { %v595_v46 = vmax.f32 %v563_v38, 0.0  ;;  %v565_v47 = vadd.f32 %v1003_v29, %v526_v39  ;;  %v527_v48 = vadd.f32 %v495_v35, %v392_v40  ;;  %v355_v49 = vmul.f32 %v765_v41, %v972_v0 }
  0x26   : > { %v596_v52 = vmax.f32 %v564_v42, 0.0  ;;  %v528_v53 = vadd.f32 %v496_v44, %v393_v43  ;;  %v497_v54 = vmul.f32 %v829_v45, %v977_v1  ;;  %v766_v55 = vunpack.c.h.bf16 %v872_v27  ;;  %v876_v44 = vld [vmem:[%s962_s26 + $0x50] sm:$0xff]  }
  0x27   : > { %627 = vst [vmem:[%s1020_s17 + $0x38] sm:$0xff] %v595_v46  ;;  %v597_v56 = vmax.f32 %v565_v47, 0.0  ;;  %v566_v57 = vadd.f32 %v1003_v29, %v527_v48  ;;  %v394_v58 = vadd.f32 %v986_v10, %v355_v49  ;;  %v830_v59 = vunpack.c.h.bf16 %v887_v33  ;;  %v891_v45 = vld [vmem:[%s967_s29 + $0x50] sm:$0xff]  }
  0x28   : > { %628 = vst [vmem:[%s1020_s17 + $0x40] sm:$0xff] %v596_v52  ;;  %v567_v60 = vadd.f32 %v1003_v29, %v528_v53  ;;  %v356_v61 = vmul.f32 %v766_v55, %v972_v0  ;;  %v769_v62 = vunpack.c.l.bf16 %v873_v50  ;;  %v833_v63 = vunpack.c.l.bf16 %v888_v51 }
  0x29   : > { %629 = vst [vmem:[%s1020_s17 + $0x48] sm:$0xff] %v597_v56  ;;  %v598_v3 = vmax.f32 %v566_v57, 0.0  ;;  %v529_v4 = vadd.f32 %v497_v54, %v394_v58  ;;  %v498_v5 = vmul.f32 %v830_v59, %v977_v1  ;;  %v770_v6 = vunpack.c.h.bf16 %v873_v50  ;;  %v877_v58 = vld [vmem:[%s962_s26 + $0x58] sm:$0xff]  }
  0x2a   : > { %v599_v8 = vmax.f32 %v567_v60, 0.0  ;;  %v395_v9 = vadd.f32 %v986_v10, %v356_v61  ;;  %v357_v11 = vmul.f32 %v769_v62, %v972_v0  ;;  %v499_v12 = vmul.f32 %v833_v63, %v977_v1  ;;  %v892_v63 = vld [vmem:[%s967_s29 + $0x58] sm:$0xff]  }
  0x2b   : > { %630 = vst [vmem:[%s1020_s17 + $0x50] sm:$0xff] %v598_v3  ;;  %v568_v13 = vadd.f32 %v1003_v29, %v529_v4  ;;  %v358_v14 = vmul.f32 %v770_v6, %v972_v0  ;;  %v834_v15 = vunpack.c.h.bf16 %v888_v51  ;;  %v773_v16 = vunpack.c.l.bf16 %v874_v2 }
  0x2c   : > { %631 = vst [vmem:[%s1020_s17 + $0x58] sm:$0xff] %v599_v8  ;;  %v530_v17 = vadd.f32 %v498_v5, %v395_v9  ;;  %v396_v18 = vadd.f32 %v986_v10, %v357_v11  ;;  %v837_v19 = vunpack.c.l.bf16 %v889_v7  ;;  %v774_v20 = vunpack.c.h.bf16 %v874_v2 }
  0x2d   : > { %v600_v22 = vmax.f32 %v568_v13, 0.0  ;;  %v397_v23 = vadd.f32 %v986_v10, %v358_v14  ;;  %v500_v24 = vmul.f32 %v834_v15, %v977_v1  ;;  %v359_v25 = vmul.f32 %v773_v16, %v972_v0  ;;  %v878_v15 = vld [vmem:[%s962_s26 + $0x60] sm:$0xff]  }
  0x2e   : > { %v569_v27 = vadd.f32 %v1003_v29, %v530_v17  ;;  %v531_v28 = vadd.f32 %v499_v12, %v396_v18  ;;  %v501_v30 = vmul.f32 %v837_v19, %v977_v1  ;;  %v360_v31 = vmul.f32 %v774_v20, %v972_v0  ;;  %v893_v20 = vld [vmem:[%s967_s29 + $0x60] sm:$0xff]  }
  0x2f   : > { %632 = vst [vmem:[%s1020_s17 + $0x60] sm:$0xff] %v600_v22  ;;  %v532_v32 = vadd.f32 %v500_v24, %v397_v23  ;;  %v398_v33 = vadd.f32 %v986_v10, %v359_v25  ;;  %v838_v34 = vunpack.c.h.bf16 %v889_v7  ;;  %v777_v35 = vunpack.c.l.bf16 %v875_v21 }
  0x30   : > { %v601_v36 = vmax.f32 %v569_v27, 0.0  ;;  %v570_v37 = vadd.f32 %v1003_v29, %v531_v28  ;;  %v399_v38 = vadd.f32 %v986_v10, %v360_v31  ;;  %v841_v39 = vunpack.c.l.bf16 %v890_v26 }
  0x31   : > { %v571_v40 = vadd.f32 %v1003_v29, %v532_v32  ;;  %v533_v41 = vadd.f32 %v501_v30, %v398_v33  ;;  %v502_v42 = vmul.f32 %v838_v34, %v977_v1  ;;  %v361_v43 = vmul.f32 %v777_v35, %v972_v0 }
  0x32   : > { %633 = vst [vmem:[%s1020_s17 + $0x68] sm:$0xff] %v601_v36  ;;  %v602_v46 = vmax.f32 %v570_v37, 0.0  ;;  %v503_v47 = vmul.f32 %v841_v39, %v977_v1  ;;  %v778_v48 = vunpack.c.h.bf16 %v875_v21  ;;  %v842_v49 = vunpack.c.h.bf16 %v890_v26  ;;  %v894_v39 = vld [vmem:[%s967_s29 + $0x68] sm:$0xff]  }
  0x33   : > { %v603_v50 = vmax.f32 %v571_v40, 0.0  ;;  %v572_v51 = vadd.f32 %v1003_v29, %v533_v41  ;;  %v534_v52 = vadd.f32 %v502_v42, %v399_v38  ;;  %v400_v53 = vadd.f32 %v986_v10, %v361_v43  ;;  %v879_v38 = vld [vmem:[%s962_s26 + $0x68] sm:$0xff]  }
  0x34   : > { %634 = vst [vmem:[%s1020_s17 + $0x70] sm:$0xff] %v602_v46  ;;  %v362_v54 = vmul.f32 %v778_v48, %v972_v0  ;;  %v504_v55 = vmul.f32 %v842_v49, %v977_v1  ;;  %v781_v56 = vunpack.c.l.bf16 %v876_v44  ;;  %v845_v57 = vunpack.c.l.bf16 %v891_v45 }
  0x35   : > { %635 = vst [vmem:[%s1020_s17 + $0x78] sm:$0xff] %v603_v50  ;;  %v604_v59 = vmax.f32 %v572_v51, 0.0  ;;  %v573_v60 = vadd.f32 %v1003_v29, %v534_v52  ;;  %v535_v61 = vadd.f32 %v503_v47, %v400_v53  ;;  %v782_v62 = vunpack.c.h.bf16 %v876_v44  ;;  %v880_v52 = vld [vmem:[%s962_s26 + $0x70] sm:$0xff]  }
  0x36   : > { %v401_v2 = vadd.f32 %v986_v10, %v362_v54  ;;  %v363_v3 = vmul.f32 %v781_v56, %v972_v0  ;;  %v505_v4 = vmul.f32 %v845_v57, %v977_v1  ;;  %v846_v5 = vunpack.c.h.bf16 %v891_v45  ;;  %v895_v57 = vld [vmem:[%s967_s29 + $0x70] sm:$0xff]  }
  0x37   : > { %636 = vst [vmem:[%s1020_s17 + $0x80] sm:$0xff] %v604_v59  ;;  %v605_v6 = vmax.f32 %v573_v60, 0.0  ;;  %v574_v7 = vadd.f32 %v1003_v29, %v535_v61  ;;  %v364_v8 = vmul.f32 %v782_v62, %v972_v0  ;;  %v785_v9 = vunpack.c.l.bf16 %v877_v58 }
  0x38   : > { %v536_v11 = vadd.f32 %v504_v55, %v401_v2  ;;  %v402_v12 = vadd.f32 %v986_v10, %v363_v3  ;;  %v506_v13 = vmul.f32 %v846_v5, %v977_v1  ;;  %v849_v14 = vunpack.c.l.bf16 %v892_v63 }
  0x39   : > { %637 = vst [vmem:[%s1020_s17 + $0x88] sm:$0xff] %v605_v6  ;;  %v606_v16 = vmax.f32 %v574_v7, 0.0  ;;  %v403_v17 = vadd.f32 %v986_v10, %v364_v8  ;;  %v365_v18 = vmul.f32 %v785_v9, %v972_v0  ;;  %v786_v19 = vunpack.c.h.bf16 %v877_v58  ;;  %v881_v8 = vld [vmem:[%s962_s26 + $0x78] sm:$0xff]  }
  0x3a   : > { %v575_v21 = vadd.f32 %v1003_v29, %v536_v11  ;;  %v537_v22 = vadd.f32 %v505_v4, %v402_v12  ;;  %v507_v23 = vmul.f32 %v849_v14, %v977_v1  ;;  %v850_v24 = vunpack.c.h.bf16 %v892_v63  ;;  %v896_v14 = vld [vmem:[%s967_s29 + $0x78] sm:$0xff]  }
  0x3b   : > { %638 = vst [vmem:[%s1020_s17 + $0x90] sm:$0xff] %v606_v16  ;;  %v538_v25 = vadd.f32 %v506_v13, %v403_v17  ;;  %v404_v26 = vadd.f32 %v986_v10, %v365_v18  ;;  %v366_v27 = vmul.f32 %v786_v19, %v972_v0  ;;  %v789_v28 = vunpack.c.l.bf16 %v878_v15 }
  0x3c   : > { %v607_v30 = vmax.f32 %v575_v21, 0.0  ;;  %v576_v31 = vadd.f32 %v1003_v29, %v537_v22  ;;  %v508_v32 = vmul.f32 %v850_v24, %v977_v1  ;;  %v853_v33 = vunpack.c.l.bf16 %v893_v20 }
  0x3d   : > { %v577_v34 = vadd.f32 %v1003_v29, %v538_v25  ;;  %v539_v35 = vadd.f32 %v507_v23, %v404_v26  ;;  %v405_v36 = vadd.f32 %v986_v10, %v366_v27  ;;  %v367_v37 = vmul.f32 %v789_v28, %v972_v0 }
  0x3e   : > { %639 = vst [vmem:[%s1020_s17 + $0x98] sm:$0xff] %v607_v30  ;;  %v608_v40 = vmax.f32 %v576_v31, 0.0  ;;  %v509_v41 = vmul.f32 %v853_v33, %v977_v1  ;;  %v790_v42 = vunpack.c.h.bf16 %v878_v15  ;;  %v854_v43 = vunpack.c.h.bf16 %v893_v20 }
  0x3f   : > { %v609_v44 = vmax.f32 %v577_v34, 0.0  ;;  %v578_v45 = vadd.f32 %v1003_v29, %v539_v35  ;;  %v540_v46 = vadd.f32 %v508_v32, %v405_v36  ;;  %v406_v47 = vadd.f32 %v986_v10, %v367_v37 }
  0x40   : > { %640 = vst [vmem:[%s1020_s17 + $0xa0] sm:$0xff] %v608_v40  ;;  %v368_v48 = vmul.f32 %v790_v42, %v972_v0  ;;  %v510_v49 = vmul.f32 %v854_v43, %v977_v1  ;;  %v793_v50 = vunpack.c.l.bf16 %v879_v38  ;;  %v857_v51 = vunpack.c.l.bf16 %v894_v39 }
  0x41   : > { %641 = vst [vmem:[%s1020_s17 + $0xa8] sm:$0xff] %v609_v44  ;;  %v610_v53 = vmax.f32 %v578_v45, 0.0  ;;  %v579_v54 = vadd.f32 %v1003_v29, %v540_v46  ;;  %v541_v55 = vadd.f32 %v509_v41, %v406_v47  ;;  %v794_v56 = vunpack.c.h.bf16 %v879_v38 }
  0x42   : > { %v407_v58 = vadd.f32 %v986_v10, %v368_v48  ;;  %v369_v59 = vmul.f32 %v793_v50, %v972_v0  ;;  %v511_v60 = vmul.f32 %v857_v51, %v977_v1  ;;  %v858_v61 = vunpack.c.h.bf16 %v894_v39 }
  0x43   : > { %642 = vst [vmem:[%s1020_s17 + $0xb0] sm:$0xff] %v610_v53  ;;  %v611_v62 = vmax.f32 %v579_v54, 0.0  ;;  %v580_v63 = vadd.f32 %v1003_v29, %v541_v55  ;;  %v370_v2 = vmul.f32 %v794_v56, %v972_v0  ;;  %v797_v3 = vunpack.c.l.bf16 %v880_v52 }
  0x44   : > { %v542_v4 = vadd.f32 %v510_v49, %v407_v58  ;;  %v408_v5 = vadd.f32 %v986_v10, %v369_v59  ;;  %v512_v6 = vmul.f32 %v858_v61, %v977_v1  ;;  %v861_v7 = vunpack.c.l.bf16 %v895_v57 }
  0x45   : > { %643 = vst [vmem:[%s1020_s17 + $0xb8] sm:$0xff] %v611_v62  ;;  %v612_v9 = vmax.f32 %v580_v63, 0.0  ;;  %v409_v11 = vadd.f32 %v986_v10, %v370_v2  ;;  %v371_v12 = vmul.f32 %v797_v3, %v972_v0  ;;  %v798_v13 = vunpack.c.h.bf16 %v880_v52 }
  0x46   : > { %v581_v15 = vadd.f32 %v1003_v29, %v542_v4  ;;  %v543_v16 = vadd.f32 %v511_v60, %v408_v5  ;;  %v513_v17 = vmul.f32 %v861_v7, %v977_v1  ;;  %v862_v18 = vunpack.c.h.bf16 %v895_v57 }
  0x47   : > { %644 = vst [vmem:[%s1020_s17 + $0xc0] sm:$0xff] %v612_v9  ;;  %v544_v19 = vadd.f32 %v512_v6, %v409_v11  ;;  %v410_v20 = vadd.f32 %v986_v10, %v371_v12  ;;  %v372_v21 = vmul.f32 %v798_v13, %v972_v0  ;;  %v801_v22 = vunpack.c.l.bf16 %v881_v8 }
  0x48   : > { %v613_v23 = vmax.f32 %v581_v15, 0.0  ;;  %v582_v24 = vadd.f32 %v1003_v29, %v543_v16  ;;  %v514_v25 = vmul.f32 %v862_v18, %v977_v1  ;;  %v865_v26 = vunpack.c.l.bf16 %v896_v14 }
  0x49   : > { %v583_v27 = vadd.f32 %v1003_v29, %v544_v19  ;;  %v545_v28 = vadd.f32 %v513_v17, %v410_v20  ;;  %v411_v30 = vadd.f32 %v986_v10, %v372_v21  ;;  %v373_v31 = vmul.f32 %v801_v22, %v972_v0 }
  0x4a   : > { %645 = vst [vmem:[%s1020_s17 + $0xc8] sm:$0xff] %v613_v23  ;;  %v614_v32 = vmax.f32 %v582_v24, 0.0  ;;  %v515_v33 = vmul.f32 %v865_v26, %v977_v1  ;;  %v802_v34 = vunpack.c.h.bf16 %v881_v8  ;;  %v866_v35 = vunpack.c.h.bf16 %v896_v14 }
  0x4b   : > { %v615_v36 = vmax.f32 %v583_v27, 0.0  ;;  %v584_v37 = vadd.f32 %v1003_v29, %v545_v28  ;;  %v546_v38 = vadd.f32 %v514_v25, %v411_v30  ;;  %v412_v39 = vadd.f32 %v986_v10, %v373_v31 }
  0x4c   : > { %646 = vst [vmem:[%s1020_s17 + $0xd0] sm:$0xff] %v614_v32  ;;  %v374_v40 = vmul.f32 %v802_v34, %v972_v0  ;;  %v516_v41 = vmul.f32 %v866_v35, %v977_v1 }
  0x4d   : > { %647 = vst [vmem:[%s1020_s17 + $0xd8] sm:$0xff] %v615_v36  ;;  %v616_v42 = vmax.f32 %v584_v37, 0.0  ;;  %v585_v43 = vadd.f32 %v1003_v29, %v546_v38  ;;  %v547_v44 = vadd.f32 %v515_v33, %v412_v39 }
  0x4e   : > { %v413_v45 = vadd.f32 %v986_v10, %v374_v40 }
  0x4f   : > { %648 = vst [vmem:[%s1020_s17 + $0xe0] sm:$0xff] %v616_v42  ;;  %v617_v46 = vmax.f32 %v585_v43, 0.0  ;;  %v586_v47 = vadd.f32 %v1003_v29, %v547_v44 }
  0x50   : > { %v548_v48 = vadd.f32 %v516_v41, %v413_v45 }
  0x51   : > { %649 = vst [vmem:[%s1020_s17 + $0xe8] sm:$0xff] %v617_v46  ;;  %v618_v49 = vmax.f32 %v586_v47, 0.0 }
  0x52   : > { %v587_v50 = vadd.f32 %v1003_v29, %v548_v48 }
  0x53   : > { %650 = vst [vmem:[%s1020_s17 + $0xf0] sm:$0xff] %v618_v49 }
  0x54   : > { %v619_v0 = vmax.f32 %v587_v50, 0.0 }
  0x56   : > { %651 = vst [vmem:[%s1020_s17 + $0xf8] sm:$0xff] %v619_v0 }
  0x57 PF: > { %s16_s21 = sadd.s32 1, %s911_s21  }
  0x58   : > { %p13_p4 = scmp.ge.s32.totalorder %s16_s21, 4  }
  0x5a   :  { %15 = sbr.rel (!%p13_p4) target bundleno = 1 (0x1), region = 77 }

// kernel: resblock_forward.5
= control target key start
LH: loop header
LB: loop body
LE: loop exit
PB: predicated region body
PF: predicated region fallthrough
CT: control target
= control target key end

     0   :  { %s1267_s12 = smov 0   ;;  %s1658_s0 = inlined_call_operand.vmem [shape: bf16[2,256,128], index: 0, kind: input, shape index: {}]   ;;  %s1659_s1 = inlined_call_operand.vmem [shape: f32[1,128], index: 1, kind: input, shape index: {}]   ;;  %s1660_s2 = inlined_call_operand.vmem [shape: f32[1,128], index: 2, kind: input, shape index: {}]   ;;  %s1661_s3 = inlined_call_operand.vmem [shape: bf16[2,18,18,128], index: 3, kind: output, shape index: {}]  }
   0x1 LB: > { %s992_s13 = sadd.s32 4294967295, %s1244_s12   ;;  %p996_p0 = scmp.ge.s32.totalorder %s1244_s12, 1  ;;  %s1244_s12 = sphi %s1267_s12, %s13_s12  }
   0x2   : > { %p137_p1 = scmp.lt.s32.totalorder %s1244_s12, 3 }
   0x4   : > { %p138_p2 = pnand %p996_p0, %p137_p1 }
   0x5   : > { %p161_p3 = scmp.lt.s32.totalorder (!%p138_p2), %s992_s13, 1 }
   0x6   : > { %141 = sbr.rel (%p138_p2) target bundleno = 121 (0x79), region = 32 }
   0xb   : > { %s1669_s13 = smov (!%p161_p3, %s992_s13), 1  ;;  %v1283_v0 = vld [vmem:[%s1659_s1] ss:$0 sm:$0xff]  ;;  %v1246_v4 = vmov 0   ;;  %vm820_vm0 = vcmask 1043456   ;;  %vm827_vm4 = vcmask 1040384  }
   0xc   : > { %s1228_s14 = smul.u32 216, %s1669_s13  ;;  %s1116_s15 = sshll.u32 %s1669_s13, 7  ;;  %vm821_vm1 = vsmask.f32 7938  ;;  %v1361_v10 = vld [vmem:[%s1660_s2] ss:$0 sm:$0xff] }
   0xd   : > { %s1278_s18 = scalar_lea.vmem %s1658_s0, %s1116_s15  ;;  %vm496_vm2 = vsmask.f32 256  ;;  %vm497_vm3 = vsmask.f32 4368  ;;  %vm1393_vm5 = vmand %vm820_vm0, %vm821_vm1 }
   0xe   : > { %s1288_s23 = scalar_lea.vmem %s1661_s3, %s1228_s14  ;;  %v1291_v1 = vld [vmem:[%s1278_s18] sm:$0xff]   ;;  %v1294_v2 = vld [vmem:[%s1278_s18 + $0x8] sm:$0xff]   ;;  %v1297_v3 = vld [vmem:[%s1278_s18 + $0x10] sm:$0xff]  }
   0xf   : > { %349 = vst [vmem:[%s1288_s23 + $0xc] sm:$0xf] %v1246_v4  ;;  %346 = vst [vmem:[%s1288_s23] sm:$0xf] %v1246_v4  ;;  %v1151_v5 = vunpack.c.l.bf16 %v1291_v1  ;;  %v1152_v6 = vunpack.c.h.bf16 %v1291_v1  ;;  %v1155_v7 = vunpack.c.l.bf16 %v1294_v2  ;;  %v1156_v8 = vunpack.c.h.bf16 %v1294_v2  ;;  %v1215_v9 = vld [vmem:[%s1278_s18 + $0x18] sm:$0xff]   ;;  %v1378_v27 = vld [vmem:[%s1278_s18 + $0x20] sm:$0xff]  }
  0x10   : > { %347 = vst [vmem:[%s1288_s23 + $0x4] sm:$0xf] %v1246_v4  ;;  %348 = vst [vmem:[%s1288_s23 + $0x8] sm:$0x1] %v1246_v4  ;;  %v1159_v11 = vunpack.c.l.bf16 %v1297_v3  ;;  %v1160_v12 = vunpack.c.h.bf16 %v1297_v3  ;;  %v1163_v13 = vunpack.c.l.bf16 %v1215_v9  ;;  %v1164_v14 = vunpack.c.h.bf16 %v1215_v9  ;;  %v1381_v28 = vld [vmem:[%s1278_s18 + $0x28] sm:$0xff]  }
  0x11   : > { %350 = vst [vmem:[%s1288_s23 + $0x10] sm:$0xf] %v1246_v4  ;;  %351 = vst [vmem:[%s1288_s23 + $0x14] sm:$0x1] %v1246_v4  ;;  %v243_v15 = vmul.f32 %v1151_v5, %v1283_v0  ;;  %v244_v16 = vmul.f32 %v1152_v6, %v1283_v0  ;;  %v245_v17 = vmul.f32 %v1155_v7, %v1283_v0  ;;  %v1167_v37 = vunpack.c.l.bf16 %v1378_v27 }
  0x12   : > { %352 = vst [vmem:[%s1288_s23 + $0x18] sm:$0xf] %v1246_v4  ;;  %353 = vst [vmem:[%s1288_s23 + $0x1c] sm:$0xf] %v1246_v4  ;;  %v246_v18 = vmul.f32 %v1156_v8, %v1283_v0  ;;  %v247_v19 = vmul.f32 %v1159_v11, %v1283_v0  ;;  %v248_v20 = vmul.f32 %v1160_v12, %v1283_v0  ;;  %v1168_v38 = vunpack.c.h.bf16 %v1378_v27 }
  0x13   : > { %354 = vst [vmem:[%s1288_s23 + $0x20] sm:$0x1] %v1246_v4  ;;  %355 = vst [vmem:[%s1288_s23 + $0x24] sm:$0xf] %v1246_v4  ;;  %v249_v21 = vmul.f32 %v1163_v13, %v1283_v0  ;;  %v250_v22 = vmul.f32 %v1164_v14, %v1283_v0  ;;  %v282_v23 = vadd.f32 %v1361_v10, %v243_v15  ;;  %v1171_v39 = vunpack.c.l.bf16 %v1381_v28 }
  0x14   : > { %356 = vst [vmem:[%s1288_s23 + $0x28] sm:$0xf] %v1246_v4  ;;  %357 = vst [vmem:[%s1288_s23 + $0x2c] sm:$0x1] %v1246_v4  ;;  %v283_v24 = vadd.f32 %v1361_v10, %v244_v16  ;;  %v284_v25 = vadd.f32 %v1361_v10, %v245_v17  ;;  %v285_v26 = vadd.f32 %v1361_v10, %v246_v18  ;;  %v1172_v40 = vunpack.c.h.bf16 %v1381_v28 }
  0x15   : > { %358 = vst [vmem:[%s1288_s23 + $0x30] sm:$0xf] %v1246_v4  ;;  %359 = vst [vmem:[%s1288_s23 + $0x34] sm:$0xf] %v1246_v4  ;;  %v286_v29 = vadd.f32 %v1361_v10, %v247_v19  ;;  %v287_v30 = vadd.f32 %v1361_v10, %v248_v20  ;;  %v288_v31 = vadd.f32 %v1361_v10, %v249_v21  ;;  %v314_v33 = vmax.f32 %v282_v23, 0.0 }
  0x16   : > { %360 = vst [vmem:[%s1288_s23 + $0x38] sm:$0x1] %v1246_v4  ;;  %361 = vst [vmem:[%s1288_s23 + $0x3c] sm:$0xf] %v1246_v4  ;;  %v289_v32 = vadd.f32 %v1361_v10, %v250_v22  ;;  %v315_v34 = vmax.f32 %v283_v24, 0.0  ;;  %v316_v35 = vmax.f32 %v284_v25, 0.0 }
  0x17   : > { %362 = vst [vmem:[%s1288_s23 + $0x40] sm:$0xf] %v1246_v4  ;;  %363 = vst [vmem:[%s1288_s23 + $0x44] sm:$0x1] %v1246_v4  ;;  %v317_v36 = vmax.f32 %v285_v26, 0.0  ;;  %v1117_v41 = vpack.c.bf16 %v314_v33, %v314_v33  ;;  %v318_v45 = vmax.f32 %v286_v29, 0.0 }
  0x18   : > { %364 = vst [vmem:[%s1288_s23 + $0x48] sm:$0xf] %v1246_v4  ;;  %365 = vst [vmem:[%s1288_s23 + $0x4c] sm:$0xf] %v1246_v4  ;;  %v1118_v42 = vpack.c.bf16 %v315_v34, %v315_v34  ;;  %v1119_v43 = vpack.c.bf16 %v316_v35, %v316_v35  ;;  %v319_v46 = vmax.f32 %v287_v30, 0.0  ;;  %v320_v47 = vmax.f32 %v288_v31, 0.0 }
  0x19   : > { %366 = vst [vmem:[%s1288_s23 + $0x50] sm:$0x1] %v1246_v4  ;;  %367 = vst [vmem:[%s1288_s23 + $0x54] sm:$0xf] %v1246_v4  ;;  %v1120_v44 = vpack.c.bf16 %v317_v36, %v317_v36  ;;  %v321_v48 = vmax.f32 %v289_v32, 0.0  ;;  %v500_v49 = vshrl.u32 %v1117_v41, 16  ;;  %v1121_v61 = vpack.c.bf16 %v318_v45, %v318_v45 }
  0x1a   : > { %368 = vst [vmem:[%s1288_s23 + $0x58] sm:$0xf] %v1246_v4  ;;  %369 = vst [vmem:[%s1288_s23 + $0x5c] sm:$0x1] %v1246_v4  ;;  %v503_v50 = vshll.u32 %v1117_v41, 16  ;;  %v508_v51 = vshrl.u32 %v1118_v42, 16  ;;  %v1122_v62 = vpack.c.bf16 %v319_v46, %v319_v46  ;;  %v1123_v5 = vpack.c.bf16 %v320_v47, %v320_v47 }
  0x1b   : > { %370 = vst [vmem:[%s1288_s23 + $0x60] sm:$0xf] %v1246_v4  ;;  %371 = vst [vmem:[%s1288_s23 + $0x64] sm:$0xf] %v1246_v4  ;;  %v511_v52 = vshll.u32 %v1118_v42, 16  ;;  %v517_v54 = vshrl.u32 %v1119_v43, 16  ;;  %v1124_v6 = vpack.c.bf16 %v321_v48, %v321_v48  ;;  %v251_v36 = vmul.f32 %v1167_v37, %v1283_v0 }
  0x1c   : > { %372 = vst [vmem:[%s1288_s23 + $0x68] sm:$0x1] %v1246_v4  ;;  %373 = vst [vmem:[%s1288_s23 + $0x6c] sm:$0xf] %v1246_v4  ;;  %v520_v55 = vshll.u32 %v1119_v43, 16  ;;  %v525_v56 = vshrl.u32 %v1120_v44, 16 }
  0x1d   : > { %374 = vst [vmem:[%s1288_s23 + $0x70] sm:$0xf] %v1246_v4  ;;  %375 = vst [vmem:[%s1288_s23 + $0x74] sm:$0x1] %v1246_v4  ;;  %v528_v57 = vshll.u32 %v1120_v44, 16  ;;  %v502_v58 = vrot.slane %v500_v49, 7  ;;  %v290_v48 = vadd.f32 %v1361_v10, %v251_v36  ;;  %v252_v49 = vmul.f32 %v1168_v38, %v1283_v0 }
  0x1e   : > { %376 = vst [vmem:[%s1288_s23 + $0x78] sm:$0xf] %v1246_v4  ;;  %377 = vst [vmem:[%s1288_s23 + $0x7c] sm:$0xf] %v1246_v4  ;;  %v510_v60 = vrot.slane %v508_v51, 7  ;;  %v519_v3 = vrot.slane %v517_v54, 7 }
  0x1f   : > { %378 = vst [vmem:[%s1288_s23 + $0x80] sm:$0x1] %v1246_v4  ;;  %379 = vst [vmem:[%s1288_s23 + $0x84] sm:$0xf] %v1246_v4  ;;  %v1034_v63 = vld [vmem:[%s1288_s23 + $0xc] sm:$0xf]  ;;  %v505_v7 = vor.u32 %v503_v50, %v502_v58  ;;  %v253_v50 = vmul.f32 %v1171_v39, %v1283_v0 }
  0x20   : > { %380 = vst [vmem:[%s1288_s23 + $0x88] sm:$0xf] %v1246_v4  ;;  %381 = vst [vmem:[%s1288_s23 + $0x8c] sm:$0x1] %v1246_v4  ;;  %v1037_v2 = vld [vmem:[%s1288_s23 + $0x14] sm:$0x1]  ;;  %v513_v9 = vor.u32 %v511_v52, %v510_v60  ;;  %v522_v14 = vor.u32 %v520_v55, %v519_v3 }
  0x21   : > { %382 = vst [vmem:[%s1288_s23 + $0x90] sm:$0xf] %v1246_v4  ;;  %383 = vst [vmem:[%s1288_s23 + $0x94] sm:$0xf] %v1246_v4  ;;  %v506_v8 = vrot.slane %v502_v58, 4  ;;  %v515_v11 = vrot.slane %v510_v60, 4  ;;  %v824_v18 = vsel %vm1393_vm5, %v505_v7, %v1034_v63  ;;  %v254_v7 = vmul.f32 %v1172_v40, %v1283_v0 }
  0x22   : > { %384 = vst [vmem:[%s1288_s23 + $0x98] sm:$0x1] %v1246_v4  ;;  %385 = vst [vmem:[%s1288_s23 + $0x9c] sm:$0xf] %v1246_v4  ;;  %v1039_v12 = vld [vmem:[%s1288_s23 + $0x18] sm:$0xf] }
  0x23   : > { %386 = vst [vmem:[%s1288_s23 + $0xa0] sm:$0xf] %v1246_v4  ;;  %387 = vst [vmem:[%s1288_s23 + $0xa4] sm:$0x1] %v1246_v4  ;;  %v1042_v13 = vld [vmem:[%s1288_s23 + $0x20] sm:$0x1]  ;;  %v833_v22 = vsel %vm1393_vm5, %v522_v14, %v1039_v12 }
  0x24   : > { %388 = vst [vmem:[%s1288_s23 + $0xa8] sm:$0xf] %v1246_v4  ;;  %389 = vst [vmem:[%s1288_s23 + $0xac] sm:$0xf] %v1246_v4  ;;  %v523_v15 = vrot.slane %v519_v3, 4  ;;  %v534_v21 = vshrl.u32 %v1121_v61, 16 }
  0x25   : > { %390 = vst [vmem:[%s1288_s23 + $0xb0] sm:$0x1] %v1246_v4  ;;  %391 = vst [vmem:[%s1288_s23 + $0xb4] sm:$0xf] %v1246_v4  ;;  %v537_v25 = vshll.u32 %v1121_v61, 16  ;;  %v542_v29 = vshrl.u32 %v1122_v62, 16 }
  0x26   : > { %392 = vst [vmem:[%s1288_s23 + $0xb8] sm:$0xf] %v1246_v4  ;;  %393 = vst [vmem:[%s1288_s23 + $0xbc] sm:$0x1] %v1246_v4  ;;  %v536_v26 = vrot.slane %v534_v21, 7  ;;  %v545_v30 = vshll.u32 %v1122_v62, 16  ;;  %v291_v62 = vadd.f32 %v1361_v10, %v252_v49 }
  0x27   : > { %394 = vst [vmem:[%s1288_s23 + $0xc0] sm:$0xf] %v1246_v4  ;;  %395 = vst [vmem:[%s1288_s23 + $0xc4] sm:$0xf] %v1246_v4  ;;  %v551_v31 = vshrl.u32 %v1123_v5, 16  ;;  %v554_v33 = vshll.u32 %v1123_v5, 16  ;;  %v292_v5 = vadd.f32 %v1361_v10, %v253_v50 }
  0x28   : > { %396 = vst [vmem:[%s1288_s23 + $0xc8] sm:$0x1] %v1246_v4  ;;  %397 = vst [vmem:[%s1288_s23 + $0xcc] sm:$0xf] %v1246_v4  ;;  %v1044_v32 = vld [vmem:[%s1288_s23 + $0x24] sm:$0xf]  ;;  %v539_v41 = vor.u32 %v537_v25, %v536_v26 }
  0x29   : > { %398 = vst [vmem:[%s1288_s23 + $0xd0] sm:$0xf] %v1246_v4  ;;  %399 = vst [vmem:[%s1288_s23 + $0xd4] sm:$0x1] %v1246_v4  ;;  %v527_v4 = vrot.slane %v525_v56, 7  ;;  %v559_v34 = vshrl.u32 %v1124_v6, 16 }
  0x2a   : > { %vm1399_vm6 = vmor %vm496_vm2, %vm497_vm3  ;;  %1035 = vst [vmem:[%s1288_s23 + $0xc] sm:$0xf] %v824_v18  ;;  %v562_v35 = vshll.u32 %v1124_v6, 16  ;;  %v540_v42 = vrot.slane %v536_v26, 4  ;;  %v544_v43 = vrot.slane %v542_v29, 7  ;;  %v553_v44 = vrot.slane %v551_v31, 7 }
  0x2b   : > { %vm1406_vm7 = vmand %vm827_vm4, %vm496_vm2  ;;  %v530_v16 = vor.u32 %v528_v57, %v527_v4  ;;  %v532_v17 = vrot.slane %v527_v4, 4  ;;  %v514_v19 = vsel %vm1399_vm6, %v506_v8, %v513_v9  ;;  %1040 = vst [vmem:[%s1288_s23 + $0x18] sm:$0xf] %v833_v22  ;;  %v1047_v45 = vld [vmem:[%s1288_s23 + $0x2c] sm:$0x1]  ;;  %v561_v47 = vrot.slane %v559_v34, 7 }
  0x2c   : > { %v830_v20 = vsel %vm1406_vm7, %v515_v11, %v1037_v2  ;;  %1036 = vst [vmem:[%s1288_s23 + $0x10] sm:$0xf] %v514_v19  ;;  %v1049_v46 = vld [vmem:[%s1288_s23 + $0x30] sm:$0xf]  ;;  %v840_v37 = vsel %vm1393_vm5, %v539_v41, %v1044_v32  ;;  %v547_v51 = vor.u32 %v545_v30, %v544_v43  ;;  %v549_v52 = vrot.slane %v544_v43, 4  ;;  %v1219_v63 = vld [vmem:[%s1278_s18 + $0x38] sm:$0xff]  }
  0x2d   : > { %1038 = vst [vmem:[%s1288_s23 + $0x14] sm:$0x1] %v830_v20  ;;  %v531_v23 = vsel %vm1399_vm6, %v523_v15, %v530_v16  ;;  %v837_v24 = vsel %vm1406_vm7, %v532_v17, %v1042_v13  ;;  %v556_v54 = vor.u32 %v554_v33, %v553_v44  ;;  %v1052_v55 = vld [vmem:[%s1288_s23 + $0x38] sm:$0x1]  ;;  %1045 = vst [vmem:[%s1288_s23 + $0x24] sm:$0xf] %v840_v37  ;;  %v1179_v14 = vunpack.c.l.bf16 %v1219_v63 }
  0x2e   : > { %1041 = vst [vmem:[%s1288_s23 + $0x1c] sm:$0xf] %v531_v23  ;;  %1043 = vst [vmem:[%s1288_s23 + $0x20] sm:$0x1] %v837_v24  ;;  %v557_v56 = vrot.slane %v553_v44, 4  ;;  %v564_v57 = vor.u32 %v562_v35, %v561_v47  ;;  %v566_v27 = vrot.slane %v561_v47, 4  ;;  %v548_v39 = vsel %vm1399_vm6, %v540_v42, %v547_v51 }
  0x2f   : > { %v322_v38 = vmax.f32 %v290_v48, 0.0  ;;  %v1218_v58 = vld [vmem:[%s1278_s18 + $0x30] sm:$0xff]   ;;  %v844_v60 = vsel %vm1406_vm7, %v549_v52, %v1047_v45  ;;  %v847_v61 = vsel %vm1393_vm5, %v556_v54, %v1049_v46  ;;  %1046 = vst [vmem:[%s1288_s23 + $0x28] sm:$0xf] %v548_v39  ;;  %v323_v6 = vmax.f32 %v291_v62, 0.0 }
  0x30   : > { %1048 = vst [vmem:[%s1288_s23 + $0x2c] sm:$0x1] %v844_v60  ;;  %1050 = vst [vmem:[%s1288_s23 + $0x30] sm:$0xf] %v847_v61  ;;  %v565_v2 = vsel %vm1399_vm6, %v557_v56, %v564_v57  ;;  %v851_v3 = vsel %vm1406_vm7, %v566_v27, %v1052_v55  ;;  %v1175_v8 = vunpack.c.l.bf16 %v1218_v58  ;;  %v1176_v9 = vunpack.c.h.bf16 %v1218_v58  ;;  %v1054_v40 = vld [vmem:[%s1288_s23 + $0x3c] sm:$0xf] }
  0x31   : > { %v1125_v4 = vpack.c.bf16 %v322_v38, %v322_v38  ;;  %1051 = vst [vmem:[%s1288_s23 + $0x34] sm:$0xf] %v565_v2  ;;  %1053 = vst [vmem:[%s1288_s23 + $0x38] sm:$0x1] %v851_v3  ;;  %v324_v13 = vmax.f32 %v292_v5, 0.0  ;;  %v1126_v15 = vpack.c.bf16 %v323_v6, %v323_v6  ;;  %v293_v16 = vadd.f32 %v1361_v10, %v254_v7  ;;  %v1220_v27 = vld [vmem:[%s1278_s18 + $0x40] sm:$0xff]  }
  0x32   : > { %v255_v17 = vmul.f32 %v1175_v8, %v1283_v0  ;;  %v256_v18 = vmul.f32 %v1176_v9, %v1283_v0  ;;  %v257_v21 = vmul.f32 %v1179_v14, %v1283_v0  ;;  %v1180_v28 = vunpack.c.h.bf16 %v1219_v63  ;;  %v1057_v41 = vld [vmem:[%s1288_s23 + $0x44] sm:$0x1]  ;;  %v1059_v47 = vld [vmem:[%s1288_s23 + $0x48] sm:$0xf]  ;;  %v1062_v58 = vld [vmem:[%s1288_s23 + $0x50] sm:$0x1] }
  0x33   : > { %v568_v11 = vshrl.u32 %v1125_v4, 16  ;;  %v571_v12 = vshll.u32 %v1125_v4, 16  ;;  %v1127_v20 = vpack.c.bf16 %v324_v13, %v324_v13  ;;  %v576_v22 = vshrl.u32 %v1126_v15, 16  ;;  %v1221_v8 = vld [vmem:[%s1278_s18 + $0x48] sm:$0xff]  }
  0x34   : > { %v579_v23 = vshll.u32 %v1126_v15, 16  ;;  %v325_v24 = vmax.f32 %v293_v16, 0.0  ;;  %v294_v25 = vadd.f32 %v1361_v10, %v255_v17  ;;  %v295_v35 = vadd.f32 %v1361_v10, %v256_v18 }
  0x35   : > { %v570_v19 = vrot.slane %v568_v11, 7  ;;  %v585_v30 = vshrl.u32 %v1127_v20, 16  ;;  %v588_v31 = vshll.u32 %v1127_v20, 16  ;;  %v578_v32 = vrot.slane %v576_v22, 7 }
  0x36   : > { %v1128_v33 = vpack.c.bf16 %v325_v24, %v325_v24  ;;  %v326_v34 = vmax.f32 %v294_v25, 0.0  ;;  %v296_v43 = vadd.f32 %v1361_v10, %v257_v21  ;;  %v258_v44 = vmul.f32 %v1180_v28, %v1283_v0  ;;  %v1069_v25 = vld [vmem:[%s1288_s23 + $0x60] sm:$0xf] }
  0x37   : > { %v573_v26 = vor.u32 %v571_v12, %v570_v19  ;;  %v574_v29 = vrot.slane %v570_v19, 4  ;;  %v587_v42 = vrot.slane %v585_v30, 7  ;;  %v581_v45 = vor.u32 %v579_v23, %v578_v32  ;;  %v1064_v12 = vld [vmem:[%s1288_s23 + $0x54] sm:$0xf]  ;;  %v1067_v19 = vld [vmem:[%s1288_s23 + $0x5c] sm:$0x1] }
  0x38   : > { %v583_v46 = vrot.slane %v578_v32, 4  ;;  %v593_v48 = vshrl.u32 %v1128_v33, 16  ;;  %v596_v49 = vshll.u32 %v1128_v33, 16  ;;  %v1129_v51 = vpack.c.bf16 %v326_v34, %v326_v34  ;;  %v1222_v33 = vld [vmem:[%s1278_s18 + $0x50] sm:$0xff]  }
  0x39   : > { %v854_v36 = vsel %vm1393_vm5, %v573_v26, %v1054_v40  ;;  %v590_v50 = vor.u32 %v588_v31, %v587_v42  ;;  %v591_v37 = vrot.slane %v587_v42, 4  ;;  %v327_v52 = vmax.f32 %v295_v35, 0.0  ;;  %v1518_v42 = vld [vmem:[%s1278_s18 + $0x58] sm:$0xff]  }
  0x3a   : > { %1055 = vst [vmem:[%s1288_s23 + $0x3c] sm:$0xf] %v854_v36  ;;  %v582_v54 = vsel %vm1399_vm6, %v574_v29, %v581_v45  ;;  %v858_v55 = vsel %vm1406_vm7, %v583_v46, %v1057_v41  ;;  %v595_v56 = vrot.slane %v593_v48, 7  ;;  %v328_v57 = vmax.f32 %v296_v43, 0.0 }
  0x3b   : > { %1056 = vst [vmem:[%s1288_s23 + $0x40] sm:$0xf] %v582_v54  ;;  %1058 = vst [vmem:[%s1288_s23 + $0x44] sm:$0x1] %v858_v55  ;;  %v861_v38 = vsel %vm1393_vm5, %v590_v50, %v1059_v47  ;;  %v602_v39 = vshrl.u32 %v1129_v51, 16  ;;  %v605_v60 = vshll.u32 %v1129_v51, 16  ;;  %v1130_v61 = vpack.c.bf16 %v327_v52, %v327_v52 }
  0x3c   : > { %1060 = vst [vmem:[%s1288_s23 + $0x48] sm:$0xf] %v861_v38  ;;  %v598_v62 = vor.u32 %v596_v49, %v595_v56  ;;  %v600_v63 = vrot.slane %v595_v56, 4  ;;  %v1131_v2 = vpack.c.bf16 %v328_v57, %v328_v57  ;;  %v297_v3 = vadd.f32 %v1361_v10, %v258_v44 }
  0x3d   : > { %v604_v4 = vrot.slane %v602_v39, 7  ;;  %v610_v5 = vshrl.u32 %v1130_v61, 16  ;;  %v613_v6 = vshll.u32 %v1130_v61, 16  ;;  %v1183_v7 = vunpack.c.l.bf16 %v1220_v27 }
  0x3e   : > { %v599_v9 = vsel %vm1399_vm6, %v591_v37, %v598_v62  ;;  %v865_v11 = vsel %vm1406_vm7, %v600_v63, %v1062_v58  ;;  %v619_v13 = vshrl.u32 %v1131_v2, 16  ;;  %v622_v14 = vshll.u32 %v1131_v2, 16  ;;  %v1072_v37 = vld [vmem:[%s1288_s23 + $0x68] sm:$0x1] }
  0x3f   : > { %1061 = vst [vmem:[%s1288_s23 + $0x4c] sm:$0xf] %v599_v9  ;;  %1063 = vst [vmem:[%s1288_s23 + $0x50] sm:$0x1] %v865_v11  ;;  %v607_v15 = vor.u32 %v605_v60, %v604_v4  ;;  %v608_v16 = vrot.slane %v604_v4, 4  ;;  %v612_v17 = vrot.slane %v610_v5, 7  ;;  %v259_v21 = vmul.f32 %v1183_v7, %v1283_v0 }
  0x40   : > { %v329_v18 = vmax.f32 %v297_v3, 0.0  ;;  %v621_v20 = vrot.slane %v619_v13, 7  ;;  %v1184_v28 = vunpack.c.h.bf16 %v1220_v27  ;;  %v1187_v40 = vunpack.c.l.bf16 %v1221_v8 }
  0x41   : > { %v868_v22 = vsel %vm1393_vm5, %v607_v15, %v1064_v12  ;;  %v615_v23 = vor.u32 %v613_v6, %v612_v17  ;;  %v617_v24 = vrot.slane %v612_v17, 4  ;;  %v298_v31 = vadd.f32 %v1361_v10, %v259_v21 }
  0x42   : > { %v1132_v26 = vpack.c.bf16 %v329_v18, %v329_v18  ;;  %1065 = vst [vmem:[%s1288_s23 + $0x54] sm:$0xf] %v868_v22  ;;  %v624_v29 = vor.u32 %v622_v14, %v621_v20  ;;  %v625_v30 = vrot.slane %v621_v20, 4  ;;  %v260_v32 = vmul.f32 %v1184_v28, %v1283_v0  ;;  %v1077_v18 = vld [vmem:[%s1288_s23 + $0x74] sm:$0x1] }
  0x43   : > { %v616_v34 = vsel %vm1399_vm6, %v608_v16, %v615_v23  ;;  %v872_v35 = vsel %vm1406_vm7, %v617_v24, %v1067_v19  ;;  %v330_v44 = vmax.f32 %v298_v31, 0.0  ;;  %v261_v46 = vmul.f32 %v1187_v40, %v1283_v0 }
  0x44   : > { %v627_v36 = vshrl.u32 %v1132_v26, 16  ;;  %v630_v41 = vshll.u32 %v1132_v26, 16  ;;  %1066 = vst [vmem:[%s1288_s23 + $0x58] sm:$0xf] %v616_v34  ;;  %1068 = vst [vmem:[%s1288_s23 + $0x5c] sm:$0x1] %v872_v35  ;;  %v875_v43 = vsel %vm1393_vm5, %v624_v29, %v1069_v25  ;;  %v299_v45 = vadd.f32 %v1361_v10, %v260_v32 }
  0x45   : > { %1070 = vst [vmem:[%s1288_s23 + $0x60] sm:$0xf] %v875_v43  ;;  %v1188_v48 = vunpack.c.h.bf16 %v1221_v8  ;;  %v1191_v49 = vunpack.c.l.bf16 %v1222_v33  ;;  %v1192_v50 = vunpack.c.h.bf16 %v1222_v33  ;;  %v1133_v51 = vpack.c.bf16 %v330_v44, %v330_v44  ;;  %v1074_v8 = vld [vmem:[%s1288_s23 + $0x6c] sm:$0xf]  ;;  %v1224_v25 = vld [vmem:[%s1278_s18 + $0x60] sm:$0xff]  }
  0x46   : > { %v629_v47 = vrot.slane %v627_v36, 7  ;;  %v331_v52 = vmax.f32 %v299_v45, 0.0  ;;  %v300_v54 = vadd.f32 %v1361_v10, %v261_v46  ;;  %v1195_v55 = vunpack.c.l.bf16 %v1518_v42  ;;  %v1079_v26 = vld [vmem:[%s1288_s23 + $0x78] sm:$0xf] }
  0x47   : > { %v262_v27 = vmul.f32 %v1188_v48, %v1283_v0  ;;  %v263_v38 = vmul.f32 %v1191_v49, %v1283_v0  ;;  %v636_v58 = vshrl.u32 %v1133_v51, 16  ;;  %v639_v39 = vshll.u32 %v1133_v51, 16  ;;  %v1084_v48 = vld [vmem:[%s1288_s23 + $0x84] sm:$0xf] }
  0x48   : > { %v632_v56 = vor.u32 %v630_v41, %v629_v47  ;;  %v634_v57 = vrot.slane %v629_v47, 4  ;;  %v1134_v60 = vpack.c.bf16 %v331_v52, %v331_v52  ;;  %v332_v61 = vmax.f32 %v300_v54, 0.0  ;;  %v1082_v47 = vld [vmem:[%s1288_s23 + $0x80] sm:$0x1] }
  0x49   : > { %v301_v2 = vadd.f32 %v1361_v10, %v262_v27  ;;  %v302_v3 = vadd.f32 %v1361_v10, %v263_v38  ;;  %v638_v4 = vrot.slane %v636_v58, 7  ;;  %v264_v12 = vmul.f32 %v1192_v50, %v1283_v0  ;;  %v1225_v58 = vld [vmem:[%s1278_s18 + $0x68] sm:$0xff]  }
  0x4a   : > { %v633_v62 = vsel %vm1399_vm6, %v625_v30, %v632_v56  ;;  %v879_v63 = vsel %vm1406_vm7, %v634_v57, %v1072_v37  ;;  %v644_v5 = vshrl.u32 %v1134_v60, 16  ;;  %v647_v6 = vshll.u32 %v1134_v60, 16 }
  0x4b   : > { %1071 = vst [vmem:[%s1288_s23 + $0x64] sm:$0xf] %v633_v62  ;;  %1073 = vst [vmem:[%s1288_s23 + $0x68] sm:$0x1] %v879_v63  ;;  %v1135_v7 = vpack.c.bf16 %v332_v61, %v332_v61  ;;  %v333_v9 = vmax.f32 %v301_v2, 0.0  ;;  %v334_v11 = vmax.f32 %v302_v3, 0.0  ;;  %v265_v13 = vmul.f32 %v1195_v55, %v1283_v0 }
  0x4c   : > { %v641_v14 = vor.u32 %v639_v39, %v638_v4  ;;  %v642_v15 = vrot.slane %v638_v4, 4  ;;  %v646_v16 = vrot.slane %v644_v5, 7  ;;  %v303_v28 = vadd.f32 %v1361_v10, %v264_v12 }
  0x4d   : > { %v653_v17 = vshrl.u32 %v1135_v7, 16  ;;  %v656_v19 = vshll.u32 %v1135_v7, 16  ;;  %v1136_v20 = vpack.c.bf16 %v333_v9, %v333_v9  ;;  %v1137_v21 = vpack.c.bf16 %v334_v11, %v334_v11 }
  0x4e   : > { %v882_v40 = vsel %vm1393_vm5, %v641_v14, %v1074_v8  ;;  %v649_v22 = vor.u32 %v647_v6, %v646_v16  ;;  %v651_v23 = vrot.slane %v646_v16, 4  ;;  %v335_v44 = vmax.f32 %v303_v28, 0.0  ;;  %v1087_v8 = vld [vmem:[%s1288_s23 + $0x8c] sm:$0x1] }
  0x4f   : > { %v655_v24 = vrot.slane %v653_v17, 7  ;;  %1075 = vst [vmem:[%s1288_s23 + $0x6c] sm:$0xf] %v882_v40  ;;  %v661_v29 = vshrl.u32 %v1136_v20, 16  ;;  %v664_v30 = vshll.u32 %v1136_v20, 16  ;;  %v670_v31 = vshrl.u32 %v1137_v21, 16 }
  0x50   : > { %v673_v32 = vshll.u32 %v1137_v21, 16  ;;  %v650_v33 = vsel %vm1399_vm6, %v642_v15, %v649_v22  ;;  %v886_v34 = vsel %vm1406_vm7, %v651_v23, %v1077_v18  ;;  %v304_v45 = vadd.f32 %v1361_v10, %v265_v13  ;;  %v1089_v22 = vld [vmem:[%s1288_s23 + $0x90] sm:$0xf] }
  0x51   : > { %v658_v35 = vor.u32 %v656_v19, %v655_v24  ;;  %v659_v36 = vrot.slane %v655_v24, 4  ;;  %1076 = vst [vmem:[%s1288_s23 + $0x70] sm:$0xf] %v650_v33  ;;  %1078 = vst [vmem:[%s1288_s23 + $0x74] sm:$0x1] %v886_v34  ;;  %v663_v41 = vrot.slane %v661_v29, 7  ;;  %v1196_v49 = vunpack.c.h.bf16 %v1518_v42 }
  0x52   : > { %v672_v43 = vrot.slane %v670_v31, 7  ;;  %v1199_v50 = vunpack.c.l.bf16 %v1224_v25  ;;  %v1200_v37 = vunpack.c.h.bf16 %v1224_v25  ;;  %v1138_v55 = vpack.c.bf16 %v335_v44, %v335_v44  ;;  %v1226_v25 = vld [vmem:[%s1278_s18 + $0x70] sm:$0xff]  }
  0x53   : > { %v889_v46 = vsel %vm1393_vm5, %v658_v35, %v1079_v26  ;;  %v666_v51 = vor.u32 %v664_v30, %v663_v41  ;;  %v668_v52 = vrot.slane %v663_v41, 4  ;;  %v336_v57 = vmax.f32 %v304_v45, 0.0  ;;  %v1092_v45 = vld [vmem:[%s1288_s23 + $0x98] sm:$0x1] }
  0x54   : > { %1080 = vst [vmem:[%s1288_s23 + $0x78] sm:$0xf] %v889_v46  ;;  %v675_v54 = vor.u32 %v673_v32, %v672_v43  ;;  %v676_v56 = vrot.slane %v672_v43, 4  ;;  %v266_v27 = vmul.f32 %v1196_v49, %v1283_v0  ;;  %v267_v38 = vmul.f32 %v1199_v50, %v1283_v0 }
  0x55   : > { %v667_v42 = vsel %vm1399_vm6, %v659_v36, %v666_v51  ;;  %v893_v39 = vsel %vm1406_vm7, %v668_v52, %v1082_v47  ;;  %v678_v61 = vshrl.u32 %v1138_v55, 16  ;;  %v681_v62 = vshll.u32 %v1138_v55, 16  ;;  %v1094_v51 = vld [vmem:[%s1288_s23 + $0x9c] sm:$0xf] }
  0x56   : > { %v896_v60 = vsel %vm1393_vm5, %v675_v54, %v1084_v48  ;;  %1081 = vst [vmem:[%s1288_s23 + $0x7c] sm:$0xf] %v667_v42  ;;  %1083 = vst [vmem:[%s1288_s23 + $0x80] sm:$0x1] %v893_v39  ;;  %v1139_v63 = vpack.c.bf16 %v336_v57, %v336_v57  ;;  %v305_v2 = vadd.f32 %v1361_v10, %v266_v27  ;;  %v1203_v6 = vunpack.c.l.bf16 %v1225_v58  ;;  %v1097_v42 = vld [vmem:[%s1288_s23 + $0xa4] sm:$0x1] }
  0x57   : > { %1085 = vst [vmem:[%s1288_s23 + $0x84] sm:$0xf] %v896_v60  ;;  %v306_v3 = vadd.f32 %v1361_v10, %v267_v38  ;;  %v680_v4 = vrot.slane %v678_v61, 7  ;;  %v268_v5 = vmul.f32 %v1200_v37, %v1283_v0  ;;  %v1204_v7 = vunpack.c.h.bf16 %v1225_v58 }
  0x58   : > { %v687_v9 = vshrl.u32 %v1139_v63, 16  ;;  %v690_v11 = vshll.u32 %v1139_v63, 16  ;;  %v337_v12 = vmax.f32 %v305_v2, 0.0  ;;  %v269_v17 = vmul.f32 %v1203_v6, %v1283_v0 }
  0x59   : > { %v338_v13 = vmax.f32 %v306_v3, 0.0  ;;  %v683_v14 = vor.u32 %v681_v62, %v680_v4  ;;  %v685_v15 = vrot.slane %v680_v4, 4  ;;  %v307_v16 = vadd.f32 %v1361_v10, %v268_v5  ;;  %v1227_v3 = vld [vmem:[%s1278_s18 + $0x78] sm:$0xff]   ;;  %v1099_v4 = vld [vmem:[%s1288_s23 + $0xa8] sm:$0xf] }
  0x5a   : > { %v689_v18 = vrot.slane %v687_v9, 7  ;;  %v1140_v19 = vpack.c.bf16 %v337_v12, %v337_v12  ;;  %v270_v21 = vmul.f32 %v1204_v7, %v1283_v0  ;;  %v308_v24 = vadd.f32 %v1361_v10, %v269_v17 }
  0x5b   : > { %v1141_v20 = vpack.c.bf16 %v338_v13, %v338_v13  ;;  %v684_v28 = vsel %vm1399_vm6, %v676_v56, %v683_v14  ;;  %v900_v40 = vsel %vm1406_vm7, %v685_v15, %v1087_v8  ;;  %v339_v23 = vmax.f32 %v307_v16, 0.0 }
  0x5c   : > { %1086 = vst [vmem:[%s1288_s23 + $0x88] sm:$0xf] %v684_v28  ;;  %1088 = vst [vmem:[%s1288_s23 + $0x8c] sm:$0x1] %v900_v40  ;;  %v692_v26 = vor.u32 %v690_v11, %v689_v18  ;;  %v693_v29 = vrot.slane %v689_v18, 4  ;;  %v695_v30 = vshrl.u32 %v1140_v19, 16  ;;  %v309_v43 = vadd.f32 %v1361_v10, %v270_v21 }
  0x5d   : > { %v698_v31 = vshll.u32 %v1140_v19, 16  ;;  %v704_v32 = vshrl.u32 %v1141_v20, 16  ;;  %v707_v33 = vshll.u32 %v1141_v20, 16  ;;  %v1142_v34 = vpack.c.bf16 %v339_v23, %v339_v23  ;;  %v1102_v19 = vld [vmem:[%s1288_s23 + $0xb0] sm:$0x1] }
  0x5e   : > { %v340_v35 = vmax.f32 %v308_v24, 0.0  ;;  %v903_v36 = vsel %vm1393_vm5, %v692_v26, %v1089_v22  ;;  %v697_v41 = vrot.slane %v695_v30, 7  ;;  %v1207_v44 = vunpack.c.l.bf16 %v1226_v25 }
  0x5f   : > { %1090 = vst [vmem:[%s1288_s23 + $0x90] sm:$0xf] %v903_v36  ;;  %v706_v46 = vrot.slane %v704_v32, 7  ;;  %v712_v47 = vshrl.u32 %v1142_v34, 16  ;;  %v715_v48 = vshll.u32 %v1142_v34, 16  ;;  %v341_v52 = vmax.f32 %v309_v43, 0.0 }
  0x60   : > { %v1143_v49 = vpack.c.bf16 %v340_v35, %v340_v35  ;;  %v700_v50 = vor.u32 %v698_v31, %v697_v41  ;;  %v702_v37 = vrot.slane %v697_v41, 4  ;;  %v271_v54 = vmul.f32 %v1207_v44, %v1283_v0  ;;  %v1104_v35 = vld [vmem:[%s1288_s23 + $0xb4] sm:$0xf] }
  0x61   : > { %v709_v55 = vor.u32 %v707_v33, %v706_v46  ;;  %v710_v56 = vrot.slane %v706_v46, 4  ;;  %v714_v57 = vrot.slane %v712_v47, 7  ;;  %v1144_v60 = vpack.c.bf16 %v341_v52, %v341_v52  ;;  %v1107_v52 = vld [vmem:[%s1288_s23 + $0xbc] sm:$0x1] }
  0x62   : > { %v721_v27 = vshrl.u32 %v1143_v49, 16  ;;  %v701_v38 = vsel %vm1399_vm6, %v693_v29, %v700_v50  ;;  %v907_v58 = vsel %vm1406_vm7, %v702_v37, %v1092_v45  ;;  %v724_v39 = vshll.u32 %v1143_v49, 16 }
  0x63   : > { %1091 = vst [vmem:[%s1288_s23 + $0x94] sm:$0xf] %v701_v38  ;;  %1093 = vst [vmem:[%s1288_s23 + $0x98] sm:$0x1] %v907_v58  ;;  %v910_v61 = vsel %vm1393_vm5, %v709_v55, %v1094_v51  ;;  %v717_v62 = vor.u32 %v715_v48, %v714_v57  ;;  %v719_v63 = vrot.slane %v714_v57, 4  ;;  %v729_v5 = vshrl.u32 %v1144_v60, 16 }
  0x64   : > { %v723_v2 = vrot.slane %v721_v27, 7  ;;  %1095 = vst [vmem:[%s1288_s23 + $0x9c] sm:$0xf] %v910_v61  ;;  %v732_v6 = vshll.u32 %v1144_v60, 16  ;;  %v310_v7 = vadd.f32 %v1361_v10, %v271_v54  ;;  %v1208_v8 = vunpack.c.h.bf16 %v1226_v25  ;;  %v1109_v38 = vld [vmem:[%s1288_s23 + $0xc0] sm:$0xf] }
  0x65   : > { %v718_v9 = vsel %vm1399_vm6, %v710_v56, %v717_v62  ;;  %v914_v11 = vsel %vm1406_vm7, %v719_v63, %v1097_v42  ;;  %v731_v14 = vrot.slane %v729_v5, 7  ;;  %v1211_v17 = vunpack.c.l.bf16 %v1227_v3  ;;  %v1112_v61 = vld [vmem:[%s1288_s23 + $0xc8] sm:$0x1] }
  0x66   : > { %v726_v12 = vor.u32 %v724_v39, %v723_v2  ;;  %v727_v13 = vrot.slane %v723_v2, 4  ;;  %1096 = vst [vmem:[%s1288_s23 + $0xa0] sm:$0xf] %v718_v9  ;;  %1098 = vst [vmem:[%s1288_s23 + $0xa4] sm:$0x1] %v914_v11  ;;  %v342_v15 = vmax.f32 %v310_v7, 0.0  ;;  %v272_v16 = vmul.f32 %v1208_v8, %v1283_v0 }
  0x67   : > { %v1212_v20 = vunpack.c.h.bf16 %v1227_v3  ;;  %v734_v21 = vor.u32 %v732_v6, %v731_v14  ;;  %v736_v28 = vrot.slane %v731_v14, 4  ;;  %v273_v23 = vmul.f32 %v1211_v17, %v1283_v0 }
  0x68   : > { %v917_v18 = vsel %vm1393_vm5, %v726_v12, %v1099_v4  ;;  %v1145_v40 = vpack.c.bf16 %v342_v15, %v342_v15  ;;  %v311_v22 = vadd.f32 %v1361_v10, %v272_v16 }
  0x69   : > { %1100 = vst [vmem:[%s1288_s23 + $0xa8] sm:$0xf] %v917_v18  ;;  %v274_v24 = vmul.f32 %v1212_v20, %v1283_v0  ;;  %v735_v25 = vsel %vm1399_vm6, %v727_v13, %v734_v21  ;;  %v921_v26 = vsel %vm1406_vm7, %v736_v28, %v1102_v19  ;;  %v312_v32 = vadd.f32 %v1361_v10, %v273_v23 }
  0x6a   : > { %v738_v29 = vshrl.u32 %v1145_v40, 16  ;;  %v741_v30 = vshll.u32 %v1145_v40, 16  ;;  %1101 = vst [vmem:[%s1288_s23 + $0xac] sm:$0xf] %v735_v25  ;;  %1103 = vst [vmem:[%s1288_s23 + $0xb0] sm:$0x1] %v921_v26 }
  0x6b   : > { %v343_v31 = vmax.f32 %v311_v22, 0.0  ;;  %v313_v33 = vadd.f32 %v1361_v10, %v274_v24  ;;  %v344_v36 = vmax.f32 %v312_v32, 0.0 }
  0x6c   : > { %v740_v34 = vrot.slane %v738_v29, 7 }
  0x6d   : > { %v1146_v0 = vpack.c.bf16 %v343_v31, %v343_v31  ;;  %v345_v41 = vmax.f32 %v313_v33, 0.0  ;;  %v1147_v46 = vpack.c.bf16 %v344_v36, %v344_v36 }
  0x6e   : > { %v743_v43 = vor.u32 %v741_v30, %v740_v34  ;;  %v744_v49 = vrot.slane %v740_v34, 4 }
  0x6f   : > { %v746_v44 = vshrl.u32 %v1146_v0, 16  ;;  %v749_v45 = vshll.u32 %v1146_v0, 16  ;;  %v1148_v47 = vpack.c.bf16 %v345_v41, %v345_v41  ;;  %v755_v10 = vshrl.u32 %v1147_v46, 16 }
  0x70   : > { %v924_v48 = vsel %vm1393_vm5, %v743_v43, %v1104_v35  ;;  %v758_v37 = vshll.u32 %v1147_v46, 16 }
  0x71   : > { %1105 = vst [vmem:[%s1288_s23 + $0xb4] sm:$0xf] %v924_v48  ;;  %v748_v50 = vrot.slane %v746_v44, 7  ;;  %v763_v51 = vshrl.u32 %v1148_v47, 16  ;;  %v766_v54 = vshll.u32 %v1148_v47, 16  ;;  %v757_v57 = vrot.slane %v755_v10, 7 }
  0x73   : > { %v751_v55 = vor.u32 %v749_v45, %v748_v50  ;;  %v753_v56 = vrot.slane %v748_v50, 4  ;;  %v765_v27 = vrot.slane %v763_v51, 7  ;;  %v760_v39 = vor.u32 %v758_v37, %v757_v57 }
  0x74   : > { %v761_v60 = vrot.slane %v757_v57, 4 }
  0x75   : > { %v752_v58 = vsel %vm1399_vm6, %v744_v49, %v751_v55  ;;  %v928_v42 = vsel %vm1406_vm7, %v753_v56, %v1107_v52  ;;  %v768_v62 = vor.u32 %v766_v54, %v765_v27  ;;  %v770_v63 = vrot.slane %v765_v27, 4 }
  0x76   : > { %1106 = vst [vmem:[%s1288_s23 + $0xb8] sm:$0xf] %v752_v58  ;;  %1108 = vst [vmem:[%s1288_s23 + $0xbc] sm:$0x1] %v928_v42  ;;  %v931_v2 = vsel %vm1393_vm5, %v760_v39, %v1109_v38 }
  0x77   : > { %1110 = vst [vmem:[%s1288_s23 + $0xc0] sm:$0xf] %v931_v2  ;;  %v769_v3 = vsel %vm1399_vm6, %v761_v60, %v768_v62  ;;  %v935_v4 = vsel %vm1406_vm7, %v770_v63, %v1112_v61 }
  0x78   : > { %1111 = vst [vmem:[%s1288_s23 + $0xc4] sm:$0xf] %v769_v3  ;;  %1113 = vst [vmem:[%s1288_s23 + $0xc8] sm:$0x1] %v935_v4 }
  0x79 PF: > { %s13_s12 = sadd.s32 1, %s1244_s12  }
  0x7a   : > { %p10_p4 = scmp.ge.s32.totalorder %s13_s12, 4  }
  0x7c   :  { %12 = sbr.rel (!%p10_p4) target bundleno = 1 (0x1), region = 63 }

// kernel: resblock_forward.6
= control target key start
LH: loop header
LB: loop body
LE: loop exit
PB: predicated region body
PF: predicated region fallthrough
CT: control target
= control target key end

     0   :  { %s5860_s12 = smov 0   ;;  %s7949_s0 = inlined_call_operand.vmem [shape: bf16[2,18,18,128], index: 0, kind: input, shape index: {}]   ;;  %s7950_s1 = inlined_call_operand.vmem [shape: bf16[1152,128], index: 1, kind: input, shape index: {}]   ;;  %s7951_s2 = inlined_call_operand.vmem [shape: bf16[2,256,128], index: 2, kind: output, shape index: {0}]   ;;  %s7952_s3 = inlined_call_operand.vmem [shape: f32[2,2,128], index: 3, kind: output, shape index: {1}]  }
   0x1 LB: > { %s4567_s13 = sadd.s32 4294967295, %s5838_s12   ;;  %p4571_p0 = scmp.ge.s32.totalorder %s5838_s12, 1  ;;  %s5838_s12 = sphi %s5860_s12, %s14_s12  }
   0x2   : > { %p140_p1 = scmp.lt.s32.totalorder %s5838_s12, 3 }
   0x4   : > { %p141_p2 = pnand %p4571_p0, %p140_p1 }
   0x6   : > { %144 = sbr.rel (%p141_p2) target bundleno = 568 (0x238), region = 28 }
   0xb   : > { %v5707_v0 = vld [vmem:[%s7950_s1 + $0x138] sm:$0xff]   ;;  %p168_p3 = scmp.lt.s32.totalorder %s4567_s13, 1  ;;  %v5709_v2 = vld [vmem:[%s7950_s1 + $0x130] sm:$0xff]   ;;  %v5711_v4 = vld [vmem:[%s7950_s1 + $0x128] sm:$0xff]   ;;  %vm231_vm0 = vsmask.f32 3328 }
   0xc   : > { %v5708_v1 = vld [vmem:[%s7950_s1 + $0xf8] sm:$0xff]   ;;  %5130 = vmatprep.subr.bf16.mxu0 %v5707_v0  ;;  %5682 = vmatprep.subr.bf16.mxu1 %v5707_v0  ;;  %v5710_v3 = vld [vmem:[%s7950_s1 + $0xf0] sm:$0xff]   ;;  %v5712_v5 = vld [vmem:[%s7950_s1 + $0xe8] sm:$0xff]   ;;  %vm232_vm1 = vsmask.f32 7440  ;;  %vm682_vm3 = vcmask 1042432  }
   0xd   : > { %5131 = vmatpush3.bf16.msra.mxu0 %v5708_v1  ;;  %5690 = vmatpush3.bf16.msra.mxu1 %v5708_v1  ;;  %s8014_s13 = smov (!%p168_p3, %s4567_s13), 1  ;;  %v5713_v6 = vld [vmem:[%s7950_s1 + $0x120] sm:$0xff]   ;;  %v5715_v8 = vld [vmem:[%s7950_s1 + $0x118] sm:$0xff]   ;;  %v5717_v10 = vld [vmem:[%s7950_s1 + $0x110] sm:$0xff]   ;;  %vm683_vm4 = vcmask 1046532  }
   0xe   : > { %5132 = vmatprep.subr.bf16.mxu0 %v5709_v2  ;;  %5683 = vmatprep.subr.bf16.mxu1 %v5709_v2  ;;  %s5698_s28 = smul.u32 216, %s8014_s13  ;;  %v5714_v7 = vld [vmem:[%s7950_s1 + $0xe0] sm:$0xff]   ;;  %v5716_v9 = vld [vmem:[%s7950_s1 + $0xd8] sm:$0xff]   ;;  %v5718_v12 = vld [vmem:[%s7950_s1 + $0xd0] sm:$0xff]   ;;  %s4575_s20 = sshll.u32 %s8014_s13, 1 }
   0xf   : > { %v5719_v17 = vld [vmem:[%s7950_s1 + $0x108] sm:$0xff]   ;;  %v5721_v36 = vld [vmem:[%s7950_s1 + $0x100] sm:$0xff]   ;;  %vm5951_vm2 = vmor %vm231_vm0, %vm232_vm1  ;;  %s181_s23 = scalar_lea.vmem %s7952_s3, %s4575_s20 }
  0x10   : > { %s5901_s8 = scalar_lea.vmem %s7949_s0, %s5698_s28  ;;  %v5720_v31 = vld [vmem:[%s7950_s1 + $0xc8] sm:$0xff]   ;;  %v5722_v50 = vld [vmem:[%s7950_s1 + $0xc0] sm:$0xff]   ;;  %v5725_v58 = vld [vmem:[%s7950_s1 + $0x178] sm:$0xff]  }
  0x11   : > { %5133 = vmatpush3.bf16.msra.mxu0 %v5710_v3  ;;  %5691 = vmatpush3.bf16.msra.mxu1 %v5710_v3  ;;  %v5910_v11 = vld [vmem:[%s5901_s8 + $0xc] sm:$0xf]  ;;  %v5916_v13 = vld [vmem:[%s5901_s8 + $0x10] sm:$0xf]  ;;  %v5919_v14 = vld [vmem:[%s5901_s8 + $0x14] sm:$0x1] }
  0x12   : > { %5134 = vmatprep.subr.bf16.mxu0 %v5711_v4  ;;  %5684 = vmatprep.subr.bf16.mxu1 %v5711_v4  ;;  %v1103_v15 = vshrl.u32 %v5910_v11, 16  ;;  %v1106_v16 = vshll.u32 %v5910_v11, 16  ;;  %v1112_v18 = vshll.u32 %v5916_v13, 16  ;;  %v1116_v19 = vshrl.u32 %v5916_v13, 16  ;;  %v5931_v22 = vld [vmem:[%s5901_s8 + $0x9c] sm:$0xf]  ;;  %vm6146_vm5 = vmor %vm682_vm3, %vm683_vm4 }
  0x13   : > { %v1122_v20 = vshll.u32 %v5919_v14, 16  ;;  %v1555_v21 = vrot.slane %v5919_v14, 5  ;;  %v5934_v25 = vld [vmem:[%s5901_s8 + $0xa0] sm:$0xf]  ;;  %v5937_v26 = vld [vmem:[%s5901_s8 + $0xa4] sm:$0x1]  ;;  %v4720_v48 = vcombine.low %v5910_v11, %v5916_v13 }
  0x14   : > { %v1105_v23 = vrot.slane %v1103_v15, 4  ;;  %v1108_v24 = vrot.slane %v1106_v16, 5  ;;  %v1114_v27 = vrot.slane %v1112_v18, 5  ;;  %v1118_v28 = vrot.slane %v1116_v19, 4  ;;  %v5967_v54 = vld [vmem:[%s5901_s8 + $0x18] sm:$0xf] }
  0x15   : > { %5135 = vmatpush3.bf16.msra.mxu0 %v5712_v5  ;;  %5692 = vmatpush3.bf16.msra.mxu1 %v5712_v5  ;;  %v1124_v29 = vrot.slane %v1122_v20, 5  ;;  %v1391_v30 = vshrl.u32 %v5931_v22, 16  ;;  %v1394_v33 = vshll.u32 %v5931_v22, 16  ;;  %v1400_v34 = vshll.u32 %v5934_v25, 16  ;;  %v5970_v55 = vld [vmem:[%s5901_s8 + $0x1c] sm:$0xf] }
  0x16   : > { %5136 = vmatprep.subr.bf16.mxu0 %v5713_v6  ;;  %5685 = vmatprep.subr.bf16.mxu1 %v5713_v6  ;;  %v1109_v32 = vor.u32 %v1108_v24, %v1105_v23  ;;  %v1404_v35 = vshrl.u32 %v5934_v25, 16  ;;  %v1119_v38 = vor.u32 %v1118_v28, %v1114_v27  ;;  %v1410_v40 = vshll.u32 %v5937_v26, 16  ;;  %v5979_v59 = vld [vmem:[%s5901_s8 + $0x20] sm:$0x1]  ;;  %v5726_v2 = vld [vmem:[%s7950_s1 + $0xb8] sm:$0xff]  }
  0x17   : > { %v1393_v39 = vrot.slane %v1391_v30, 4  ;;  %v1639_v41 = vrot.slane %v5937_v26, 5  ;;  %v1396_v43 = vrot.slane %v1394_v33, 5  ;;  %v1402_v44 = vrot.slane %v1400_v34, 5  ;;  %v5989_v4 = vld [vmem:[%s5901_s8 + $0xa8] sm:$0xf] }
  0x18   : > { %v1110_v42 = vrot.slane %v1109_v32, 4  ;;  %v1406_v45 = vrot.slane %v1404_v35, 4  ;;  %v1120_v46 = vrot.slane %v1119_v38, 4  ;;  %v1412_v47 = vrot.slane %v1410_v40, 5  ;;  %v4685_v16 = vld [vmem:[%s5901_s8 + $0xb0] sm:$0x1] }
  0x19   : > { %5137 = vmatpush3.bf16.msra.mxu0 %v5714_v7  ;;  %5693 = vmatpush3.bf16.msra.mxu1 %v5714_v7  ;;  %v4732_v49 = vcombine.low %v5931_v22, %v5934_v25  ;;  %v1397_v52 = vor.u32 %v1396_v43, %v1393_v39  ;;  %v1552_v56 = vrot.slane %v5916_v13, 5  ;;  %v1127_v60 = vshrl.u32 %v5967_v54, 16  ;;  %v5727_v22 = vld [vmem:[%s7950_s1 + $0x170] sm:$0xff]   ;;  %v6021_v43 = vld [vmem:[%s5901_s8 + $0x28] sm:$0xf] }
  0x1a   : > { %5138 = vmatprep.subr.bf16.mxu0 %v5715_v8  ;;  %5686 = vmatprep.subr.bf16.mxu1 %v5715_v8  ;;  %v1115_v51 = vsel %vm5951_vm2, %v1110_v42, %v1114_v27  ;;  %v1407_v53 = vor.u32 %v1406_v45, %v1402_v44  ;;  %v1125_v57 = vsel %vm5951_vm2, %v1120_v46, %v1124_v29  ;;  %v1130_v61 = vshll.u32 %v5967_v54, 16  ;;  %v6018_v42 = vld [vmem:[%s5901_s8 + $0x24] sm:$0xf] }
  0x1b   : > { %v1136_v62 = vshll.u32 %v5970_v55, 16  ;;  %v4736_v63 = vcombine.low %v1115_v51, %v1125_v57  ;;  %v1398_v0 = vrot.slane %v1397_v52, 4  ;;  %v1140_v3 = vshrl.u32 %v5970_v55, 16  ;;  %v6039_v57 = vld [vmem:[%s5901_s8 + $0xb8] sm:$0xf] }
  0x1c   : > { %v1408_v1 = vrot.slane %v1407_v53, 4  ;;  %v1129_v5 = vrot.slane %v1127_v60, 4  ;;  %v1132_v6 = vrot.slane %v1130_v61, 5  ;;  %v1146_v8 = vshll.u32 %v5979_v59, 16 }
  0x1d   : > { %5139 = vmatpush3.bf16.msra.mxu0 %v5716_v9  ;;  %5694 = vmatpush3.bf16.msra.mxu1 %v5716_v9  ;;  %v1138_v7 = vrot.slane %v1136_v62, 5  ;;  %v5993_v9 = vld [vmem:[%s5901_s8 + $0xac] sm:$0xf]  ;;  %v1562_v15 = vrot.slane %v5979_v59, 5  ;;  %v1415_v20 = vshrl.u32 %v5989_v4, 16  ;;  %v1418_v24 = vshll.u32 %v5989_v4, 16 }
  0x1e   : > { %5140 = vmatprep.subr.bf16.mxu0 %v5717_v10  ;;  %5687 = vmatprep.subr.bf16.mxu1 %v5717_v10  ;;  %v1403_v10 = vsel %vm5951_vm2, %v1398_v0, %v1402_v44  ;;  %v1413_v11 = vsel %vm5951_vm2, %v1408_v1, %v1412_v47  ;;  %v1133_v18 = vor.u32 %v1132_v6, %v1129_v5  ;;  %v1148_v19 = vrot.slane %v1146_v8, 5  ;;  %v5730_v47 = vld [vmem:[%s7950_s1 + $0x168] sm:$0xff]   ;;  %v4686_v0 = vld [vmem:[%s5901_s8 + $0xbc] sm:$0x1] }
  0x1f   : > { %2094 = vmatprep.mubr.bf16.mxu0 %v4736_v63  ;;  %v1424_v25 = vshll.u32 %v5993_v9, 16  ;;  %v1428_v27 = vshrl.u32 %v5993_v9, 16  ;;  %v1417_v29 = vrot.slane %v1415_v20, 4  ;;  %v1434_v30 = vshll.u32 %v4685_v16, 16 }
  0x20   : > { %v1134_v28 = vrot.slane %v1133_v18, 4  ;;  %v1420_v33 = vrot.slane %v1418_v24, 5  ;;  %v4721_v39 = vcombine.low %v5967_v54, %v5970_v55  ;;  %v4733_v40 = vcombine.low %v5989_v4, %v5993_v9 }
  0x21   : > { %5141 = vmatpush3.bf16.msra.mxu0 %v5718_v12  ;;  %5695 = vmatpush3.bf16.msra.mxu1 %v5718_v12  ;;  %v1142_v12 = vrot.slane %v1140_v3, 4  ;;  %v1426_v34 = vrot.slane %v1424_v25, 5  ;;  %v1430_v35 = vrot.slane %v1428_v27, 4  ;;  %v1436_v38 = vrot.slane %v1434_v30, 5 }
  0x22   : > { %5142 = vmatprep.subr.bf16.mxu0 %v5719_v17  ;;  %5688 = vmatprep.subr.bf16.mxu1 %v5719_v17  ;;  %v4748_v17 = vcombine.low %v1403_v10, %v1413_v11  ;;  %v1421_v45 = vor.u32 %v1420_v33, %v1417_v29  ;;  %v1154_v52 = vshll.u32 %v6018_v42, 16  ;;  %v1160_v53 = vshll.u32 %v6021_v43, 16  ;;  %v5731_v10 = vld [vmem:[%s7950_s1 + $0x160] sm:$0xff]   ;;  %v6068_v29 = vld [vmem:[%s5901_s8 + $0x38] sm:$0x1] }
  0x23   : > { %v1143_v23 = vor.u32 %v1142_v12, %v1138_v7  ;;  %v1431_v46 = vor.u32 %v1430_v35, %v1426_v34  ;;  %v1164_v54 = vshrl.u32 %v6021_v43, 16  ;;  %v1448_v18 = vshll.u32 %v6039_v57, 16  ;;  %v6074_v35 = vld [vmem:[%s5901_s8 + $0xc0] sm:$0xf] }
  0x24   : > { %2190 = vmatprep.mubr.bf16.mxu1 %v4748_v17  ;;  %v1422_v60 = vrot.slane %v1421_v45, 4  ;;  %v1156_v1 = vrot.slane %v1154_v52, 5  ;;  %v1458_v20 = vshll.u32 %v4686_v0, 16  ;;  %v4722_v25 = vcombine.low %v6018_v42, %v6021_v43 }
  0x25   : > { %5143 = vmatpush3.bf16.msra.mxu0 %v5720_v31  ;;  %5696 = vmatpush3.bf16.msra.mxu1 %v5720_v31  ;;  %v5732_v31 = vld [vmem:[%s7950_s1 + $0xb0] sm:$0xff]   ;;  %v1144_v32 = vrot.slane %v1143_v23, 4  ;;  %v1432_v61 = vrot.slane %v1431_v46, 4  ;;  %v1166_v3 = vrot.slane %v1164_v54, 4  ;;  %v6089_v54 = vld [vmem:[%s5901_s8 + $0xc8] sm:$0x1] }
  0x26   : > { %5144 = vmatprep.subr.bf16.mxu0 %v5721_v36  ;;  %5689 = vmatprep.subr.bf16.mxu1 %v5721_v36  ;;  %v1139_v36 = vsel %vm5951_vm2, %v1134_v28, %v1138_v7  ;;  %v1427_v5 = vsel %vm5951_vm2, %v1422_v60, %v1426_v34  ;;  %v6065_v28 = vld [vmem:[%s5901_s8 + $0x34] sm:$0xf]  ;;  %v1460_v33 = vrot.slane %v1458_v20, 5  ;;  %v5735_v34 = vld [vmem:[%s7950_s1 + $0x158] sm:$0xff]   ;;  %v1482_v20 = vshll.u32 %v6089_v54, 16 }
  0x27   : > { %v1149_v44 = vsel %vm5951_vm2, %v1144_v32, %v1148_v19  ;;  %v1437_v6 = vsel %vm5951_vm2, %v1432_v61, %v1436_v38  ;;  %v1452_v19 = vshrl.u32 %v6039_v57, 16  ;;  %v1188_v52 = vshrl.u32 %v6065_v28, 16 }
  0x28   : > { %v4737_v51 = vcombine.low %v1139_v36, %v1149_v44  ;;  %v4749_v9 = vcombine.low %v1427_v5, %v1437_v6  ;;  %v5736_v5 = vld [vmem:[%s7950_s1 + $0x150] sm:$0xff]  }
  0x29   : > { %5145 = vmatpush3.bf16.msra.mxu0 %v5722_v50  ;;  %5697 = vmatpush3.bf16.msra.mxu1 %v5722_v50  ;;  %v6033_v50 = vld [vmem:[%s5901_s8 + $0xb4] sm:$0xf]  ;;  %v1454_v32 = vrot.slane %v1452_v19, 4  ;;  %v1190_v0 = vrot.slane %v1188_v52, 4  ;;  %v5741_v52 = vld [vmem:[%s7950_s1 + $0x140] sm:$0xff]  }
  0x2a   : > { %5538 = vmatprep.subr.bf16.mxu1 %v5725_v58  ;;  %5586 = vmatprep.subr.bf16.mxu0 %v5726_v2  ;;  %v1439_v4 = vshrl.u32 %v6033_v50, 16  ;;  %v1442_v8 = vshll.u32 %v6033_v50, 16  ;;  %v4734_v27 = vcombine.low %v6033_v50, %v6039_v57  ;;  %v4689_v57 = vld [vmem:[%s5901_s8 + $0x18] sm:$0xe] }
  0x2c   : > { %2095 = vmatmul.mubr.bf16.vlgmr.msra.gmra.mxu0 %v4720_v48  ;;  %2191 = vmatmul.mubr.bf16.vlgmr.msra.gmra.mxu1 %v4732_v49  ;;  %v6029_v48 = vld [vmem:[%s5901_s8 + $0x2c] sm:$0x1]  ;;  %v1151_v49 = vshrl.u32 %v6018_v42, 16  ;;  %v1441_v16 = vrot.slane %v1439_v4, 4  ;;  %v1444_v17 = vrot.slane %v1442_v8, 5 }
  0x2d   : > { %5539 = vmatpush3.bf16.msra.mxu1 %v5725_v58  ;;  %5587 = vmatpush3.bf16.msra.mxu0 %v5726_v2  ;;  %v5740_v58 = vld [vmem:[%s7950_s1 + $0xa8] sm:$0xff]   ;;  %v1170_v63 = vshll.u32 %v6029_v48, 16  ;;  %v1162_v2 = vrot.slane %v1160_v53, 5  ;;  %v6083_v42 = vld [vmem:[%s5901_s8 + $0xc4] sm:$0xf]  ;;  %v1194_v53 = vshll.u32 %v6068_v29, 16 }
  0x2e   : > { %5540 = vmatprep.subr.bf16.mxu1 %v5727_v22  ;;  %5588 = vmatprep.subr.bf16.mxu0 %v5732_v31  ;;  %v1153_v62 = vrot.slane %v1151_v49, 4  ;;  %v1445_v30 = vor.u32 %v1444_v17, %v1441_v16  ;;  %v1184_v49 = vshll.u32 %v6065_v28, 16  ;;  %v1476_v8 = vshrl.u32 %v6083_v42, 16  ;;  %v6106_v16 = vld [vmem:[%s5901_s8 + $0x3c] sm:$0xf] }
  0x2f   : > { %2102 = vmatprep.mubr.bf16.mxu0 %v4737_v51  ;;  %v1172_v7 = vrot.slane %v1170_v63, 5  ;;  %v1167_v12 = vor.u32 %v1166_v3, %v1162_v2  ;;  %2198 = vmatprep.mubr.bf16.mxu1 %v4749_v9  ;;  %v5745_v3 = vld [vmem:[%s7950_s1 + $0xa0] sm:$0xff]  }
  0x30   : > { %v1157_v11 = vor.u32 %v1156_v1, %v1153_v62  ;;  %v1446_v45 = vrot.slane %v1445_v30, 4  ;;  %v1186_v61 = vrot.slane %v1184_v49, 5  ;;  %v1463_v62 = vshrl.u32 %v6074_v35, 16  ;;  %v6109_v17 = vld [vmem:[%s5901_s8 + $0x40] sm:$0xf] }
  0x31   : > { %5541 = vmatpush3.bf16.msra.mxu1 %v5727_v22  ;;  %5589 = vmatpush3.bf16.msra.mxu0 %v5732_v31  ;;  %v6058_v22 = vld [vmem:[%s5901_s8 + $0x30] sm:$0xf]  ;;  %v1168_v24 = vrot.slane %v1167_v12, 4  ;;  %v1450_v31 = vrot.slane %v1448_v18, 5  ;;  %v1196_v1 = vrot.slane %v1194_v53, 5  ;;  %v1478_v19 = vrot.slane %v1476_v8, 4 }
  0x32   : > { %5542 = vmatprep.subr.bf16.mxu1 %v5730_v47  ;;  %5590 = vmatprep.subr.bf16.mxu0 %v5740_v58  ;;  %v1158_v23 = vrot.slane %v1157_v11, 4  ;;  %v1465_v6 = vrot.slane %v1463_v62, 4  ;;  %v1191_v11 = vor.u32 %v1190_v0, %v1186_v61  ;;  %v1212_v50 = vshrl.u32 %v6109_v17, 16  ;;  %v5756_v8 = vld [vmem:[%s7950_s1 + $0x90] sm:$0xff]  }
  0x33   : > { %v1173_v38 = vsel %vm5951_vm2, %v1168_v24, %v1172_v7  ;;  %v1455_v46 = vor.u32 %v1454_v32, %v1450_v31  ;;  %v1472_v7 = vshll.u32 %v6083_v42, 16  ;;  %v6115_v24 = vld [vmem:[%s5901_s8 + $0x44] sm:$0x1]  ;;  %v4735_v32 = vcombine.low %v6074_v35, %v6083_v42 }
  0x34   : > { %2103 = vmatmul.mubr.bf16.gmra.mxu0 %v4721_v39  ;;  %2199 = vmatmul.mubr.bf16.gmra.mxu1 %v4733_v40  ;;  %v1163_v36 = vsel %vm5951_vm2, %v1158_v23, %v1162_v2  ;;  %v1175_v39 = vshrl.u32 %v6058_v22, 16  ;;  %v1178_v40 = vshll.u32 %v6058_v22, 16  ;;  %v1466_v2 = vshll.u32 %v6074_v35, 16 }
  0x35   : > { %5591 = vmatpush3.bf16.msra.mxu0 %v5740_v58  ;;  %5543 = vmatpush3.bf16.msra.mxu1 %v5730_v47  ;;  %v4738_v44 = vcombine.low %v1163_v36, %v1173_v38  ;;  %v1451_v58 = vsel %vm5951_vm2, %v1446_v45, %v1450_v31  ;;  %v1456_v60 = vrot.slane %v1455_v46, 4  ;;  %v1474_v18 = vrot.slane %v1472_v7, 5  ;;  %v6160_v7 = vld [vmem:[%s5901_s8 + $0x4c] sm:$0xf] }
  0x36   : > { %5544 = vmatprep.subr.bf16.mxu1 %v5731_v10  ;;  %v1177_v47 = vrot.slane %v1175_v39, 4  ;;  %v1180_v51 = vrot.slane %v1178_v40, 5  ;;  %v1468_v12 = vrot.slane %v1466_v2, 5  ;;  %5592 = vmatprep.subr.bf16.mxu0 %v5745_v3  ;;  %v4723_v23 = vcombine.low %v6058_v22, %v6065_v28  ;;  %v6155_v2 = vld [vmem:[%s5901_s8 + $0x48] sm:$0xf] }
  0x37   : > { %2110 = vmatprep.mubr.bf16.mxu0 %v4738_v44  ;;  %v1461_v4 = vsel %vm5951_vm2, %v1456_v60, %v1460_v33  ;;  %v1192_v30 = vrot.slane %v1191_v11, 4  ;;  %v4688_v33 = vld [vmem:[%s5901_s8 + $0xc] sm:$0xe]  ;;  %v1479_v22 = vor.u32 %v1478_v19, %v1474_v18  ;;  %v1484_v36 = vrot.slane %v1482_v20, 5 }
  0x38   : > { %v1181_v63 = vor.u32 %v1180_v51, %v1177_v47  ;;  %v4750_v9 = vcombine.low %v1451_v58, %v1461_v4  ;;  %v1469_v31 = vor.u32 %v1468_v12, %v1465_v6  ;;  %v1199_v38 = vshrl.u32 %v6106_v16, 16 }
  0x39   : > { %5545 = vmatpush3.bf16.msra.mxu1 %v5731_v10  ;;  %5593 = vmatpush3.bf16.msra.mxu0 %v5745_v3  ;;  %v1202_v39 = vshll.u32 %v6106_v16, 16  ;;  %v1197_v40 = vsel %vm5951_vm2, %v1192_v30, %v1196_v1  ;;  %v1208_v44 = vshll.u32 %v6109_v17, 16  ;;  %v1480_v46 = vrot.slane %v1479_v22, 4 }
  0x3a   : > { %5546 = vmatprep.subr.bf16.mxu1 %v5735_v34  ;;  %v1182_v10 = vrot.slane %v1181_v63, 4  ;;  %2206 = vmatprep.mubr.bf16.mxu1 %v4750_v9  ;;  %v1470_v35 = vrot.slane %v1469_v31, 4  ;;  %v1201_v49 = vrot.slane %v1199_v38, 4  ;;  %v1214_v58 = vrot.slane %v1212_v50, 4 }
  0x3b   : > { %v1204_v47 = vrot.slane %v1202_v39, 5  ;;  %v1210_v53 = vrot.slane %v1208_v44, 5  ;;  %v1218_v60 = vshll.u32 %v6115_v24, 16  ;;  %v1485_v62 = vsel %vm5951_vm2, %v1480_v46, %v1484_v36  ;;  %v5747_v46 = vld [vmem:[%s7950_s1 + $0x70] sm:$0xff]  }
  0x3c   : > { %2111 = vmatmul.mubr.bf16.gmra.mxu0 %v4722_v25  ;;  %v1187_v25 = vsel %vm5951_vm2, %v1182_v10, %v1186_v61  ;;  %2207 = vmatmul.mubr.bf16.gmra.mxu1 %v4734_v27  ;;  %v5752_v27 = vld [vmem:[%s7950_s1 + $0x98] sm:$0xff]   ;;  %v1475_v51 = vsel %vm5951_vm2, %v1470_v35, %v1474_v18  ;;  %v4704_v0 = vrot.slane %v4688_v33, 9  ;;  %v1554_v1 = vrot.slane %v1552_v56, 4  ;;  %v6174_v18 = vld [vmem:[%s5901_s8 + $0x50] sm:$0x1] }
  0x3d   : > { %5547 = vmatpush3.bf16.msra.mxu1 %v5735_v34  ;;  %v5739_v34 = vld [vmem:[%s7950_s1 + $0x148] sm:$0xff]   ;;  %v4739_v45 = vcombine.low %v1187_v25, %v1197_v40  ;;  %5594 = vmatprep.subr.bf16.mxu0 %v5752_v27  ;;  %v1205_v63 = vor.u32 %v1204_v47, %v1201_v49  ;;  %v4751_v3 = vcombine.low %v1475_v51, %v1485_v62  ;;  %v4705_v12 = vrot.slane %v4689_v57, 9  ;;  %v5744_v40 = vld [vmem:[%s7950_s1 + $0x38] sm:$0xff]   ;;  %v4691_v57 = vld [vmem:[%s5901_s8 + $0x30] sm:$0xe] }
  0x3e   : > { %5548 = vmatprep.subr.bf16.mxu1 %v5736_v5  ;;  %v1215_v4 = vor.u32 %v1214_v58, %v1210_v53  ;;  %v4724_v6 = vcombine.low %v6106_v16, %v6109_v17  ;;  %v1553_v10 = vsel %vm6146_vm5, %v4704_v0, %v1552_v56  ;;  %v1556_v11 = vsel %vm6146_vm5, %v1554_v1, %v1555_v21  ;;  %v4690_v16 = vld [vmem:[%s5901_s8 + $0x24] sm:$0xe]  ;;  %v5743_v21 = vld [vmem:[%s7950_s1 + $0x78] sm:$0xff]   ;;  %v6206_v49 = vld [vmem:[%s5901_s8 + $0x54] sm:$0xf] }
  0x3f   : > { %2118 = vmatprep.mubr.bf16.mxu0 %v4739_v45  ;;  %v1206_v9 = vrot.slane %v1205_v63, 4  ;;  %5595 = vmatpush3.bf16.msra.mxu0 %v5752_v27  ;;  %v4752_v20 = vcombine.low %v1553_v10, %v1556_v11  ;;  %v1223_v13 = vshrl.u32 %v6155_v2, 16  ;;  %v1226_v56 = vshll.u32 %v6155_v2, 16  ;;  %v6219_v58 = vld [vmem:[%s5901_s8 + $0x5c] sm:$0x1] }
  0x40   : > { %2214 = vmatprep.mubr.bf16.mxu1 %v4751_v3  ;;  %v1216_v19 = vrot.slane %v1215_v4, 4  ;;  %v1232_v25 = vshll.u32 %v6160_v7, 16  ;;  %v1236_v30 = vshrl.u32 %v6160_v7, 16  ;;  %5596 = vmatprep.subr.bf16.mxu0 %v5756_v8  ;;  %v1242_v35 = vshll.u32 %v6174_v18, 16 }
  0x41   : > { %5549 = vmatpush3.bf16.msra.mxu1 %v5736_v5  ;;  %v1220_v5 = vrot.slane %v1218_v60, 5  ;;  %v1211_v14 = vsel %vm5951_vm2, %v1206_v9, %v1210_v53  ;;  %v1225_v33 = vrot.slane %v1223_v13, 4  ;;  %v1228_v36 = vrot.slane %v1226_v56, 5  ;;  %v4692_v60 = vld [vmem:[%s5901_s8 + $0x3c] sm:$0xe] }
  0x42   : > { %5550 = vmatprep.subr.bf16.mxu1 %v5739_v34  ;;  %v1238_v38 = vrot.slane %v1236_v30, 4  ;;  %v4706_v44 = vrot.slane %v4690_v16, 9  ;;  %v1566_v50 = vrot.slane %v6021_v43, 5  ;;  %v5763_v43 = vld [vmem:[%s7950_s1 + $0x88] sm:$0xff]   ;;  %v1244_v47 = vrot.slane %v1242_v35, 5 }
  0x43   : > { %5597 = vmatpush3.bf16.msra.mxu0 %v5756_v8  ;;  %v1229_v59 = vor.u32 %v1228_v36, %v1225_v33  ;;  %v4725_v53 = vcombine.low %v6155_v2, %v6160_v7  ;;  %v4707_v0 = vrot.slane %v4691_v57, 9  ;;  %v1573_v1 = vrot.slane %v6065_v28, 5 }
  0x44   : > { %2119 = vmatmul.mubr.bf16.gmra.mxu0 %v4723_v23  ;;  %v1559_v23 = vrot.slane %v5970_v55, 5  ;;  %2215 = vmatmul.mubr.bf16.gmra.mxu1 %v4735_v32  ;;  %v1221_v55 = vsel %vm5951_vm2, %v1216_v19, %v1220_v5  ;;  %v1567_v51 = vsel %vm6146_vm5, %v4706_v44, %v1566_v50  ;;  %v1576_v4 = vrot.slane %v6068_v29, 5  ;;  %v5748_v29 = vld [vmem:[%s7950_s1 + $0x30] sm:$0xff]   ;;  %v6265_v44 = vld [vmem:[%s5901_s8 + $0x68] sm:$0x1] }
  0x45   : > { %5551 = vmatpush3.bf16.msra.mxu1 %v5739_v34  ;;  %5554 = vmatprep.mubr.bf16.mxu1 %v4752_v20  ;;  %v4740_v22 = vcombine.low %v1211_v14, %v1221_v55  ;;  %v1234_v34 = vrot.slane %v1232_v25, 5  ;;  %v1230_v62 = vrot.slane %v1229_v59, 4  ;;  %v1247_v5 = vshrl.u32 %v6206_v49, 16  ;;  %v5750_v14 = vld [vmem:[%s7950_s1 + $0x68] sm:$0xff]  }
  0x46   : > { %5552 = vmatprep.subr.bf16.mxu1 %v5741_v52  ;;  %v1560_v31 = vsel %vm6146_vm5, %v4705_v12, %v1559_v23  ;;  %v1561_v32 = vrot.slane %v1559_v23, 4  ;;  %5598 = vmatprep.subr.bf16.mxu0 %v5763_v43  ;;  %v1250_v2 = vshll.u32 %v6206_v49, 16  ;;  %v1574_v28 = vsel %vm6146_vm5, %v4707_v0, %v1573_v1  ;;  %v4693_v55 = vld [vmem:[%s5901_s8 + $0x48] sm:$0xe]  ;;  %v5755_v0 = vld [vmem:[%s7950_s1 + $0x20] sm:$0xff]  }
  0x47   : > { %2126 = vmatprep.mubr.bf16.mxu0 %v4740_v22  ;;  %v1239_v45 = vor.u32 %v1238_v38, %v1234_v34  ;;  %5599 = vmatpush3.bf16.msra.mxu0 %v5763_v43  ;;  %v1575_v11 = vrot.slane %v1573_v1, 4  ;;  %v1249_v12 = vrot.slane %v1247_v5, 4  ;;  %v1266_v23 = vshll.u32 %v6219_v58, 16  ;;  %v6255_v38 = vld [vmem:[%s5901_s8 + $0x64] sm:$0xf] }
  0x48   : > { %v1563_v39 = vsel %vm6146_vm5, %v1561_v32, %v1562_v15  ;;  %v1569_v15 = vrot.slane %v6029_v48, 5  ;;  %v6216_v48 = vld [vmem:[%s5901_s8 + $0x58] sm:$0xf]  ;;  %v1252_v16 = vrot.slane %v1250_v2, 5  ;;  %v4708_v13 = vrot.slane %v4692_v60, 9 }
  0x49   : > { %5553 = vmatpush3.bf16.msra.mxu1 %v5741_v52  ;;  %v4753_v27 = vcombine.low %v1560_v31, %v1563_v39  ;;  %v1568_v52 = vrot.slane %v1566_v50, 4  ;;  %v1240_v63 = vrot.slane %v1239_v45, 4  ;;  %v1256_v19 = vshll.u32 %v6216_v48, 16  ;;  %v5751_v31 = vld [vmem:[%s7950_s1 + $0x28] sm:$0xff]   ;;  %v6252_v32 = vld [vmem:[%s5901_s8 + $0x60] sm:$0xf] }
  0x4a   : > { %5266 = vmatprep.subr.bf16.mxu1 %v5743_v21  ;;  %v1260_v20 = vshrl.u32 %v6216_v48, 16  ;;  %v1577_v21 = vsel %vm6146_vm5, %v1575_v11, %v1576_v4  ;;  %v1253_v56 = vor.u32 %v1252_v16, %v1249_v12  ;;  %v1580_v25 = vrot.slane %v6109_v17, 5  ;;  %v5767_v17 = vld [vmem:[%s7950_s1 + $0x80] sm:$0xff]   ;;  %v4694_v50 = vld [vmem:[%s5901_s8 + $0x54] sm:$0xe] }
  0x4b   : > { %v1570_v3 = vsel %vm6146_vm5, %v1568_v52, %v1569_v15  ;;  %v1245_v8 = vsel %vm5951_vm2, %v1240_v63, %v1244_v47  ;;  %v1583_v30 = vrot.slane %v6115_v24, 5  ;;  %v4755_v33 = vcombine.low %v1574_v28, %v1577_v21  ;;  %v5754_v15 = vld [vmem:[%s7950_s1 + $0x60] sm:$0xff]   ;;  %5600 = vmatprep.subr.bf16.mxu0 %v5767_v17  ;;  %v6296_v11 = vld [vmem:[%s5901_s8 + $0x6c] sm:$0xf] }
  0x4c   : > { %2127 = vmatmul.mubr.bf16.gmra.mxu0 %v4724_v6  ;;  %5555 = vmatmul.mubr.bf16.vlgmr.msra.gmra.mxu1 %v4753_v27  ;;  %v1235_v6 = vsel %vm5951_vm2, %v1230_v62, %v1234_v34  ;;  %v4754_v9 = vcombine.low %v1567_v51, %v1570_v3  ;;  %v1258_v22 = vrot.slane %v1256_v19, 5  ;;  %v1262_v36 = vrot.slane %v1260_v20, 4  ;;  %v4695_v2 = vld [vmem:[%s5901_s8 + $0x60] sm:$0xe] }
  0x4d   : > { %5267 = vmatpush3.bf16.msra.mxu1 %v5744_v40  ;;  %v4741_v10 = vcombine.low %v1235_v6, %v1245_v8  ;;  %v1268_v34 = vrot.slane %v1266_v23, 5  ;;  %v1254_v24 = vrot.slane %v1253_v56, 4  ;;  %v1581_v39 = vsel %vm6146_vm5, %v4708_v13, %v1580_v25  ;;  %5601 = vmatpush3.bf16.msra.mxu0 %v5767_v17  ;;  %v5758_v6 = vld [vmem:[%s7950_s1 + $0x58] sm:$0xff]   ;;  %v6304_v23 = vld [vmem:[%s5901_s8 + $0x70] sm:$0xf] }
  0x4e   : > { %5558 = vmatprep.mubr.bf16.mxu1 %v4754_v9  ;;  %5268 = vmatprep.subr.bf16.mxu1 %v5747_v46  ;;  %v1582_v40 = vrot.slane %v1580_v25, 4  ;;  %v4726_v35 = vcombine.low %v6206_v49, %v6216_v48  ;;  %v1263_v57 = vor.u32 %v1262_v36, %v1258_v22  ;;  %v4709_v27 = vrot.slane %v4693_v55, 9  ;;  %v5761_v25 = vld [vmem:[%s7950_s1 + $0x50] sm:$0xff]  }
  0x4f   : > { %2134 = vmatprep.mubr.bf16.mxu0 %v4741_v10  ;;  %v1587_v59 = vrot.slane %v6160_v7, 5  ;;  %v1590_v45 = vrot.slane %v6174_v18, 5  ;;  %v1259_v46 = vsel %vm5951_vm2, %v1254_v24, %v1258_v22  ;;  %v1271_v43 = vshrl.u32 %v6252_v32, 16  ;;  %v4680_v22 = vld [vmem:[%s5901_s8 + $0x74] sm:$0x1] }
  0x50   : > { %v1584_v49 = vsel %vm6146_vm5, %v1582_v40, %v1583_v30  ;;  %v1274_v47 = vshll.u32 %v6252_v32, 16  ;;  %v1264_v7 = vrot.slane %v1263_v57, 4  ;;  %v1280_v62 = vshll.u32 %v6255_v38, 16  ;;  %v5773_v40 = vld [vmem:[%s7950_s1 + $0x1f8] sm:$0xff]  }
  0x51   : > { %5269 = vmatpush3.bf16.msra.mxu1 %v5748_v29  ;;  %v4756_v18 = vcombine.low %v1581_v39, %v1584_v49  ;;  %v1588_v51 = vsel %vm6146_vm5, %v4709_v27, %v1587_v59  ;;  %v1589_v52 = vrot.slane %v1587_v59, 4  ;;  %v1284_v63 = vshrl.u32 %v6255_v38, 16  ;;  %v5759_v29 = vld [vmem:[%s7950_s1 + $0x18] sm:$0xff]   ;;  %v4696_v39 = vld [vmem:[%s5901_s8 + $0x6c] sm:$0xe]  ;;  %v5762_v59 = vld [vmem:[%s7950_s1 + $0x10] sm:$0xff]   ;;  %5402 = vmatprep.subr.bf16.mxu0 %v5773_v40 }
  0x52   : > { %5270 = vmatprep.subr.bf16.mxu1 %v5750_v14  ;;  %v1276_v60 = vrot.slane %v1274_v47, 5  ;;  %v1269_v1 = vsel %vm5951_vm2, %v1264_v7, %v1268_v34  ;;  %v1290_v4 = vshll.u32 %v6265_v44, 16  ;;  %v4710_v5 = vrot.slane %v4694_v50, 9  ;;  %v6333_v27 = vld [vmem:[%s5901_s8 + $0x7c] sm:$0xf] }
  0x53   : > { %v1591_v3 = vsel %vm6146_vm5, %v1589_v52, %v1590_v45  ;;  %v4742_v8 = vcombine.low %v1259_v46, %v1269_v1  ;;  %v1282_v10 = vrot.slane %v1280_v62, 5  ;;  %v1286_v12 = vrot.slane %v1284_v63, 4  ;;  %v5765_v45 = vld [vmem:[%s7950_s1 + $0x48] sm:$0xff]   ;;  %v6344_v47 = vld [vmem:[%s5901_s8 + $0x80] sm:$0x1] }
  0x54   : > { %2135 = vmatmul.mubr.bf16.gmra.mxu0 %v4725_v53  ;;  %5559 = vmatmul.mubr.bf16.gmra.mxu1 %v4755_v33  ;;  %v1273_v53 = vrot.slane %v1271_v43, 4  ;;  %v4757_v9 = vcombine.low %v1588_v51, %v1591_v3  ;;  %v1292_v16 = vrot.slane %v1290_v4, 5  ;;  %v1594_v19 = vrot.slane %v6216_v48, 5  ;;  %v4697_v7 = vld [vmem:[%s5901_s8 + $0x78] sm:$0xe] }
  0x55   : > { %5271 = vmatpush3.bf16.msra.mxu1 %v5751_v31  ;;  %5562 = vmatprep.mubr.bf16.mxu1 %v4756_v18  ;;  %v1597_v20 = vrot.slane %v6219_v58, 5  ;;  %v4727_v14 = vcombine.low %v6252_v32, %v6255_v38  ;;  %v4711_v21 = vrot.slane %v4695_v2, 9  ;;  %v1601_v56 = vrot.slane %v6255_v38, 5 }
  0x56   : > { %5272 = vmatprep.subr.bf16.mxu1 %v5754_v15  ;;  %v1277_v28 = vor.u32 %v1276_v60, %v1273_v53  ;;  %2142 = vmatprep.mubr.bf16.mxu0 %v4742_v8  ;;  %v1287_v48 = vor.u32 %v1286_v12, %v1282_v10  ;;  %v1595_v58 = vsel %vm6146_vm5, %v4710_v5, %v1594_v19  ;;  %v1596_v30 = vrot.slane %v1594_v19, 4  ;;  %v6348_v60 = vld [vmem:[%s5901_s8 + $0x78] sm:$0xf] }
  0x57   : > { %v1604_v55 = vrot.slane %v6265_v44, 5  ;;  %v1602_v32 = vsel %vm6146_vm5, %v4711_v21, %v1601_v56  ;;  %v1603_v33 = vrot.slane %v1601_v56, 4  ;;  %v1295_v36 = vshrl.u32 %v6296_v11, 16 }
  0x58   : > { %v1278_v13 = vrot.slane %v1277_v28, 4  ;;  %v1288_v34 = vrot.slane %v1287_v48, 4  ;;  %v1598_v38 = vsel %vm6146_vm5, %v1596_v30, %v1597_v20  ;;  %v1298_v17 = vshll.u32 %v6296_v11, 16  ;;  %v4698_v48 = vld [vmem:[%s5901_s8 + $0x84] sm:$0xe] }
  0x59   : > { %5273 = vmatpush3.bf16.msra.mxu1 %v5755_v0  ;;  %v1304_v24 = vshll.u32 %v6304_v23, 16  ;;  %v1605_v44 = vsel %vm6146_vm5, %v1603_v33, %v1604_v55  ;;  %v1297_v50 = vrot.slane %v1295_v36, 4  ;;  %v1308_v57 = vshrl.u32 %v6304_v23, 16  ;;  %v6390_v33 = vld [vmem:[%s5901_s8 + $0x98] sm:$0x1] }
  0x5a   : > { %5274 = vmatprep.subr.bf16.mxu1 %v5758_v6  ;;  %v1283_v31 = vsel %vm5951_vm2, %v1278_v13, %v1282_v10  ;;  %v1293_v15 = vsel %vm5951_vm2, %v1288_v34, %v1292_v16  ;;  %v4759_v46 = vcombine.low %v1602_v32, %v1605_v44  ;;  %v1300_v49 = vrot.slane %v1298_v17, 5  ;;  %v5766_v6 = vld [vmem:[%s7950_s1 + $0x8] sm:$0xff]   ;;  %v5770_v13 = vld [vmem:[%s7950_s1] sm:$0xff]   ;;  %v6387_v32 = vld [vmem:[%s5901_s8 + $0x94] sm:$0xf] }
  0x5b   : > { %v1306_v43 = vrot.slane %v1304_v24, 5  ;;  %v4743_v18 = vcombine.low %v1283_v31, %v1293_v15  ;;  %v1310_v51 = vrot.slane %v1308_v57, 4  ;;  %v1314_v52 = vshll.u32 %v4680_v22, 16  ;;  %v6394_v36 = vld [vmem:[%s5901_s8 + $0x84] sm:$0xf]  ;;  %v6399_v34 = vld [vmem:[%s7950_s1 + $0x238] sm:$0xff]  }
  0x5c   : > { %2143 = vmatmul.mubr.bf16.gmra.mxu0 %v4726_v35  ;;  %5563 = vmatmul.mubr.bf16.gmra.mxu1 %v4757_v9  ;;  %v4758_v35 = vcombine.low %v1595_v58, %v1598_v38  ;;  %v4712_v53 = vrot.slane %v4696_v39, 9  ;;  %v1301_v62 = vor.u32 %v1300_v49, %v1297_v50  ;;  %v1608_v63 = vrot.slane %v6304_v23, 5 }
  0x5d   : > { %5275 = vmatpush3.bf16.msra.mxu1 %v5759_v29  ;;  %v1611_v0 = vrot.slane %v4680_v22, 5  ;;  %v4728_v1 = vcombine.low %v6296_v11, %v6304_v23  ;;  %2150 = vmatprep.mubr.bf16.mxu0 %v4743_v18  ;;  %v1311_v3 = vor.u32 %v1310_v51, %v1306_v43  ;;  %v1316_v4 = vrot.slane %v1314_v52, 5  ;;  %v6361_v11 = vld [vmem:[%s5901_s8 + $0x88] sm:$0xf]  ;;  %v5769_v29 = vld [vmem:[%s7950_s1 + $0x40] sm:$0xff]  }
  0x5e   : > { %5276 = vmatprep.subr.bf16.mxu1 %v5761_v25  ;;  %5566 = vmatprep.mubr.bf16.mxu1 %v4758_v35  ;;  %v4713_v5 = vrot.slane %v4697_v7, 9  ;;  %v1615_v2 = vrot.slane %v6333_v27, 5  ;;  %v1302_v8 = vrot.slane %v1301_v62, 4  ;;  %v1609_v9 = vsel %vm6146_vm5, %v4712_v53, %v1608_v63  ;;  %v6370_v23 = vld [vmem:[%s5901_s8 + $0x8c] sm:$0x1] }
  0x5f   : > { %v1610_v28 = vrot.slane %v1608_v63, 4  ;;  %v1618_v10 = vrot.slane %v6344_v47, 5  ;;  %v1312_v12 = vrot.slane %v1311_v3, 4  ;;  %v1319_v20 = vshrl.u32 %v6348_v60, 16  ;;  %v4699_v22 = vld [vmem:[%s5901_s8 + $0x90] sm:$0xe] }
  0x60   : > { %v1616_v16 = vsel %vm6146_vm5, %v4713_v5, %v1615_v2  ;;  %v1617_v19 = vrot.slane %v1615_v2, 4  ;;  %v1322_v56 = vshll.u32 %v6348_v60, 16  ;;  %v1328_v25 = vshll.u32 %v6333_v27, 16  ;;  %v4700_v63 = vld [vmem:[%s5901_s8 + $0x9c] sm:$0xe] }
  0x61   : > { %5277 = vmatpush3.bf16.msra.mxu1 %v5762_v59  ;;  %v1612_v21 = vsel %vm6146_vm5, %v1610_v28, %v1611_v0  ;;  %v1317_v58 = vsel %vm5951_vm2, %v1312_v12, %v1316_v4  ;;  %v1321_v31 = vrot.slane %v1319_v20, 4  ;;  %v1332_v40 = vshrl.u32 %v6333_v27, 16  ;;  %v4701_v5 = vld [vmem:[%s5901_s8 + $0xa8] sm:$0xe] }
  0x62   : > { %5278 = vmatprep.subr.bf16.mxu1 %v5765_v45  ;;  %v4760_v30 = vcombine.low %v1609_v9, %v1612_v21  ;;  %v1619_v55 = vsel %vm6146_vm5, %v1617_v19, %v1618_v10  ;;  %v1324_v24 = vrot.slane %v1322_v56, 5  ;;  %v1330_v39 = vrot.slane %v1328_v25, 5  ;;  %v6431_v21 = vld [vmem:[%s5901_s8 + $0x90] sm:$0xf] }
  0x63   : > { %v4761_v17 = vcombine.low %v1616_v16, %v1619_v55  ;;  %v1338_v35 = vshll.u32 %v6344_v47, 16  ;;  %v4714_v44 = vrot.slane %v4698_v48, 9  ;;  %v1622_v50 = vrot.slane %v6361_v11, 5 }
  0x64   : > { %2151 = vmatmul.mubr.bf16.gmra.mxu0 %v4727_v14  ;;  %5567 = vmatmul.mubr.bf16.gmra.mxu1 %v4759_v46  ;;  %v1307_v14 = vsel %vm5951_vm2, %v1302_v8, %v1306_v43  ;;  %v1325_v57 = vor.u32 %v1324_v24, %v1321_v31  ;;  %v1625_v59 = vrot.slane %v6370_v23, 5  ;;  %v4729_v45 = vcombine.low %v6348_v60, %v6333_v27  ;;  %v5829_v24 = vld [vmem:[%s5901_s8 + $0xb0] sm:$0x1] }
  0x65   : > { %5279 = vmatpush3.bf16.msra.mxu1 %v5766_v6  ;;  %v4744_v38 = vcombine.low %v1307_v14, %v1317_v58  ;;  %5570 = vmatprep.mubr.bf16.mxu1 %v4760_v30  ;;  %v4715_v15 = vrot.slane %v4699_v22, 9  ;;  %v1334_v46 = vrot.slane %v1332_v40, 4  ;;  %v1340_v49 = vrot.slane %v1338_v35, 5 }
  0x66   : > { %5280 = vmatprep.subr.bf16.mxu1 %v5769_v29  ;;  %v1623_v43 = vsel %vm6146_vm5, %v4714_v44, %v1622_v50  ;;  %v1624_v7 = vrot.slane %v1622_v50, 4  ;;  %v1326_v47 = vrot.slane %v1325_v57, 4  ;;  %v1629_v18 = vrot.slane %v6387_v32, 5  ;;  %v4702_v50 = vld [vmem:[%s5901_s8 + $0xb4] sm:$0xe] }
  0x67   : > { %2158 = vmatprep.mubr.bf16.mxu0 %v4744_v38  ;;  %v1632_v51 = vrot.slane %v6390_v33, 5  ;;  %v1343_v52 = vshrl.u32 %v6394_v36, 16  ;;  %v1335_v27 = vor.u32 %v1334_v46, %v1330_v39  ;;  %v1346_v60 = vshll.u32 %v6394_v36, 16  ;;  %v5828_v38 = vld [vmem:[%s5901_s8 + $0xac] sm:$0xf] }
  0x68   : > { %v1626_v53 = vsel %vm6146_vm5, %v1624_v7, %v1625_v59  ;;  %v1352_v62 = vshll.u32 %v6361_v11, 16  ;;  %v1331_v0 = vsel %vm5951_vm2, %v1326_v47, %v1330_v39  ;;  %v1630_v3 = vsel %vm6146_vm5, %v4715_v15, %v1629_v18  ;;  %v4703_v46 = vld [vmem:[%s5901_s8 + $0xc0] sm:$0xe] }
  0x69   : > { %5281 = vmatpush3.bf16.msra.mxu1 %v5770_v13  ;;  %v1631_v4 = vrot.slane %v1629_v18, 4  ;;  %v1336_v2 = vrot.slane %v1335_v27, 4  ;;  %v1345_v6 = vrot.slane %v1343_v52, 4  ;;  %v1348_v8 = vrot.slane %v1346_v60, 5  ;;  %v5827_v13 = vld [vmem:[%s5901_s8 + $0xa0] sm:$0xf] }
  0x6a   : > { %5634 = vmatprep.subr.bf16.mxu1 %v6399_v34  ;;  %v1354_v9 = vrot.slane %v1352_v62, 5  ;;  %v1356_v10 = vshrl.u32 %v6361_v11, 16  ;;  %v1362_v29 = vshll.u32 %v6370_v23, 16  ;;  %v4716_v12 = vrot.slane %v4700_v63, 9  ;;  %v6459_v62 = vld [vmem:[%s5901_s8] sm:$0xf] }
  0x6b   : > { %v1633_v28 = vsel %vm6146_vm5, %v1631_v4, %v1632_v51  ;;  %v1341_v16 = vsel %vm5951_vm2, %v1336_v2, %v1340_v49  ;;  %v1349_v20 = vor.u32 %v1348_v8, %v1345_v6  ;;  %v1636_v14 = vrot.slane %v5827_v13, 5  ;;  %v618_v13 = vld [vmem:[%s5901_s8] sm:$0xe] }
  0x6c   : > { %2159 = vmatmul.mubr.bf16.gmra.mxu0 %v4728_v1  ;;  %5571 = vmatmul.mubr.bf16.gmra.mxu1 %v4761_v17  ;;  %v4762_v1 = vcombine.low %v1623_v43, %v1626_v53  ;;  %v4763_v19 = vcombine.low %v1630_v3, %v1633_v28  ;;  %v4745_v56 = vcombine.low %v1331_v0, %v1341_v16  ;;  %v1358_v25 = vrot.slane %v1356_v10, 4  ;;  %v5830_v0 = vld [vmem:[%s5901_s8 + $0xb8] sm:$0xf]  ;;  %v5831_v3 = vld [vmem:[%s5901_s8 + $0xbc] sm:$0x1] }
  0x6d   : > { %v1364_v48 = vrot.slane %v1362_v29, 5  ;;  %v4730_v58 = vcombine.low %v6394_v36, %v6361_v11  ;;  %v1350_v30 = vrot.slane %v1349_v20, 4  ;;  %v1637_v23 = vsel %vm6146_vm5, %v4716_v12, %v1636_v14  ;;  %v215_v12 = vld [vmem:[%s5901_s8 + $0x8] sm:$0x1] }
  0x6e   : > { %5574 = vmatprep.mubr.bf16.mxu1 %v4762_v1  ;;  %v1638_v55 = vrot.slane %v1636_v14, 4  ;;  %v4717_v31 = vrot.slane %v4701_v5, 9  ;;  %2166 = vmatprep.mubr.bf16.mxu0 %v4745_v56  ;;  %v1359_v22 = vor.u32 %v1358_v25, %v1354_v9  ;;  %v1643_v17 = vrot.slane %v5828_v38, 5  ;;  %v619_v14 = vld [vmem:[%s5901_s8 + $0xc] sm:$0xe] }
  0x6f   : > { %v1646_v39 = vrot.slane %v5829_v24, 5  ;;  %v1367_v40 = vshrl.u32 %v6431_v21, 16  ;;  %v1355_v11 = vsel %vm5951_vm2, %v1350_v30, %v1354_v9  ;;  %v1370_v35 = vshll.u32 %v6431_v21, 16  ;;  %v6467_v9 = vld [vmem:[%s5901_s8 + $0x4] sm:$0xf] }
  0x70   : > { %v1640_v36 = vsel %vm6146_vm5, %v1638_v55, %v1639_v41  ;;  %v1376_v44 = vshll.u32 %v6387_v32, 16  ;;  %v1360_v57 = vrot.slane %v1359_v22, 4  ;;  %v1644_v15 = vsel %vm6146_vm5, %v4717_v31, %v1643_v17  ;;  %v6490_v55 = vld [vmem:[%s5901_s8 + $0x10] sm:$0xf]  ;;  %v216_v24 = vld [vmem:[%s5901_s8 + $0x14] sm:$0x1] }
  0x71   : > { %v4764_v59 = vcombine.low %v1637_v23, %v1640_v36  ;;  %v1369_v49 = vrot.slane %v1367_v40, 4  ;;  %v1372_v26 = vrot.slane %v1370_v35, 5  ;;  %v1380_v41 = vshrl.u32 %v6387_v32, 16  ;;  %v6495_v35 = vld [vmem:[%s5901_s8 + $0xc] sm:$0xf] }
  0x72   : > { %v1378_v43 = vrot.slane %v1376_v44, 5  ;;  %v1365_v7 = vsel %vm5951_vm2, %v1360_v57, %v1364_v48  ;;  %v1386_v18 = vshll.u32 %v6390_v33, 16  ;;  %v4718_v51 = vrot.slane %v4702_v50, 9 }
  0x73   : > { %v4746_v52 = vcombine.low %v1355_v11, %v1365_v7  ;;  %v1373_v53 = vor.u32 %v1372_v26, %v1369_v49  ;;  %v1382_v60 = vrot.slane %v1380_v41, 4  ;;  %v1650_v1 = vrot.slane %v5830_v0, 5 }
  0x74   : > { %2167 = vmatmul.mubr.bf16.gmra.mxu0 %v4729_v45  ;;  %5575 = vmatmul.mubr.bf16.gmra.mxu1 %v4763_v19  ;;  %v1645_v45 = vrot.slane %v1643_v17, 4  ;;  %v1388_v63 = vrot.slane %v1386_v18, 5  ;;  %v1653_v4 = vrot.slane %v5831_v3, 5  ;;  %v4731_v5 = vcombine.low %v6431_v21, %v6387_v32  ;;  %v620_v18 = vld [vmem:[%s5901_s8 + $0x18] sm:$0xe] }
  0x75   : > { %5578 = vmatprep.mubr.bf16.mxu1 %v4764_v59  ;;  %2174 = vmatprep.mubr.bf16.mxu0 %v4746_v52  ;;  %v1374_v33 = vrot.slane %v1373_v53, 4  ;;  %v1383_v2 = vor.u32 %v1382_v60, %v1378_v43  ;;  %v4719_v6 = vrot.slane %v4703_v46, 9  ;;  %v1657_v8 = vrot.slane %v6083_v42, 5  ;;  %v6512_v60 = vld [vmem:[%s5901_s8 + $0x20] sm:$0x1] }
  0x76   : > { %v1647_v47 = vsel %vm6146_vm5, %v1645_v45, %v1646_v39  ;;  %v1651_v28 = vsel %vm6146_vm5, %v4718_v51, %v1650_v1  ;;  %v1652_v10 = vrot.slane %v1650_v1, 4  ;;  %v1660_v29 = vrot.slane %v6089_v54, 5 }
  0x77   : > { %v4765_v27 = vcombine.low %v1644_v15, %v1647_v47  ;;  %v235_v16 = vshrl.u32 %v6459_v62, 16  ;;  %v1379_v32 = vsel %vm5951_vm2, %v1374_v33, %v1378_v43  ;;  %v1384_v19 = vrot.slane %v1383_v2, 4  ;;  %v6504_v47 = vld [vmem:[%s5901_s8 + $0x1c] sm:$0xf] }
  0x78   : > { %v1658_v42 = vsel %vm6146_vm5, %v4719_v6, %v1657_v8  ;;  %v1659_v20 = vrot.slane %v1657_v8, 4  ;;  %v1654_v54 = vsel %vm6146_vm5, %v1652_v10, %v1653_v4  ;;  %v238_v56 = vshll.u32 %v6459_v62, 16  ;;  %v621_v4 = vld [vmem:[%s5901_s8 + $0x24] sm:$0xe]  ;;  %v6522_v8 = vld [vmem:[%s5901_s8 + $0x28] sm:$0xf] }
  0x79   : > { %v237_v21 = vrot.slane %v235_v16, 4  ;;  %v244_v25 = vshll.u32 %v6467_v9, 16  ;;  %v1389_v48 = vsel %vm5951_vm2, %v1384_v19, %v1388_v63  ;;  %v248_v23 = vshrl.u32 %v6467_v9, 16 }
  0x7a   : > { %v1661_v30 = vsel %vm6146_vm5, %v1659_v20, %v1660_v29  ;;  %v4747_v31 = vcombine.low %v1379_v32, %v1389_v48  ;;  %v240_v38 = vrot.slane %v238_v56, 5  ;;  %v254_v40 = vshll.u32 %v215_v12, 16  ;;  %v6529_v20 = vld [vmem:[%s5901_s8 + $0x2c] sm:$0x1] }
  0x7b   : > { %v4767_v22 = vcombine.low %v1658_v42, %v1661_v30  ;;  %v246_v17 = vrot.slane %v244_v25, 5  ;;  %v250_v39 = vrot.slane %v248_v23, 4  ;;  %v4576_v11 = vrot.slane %v618_v13, 9  ;;  %v6532_v13 = vld [vmem:[%s5901_s8 + $0x18] sm:$0xf] }
  0x7c   : > { %2175 = vmatmul.mubr.bf16.gmra.mxu0 %v4730_v58  ;;  %5579 = vmatmul.mubr.bf16.gmra.mxu1 %v4765_v27  ;;  %v4766_v58 = vcombine.low %v1651_v28, %v1654_v54  ;;  %v687_v36 = vrot.slane %v6467_v9, 5  ;;  %v241_v44 = vor.u32 %v240_v38, %v237_v21  ;;  %v690_v50 = vrot.slane %v215_v12, 5 }
  0x7d   : > { %2182 = vmatprep.mubr.bf16.mxu0 %v4747_v31  ;;  %v4592_v57 = vcombine.low %v6459_v62, %v6467_v9  ;;  %v4577_v59 = vrot.slane %v619_v14, 9  ;;  %v251_v15 = vor.u32 %v250_v39, %v246_v17  ;;  %v256_v45 = vrot.slane %v254_v40, 5  ;;  %v5774_v14 = vld [vmem:[%s7950_s1 + $0x1b8] sm:$0xff]   ;;  %v5776_v31 = vld [vmem:[%s7950_s1 + $0x1f0] sm:$0xff]  }
  0x7e   : > { %5582 = vmatprep.mubr.bf16.mxu1 %v4766_v58  ;;  %v688_v46 = vsel %vm6146_vm5, %v4576_v11, %v687_v36  ;;  %v689_v49 = vrot.slane %v687_v36, 4  ;;  %v242_v26 = vrot.slane %v241_v44, 4  ;;  %v694_v43 = vrot.slane %v6490_v55, 5  ;;  %v5779_v40 = vld [vmem:[%s7950_s1 + $0x230] sm:$0xff]  }
  0x7f   : > { %v697_v41 = vrot.slane %v216_v24, 5  ;;  %v259_v7 = vshrl.u32 %v6495_v35, 16  ;;  %v252_v51 = vrot.slane %v251_v15, 4  ;;  %v262_v27 = vshll.u32 %v6495_v35, 16  ;;  %v6564_v15 = vld [vmem:[%s5901_s8 + $0x38] sm:$0x1] }
  0x80   : > { %v691_v52 = vsel %vm6146_vm5, %v689_v49, %v690_v50  ;;  %v268_v53 = vshll.u32 %v6490_v55, 16  ;;  %v247_v63 = vsel %vm5951_vm2, %v242_v26, %v246_v17  ;;  %v695_v1 = vsel %vm6146_vm5, %v4577_v59, %v694_v43  ;;  %v6561_v59 = vld [vmem:[%s5901_s8 + $0x34] sm:$0xf] }
  0x81   : > { %v4624_v0 = vcombine.low %v688_v46, %v691_v52  ;;  %v696_v3 = vrot.slane %v694_v43, 4  ;;  %v261_v33 = vrot.slane %v259_v7, 4  ;;  %v264_v2 = vrot.slane %v262_v27, 5  ;;  %v5780_v7 = vld [vmem:[%s7950_s1 + $0x1e8] sm:$0xff]  }
  0x82   : > { %v270_v6 = vrot.slane %v268_v53, 5  ;;  %v272_v29 = vshrl.u32 %v6490_v55, 16  ;;  %v278_v12 = vshll.u32 %v216_v24, 16  ;;  %v4578_v19 = vrot.slane %v620_v18, 9  ;;  %v5777_v24 = vld [vmem:[%s7950_s1 + $0x1b0] sm:$0xff]   ;;  %v6581_v18 = vld [vmem:[%s7950_s1 + $0x228] sm:$0xff]  }
  0x83   : > { %v698_v10 = vsel %vm6146_vm5, %v696_v3, %v697_v41  ;;  %v265_v32 = vor.u32 %v264_v2, %v261_v33  ;;  %v701_v42 = vrot.slane %v6504_v47, 5  ;;  %v704_v56 = vrot.slane %v6512_v60, 5  ;;  %v6573_v41 = vld [vmem:[%s5901_s8 + $0x40] sm:$0xf]  ;;  %v6595_v33 = vld [vmem:[%s5901_s8 + $0x24] sm:$0xf] }
  0x84   : > { %2183 = vmatmul.mubr.bf16.gmra.mxu0 %v4731_v5  ;;  %5583 = vmatmul.mubr.bf16.gmra.mxu1 %v4767_v22  ;;  %v257_v5 = vsel %vm5951_vm2, %v252_v51, %v256_v45  ;;  %v4625_v16 = vcombine.low %v695_v1, %v698_v10  ;;  %v274_v54 = vrot.slane %v272_v29, 4  ;;  %v280_v21 = vrot.slane %v278_v12, 5  ;;  %v622_v45 = vld [vmem:[%s5901_s8 + $0x30] sm:$0xe]  ;;  %v5781_v10 = vld [vmem:[%s7950_s1 + $0x1a8] sm:$0xff]  }
  0x85   : > { %v4608_v28 = vcombine.low %v247_v63, %v257_v5  ;;  %5602 = vmatprep.mubr.bf16.mxu0 %v4624_v0  ;;  %v4593_v25 = vcombine.low %v6495_v35, %v6490_v55  ;;  %v266_v48 = vrot.slane %v265_v32, 4  ;;  %v702_v58 = vsel %vm6146_vm5, %v4578_v19, %v701_v42  ;;  %v623_v0 = vld [vmem:[%s5901_s8 + $0x3c] sm:$0xe]  ;;  %v6592_v5 = vld [vmem:[%s5901_s8 + $0x44] sm:$0x1] }
  0x86   : > { %v703_v30 = vrot.slane %v701_v42, 4  ;;  %v4579_v23 = vrot.slane %v621_v4, 9  ;;  %v275_v22 = vor.u32 %v274_v54, %v270_v6  ;;  %v708_v38 = vrot.slane %v6522_v8, 5  ;;  %v5783_v19 = vld [vmem:[%s7950_s1 + $0x1e0] sm:$0xff]  }
  0x87   : > { %2560 = vmatprep.mubr.bf16.mxu1 %v4608_v28  ;;  %v711_v17 = vrot.slane %v6529_v20, 5  ;;  %v283_v39 = vshrl.u32 %v6532_v13, 16  ;;  %v271_v11 = vsel %vm5951_vm2, %v266_v48, %v270_v6  ;;  %v286_v44 = vshll.u32 %v6532_v13, 16  ;;  %v624_v48 = vld [vmem:[%s5901_s8 + $0x48] sm:$0xe] }
  0x88   : > { %v705_v36 = vsel %vm6146_vm5, %v703_v30, %v704_v56  ;;  %v292_v50 = vshll.u32 %v6504_v47, 16  ;;  %v276_v46 = vrot.slane %v275_v22, 4  ;;  %v709_v26 = vsel %vm6146_vm5, %v4579_v23, %v708_v38  ;;  %v6613_v56 = vld [vmem:[%s5901_s8 + $0x4c] sm:$0xf]  ;;  %v5793_v30 = vld [vmem:[%s7950_s1 + $0x220] sm:$0xff]  }
  0x89   : > { %v4626_v49 = vcombine.low %v702_v58, %v705_v36  ;;  %v710_v43 = vrot.slane %v708_v38, 4  ;;  %v285_v62 = vrot.slane %v283_v39, 4  ;;  %v288_v9 = vrot.slane %v286_v44, 5  ;;  %v5784_v58 = vld [vmem:[%s7950_s1 + $0x1a0] sm:$0xff]   ;;  %v5787_v44 = vld [vmem:[%s7950_s1 + $0x1d8] sm:$0xff]  }
  0x8a   : > { %v296_v51 = vshrl.u32 %v6504_v47, 16  ;;  %v281_v52 = vsel %vm5951_vm2, %v276_v46, %v280_v21  ;;  %v302_v53 = vshll.u32 %v6512_v60, 16  ;;  %v4580_v63 = vrot.slane %v622_v45, 9  ;;  %v6650_v46 = vld [vmem:[%s5901_s8 + $0x5c] sm:$0x1] }
  0x8b   : > { %v712_v27 = vsel %vm6146_vm5, %v710_v43, %v711_v17  ;;  %v289_v3 = vor.u32 %v288_v9, %v285_v62  ;;  %v715_v6 = vrot.slane %v6561_v59, 5  ;;  %v718_v28 = vrot.slane %v6564_v15, 5  ;;  %v6628_v17 = vld [vmem:[%s5901_s8 + $0x50] sm:$0x1] }
  0x8c   : > { %5603 = vmatmul.mubr.bf16.vlgmr.msra.gmra.mxu0 %v4625_v16  ;;  %2561 = vmatmul.mubr.bf16.vlgmr.msra.gmra.mxu1 %v4592_v57  ;;  %v294_v57 = vrot.slane %v292_v50, 5  ;;  %v4627_v1 = vcombine.low %v709_v26, %v712_v27  ;;  %v298_v4 = vrot.slane %v296_v51, 4  ;;  %v304_v2 = vrot.slane %v302_v53, 5  ;;  %v6659_v27 = vld [vmem:[%s5901_s8 + $0x30] sm:$0xf] }
  0x8d   : > { %5403 = vmatpush3.bf16.msra.mxu0 %v5774_v14  ;;  %5635 = vmatpush3.bf16.msra.mxu1 %v6399_v34  ;;  %v4609_v34 = vcombine.low %v271_v11, %v281_v52  ;;  %v4594_v60 = vcombine.low %v6532_v13, %v6504_v47  ;;  %v290_v29 = vrot.slane %v289_v3, 4  ;;  %v4581_v16 = vrot.slane %v623_v0, 9 }
  0x8e   : > { %5404 = vmatprep.subr.bf16.mxu0 %v5776_v31  ;;  %5606 = vmatprep.mubr.bf16.mxu0 %v4626_v49  ;;  %v299_v12 = vor.u32 %v298_v4, %v294_v57  ;;  %v722_v32 = vrot.slane %v6573_v41, 5  ;;  %v716_v42 = vsel %vm6146_vm5, %v4580_v63, %v715_v6  ;;  %v717_v14 = vrot.slane %v715_v6, 4  ;;  %v5801_v49 = vld [vmem:[%s7950_s1 + $0x218] sm:$0xff]   ;;  %v5806_v6 = vld [vmem:[%s7950_s1 + $0x210] sm:$0xff]  }
  0x8f   : > { %5636 = vmatprep.subr.bf16.mxu1 %v5779_v40  ;;  %2568 = vmatprep.mubr.bf16.mxu1 %v4609_v34  ;;  %v725_v54 = vrot.slane %v6592_v5, 5  ;;  %v307_v21 = vshrl.u32 %v6595_v33, 16  ;;  %v295_v23 = vsel %vm5951_vm2, %v290_v29, %v294_v57  ;;  %v310_v11 = vshll.u32 %v6595_v33, 16  ;;  %v5788_v34 = vld [vmem:[%s7950_s1 + $0x198] sm:$0xff]  }
  0x90   : > { %v300_v31 = vrot.slane %v299_v12, 4  ;;  %v723_v22 = vsel %vm6146_vm5, %v4581_v16, %v722_v32  ;;  %v724_v38 = vrot.slane %v722_v32, 4  ;;  %v719_v39 = vsel %vm6146_vm5, %v717_v14, %v718_v28  ;;  %v6679_v16 = vld [vmem:[%s5901_s8 + $0x64] sm:$0xf] }
  0x91   : > { %5405 = vmatpush3.bf16.msra.mxu0 %v5777_v24  ;;  %5637 = vmatpush3.bf16.msra.mxu1 %v5779_v40  ;;  %v625_v24 = vld [vmem:[%s5901_s8 + $0x54] sm:$0xe]  ;;  %v309_v40 = vrot.slane %v307_v21, 4  ;;  %v316_v36 = vshll.u32 %v6522_v8, 16  ;;  %v4628_v45 = vcombine.low %v716_v42, %v719_v39  ;;  %v320_v35 = vshrl.u32 %v6522_v8, 16  ;;  %v5811_v39 = vld [vmem:[%s7950_s1 + $0x208] sm:$0xff]  }
  0x92   : > { %5406 = vmatprep.subr.bf16.mxu0 %v5780_v7  ;;  %5638 = vmatprep.subr.bf16.mxu1 %v6581_v18  ;;  %v305_v50 = vsel %vm5951_vm2, %v300_v31, %v304_v2  ;;  %v726_v55 = vsel %vm6146_vm5, %v724_v38, %v725_v54  ;;  %v312_v7 = vrot.slane %v310_v11, 5  ;;  %v326_v57 = vshll.u32 %v6529_v20, 16  ;;  %v5790_v2 = vld [vmem:[%s7950_s1 + $0x1d0] sm:$0xff]   ;;  %v6686_v54 = vld [vmem:[%s5901_s8 + $0x68] sm:$0x1] }
  0x93   : > { %v4610_v26 = vcombine.low %v295_v23, %v305_v50  ;;  %v4629_v43 = vcombine.low %v723_v22, %v726_v55  ;;  %v318_v62 = vrot.slane %v316_v36, 5  ;;  %v322_v9 = vrot.slane %v320_v35, 4  ;;  %v626_v21 = vld [vmem:[%s5901_s8 + $0x60] sm:$0xe]  ;;  %v5794_v22 = vld [vmem:[%s7950_s1 + $0x1c8] sm:$0xff]  }
  0x94   : > { %5607 = vmatmul.mubr.bf16.gmra.mxu0 %v4627_v1  ;;  %2569 = vmatmul.mubr.bf16.gmra.mxu1 %v4593_v25  ;;  %v6647_v25 = vld [vmem:[%s5901_s8 + $0x58] sm:$0xf]  ;;  %v4582_v51 = vrot.slane %v624_v48, 9  ;;  %v729_v52 = vrot.slane %v6613_v56, 5  ;;  %v732_v53 = vrot.slane %v6628_v17, 5  ;;  %v4595_v63 = vcombine.low %v6595_v33, %v6522_v8  ;;  %v5791_v48 = vld [vmem:[%s7950_s1 + $0x190] sm:$0xff]  }
  0x95   : > { %5407 = vmatpush3.bf16.msra.mxu0 %v5781_v10  ;;  %5639 = vmatpush3.bf16.msra.mxu1 %v6581_v18  ;;  %v313_v18 = vor.u32 %v312_v7, %v309_v40  ;;  %v4583_v0 = vrot.slane %v625_v24, 9  ;;  %v323_v20 = vor.u32 %v322_v9, %v318_v62  ;;  %v328_v1 = vrot.slane %v326_v57, 5  ;;  %v627_v50 = vld [vmem:[%s5901_s8 + $0x6c] sm:$0xe] }
  0x96   : > { %5408 = vmatprep.subr.bf16.mxu0 %v5783_v19  ;;  %5640 = vmatprep.subr.bf16.mxu1 %v5793_v30  ;;  %v730_v3 = vsel %vm6146_vm5, %v4582_v51, %v729_v52  ;;  %v731_v4 = vrot.slane %v729_v52, 4  ;;  %v736_v10 = vrot.slane %v6647_v25, 5  ;;  %v739_v29 = vrot.slane %v6650_v46, 5 }
  0x97   : > { %5610 = vmatprep.mubr.bf16.mxu0 %v4628_v45  ;;  %2576 = vmatprep.mubr.bf16.mxu1 %v4610_v26  ;;  %v314_v28 = vrot.slane %v313_v18, 4  ;;  %v331_v12 = vshrl.u32 %v6659_v27, 16  ;;  %v324_v32 = vrot.slane %v323_v20, 4  ;;  %v334_v42 = vshll.u32 %v6659_v27, 16  ;;  %v6719_v26 = vld [vmem:[%s5901_s8 + $0x74] sm:$0x1] }
  0x98   : > { %v733_v19 = vsel %vm6146_vm5, %v731_v4, %v732_v53  ;;  %v340_v14 = vshll.u32 %v6561_v59, 16  ;;  %v737_v23 = vsel %vm6146_vm5, %v4583_v0, %v736_v10  ;;  %v738_v31 = vrot.slane %v736_v10, 4  ;;  %v5797_v0 = vld [vmem:[%s7950_s1 + $0x1c0] sm:$0xff]  }
  0x99   : > { %5409 = vmatpush3.bf16.msra.mxu0 %v5784_v58  ;;  %5641 = vmatpush3.bf16.msra.mxu1 %v5793_v30  ;;  %v319_v58 = vsel %vm5951_vm2, %v314_v28, %v318_v62  ;;  %v4630_v30 = vcombine.low %v730_v3, %v733_v19  ;;  %v329_v38 = vsel %vm5951_vm2, %v324_v32, %v328_v1  ;;  %v333_v24 = vrot.slane %v331_v12, 4  ;;  %v5798_v4 = vld [vmem:[%s7950_s1 + $0x180] sm:$0xff]   ;;  %v6753_v12 = vld [vmem:[%s5901_s8 + $0x7c] sm:$0xf]  ;;  %v628_v19 = vld [vmem:[%s5901_s8 + $0x78] sm:$0xe] }
  0x9a   : > { %5410 = vmatprep.subr.bf16.mxu0 %v5787_v44  ;;  %5642 = vmatprep.subr.bf16.mxu1 %v5801_v49  ;;  %v336_v47 = vrot.slane %v334_v42, 5  ;;  %v6704_v13 = vrot.slane %v340_v14, 5  ;;  %v4611_v40 = vcombine.low %v319_v58, %v329_v38  ;;  %v740_v11 = vsel %vm6146_vm5, %v738_v31, %v739_v29  ;;  %v6756_v32 = vld [vmem:[%s5901_s8 + $0x80] sm:$0x1]  ;;  %v6765_v58 = vld [vmem:[%s5901_s8 + $0x88] sm:$0xf] }
  0x9b   : > { %v344_v36 = vshrl.u32 %v6561_v59, 16  ;;  %v350_v44 = vshll.u32 %v6564_v15, 16  ;;  %v4631_v45 = vcombine.low %v737_v23, %v740_v11  ;;  %v4584_v35 = vrot.slane %v626_v21, 9  ;;  %v5795_v15 = vld [vmem:[%s7950_s1 + $0x188] sm:$0xff]  }
  0x9c   : > { %5611 = vmatmul.mubr.bf16.gmra.mxu0 %v4629_v43  ;;  %2577 = vmatmul.mubr.bf16.gmra.mxu1 %v4594_v60  ;;  %v6707_v60 = vld [vmem:[%s5901_s8 + $0x70] sm:$0xf]  ;;  %v337_v55 = vor.u32 %v336_v47, %v333_v24  ;;  %v6722_v43 = vld [vmem:[%s5901_s8 + $0x3c] sm:$0xf]  ;;  %v746_v9 = vrot.slane %v6686_v54, 5  ;;  %v4596_v57 = vcombine.low %v6659_v27, %v6561_v59  ;;  %v4585_v53 = vrot.slane %v627_v50, 9 }
  0x9d   : > { %5411 = vmatpush3.bf16.msra.mxu0 %v5788_v34  ;;  %5643 = vmatpush3.bf16.msra.mxu1 %v5801_v49  ;;  %v743_v49 = vrot.slane %v6679_v16, 5  ;;  %v346_v7 = vrot.slane %v344_v36, 4  ;;  %v352_v62 = vrot.slane %v350_v44, 5  ;;  %v750_v20 = vrot.slane %v6707_v60, 5  ;;  %v6775_v36 = vld [vmem:[%s5901_s8 + $0x8c] sm:$0x1] }
  0x9e   : > { %5412 = vmatprep.subr.bf16.mxu0 %v5790_v2  ;;  %5614 = vmatprep.mubr.bf16.mxu0 %v4630_v30  ;;  %v338_v51 = vrot.slane %v337_v55, 4  ;;  %v753_v1 = vrot.slane %v6719_v26, 5  ;;  %v355_v3 = vshrl.u32 %v6722_v43, 16  ;;  %v5816_v2 = vld [vmem:[%s7950_s1 + $0x200] sm:$0xff]   ;;  %v358_v10 = vshll.u32 %v6722_v43, 16 }
  0x9f   : > { %5644 = vmatprep.subr.bf16.mxu1 %v5806_v6  ;;  %2584 = vmatprep.mubr.bf16.mxu1 %v4611_v40  ;;  %v744_v52 = vsel %vm6146_vm5, %v4584_v35, %v743_v49  ;;  %v745_v18 = vrot.slane %v743_v49, 4  ;;  %v347_v34 = vor.u32 %v346_v7, %v6704_v13  ;;  %v364_v29 = vshll.u32 %v6573_v41, 16  ;;  %v629_v30 = vld [vmem:[%s5901_s8 + $0x84] sm:$0xe]  ;;  %v6778_v44 = vld [vmem:[%s5901_s8 + $0x48] sm:$0xf] }
  0xa0   : > { %v751_v21 = vsel %vm6146_vm5, %v4585_v53, %v750_v20  ;;  %v357_v23 = vrot.slane %v355_v3, 4  ;;  %v360_v31 = vrot.slane %v358_v10, 5  ;;  %v368_v38 = vshrl.u32 %v6573_v41, 16  ;;  %v6814_v59 = vld [vmem:[%s5901_s8 + $0xa0] sm:$0xf] }
  0xa1   : > { %5413 = vmatpush3.bf16.msra.mxu0 %v5791_v48  ;;  %5645 = vmatpush3.bf16.msra.mxu1 %v5806_v6  ;;  %v343_v6 = vsel %vm5951_vm2, %v338_v51, %v6704_v13  ;;  %v747_v28 = vsel %vm6146_vm5, %v745_v18, %v746_v9  ;;  %v348_v42 = vrot.slane %v347_v34, 4  ;;  %v752_v48 = vrot.slane %v750_v20, 4  ;;  %v630_v34 = vld [vmem:[%s5901_s8 + $0x90] sm:$0xe]  ;;  %v631_v20 = vld [vmem:[%s5901_s8 + $0x9c] sm:$0xe] }
  0xa2   : > { %5414 = vmatprep.subr.bf16.mxu0 %v5794_v22  ;;  %5646 = vmatprep.subr.bf16.mxu1 %v5811_v39  ;;  %v4632_v14 = vcombine.low %v744_v52, %v747_v28  ;;  %v366_v22 = vrot.slane %v364_v29, 5  ;;  %v4586_v24 = vrot.slane %v628_v19, 9  ;;  %v361_v40 = vor.u32 %v360_v31, %v357_v23  ;;  %v6822_v31 = vld [vmem:[%s5901_s8 + $0x54] sm:$0xf] }
  0xa3   : > { %v353_v8 = vsel %vm5951_vm2, %v348_v42, %v352_v62  ;;  %v754_v33 = vsel %vm6146_vm5, %v752_v48, %v753_v1  ;;  %v370_v11 = vrot.slane %v368_v38, 4  ;;  %v757_v50 = vrot.slane %v6753_v12, 5 }
  0xa4   : > { %5615 = vmatmul.mubr.bf16.gmra.mxu0 %v4631_v45  ;;  %2585 = vmatmul.mubr.bf16.gmra.mxu1 %v4595_v63  ;;  %v374_v63 = vshll.u32 %v6592_v5, 16  ;;  %v4612_v47 = vcombine.low %v343_v6, %v353_v8  ;;  %v4633_v13 = vcombine.low %v751_v21, %v754_v33  ;;  %v760_v45 = vrot.slane %v6756_v32, 5 }
  0xa5   : > { %5415 = vmatpush3.bf16.msra.mxu0 %v5795_v15  ;;  %5647 = vmatpush3.bf16.msra.mxu1 %v5811_v39  ;;  %v4597_v55 = vcombine.low %v6722_v43, %v6573_v41  ;;  %v362_v5 = vrot.slane %v361_v40, 4  ;;  %v371_v35 = vor.u32 %v370_v11, %v366_v22  ;;  %v4587_v49 = vrot.slane %v629_v30, 9  ;;  %v6790_v41 = vld [vmem:[%s5901_s8 + $0x94] sm:$0xf] }
  0xa6   : > { %5416 = vmatprep.subr.bf16.mxu0 %v5797_v0  ;;  %5618 = vmatprep.mubr.bf16.mxu0 %v4632_v14  ;;  %v376_v39 = vrot.slane %v374_v63, 5  ;;  %v764_v7 = vrot.slane %v6765_v58, 5  ;;  %v758_v62 = vsel %vm6146_vm5, %v4586_v24, %v757_v50  ;;  %v759_v9 = vrot.slane %v757_v50, 4  ;;  %v6797_v0 = vld [vmem:[%s5901_s8 + $0x98] sm:$0x1] }
  0xa7   : > { %5648 = vmatprep.subr.bf16.mxu1 %v5816_v2  ;;  %2592 = vmatprep.mubr.bf16.mxu1 %v4612_v47  ;;  %v767_v15 = vrot.slane %v6775_v36, 5  ;;  %v379_v51 = vshrl.u32 %v6778_v44, 16  ;;  %v367_v43 = vsel %vm5951_vm2, %v362_v5, %v366_v22  ;;  %v372_v52 = vrot.slane %v371_v35, 4  ;;  %v6817_v14 = vld [vmem:[%s5901_s8 + $0xa4] sm:$0x1] }
  0xa8   : > { %v765_v18 = vsel %vm6146_vm5, %v4587_v49, %v764_v7  ;;  %v766_v53 = vrot.slane %v764_v7, 4  ;;  %v761_v1 = vsel %vm6146_vm5, %v759_v9, %v760_v45  ;;  %v392_v29 = vshrl.u32 %v6613_v56, 16  ;;  %v6837_v5 = vld [vmem:[%s5901_s8 + $0xac] sm:$0xf]  ;;  %v6844_v9 = vld [vmem:[%s5901_s8 + $0xb0] sm:$0x1] }
  0xa9   : > { %5417 = vmatpush3.bf16.msra.mxu0 %v5798_v4  ;;  %5649 = vmatpush3.bf16.msra.mxu1 %v5816_v2  ;;  %v381_v3 = vrot.slane %v379_v51, 4  ;;  %v382_v4 = vshll.u32 %v6778_v44, 16  ;;  %v388_v2 = vshll.u32 %v6613_v56, 16  ;;  %v377_v6 = vsel %vm5951_vm2, %v372_v52, %v376_v39 }
  0xaa   : > { %v4634_v28 = vcombine.low %v758_v62, %v761_v1  ;;  %v768_v10 = vsel %vm6146_vm5, %v766_v53, %v767_v15  ;;  %v4613_v27 = vcombine.low %v367_v43, %v377_v6  ;;  %v394_v21 = vrot.slane %v392_v29, 4  ;;  %v632_v15 = vld [vmem:[%s5901_s8 + $0xa8] sm:$0xe]  ;;  %v6862_v29 = vld [vmem:[%s5901_s8 + $0x60] sm:$0xf] }
  0xab   : > { %v384_v19 = vrot.slane %v382_v4, 5  ;;  %v390_v42 = vrot.slane %v388_v2, 5  ;;  %v398_v48 = vshll.u32 %v6628_v17, 16  ;;  %v4588_v30 = vrot.slane %v630_v34, 9  ;;  %v633_v4 = vld [vmem:[%s5901_s8 + $0xb4] sm:$0xe] }
  0xac   : > { %5619 = vmatmul.mubr.bf16.gmra.mxu0 %v4633_v13  ;;  %2593 = vmatmul.mubr.bf16.gmra.mxu1 %v4596_v57  ;;  %v4635_v57 = vcombine.low %v765_v18, %v768_v10  ;;  %v771_v23 = vrot.slane %v6790_v41, 5  ;;  %v774_v38 = vrot.slane %v6797_v0, 5  ;;  %v4598_v8 = vcombine.low %v6778_v44, %v6613_v56  ;;  %v6850_v18 = vld [vmem:[%s5901_s8 + $0xb8] sm:$0xf] }
  0xad   : > { %5622 = vmatprep.mubr.bf16.mxu0 %v4634_v28  ;;  %2600 = vmatprep.mubr.bf16.mxu1 %v4613_v27  ;;  %v385_v22 = vor.u32 %v384_v19, %v381_v3  ;;  %v4589_v33 = vrot.slane %v631_v20, 9  ;;  %v395_v63 = vor.u32 %v394_v21, %v390_v42  ;;  %v400_v24 = vrot.slane %v398_v48, 5  ;;  %v6857_v3 = vld [vmem:[%s5901_s8 + $0xbc] sm:$0x1] }
  0xae   : > { %v772_v47 = vsel %vm6146_vm5, %v4588_v30, %v771_v23  ;;  %v773_v17 = vrot.slane %v771_v23, 4  ;;  %v778_v40 = vrot.slane %v6814_v59, 5  ;;  %v781_v11 = vrot.slane %v6817_v14, 5 }
  0xaf   : > { %v386_v13 = vrot.slane %v385_v22, 4  ;;  %v403_v39 = vshrl.u32 %v6822_v31, 16  ;;  %v396_v50 = vrot.slane %v395_v63, 4  ;;  %v406_v44 = vshll.u32 %v6822_v31, 16 }
  0xb0   : > { %v775_v56 = vsel %vm6146_vm5, %v773_v17, %v774_v38  ;;  %v412_v45 = vshll.u32 %v6647_v25, 16  ;;  %v779_v7 = vsel %vm6146_vm5, %v4589_v33, %v778_v40  ;;  %v780_v62 = vrot.slane %v778_v40, 4 }
  0xb1   : > { %v391_v35 = vsel %vm5951_vm2, %v386_v13, %v390_v42  ;;  %v4636_v49 = vcombine.low %v772_v47, %v775_v56  ;;  %v401_v51 = vsel %vm5951_vm2, %v396_v50, %v400_v24  ;;  %v405_v43 = vrot.slane %v403_v39, 4  ;;  %v6879_v47 = vld [vmem:[%s5901_s8 + $0x18] sm:$0xf] }
  0xb2   : > { %v408_v52 = vrot.slane %v406_v44, 5  ;;  %v4614_v53 = vcombine.low %v391_v35, %v401_v51  ;;  %v782_v34 = vsel %vm6146_vm5, %v780_v62, %v781_v11  ;;  %v416_v20 = vshrl.u32 %v6647_v25, 16 }
  0xb3   : > { %v422_v1 = vshll.u32 %v6650_v46, 16  ;;  %v4637_v2 = vcombine.low %v779_v7, %v782_v34  ;;  %v4590_v28 = vrot.slane %v632_v15, 9  ;;  %v785_v10 = vrot.slane %v6837_v5, 5  ;;  %v6893_v7 = vld [vmem:[%s5901_s8 + $0x20] sm:$0x1] }
  0xb4   : > { %5623 = vmatmul.mubr.bf16.gmra.mxu0 %v4635_v57  ;;  %2601 = vmatmul.mubr.bf16.gmra.mxu1 %v4597_v55  ;;  %v414_v55 = vrot.slane %v412_v45, 5  ;;  %v409_v6 = vor.u32 %v408_v52, %v405_v43  ;;  %v418_v27 = vrot.slane %v416_v20, 4  ;;  %v788_v19 = vrot.slane %v6844_v9, 5  ;;  %v6885_v45 = vld [vmem:[%s5901_s8 + $0x1c] sm:$0xf] }
  0xb5   : > { %5626 = vmatprep.mubr.bf16.mxu0 %v4636_v49  ;;  %2608 = vmatprep.mubr.bf16.mxu1 %v4614_v53  ;;  %v424_v57 = vrot.slane %v422_v1, 5  ;;  %v4599_v42 = vcombine.low %v6822_v31, %v6647_v25  ;;  %v786_v21 = vsel %vm6146_vm5, %v4590_v28, %v785_v10  ;;  %v787_v48 = vrot.slane %v785_v10, 4 }
  0xb6   : > { %v410_v46 = vrot.slane %v409_v6, 4  ;;  %v4591_v30 = vrot.slane %v633_v4, 9  ;;  %v419_v23 = vor.u32 %v418_v27, %v414_v55  ;;  %v792_v22 = vrot.slane %v6850_v18, 5  ;;  %v6901_v6 = vld [vmem:[%s5901_s8 + $0x6c] sm:$0xf] }
  0xb7   : > { %v795_v38 = vrot.slane %v6857_v3, 5  ;;  %v427_v33 = vshrl.u32 %v6862_v29, 16  ;;  %v789_v25 = vsel %vm6146_vm5, %v787_v48, %v788_v19  ;;  %v430_v31 = vshll.u32 %v6862_v29, 16 }
  0xb8   : > { %v415_v63 = vsel %vm5951_vm2, %v410_v46, %v414_v55  ;;  %v436_v24 = vshll.u32 %v6679_v16, 16  ;;  %v420_v17 = vrot.slane %v419_v23, 4  ;;  %v4638_v13 = vcombine.low %v786_v21, %v789_v25 }
  0xb9   : > { %v793_v40 = vsel %vm6146_vm5, %v4591_v30, %v792_v22  ;;  %v794_v11 = vrot.slane %v792_v22, 4  ;;  %v429_v39 = vrot.slane %v427_v33, 4  ;;  %v432_v50 = vrot.slane %v430_v31, 5  ;;  %v6920_v31 = vld [vmem:[%s5901_s8 + $0x28] sm:$0xf] }
  0xba   : > { %v438_v56 = vrot.slane %v436_v24, 5  ;;  %v440_v44 = vshrl.u32 %v6679_v16, 16  ;;  %v425_v35 = vsel %vm5951_vm2, %v420_v17, %v424_v57  ;;  %v446_v49 = vshll.u32 %v6686_v54, 16 }
  0xbb   : > { %v2900_v62 = vshrl.u32 %v6879_v47, 16  ;;  %v4615_v15 = vcombine.low %v415_v63, %v425_v35  ;;  %v433_v43 = vor.u32 %v432_v50, %v429_v39  ;;  %v2903_v34 = vshll.u32 %v6879_v47, 16 }
  0xbc   : > { %5627 = vmatmul.mubr.bf16.gmra.mxu0 %v4637_v2  ;;  %2609 = vmatmul.mubr.bf16.gmra.mxu1 %v4598_v8  ;;  %v796_v8 = vsel %vm6146_vm5, %v794_v11, %v795_v38  ;;  %v442_v52 = vrot.slane %v440_v44, 4  ;;  %v448_v55 = vrot.slane %v446_v49, 5  ;;  %v2909_v20 = vshll.u32 %v6885_v45, 16  ;;  %v4849_v44 = vld [vmem:[%s5901_s8 + $0x2c] sm:$0x1] }
  0xbd   : > { %5630 = vmatprep.mubr.bf16.mxu0 %v4638_v13  ;;  %v4639_v51 = vcombine.low %v793_v40, %v796_v8  ;;  %v2902_v53 = vrot.slane %v2900_v62, 4  ;;  %2616 = vmatprep.mubr.bf16.mxu1 %v4615_v15  ;;  %v434_v1 = vrot.slane %v433_v43, 4  ;;  %v2913_v54 = vshrl.u32 %v6885_v45, 16 }
  0xbe   : > { %v443_v4 = vor.u32 %v442_v52, %v438_v56  ;;  %v2919_v2 = vshll.u32 %v6893_v7, 16  ;;  %v2905_v28 = vrot.slane %v2903_v34, 5  ;;  %v2911_v10 = vrot.slane %v2909_v20, 5 }
  0xbf   : > { %v4600_v27 = vcombine.low %v6862_v29, %v6679_v16  ;;  %v4896_v57 = vcombine.low %v6879_v47, %v6885_v45  ;;  %v439_v19 = vsel %vm5951_vm2, %v434_v1, %v438_v56  ;;  %v2915_v21 = vrot.slane %v2913_v54, 4  ;;  %v6913_v16 = vld [vmem:[%s5901_s8 + $0x24] sm:$0xf] }
  0xc0   : > { %v444_v46 = vrot.slane %v443_v4, 4  ;;  %v2921_v48 = vrot.slane %v2919_v2, 5  ;;  %v2906_v30 = vor.u32 %v2905_v28, %v2902_v53  ;;  %v451_v23 = vshrl.u32 %v6901_v6, 16 }
  0xc1   : > { %v454_v22 = vshll.u32 %v6901_v6, 16  ;;  %v460_v38 = vshll.u32 %v6707_v60, 16  ;;  %v2916_v33 = vor.u32 %v2915_v21, %v2911_v10  ;;  %v464_v63 = vshrl.u32 %v6707_v60, 16 }
  0xc2   : > { %v449_v29 = vsel %vm5951_vm2, %v444_v46, %v448_v55  ;;  %v470_v25 = vshll.u32 %v6719_v26, 16  ;;  %v2907_v24 = vrot.slane %v2906_v30, 4  ;;  %v453_v47 = vrot.slane %v451_v23, 4 }
  0xc3   : > { %v456_v17 = vrot.slane %v454_v22, 5  ;;  %v2917_v13 = vrot.slane %v2916_v33, 4  ;;  %v462_v40 = vrot.slane %v460_v38, 5  ;;  %v466_v11 = vrot.slane %v464_v63, 4  ;;  %v6949_v63 = vld [vmem:[%s5901_s8 + $0x30] sm:$0xf] }
  0xc4   : > { %5631 = vmatmul.mubr.bf16.gmra.mxu0 %v4639_v51  ;;  %2617 = vmatmul.mubr.bf16.gmra.mxu1 %v4599_v42  ;;  %v4616_v42 = vcombine.low %v439_v19, %v449_v29  ;;  %v472_v39 = vrot.slane %v470_v25, 5  ;;  %v2912_v50 = vsel %vm5951_vm2, %v2907_v24, %v2911_v10  ;;  %v2924_v35 = vshrl.u32 %v6913_v16, 16  ;;  %v6935_v10 = vld [vmem:[%s5901_s8 + $0x78] sm:$0xf] }
  0xc5   : > { %v457_v56 = vor.u32 %v456_v17, %v453_v47  ;;  %v2927_v26 = vshll.u32 %v6913_v16, 16  ;;  %v2922_v8 = vsel %vm5951_vm2, %v2917_v13, %v2921_v48  ;;  %v467_v49 = vor.u32 %v466_v11, %v462_v40 }
  0xc6   : > { %2624 = vmatprep.mubr.bf16.mxu1 %v4616_v42  ;;  %v2933_v62 = vshll.u32 %v6920_v31, 16  ;;  %v2937_v15 = vshrl.u32 %v6920_v31, 16  ;;  %v4912_v51 = vcombine.low %v2912_v50, %v2922_v8  ;;  %v2926_v52 = vrot.slane %v2924_v35, 4  ;;  %v6960_v42 = vld [vmem:[%s5901_s8 + $0x34] sm:$0xf] }
  0xc7   : > { %v458_v43 = vrot.slane %v457_v56, 4  ;;  %v2929_v55 = vrot.slane %v2927_v26, 5  ;;  %v468_v53 = vrot.slane %v467_v49, 4  ;;  %v2943_v1 = vshll.u32 %v4849_v44, 16  ;;  %v6972_v8 = vld [vmem:[%s5901_s8 + $0x84] sm:$0xf] }
  0xc8   : > { %v2935_v34 = vrot.slane %v2933_v62, 5  ;;  %v2939_v20 = vrot.slane %v2937_v15, 4  ;;  %3891 = vmatprep.mubr.bf16.mxu0 %v4912_v51  ;;  %v3356_v2 = vrot.slane %v6920_v31, 5  ;;  %v3359_v28 = vrot.slane %v4849_v44, 5 }
  0xc9   : > { %v463_v4 = vsel %vm5951_vm2, %v458_v43, %v462_v40  ;;  %v2930_v54 = vor.u32 %v2929_v55, %v2926_v52  ;;  %v473_v19 = vsel %vm5951_vm2, %v468_v53, %v472_v39  ;;  %v2945_v21 = vrot.slane %v2943_v1, 5  ;;  %v6965_v40 = vld [vmem:[%s5901_s8 + $0x38] sm:$0x1] }
  0xca   : > { %v2940_v46 = vor.u32 %v2939_v20, %v2935_v34  ;;  %v4617_v48 = vcombine.low %v463_v4, %v473_v19  ;;  %v3358_v23 = vrot.slane %v3356_v2, 4  ;;  %v4897_v22 = vcombine.low %v6913_v16, %v6920_v31 }
  0xcb   : > { %v2931_v30 = vrot.slane %v2930_v54, 4  ;;  %v478_v29 = vshll.u32 %v6935_v10, 16  ;;  %v484_v33 = vshll.u32 %v6753_v12, 16  ;;  %v488_v16 = vshrl.u32 %v6753_v12, 16 }
  0xcc   : > { %2625 = vmatmul.mubr.bf16.gmra.mxu1 %v4600_v27  ;;  %3892 = vmatmul.mubr.bf16.vlgmr.msra.gmra.mxu0 %v4896_v57  ;;  %v4601_v27 = vcombine.low %v6901_v6, %v6707_v60  ;;  %v2941_v38 = vrot.slane %v2940_v46, 4  ;;  %v475_v57 = vshrl.u32 %v6935_v10, 16  ;;  %v6955_v6 = vsel %vm6146_vm5, %v3358_v23, %v3359_v28 }
  0xcd   : > { %2632 = vmatprep.mubr.bf16.mxu1 %v4617_v48  ;;  %v2936_v60 = vsel %vm5951_vm2, %v2931_v30, %v2935_v34  ;;  %v494_v25 = vshll.u32 %v6756_v32, 16  ;;  %v480_v17 = vrot.slane %v478_v29, 5  ;;  %v486_v13 = vrot.slane %v484_v33, 5 }
  0xce   : > { %v2946_v24 = vsel %vm5951_vm2, %v2941_v38, %v2945_v21  ;;  %v477_v47 = vrot.slane %v475_v57, 4  ;;  %v490_v39 = vrot.slane %v488_v16, 4  ;;  %v2948_v56 = vshrl.u32 %v6949_v63, 16 }
  0xcf   : > { %v4913_v11 = vcombine.low %v2936_v60, %v2946_v24  ;;  %v496_v50 = vrot.slane %v494_v25, 5  ;;  %v2951_v35 = vshll.u32 %v6949_v63, 16  ;;  %v2957_v32 = vshll.u32 %v6960_v42, 16 }
  0xd0   : > { %v481_v44 = vor.u32 %v480_v17, %v477_v47  ;;  %v2961_v26 = vshrl.u32 %v6960_v42, 16  ;;  %v491_v49 = vor.u32 %v490_v39, %v486_v13  ;;  %v2950_v62 = vrot.slane %v2948_v56, 4  ;;  %v7000_v47 = vld [vmem:[%s5901_s8 + $0x44] sm:$0x1] }
  0xd1   : > { %3899 = vmatprep.mubr.bf16.mxu0 %v4913_v11  ;;  %v2967_v15 = vshll.u32 %v6965_v40, 16  ;;  %v4602_v51 = vcombine.low %v6935_v10, %v6753_v12  ;;  %v2953_v52 = vrot.slane %v2951_v35, 5  ;;  %v2959_v55 = vrot.slane %v2957_v32, 5  ;;  %v6984_v10 = vld [vmem:[%s5901_s8 + $0x3c] sm:$0xf] }
  0xd2   : > { %v482_v43 = vrot.slane %v481_v44, 4  ;;  %v2963_v53 = vrot.slane %v2961_v26, 4  ;;  %v492_v34 = vrot.slane %v491_v49, 4  ;;  %v4898_v1 = vcombine.low %v6949_v63, %v6960_v42  ;;  %v6992_v63 = vld [vmem:[%s5901_s8 + $0x40] sm:$0xf] }
  0xd3   : > { %v2969_v20 = vrot.slane %v2967_v15, 5  ;;  %v499_v4 = vshrl.u32 %v6972_v8, 16  ;;  %v2954_v28 = vor.u32 %v2953_v52, %v2950_v62  ;;  %v502_v12 = vshll.u32 %v6972_v8, 16  ;;  %v7006_v32 = vld [vmem:[%s5901_s8 + $0x90] sm:$0xf] }
  0xd4   : > { %2633 = vmatmul.mubr.bf16.gmra.mxu1 %v4601_v27  ;;  %3900 = vmatmul.mubr.bf16.gmra.mxu0 %v4897_v22  ;;  %v487_v54 = vsel %vm5951_vm2, %v482_v43, %v486_v13  ;;  %v2964_v19 = vor.u32 %v2963_v53, %v2959_v55  ;;  %v497_v46 = vsel %vm5951_vm2, %v492_v34, %v496_v50  ;;  %v508_v27 = vshll.u32 %v6765_v58, 16 }
  0xd5   : > { %v501_v21 = vrot.slane %v499_v4, 4  ;;  %v512_v48 = vshrl.u32 %v6765_v58, 16  ;;  %v4618_v30 = vcombine.low %v487_v54, %v497_v46  ;;  %v2955_v23 = vrot.slane %v2954_v28, 4  ;;  %v7020_v54 = vld [vmem:[%s5901_s8 + $0x48] sm:$0xf] }
  0xd6   : > { %v2965_v22 = vrot.slane %v2964_v19, 4  ;;  %v504_v38 = vrot.slane %v502_v12, 5  ;;  %v510_v57 = vrot.slane %v508_v27, 5  ;;  %v518_v33 = vshll.u32 %v6775_v36, 16  ;;  %v7027_v27 = vld [vmem:[%s5901_s8 + $0x4c] sm:$0xf] }
  0xd7   : > { %v514_v29 = vrot.slane %v512_v48, 4  ;;  %v2972_v60 = vshrl.u32 %v6984_v10, 16  ;;  %2640 = vmatprep.mubr.bf16.mxu1 %v4618_v30  ;;  %v2960_v16 = vsel %vm5951_vm2, %v2955_v23, %v2959_v55  ;;  %v2975_v17 = vshll.u32 %v6984_v10, 16 }
  0xd8   : > { %v2970_v25 = vsel %vm5951_vm2, %v2965_v22, %v2969_v20  ;;  %v505_v24 = vor.u32 %v504_v38, %v501_v21  ;;  %v520_v11 = vrot.slane %v518_v33, 5  ;;  %v2981_v44 = vshll.u32 %v6992_v63, 16 }
  0xd9   : > { %v4914_v13 = vcombine.low %v2960_v16, %v2970_v25  ;;  %v515_v36 = vor.u32 %v514_v29, %v510_v57  ;;  %v2974_v39 = vrot.slane %v2972_v60, 4  ;;  %v2977_v56 = vrot.slane %v2975_v17, 5  ;;  %v7033_v29 = vld [vmem:[%s5901_s8 + $0x50] sm:$0x1] }
  0xda   : > { %v506_v50 = vrot.slane %v505_v24, 4  ;;  %v2985_v35 = vshrl.u32 %v6992_v63, 16  ;;  %v2991_v49 = vshll.u32 %v7000_v47, 16  ;;  %v4603_v15 = vcombine.low %v6972_v8, %v6765_v58 }
  0xdb   : > { %3907 = vmatprep.mubr.bf16.mxu0 %v4914_v13  ;;  %v516_v26 = vrot.slane %v515_v36, 4  ;;  %v2978_v43 = vor.u32 %v2977_v56, %v2974_v39  ;;  %v2983_v52 = vrot.slane %v2981_v44, 5  ;;  %v4899_v20 = vcombine.low %v6984_v10, %v6992_v63 }
  0xdc   : > { %2641 = vmatmul.mubr.bf16.gmra.mxu1 %v4602_v51  ;;  %3908 = vmatmul.mubr.bf16.gmra.mxu0 %v4898_v1  ;;  %v511_v51 = vsel %vm5951_vm2, %v506_v50, %v510_v57  ;;  %v2987_v55 = vrot.slane %v2985_v35, 4  ;;  %v2993_v34 = vrot.slane %v2991_v49, 5  ;;  %v523_v4 = vshrl.u32 %v7006_v32, 16 }
  0xdd   : > { %v521_v53 = vsel %vm5951_vm2, %v516_v26, %v520_v11  ;;  %v2979_v8 = vrot.slane %v2978_v43, 4  ;;  %v526_v28 = vshll.u32 %v7006_v32, 16  ;;  %v532_v12 = vshll.u32 %v6790_v41, 16  ;;  %v7041_v11 = vld [vmem:[%s5901_s8 + $0x9c] sm:$0xf] }
  0xde   : > { %v4619_v58 = vcombine.low %v511_v51, %v521_v53  ;;  %v2988_v1 = vor.u32 %v2987_v55, %v2983_v52  ;;  %v525_v19 = vrot.slane %v523_v4, 4  ;;  %v536_v46 = vshrl.u32 %v6790_v41, 16 }
  0xdf   : > { %v542_v21 = vshll.u32 %v6797_v0, 16  ;;  %v2984_v10 = vsel %vm5951_vm2, %v2979_v8, %v2983_v52  ;;  %v528_v30 = vrot.slane %v526_v28, 5  ;;  %v2996_v23 = vshrl.u32 %v7020_v54, 16 }
  0xe0   : > { %2648 = vmatprep.mubr.bf16.mxu1 %v4619_v58  ;;  %v2989_v48 = vrot.slane %v2988_v1, 4  ;;  %v534_v22 = vrot.slane %v532_v12, 5  ;;  %v538_v38 = vrot.slane %v536_v46, 4  ;;  %v2999_v33 = vshll.u32 %v7020_v54, 16  ;;  %v7060_v46 = vld [vmem:[%s5901_s8 + $0x58] sm:$0xf] }
  0xe1   : > { %v544_v57 = vrot.slane %v542_v21, 5  ;;  %v529_v60 = vor.u32 %v528_v30, %v525_v19  ;;  %v2998_v16 = vrot.slane %v2996_v23, 4  ;;  %v3005_v25 = vshll.u32 %v7027_v27, 16 }
  0xe2   : > { %v2994_v0 = vsel %vm5951_vm2, %v2989_v48, %v2993_v34  ;;  %v539_v17 = vor.u32 %v538_v38, %v534_v22  ;;  %v3001_v13 = vrot.slane %v2999_v33, 5  ;;  %v3009_v36 = vshrl.u32 %v7027_v27, 16 }
  0xe3   : > { %v4915_v24 = vcombine.low %v2984_v10, %v2994_v0  ;;  %v530_v39 = vrot.slane %v529_v60, 4  ;;  %v3007_v50 = vrot.slane %v3005_v25, 5  ;;  %v3015_v56 = vshll.u32 %v7033_v29, 16 }
  0xe4   : > { %2649 = vmatmul.mubr.bf16.gmra.mxu1 %v4603_v15  ;;  %v4604_v44 = vcombine.low %v7006_v32, %v6790_v41  ;;  %v540_v35 = vrot.slane %v539_v17, 4  ;;  %v3002_v26 = vor.u32 %v3001_v13, %v2998_v16  ;;  %v3011_v49 = vrot.slane %v3009_v36, 4 }
  0xe5   : > { %3915 = vmatprep.mubr.bf16.mxu0 %v4915_v24  ;;  %v4900_v15 = vcombine.low %v7020_v54, %v7027_v27  ;;  %v535_v51 = vsel %vm5951_vm2, %v530_v39, %v534_v22  ;;  %v3017_v43 = vrot.slane %v3015_v56, 5  ;;  %v547_v53 = vshrl.u32 %v7041_v11, 16  ;;  %v7056_v54 = vld [vmem:[%s5901_s8 + $0x54] sm:$0xf] }
  0xe6   : > { %3916 = vmatmul.mubr.bf16.gmra.mxu0 %v4899_v20  ;;  %v550_v41 = vshll.u32 %v7041_v11, 16  ;;  %v545_v32 = vsel %vm5951_vm2, %v540_v35, %v544_v57  ;;  %v3003_v34 = vrot.slane %v3002_v26, 4  ;;  %v3012_v4 = vor.u32 %v3011_v49, %v3007_v50  ;;  %v7075_v35 = vld [vmem:[%s5901_s8 + $0x5c] sm:$0x1] }
  0xe7   : > { %v556_v58 = vshll.u32 %v6814_v59, 16  ;;  %v4620_v20 = vcombine.low %v535_v51, %v545_v32  ;;  %v549_v28 = vrot.slane %v547_v53, 4  ;;  %v560_v12 = vshrl.u32 %v6814_v59, 16  ;;  %v7082_v51 = vld [vmem:[%s5901_s8 + $0xa8] sm:$0xf] }
  0xe8   : > { %v552_v19 = vrot.slane %v550_v41, 5  ;;  %v3008_v21 = vsel %vm5951_vm2, %v3003_v34, %v3007_v50  ;;  %v3013_v10 = vrot.slane %v3012_v4, 4  ;;  %v566_v0 = vshll.u32 %v6817_v14, 16 }
  0xe9   : > { %2656 = vmatprep.mubr.bf16.mxu1 %v4620_v20  ;;  %v558_v57 = vrot.slane %v556_v58, 5  ;;  %v562_v33 = vrot.slane %v560_v12, 4  ;;  %v3020_v16 = vshrl.u32 %v7056_v54, 16  ;;  %v3023_v25 = vshll.u32 %v7056_v54, 16 }
  0xea   : > { %v553_v38 = vor.u32 %v552_v19, %v549_v28  ;;  %v3018_v60 = vsel %vm5951_vm2, %v3013_v10, %v3017_v43  ;;  %v3029_v24 = vshll.u32 %v7060_v46, 16  ;;  %v568_v56 = vrot.slane %v566_v0, 5 }
  0xeb   : > { %v4916_v17 = vcombine.low %v3008_v21, %v3018_v60  ;;  %v563_v50 = vor.u32 %v562_v33, %v558_v57  ;;  %v3022_v49 = vrot.slane %v3020_v16, 4  ;;  %v3033_v53 = vshrl.u32 %v7060_v46, 16 }
  0xec   : > { %v5146_v52 = vpop.f32.mrf.mxu0  ;;  %v5218_v55 = vpop.f32.mrf.mxu1  ;;  %2657 = vmatmul.mubr.bf16.gmra.mxu1 %v4604_v44  ;;  %v554_v39 = vrot.slane %v553_v38, 4  ;;  %v3025_v44 = vrot.slane %v3023_v25, 5  ;;  %v3039_v34 = vshll.u32 %v7075_v35, 16  ;;  %v4605_v20 = vcombine.low %v7041_v11, %v6814_v59  ;;  %v7099_v38 = vld [vmem:[%s5901_s8 + $0x60] sm:$0xf] }
  0xed   : > { %3923 = vmatprep.mubr.bf16.mxu0 %v4916_v17  ;;  %v4901_v28 = vcombine.low %v7056_v54, %v7060_v46  ;;  %v574_v0 = vshll.u32 %v7082_v51, 16  ;;  %v580_v16 = vshll.u32 %v6837_v5, 16  ;;  %v584_v25 = vshrl.u32 %v6837_v5, 16 }
  0xee   : > { %v5147_v8 = vpop.f32.mrf.mxu0  ;;  %v5219_v1 = vpop.f32.mrf.mxu1  ;;  %v559_v43 = vsel %vm5951_vm2, %v554_v39, %v558_v57  ;;  %3924 = vmatmul.mubr.bf16.gmra.mxu0 %v4900_v15  ;;  %v3026_v32 = vor.u32 %v3025_v44, %v3022_v49  ;;  %v571_v15 = vshrl.u32 %v7082_v51, 16  ;;  %v3041_v10 = vrot.slane %v3039_v34, 5  ;;  %v7110_v39 = vld [vmem:[%s5901_s8 + $0x64] sm:$0xf] }
  0xef   : > { %v7064_v48 = vadd.f32 %v5147_v8, %v5146_v52  ;;  %v7066_v30 = vadd.f32 %v5219_v1, %v5218_v55  ;;  %v564_v52 = vrot.slane %v563_v50, 4  ;;  %v3031_v55 = vrot.slane %v3029_v24, 5 }
  0xf0   : > { %v5149_v23 = vpop.f32.mrf.mxu0  ;;  %v5221_v22 = vpop.f32.mrf.mxu1  ;;  %v3035_v1 = vrot.slane %v3033_v53, 4  ;;  %v3027_v21 = vrot.slane %v3026_v32, 4  ;;  %v573_v33 = vrot.slane %v571_v15, 4  ;;  %v590_v24 = vshll.u32 %v6844_v9, 16  ;;  %v7117_v53 = vld [vmem:[%s5901_s8 + $0x68] sm:$0x1] }
  0xf1   : > { %v569_v8 = vsel %vm5951_vm2, %v564_v52, %v568_v56  ;;  %v3044_v50 = vshrl.u32 %v7099_v38, 16  ;;  %v3047_v56 = vshll.u32 %v7099_v38, 16  ;;  %v586_v52 = vrot.slane %v584_v25, 4 }
  0xf2   : > { %v5150_v13 = vpop.f32.mrf.mxu0  ;;  %v5222_v36 = vpop.f32.mrf.mxu1  ;;  %v4621_v12 = vcombine.low %v559_v43, %v569_v8  ;;  %v3036_v59 = vor.u32 %v3035_v1, %v3031_v55  ;;  %v3032_v54 = vsel %vm5951_vm2, %v3027_v21, %v3031_v55  ;;  %v582_v43 = vrot.slane %v580_v16, 5 }
  0xf3   : > { %v7077_v14 = vadd.f32 %v5150_v13, %v5149_v23  ;;  %v7079_v26 = vadd.f32 %v5222_v36, %v5221_v22  ;;  %v576_v36 = vrot.slane %v574_v0, 5  ;;  %v592_v55 = vrot.slane %v590_v24, 5 }
  0xf4   : > { %v5152_v41 = vpop.f32.mrf.mxu0  ;;  %v5224_v58 = vpop.f32.mrf.mxu1  ;;  %2664 = vmatprep.mubr.bf16.mxu1 %v4621_v12  ;;  %v3037_v17 = vrot.slane %v3036_v59, 4  ;;  %v3046_v34 = vrot.slane %v3044_v50, 4  ;;  %v587_v8 = vor.u32 %v586_v52, %v582_v43  ;;  %v3049_v1 = vrot.slane %v3047_v56, 5 }
  0xf5   : > { %2665 = vmatmul.mubr.bf16.gmra.mxu1 %v4605_v20  ;;  %v577_v32 = vor.u32 %v576_v36, %v573_v33  ;;  %v3057_v12 = vshrl.u32 %v7110_v39, 16  ;;  %v3063_v21 = vshll.u32 %v7117_v53, 16  ;;  %v604_v52 = vshll.u32 %v6850_v18, 16 }
  0xf6   : > { %v5153_v19 = vpop.f32.mrf.mxu0  ;;  %v5225_v22 = vpop.f32.mrf.mxu1  ;;  %v3042_v9 = vsel %vm5951_vm2, %v3037_v17, %v3041_v10  ;;  %v7129_v10 = vld [vmem:[%s5901_s8 + $0xb4] sm:$0xf]  ;;  %v3050_v33 = vor.u32 %v3049_v1, %v3046_v34 }
  0xf7   : > { %v7096_v23 = vadd.f32 %v5153_v19, %v5152_v41  ;;  %v7101_v11 = vadd.f32 %v5225_v22, %v5224_v58  ;;  %v4917_v20 = vcombine.low %v3032_v54, %v3042_v9  ;;  %v3053_v19 = vshll.u32 %v7110_v39, 16  ;;  %v7145_v9 = vld [vmem:[%s5901_s8 + $0x6c] sm:$0xf] }
  0xf8   : > { %v5155_v57 = vpop.f32.mrf.mxu0  ;;  %v5227_v60 = vpop.f32.mrf.mxu1  ;;  %v578_v15 = vrot.slane %v577_v32, 4  ;;  %v4606_v22 = vcombine.low %v7082_v51, %v6837_v5  ;;  %v3059_v25 = vrot.slane %v3057_v12, 4  ;;  %v3065_v24 = vrot.slane %v3063_v21, 5  ;;  %v7148_v32 = vld [vmem:[%s5901_s8 + $0x70] sm:$0xf] }
  0xf9   : > { %3931 = vmatprep.mubr.bf16.mxu0 %v4917_v20  ;;  %v3055_v0 = vrot.slane %v3053_v19, 5  ;;  %v595_v50 = vshrl.u32 %v7129_v10, 16  ;;  %v606_v19 = vrot.slane %v604_v52, 5  ;;  %v614_v12 = vshll.u32 %v6857_v3, 16 }
  0xfa   : > { %v5156_v13 = vpop.f32.mrf.mxu0  ;;  %v5228_v44 = vpop.f32.mrf.mxu1  ;;  %3932 = vmatmul.mubr.bf16.gmra.mxu0 %v4901_v28  ;;  %v583_v16 = vsel %vm5951_vm2, %v578_v15, %v582_v43  ;;  %v608_v15 = vshrl.u32 %v6850_v18, 16  ;;  %v3081_v52 = vshrl.u32 %v7148_v32, 16 }
  0xfb   : > { %v7114_v49 = vadd.f32 %v5156_v13, %v5155_v57  ;;  %v7121_v41 = vadd.f32 %v5228_v44, %v5227_v60  ;;  %v588_v57 = vrot.slane %v587_v8, 4  ;;  %v4902_v60 = vcombine.low %v7099_v38, %v7110_v39 }
  0xfc   : > { %v5158_v58 = vpop.f32.mrf.mxu0  ;;  %v5230_v54 = vpop.f32.mrf.mxu1  ;;  %v3051_v13 = vrot.slane %v3050_v33, 4  ;;  %v598_v38 = vshll.u32 %v7129_v10, 16  ;;  %v3060_v56 = vor.u32 %v3059_v25, %v3055_v0  ;;  %v597_v20 = vrot.slane %v595_v50, 4  ;;  %v7157_v33 = vld [vmem:[%s5901_s8 + $0x74] sm:$0x1] }
  0xfd   : > { %v593_v17 = vsel %vm5951_vm2, %v588_v57, %v592_v55 }
  0xfe   : > { %v5159_v59 = vpop.f32.mrf.mxu0  ;;  %v5231_v36 = vpop.f32.mrf.mxu1  ;;  %v4622_v28 = vcombine.low %v583_v16, %v593_v17  ;;  %v3056_v55 = vsel %vm5951_vm2, %v3051_v13, %v3055_v0  ;;  %v600_v8 = vrot.slane %v598_v38, 5  ;;  %v3061_v1 = vrot.slane %v3060_v56, 4 }
  0xff   : > { %v7135_v5 = vadd.f32 %v5159_v59, %v5158_v58  ;;  %v7141_v44 = vadd.f32 %v5231_v36, %v5230_v54  ;;  %v3068_v0 = vshrl.u32 %v7145_v9, 16  ;;  %v3071_v54 = vshll.u32 %v7145_v9, 16 }
 0x100   : > { %v5161_v51 = vpop.f32.mrf.mxu0  ;;  %v5233_v34 = vpop.f32.mrf.mxu1  ;;  %2672 = vmatprep.mubr.bf16.mxu1 %v4622_v28  ;;  %v601_v57 = vor.u32 %v600_v8, %v597_v20  ;;  %v3077_v16 = vshll.u32 %v7148_v32, 16  ;;  %v3066_v25 = vsel %vm5951_vm2, %v3061_v1, %v3065_v24  ;;  %v610_v17 = vrot.slane %v608_v15, 4 }
 0x101   : > { %2673 = vmatmul.mubr.bf16.gmra.mxu1 %v4606_v22  ;;  %v616_v13 = vrot.slane %v614_v12, 5  ;;  %v4918_v36 = vcombine.low %v3056_v55, %v3066_v25  ;;  %v3070_v50 = vrot.slane %v3068_v0, 4  ;;  %v3073_v38 = vrot.slane %v3071_v54, 5  ;;  %v7174_v12 = vld [vmem:[%s5901_s8 + $0x78] sm:$0xf] }
 0x102   : > { %v5162_v43 = vpop.f32.mrf.mxu0  ;;  %v5234_v59 = vpop.f32.mrf.mxu1  ;;  %v602_v22 = vrot.slane %v601_v57, 4  ;;  %v611_v56 = vor.u32 %v610_v17, %v606_v19  ;;  %v3087_v20 = vshll.u32 %v7157_v33, 16  ;;  %v4607_v1 = vcombine.low %v7129_v10, %v6850_v18 }
 0x103   : > { %v7152_v58 = vadd.f32 %v5162_v43, %v5161_v51  ;;  %v7164_v51 = vadd.f32 %v5234_v59, %v5233_v34  ;;  %v3079_v43 = vrot.slane %v3077_v16, 5  ;;  %3939 = vmatprep.mubr.bf16.mxu0 %v4918_v36  ;;  %v3074_v34 = vor.u32 %v3073_v38, %v3070_v50  ;;  %v7190_v50 = vld [vmem:[%s5901_s8 + $0x80] sm:$0x1] }
 0x104   : > { %v5164_v21 = vpop.f32.mrf.mxu0  ;;  %v5236_v28 = vpop.f32.mrf.mxu1  ;;  %v607_v24 = vsel %vm5951_vm2, %v602_v22, %v606_v19  ;;  %3940 = vmatmul.mubr.bf16.gmra.mxu0 %v4902_v60  ;;  %v612_v59 = vrot.slane %v611_v56, 4  ;;  %v3083_v57 = vrot.slane %v3081_v52, 4  ;;  %v3089_v0 = vrot.slane %v3087_v20, 5  ;;  %v7179_v19 = vld [vmem:[%s5901_s8 + $0x7c] sm:$0xf] }
 0x105   : > { %v4903_v54 = vcombine.low %v7145_v9, %v7148_v32  ;;  %v3075_v25 = vrot.slane %v3074_v34, 4  ;;  %v3092_v38 = vshrl.u32 %v7174_v12, 16  ;;  %v3095_v9 = vshll.u32 %v7174_v12, 16  ;;  %v4864_v56 = vld [vmem:[%s5901_s8 + $0x18] sm:$0xe] }
 0x106   : > { %v5165_v3 = vpop.f32.mrf.mxu0  ;;  %v5237_v15 = vpop.f32.mrf.mxu1  ;;  %v617_v60 = vsel %vm5951_vm2, %v612_v59, %v616_v13  ;;  %v3084_v22 = vor.u32 %v3083_v57, %v3079_v43 }
 0x107   : > { %v7181_v17 = vadd.f32 %v5165_v3, %v5164_v21  ;;  %v7183_v36 = vadd.f32 %v5237_v15, %v5236_v28  ;;  %v4623_v20 = vcombine.low %v607_v24, %v617_v60  ;;  %v3080_v21 = vsel %vm5951_vm2, %v3075_v25, %v3079_v43 }
 0x108   : > { %v5167_v8 = vpop.f32.mrf.mxu0  ;;  %v5239_v18 = vpop.f32.mrf.mxu1  ;;  %v3101_v28 = vshll.u32 %v7179_v19, 16  ;;  %v3085_v34 = vrot.slane %v3084_v22, 4  ;;  %v3094_v15 = vrot.slane %v3092_v38, 4  ;;  %v3097_v59 = vrot.slane %v3095_v9, 5  ;;  %v4865_v38 = vld [vmem:[%s5901_s8 + $0x24] sm:$0xe] }
 0x109   : > { %2680 = vmatprep.mubr.bf16.mxu1 %v4623_v20  ;;  %v3111_v24 = vshll.u32 %v7190_v50, 16  ;;  %v4880_v60 = vrot.slane %v4864_v56, 9  ;;  %v3349_v22 = vrot.slane %v6885_v45, 5  ;;  %v4904_v45 = vcombine.low %v7174_v12, %v7179_v19 }
 0x10a   : > { %v5168_v16 = vpop.f32.mrf.mxu0  ;;  %v5240_v3 = vpop.f32.mrf.mxu1  ;;  %v3090_v43 = vsel %vm5951_vm2, %v3085_v34, %v3089_v0  ;;  %2681 = vmatmul.mubr.bf16.gmra.mxu1 %v4607_v1  ;;  %v3098_v25 = vor.u32 %v3097_v59, %v3094_v15  ;;  %v7215_v34 = vld [vmem:[%s5901_s8 + $0x84] sm:$0xf] }
 0x10b   : > { %v7185_v10 = vadd.f32 %v5168_v16, %v5167_v8  ;;  %v3105_v8 = vshrl.u32 %v7179_v19, 16  ;;  %v7199_v13 = vadd.f32 %v5240_v3, %v5239_v18  ;;  %v3103_v16 = vrot.slane %v3101_v28, 5 }
 0x10c   : > { %v5170_v52 = vpop.f32.mrf.mxu0  ;;  %v5556_v4 = vpop.f32.mrf.mxu1  ;;  %v3352_v18 = vrot.slane %v6893_v7, 5  ;;  %v4919_v3 = vcombine.low %v3080_v21, %v3090_v43  ;;  %v3113_v28 = vrot.slane %v3111_v24, 5  ;;  %v3099_v62 = vrot.slane %v3098_v25, 4  ;;  %v7232_v43 = vld [vmem:[%s5901_s8 + $0x88] sm:$0xf] }
 0x10d   : > { %v3107_v55 = vrot.slane %v3105_v8, 4  ;;  %v7208_v8 = vadd.f32 %v5556_v4, %v7096_v23  ;;  %v3350_v0 = vsel %vm6146_vm5, %v4880_v60, %v3349_v22  ;;  %v3351_v1 = vrot.slane %v3349_v22, 4  ;;  %v4866_v25 = vld [vmem:[%s5901_s8 + $0x30] sm:$0xe] }
 0x10e   : > { %v5171_v57 = vpop.f32.mrf.mxu0  ;;  %v2257_v56 = vpop.f32.mrf.mxu1  ;;  %3947 = vmatprep.mubr.bf16.mxu0 %v4919_v3  ;;  %v4881_v21 = vrot.slane %v4865_v38, 9  ;;  %v3104_v59 = vsel %vm5951_vm2, %v3099_v62, %v3103_v16  ;;  %v3125_v31 = vshll.u32 %v7232_v43, 16 }
 0x10f   : > { %v3108_v20 = vor.u32 %v3107_v55, %v3103_v16  ;;  %v7217_v15 = vadd.f32 %v5171_v57, %v5170_v52  ;;  %v7220_v4 = vadd.f32 %v7064_v48, %v2257_v56  ;;  %3948 = vmatmul.mubr.bf16.gmra.mxu0 %v4903_v54  ;;  %v3353_v12 = vsel %vm6146_vm5, %v3351_v1, %v3352_v18  ;;  %v7235_v52 = vld [vmem:[%s5901_s8 + $0x8c] sm:$0x1] }
 0x110   : > { %v5173_v9 = vpop.f32.mrf.mxu0  ;;  %v5557_v23 = vpop.f32.mrf.mxu1  ;;  %v4928_v54 = vcombine.low %v3350_v0, %v3353_v12  ;;  %v3357_v62 = vsel %vm6146_vm5, %v4881_v21, %v3356_v2  ;;  %v3129_v2 = vshrl.u32 %v7232_v43, 16  ;;  %v4882_v1 = vrot.slane %v4866_v25, 9 }
 0x111   : > { %v3109_v55 = vrot.slane %v3108_v20, 4  ;;  %v7227_v24 = vadd.f32 %v5557_v23, %v7114_v49  ;;  %v3116_v49 = vshrl.u32 %v7215_v34, 16  ;;  %v4929_v18 = vcombine.low %v3357_v62, %v6955_v6 }
 0x112   : > { %v5174_v7 = vpop.f32.mrf.mxu0  ;;  %v2260_v16 = vpop.f32.mrf.mxu1  ;;  %5650 = vmatprep.mubr.bf16.mxu1 %v4928_v54  ;;  %v3127_v21 = vrot.slane %v3125_v31, 5  ;;  %v3131_v23 = vrot.slane %v3129_v2, 4  ;;  %v3366_v12 = vrot.slane %v6965_v40, 5 }
 0x113   : > { %v7229_v60 = vadd.f32 %v5174_v7, %v5173_v9  ;;  %v3114_v48 = vsel %vm5951_vm2, %v3109_v55, %v3113_v28  ;;  %v7247_v38 = vadd.f32 %v7077_v14, %v2260_v16  ;;  %v3119_v9 = vshll.u32 %v7215_v34, 16  ;;  %5651 = vmatmul.mubr.bf16.vlgmr.msra.gmra.mxu1 %v4929_v18  ;;  %v4867_v7 = vld [vmem:[%s5901_s8 + $0x3c] sm:$0xe] }
 0x114   : > { %v5176_v57 = vpop.f32.mrf.mxu0  ;;  %v4920_v22 = vcombine.low %v3104_v59, %v3114_v48  ;;  %v3118_v20 = vrot.slane %v3116_v49, 4  ;;  %v3135_v28 = vshll.u32 %v7235_v52, 16  ;;  %v5560_v56 = vpop.f32.mrf.mxu1  ;;  %v3363_v14 = vrot.slane %v6960_v42, 5 }
 0x115   : > { %v3121_v0 = vrot.slane %v3119_v9, 5  ;;  %v7260_v49 = vadd.f32 %v5560_v56, %v7181_v17  ;;  %v4905_v42 = vcombine.low %v7215_v34, %v7232_v43  ;;  %v4883_v18 = vrot.slane %v4867_v7, 9 }
 0x116   : > { %v5177_v3 = vpop.f32.mrf.mxu0  ;;  %3955 = vmatprep.mubr.bf16.mxu0 %v4920_v22  ;;  %v3137_v59 = vrot.slane %v3135_v28, 5  ;;  %v2273_v48 = vpop.f32.mrf.mxu1  ;;  %v3364_v62 = vsel %vm6146_vm5, %v4882_v1, %v3363_v14  ;;  %v3365_v16 = vrot.slane %v3363_v14, 4  ;;  %v3132_v22 = vor.u32 %v3131_v23, %v3127_v21  ;;  %v7271_v28 = vld [vmem:[%s5901_s8 + $0x90] sm:$0xf]  ;;  %v7287_v23 = vld [vmem:[%s5901_s8 + $0x98] sm:$0x1] }
 0x117   : > { %v3122_v54 = vor.u32 %v3121_v0, %v3118_v20  ;;  %v3370_v9 = vrot.slane %v6992_v63, 5  ;;  %3956 = vmatmul.mubr.bf16.gmra.mxu0 %v4904_v45  ;;  %v5178_v2 = vadd.f32 %v5177_v3, %v5176_v57  ;;  %v7268_v17 = vadd.f32 %v7135_v5, %v2273_v48  ;;  %v7276_v45 = vld [vmem:[%s5901_s8 + $0x94] sm:$0xf] }
 0x118   : > { %v5179_v55 = vpop.f32.mrf.mxu0  ;;  %v5561_v40 = vpop.f32.mrf.mxu1  ;;  %v3367_v20 = vsel %vm6146_vm5, %v3365_v16, %v3366_v12  ;;  %v3133_v56 = vrot.slane %v3132_v22, 4  ;;  %v4868_v12 = vld [vmem:[%s5901_s8 + $0x48] sm:$0xe]  ;;  %v3149_v22 = vshll.u32 %v7276_v45, 16 }
 0x119   : > { %v3123_v31 = vrot.slane %v3122_v54, 4  ;;  %v4930_v0 = vcombine.low %v3364_v62, %v3367_v20  ;;  %v3371_v34 = vsel %vm6146_vm5, %v4883_v18, %v3370_v9  ;;  %v3372_v63 = vrot.slane %v3370_v9, 4 }
 0x11a   : > { %v5180_v25 = vpop.f32.mrf.mxu0  ;;  %v2276_v1 = vpop.f32.mrf.mxu1  ;;  %v7281_v57 = vadd.f32 %v5561_v40, %v7185_v10  ;;  %v3138_v48 = vsel %vm5951_vm2, %v3133_v56, %v3137_v59  ;;  %v7957_v54 = vrot.slane %v7000_v47, 5  ;;  %v3140_v10 = vshrl.u32 %v7271_v28, 16 }
 0x11b   : > { %v3128_v7 = vsel %vm5951_vm2, %v3123_v31, %v3127_v21  ;;  %v5181_v5 = vadd.f32 %v5180_v25, %v5179_v55  ;;  %v7284_v3 = vadd.f32 %v7152_v58, %v2276_v1  ;;  %5654 = vmatprep.mubr.bf16.mxu1 %v4930_v0  ;;  %v3143_v55 = vshll.u32 %v7271_v28, 16  ;;  %v4869_v31 = vld [vmem:[%s5901_s8 + $0x54] sm:$0xe] }
 0x11c   : > { %v5182_v14 = vpop.f32.mrf.mxu0  ;;  %v3374_v21 = vsel %vm6146_vm5, %v3372_v63, %v7957_v54  ;;  %v5564_v62 = vpop.f32.mrf.mxu1  ;;  %v4921_v16 = vcombine.low %v3128_v7, %v3138_v48  ;;  %v3153_v18 = vshrl.u32 %v7276_v45, 16  ;;  %v3142_v9 = vrot.slane %v3140_v10, 4 }
 0x11d   : > { %v4931_v25 = vcombine.low %v3371_v34, %v3374_v21  ;;  %v3145_v59 = vrot.slane %v3143_v55, 5  ;;  %v3159_v40 = vshll.u32 %v7287_v23, 16  ;;  %v4884_v47 = vrot.slane %v4868_v12, 9 }
 0x11e   : > { %v5183_v58 = vpop.f32.mrf.mxu0  ;;  %v2289_v20 = vpop.f32.mrf.mxu1  ;;  %3963 = vmatprep.mubr.bf16.mxu0 %v4921_v16  ;;  %v3151_v0 = vrot.slane %v3149_v22, 5  ;;  %v3155_v63 = vrot.slane %v3153_v18, 4  ;;  %v3377_v1 = vrot.slane %v7027_v27, 5  ;;  %v3380_v34 = vrot.slane %v7033_v29, 5 }
 0x11f   : > { %5655 = vmatmul.mubr.bf16.gmra.mxu1 %v4931_v25  ;;  %v3146_v7 = vor.u32 %v3145_v59, %v3142_v9  ;;  %v3161_v48 = vrot.slane %v3159_v40, 5  ;;  %v7304_v54 = vadd.f32 %v5564_v62, %v5178_v2  ;;  %v4906_v21 = vcombine.low %v7271_v28, %v7276_v45  ;;  %3964 = vmatmul.mubr.bf16.gmra.mxu0 %v4905_v42  ;;  %v7315_v28 = vld [vmem:[%s5901_s8 + $0x9c] sm:$0xf] }
 0x120   : > { %v5185_v56 = vpop.f32.mrf.mxu0  ;;  %v5565_v12 = vpop.f32.mrf.mxu1  ;;  %v3156_v55 = vor.u32 %v3155_v63, %v3151_v0  ;;  %v3378_v16 = vsel %vm6146_vm5, %v4884_v47, %v3377_v1  ;;  %v3379_v25 = vrot.slane %v3377_v1, 4  ;;  %v4885_v27 = vrot.slane %v4869_v31, 9  ;;  %v7324_v31 = vld [vmem:[%s5901_s8 + $0xa0] sm:$0xf] }
 0x121   : > { %v3147_v22 = vrot.slane %v3146_v7, 4  ;;  %v3384_v29 = vrot.slane %v7060_v46, 5  ;;  %v5184_v18 = vadd.f32 %v5183_v58, %v5182_v14  ;;  %v7312_v2 = vadd.f32 %v7217_v15, %v2289_v20  ;;  %v7331_v20 = vld [vmem:[%s5901_s8 + $0xa4] sm:$0x1]  ;;  %v4870_v7 = vld [vmem:[%s5901_s8 + $0x60] sm:$0xe] }
 0x122   : > { %v5186_v10 = vpop.f32.mrf.mxu0  ;;  %v2292_v62 = vpop.f32.mrf.mxu1  ;;  %v3157_v42 = vrot.slane %v3156_v55, 4  ;;  %v3381_v59 = vsel %vm6146_vm5, %v3379_v25, %v3380_v34  ;;  %v7319_v40 = vadd.f32 %v5565_v12, %v5181_v5  ;;  %v3164_v34 = vshrl.u32 %v7315_v28, 16 }
 0x123   : > { %v7321_v47 = vadd.f32 %v5186_v10, %v5185_v56  ;;  %v3152_v46 = vsel %vm5951_vm2, %v3147_v22, %v3151_v0  ;;  %v4932_v15 = vcombine.low %v3378_v16, %v3381_v59  ;;  %v3385_v14 = vsel %vm6146_vm5, %v4885_v27, %v3384_v29 }
 0x124   : > { %v5188_v9 = vpop.f32.mrf.mxu0  ;;  %7958 = vst [vmem:[#allocation2_spill] sm:$0xff] %v7319_v40  ;;  %v3386_v58 = vrot.slane %v3384_v29, 4  ;;  %v5568_v63 = vpop.f32.mrf.mxu1  ;;  %v3162_v5 = vsel %vm5951_vm2, %v3157_v42, %v3161_v48  ;;  %v7336_v56 = vadd.f32 %v7229_v60, %v2292_v62  ;;  %v3167_v0 = vshll.u32 %v7315_v28, 16  ;;  %v4871_v42 = vld [vmem:[%s5901_s8 + $0x6c] sm:$0xe] }
 0x125   : > { %v4922_v12 = vcombine.low %v3152_v46, %v3162_v5  ;;  %5658 = vmatprep.mubr.bf16.mxu1 %v4932_v15  ;;  %v7959_v10 = vrot.slane %v7075_v35, 5  ;;  %v3173_v16 = vshll.u32 %v7324_v31, 16  ;;  %v3177_v48 = vshrl.u32 %v7324_v31, 16 }
 0x126   : > { %v5189_v1 = vpop.f32.mrf.mxu0  ;;  %v2305_v25 = vpop.f32.mrf.mxu1  ;;  %v3166_v22 = vrot.slane %v3164_v34, 4  ;;  %v3169_v29 = vrot.slane %v3167_v0, 5  ;;  %v3183_v62 = vshll.u32 %v7331_v20, 16  ;;  %v4886_v15 = vrot.slane %v4870_v7, 9 }
 0x127   : > { %v3388_v55 = vsel %vm6146_vm5, %v3386_v58, %v7959_v10  ;;  %3971 = vmatprep.mubr.bf16.mxu0 %v4922_v12  ;;  %v3175_v59 = vrot.slane %v3173_v16, 5  ;;  %v3179_v46 = vrot.slane %v3177_v48, 4  ;;  %v3391_v40 = vrot.slane %v7110_v39, 5 }
 0x128   : > { %v5191_v27 = vpop.f32.mrf.mxu0  ;;  %v4933_v60 = vcombine.low %v3385_v14, %v3388_v55  ;;  %v5569_v5 = vpop.f32.mrf.mxu1  ;;  %3972 = vmatmul.mubr.bf16.gmra.mxu0 %v4906_v21  ;;  %v3170_v10 = vor.u32 %v3169_v29, %v3166_v22  ;;  %v3185_v6 = vrot.slane %v3183_v62, 5  ;;  %v3394_v14 = vrot.slane %v7117_v53, 5  ;;  %v7362_v62 = vld [vmem:[%s5901_s8 + $0xa8] sm:$0xf] }
 0x129   : > { %v3180_v34 = vor.u32 %v3179_v46, %v3175_v59  ;;  %v4907_v0 = vcombine.low %v7315_v28, %v7324_v31  ;;  %v4887_v12 = vrot.slane %v4871_v42, 9  ;;  %v3398_v55 = vrot.slane %v7148_v32, 5 }
 0x12a   : > { %v5192_v58 = vpop.f32.mrf.mxu0  ;;  %5659 = vmatmul.mubr.bf16.gmra.mxu1 %v4933_v60  ;;  %v2308_v16 = vpop.f32.mrf.mxu1  ;;  %v3171_v48 = vrot.slane %v3170_v10, 4  ;;  %v3392_v21 = vsel %vm6146_vm5, %v4886_v15, %v3391_v40  ;;  %v3393_v60 = vrot.slane %v3391_v40, 4  ;;  %v5190_v39 = vadd.f32 %v5189_v1, %v5188_v9  ;;  %v7373_v15 = vld [vmem:[%s5901_s8 + $0xac] sm:$0xf]  ;;  %v7376_v10 = vld [vmem:[%s5901_s8 + $0xb0] sm:$0x1] }
 0x12b   : > { %v3181_v22 = vrot.slane %v3180_v34, 4  ;;  %v3399_v53 = vsel %vm6146_vm5, %v4887_v12, %v3398_v55  ;;  %v3400_v29 = vrot.slane %v3398_v55, 4  ;;  %v7359_v28 = vadd.f32 %v5184_v18, %v2305_v25 }
 0x12c   : > { %v5194_v7 = vpop.f32.mrf.mxu0  ;;  %v7364_v32 = vpop.f32.mrf.mxu1  ;;  %v3176_v46 = vsel %vm5951_vm2, %v3171_v48, %v3175_v59  ;;  %v3395_v40 = vsel %vm6146_vm5, %v3393_v60, %v3394_v14  ;;  %v7370_v9 = vadd.f32 %v5568_v63, %v5190_v39  ;;  %v5193_v1 = vadd.f32 %v5192_v58, %v5191_v27  ;;  %v4872_v63 = vld [vmem:[%s5901_s8 + $0x78] sm:$0xe] }
 0x12d   : > { %v3186_v18 = vsel %vm5951_vm2, %v3181_v22, %v3185_v6  ;;  %v4934_v25 = vcombine.low %v3392_v21, %v3395_v40  ;;  %v7961_v34 = vrot.slane %v7157_v33, 5  ;;  %v7385_v12 = vadd.f32 %v7321_v47, %v2308_v16  ;;  %v4873_v47 = vld [vmem:[%s5901_s8 + $0x84] sm:$0xe] }
 0x12e   : > { %v5195_v42 = vpop.f32.mrf.mxu0  ;;  %7960 = vst [vmem:[#allocation3_spill] sm:$0xff] %v7370_v9  ;;  %v2321_v14 = vpop.f32.mrf.mxu1  ;;  %v4923_v58 = vcombine.low %v3176_v46, %v3186_v18  ;;  %v7388_v48 = vadd.f32 %v5569_v5, %v5193_v1  ;;  %v3188_v60 = vshrl.u32 %v7362_v62, 16  ;;  %v3191_v6 = vshll.u32 %v7362_v62, 16 }
 0x12f   : > { %v3402_v59 = vsel %vm6146_vm5, %v3400_v29, %v7961_v34  ;;  %5662 = vmatprep.mubr.bf16.mxu1 %v4934_v25  ;;  %v3197_v33 = vshll.u32 %v7373_v15, 16  ;;  %v3201_v21 = vshrl.u32 %v7373_v15, 16  ;;  %v3207_v39 = vshll.u32 %v7376_v10, 16 }
 0x130   : > { %v5197_v27 = vpop.f32.mrf.mxu0  ;;  %v4935_v55 = vcombine.low %v3399_v53, %v3402_v59  ;;  %7962 = vst [vmem:[#allocation4_spill] sm:$0xff] %v7388_v48  ;;  %v7396_v16 = vpop.f32.mrf.mxu1  ;;  %3979 = vmatprep.mubr.bf16.mxu0 %v4923_v58  ;;  %v3190_v5 = vrot.slane %v3188_v60, 4  ;;  %v4888_v53 = vrot.slane %v4872_v63, 9  ;;  %v3405_v29 = vrot.slane %v7179_v19, 5  ;;  %v7401_v59 = vld [vmem:[%s5901_s8 + $0xb4] sm:$0xf] }
 0x131   : > { %v3408_v46 = vrot.slane %v7190_v50, 5  ;;  %3980 = vmatmul.mubr.bf16.gmra.mxu0 %v4907_v0  ;;  %v3193_v40 = vrot.slane %v3191_v6, 5  ;;  %v3199_v1 = vrot.slane %v3197_v33, 5  ;;  %v3203_v18 = vrot.slane %v3201_v21, 4  ;;  %v7413_v48 = vld [vmem:[%s5901_s8 + $0xb8] sm:$0xf] }
 0x132   : > { %v5198_v22 = vpop.f32.mrf.mxu0  ;;  %5663 = vmatmul.mubr.bf16.gmra.mxu1 %v4935_v55  ;;  %v3209_v25 = vrot.slane %v3207_v39, 5  ;;  %v2324_v34 = vpop.f32.mrf.mxu1  ;;  %v3406_v35 = vsel %vm6146_vm5, %v4888_v53, %v3405_v29  ;;  %v3407_v58 = vrot.slane %v3405_v29, 4  ;;  %v4908_v63 = vcombine.low %v7362_v62, %v7373_v15 }
 0x133   : > { %v4889_v55 = vrot.slane %v4873_v47, 9  ;;  %v3194_v50 = vor.u32 %v3193_v40, %v3190_v5  ;;  %v3204_v0 = vor.u32 %v3203_v18, %v3199_v1  ;;  %v3412_v60 = vrot.slane %v7232_v43, 5 }
 0x134   : > { %v5200_v19 = vpop.f32.mrf.mxu0  ;;  %v5196_v6 = vadd.f32 %v5195_v42, %v5194_v7  ;;  %v7408_v33 = vpop.f32.mrf.mxu1  ;;  %v3409_v21 = vsel %vm6146_vm5, %v3407_v58, %v3408_v46  ;;  %v5199_v39 = vadd.f32 %v5198_v22, %v5197_v27  ;;  %v3212_v53 = vshrl.u32 %v7401_v59, 16  ;;  %v7420_v7 = vld [vmem:[%s5901_s8 + $0xbc] sm:$0x1] }
 0x135   : > { %v3215_v62 = vshll.u32 %v7401_v59, 16  ;;  %v3195_v29 = vrot.slane %v3194_v50, 4  ;;  %v3205_v5 = vrot.slane %v3204_v0, 4  ;;  %v4936_v40 = vcombine.low %v3406_v35, %v3409_v21  ;;  %v4874_v21 = vld [vmem:[%s5901_s8 + $0x90] sm:$0xe] }
 0x136   : > { %v5201_v47 = vpop.f32.mrf.mxu0  ;;  %v3413_v43 = vsel %vm6146_vm5, %v4889_v55, %v3412_v60  ;;  %v7422_v42 = vpop.f32.mrf.mxu1  ;;  %v3414_v46 = vrot.slane %v3412_v60, 4  ;;  %v7424_v27 = vadd.f32 %v5196_v6, %v2321_v14  ;;  %v7426_v22 = vadd.f32 %v5199_v39, %v2324_v34  ;;  %v4875_v39 = vld [vmem:[%s5901_s8 + $0x9c] sm:$0xe] }
 0x137   : > { %v3214_v18 = vrot.slane %v3212_v53, 4  ;;  %v3200_v50 = vsel %vm5951_vm2, %v3195_v29, %v3199_v1  ;;  %v3210_v35 = vsel %vm5951_vm2, %v3205_v5, %v3209_v25  ;;  %5666 = vmatprep.mubr.bf16.mxu1 %v4936_v40  ;;  %v3217_v55 = vrot.slane %v3215_v62, 5 }
 0x138   : > { %7963 = vst [vmem:[#allocation5_spill] sm:$0xff] %v7424_v27  ;;  %7964 = vst [vmem:[#allocation6_spill] sm:$0xff] %v7426_v22  ;;  %v5203_v58 = vpop.f32.mrf.mxu0  ;;  %v3221_v0 = vshll.u32 %v7413_v48, 16  ;;  %v7434_v9 = vpop.f32.mrf.mxu1  ;;  %v4924_v60 = vcombine.low %v3200_v50, %v3210_v35  ;;  %v7965_v14 = vrot.slane %v7235_v52, 5  ;;  %v3225_v6 = vshrl.u32 %v7413_v48, 16 }
 0x139   : > { %v3231_v1 = vshll.u32 %v7420_v7, 16  ;;  %v3218_v62 = vor.u32 %v3217_v55, %v3214_v18  ;;  %v4890_v35 = vrot.slane %v4874_v21, 9  ;;  %v3419_v22 = vrot.slane %v7276_v45, 5 }
 0x13a   : > { %v3416_v34 = vsel %vm6146_vm5, %v3414_v46, %v7965_v14  ;;  %v5204_v25 = vpop.f32.mrf.mxu0  ;;  %v3223_v29 = vrot.slane %v3221_v0, 5  ;;  %v7444_v40 = vpop.f32.mrf.mxu1  ;;  %3987 = vmatprep.mubr.bf16.mxu0 %v4924_v60  ;;  %v3227_v50 = vrot.slane %v3225_v6, 4  ;;  %v7448_v46 = vld [vmem:[%s5901_s8 + $0xc0] sm:$0xf]  ;;  %v3422_v18 = vrot.slane %v7287_v23, 5 }
 0x13b   : > { %v4937_v53 = vcombine.low %v3413_v43, %v3416_v34  ;;  %v3233_v52 = vrot.slane %v3231_v1, 5  ;;  %3988 = vmatmul.mubr.bf16.gmra.mxu0 %v4908_v63  ;;  %v3219_v43 = vrot.slane %v3218_v62, 4  ;;  %v4909_v55 = vcombine.low %v7401_v59, %v7413_v48  ;;  %v7461_v62 = vld [vmem:[%s5901_s8 + $0xc4] sm:$0xf] }
 0x13c   : > { %v7450_v14 = vpop.f32.mrf.mxu0  ;;  %v4891_v0 = vrot.slane %v4875_v39, 9  ;;  %v5580_v60 = vpop.f32.mrf.mxu1  ;;  %v3228_v34 = vor.u32 %v3227_v50, %v3223_v29  ;;  %v3420_v45 = vsel %vm6146_vm5, %v4890_v35, %v3419_v22  ;;  %v3421_v21 = vrot.slane %v3419_v22, 4  ;;  %v7469_v35 = vld [vmem:[%s5901_s8 + $0xc8] sm:$0x1] }
 0x13d   : > { %5667 = vmatmul.mubr.bf16.gmra.mxu1 %v4937_v53  ;;  %v3426_v6 = vrot.slane %v7324_v31, 5  ;;  %v3224_v63 = vsel %vm5951_vm2, %v3219_v43, %v3223_v29  ;;  %v5202_v53 = vadd.f32 %v5201_v47, %v5200_v19  ;;  %v5205_v23 = vadd.f32 %v5204_v25, %v5203_v58  ;;  %v4876_v25 = vld [vmem:[%s5901_s8 + $0xa8] sm:$0xe] }
 0x13e   : > { %v5207_v1 = vpop.f32.mrf.mxu0  ;;  %v3236_v59 = vshrl.u32 %v7448_v46, 16  ;;  %v2353_v39 = vpop.f32.mrf.mxu1  ;;  %v3229_v5 = vrot.slane %v3228_v34, 4  ;;  %v3423_v50 = vsel %vm6146_vm5, %v3421_v21, %v3422_v18 }
 0x13f   : > { %v3427_v22 = vsel %vm6146_vm5, %v4891_v0, %v3426_v6  ;;  %v3428_v31 = vrot.slane %v3426_v6, 4  ;;  %v4938_v29 = vcombine.low %v3420_v45, %v3423_v50  ;;  %v7472_v19 = vadd.f32 %v7364_v32, %v5202_v53 }
 0x140   : > { %v5209_v27 = vpop.f32.mrf.mxu0  ;;  %v7475_v47 = vadd.f32 %v7396_v16, %v5205_v23  ;;  %v3238_v58 = vrot.slane %v3236_v59, 4  ;;  %v5581_v43 = vpop.f32.mrf.mxu1  ;;  %v3234_v18 = vsel %vm5951_vm2, %v3229_v5, %v3233_v52  ;;  %v7968_v0 = vrot.slane %v7331_v20, 5 }
 0x141   : > { %7966 = vst [vmem:[#allocation7_spill] sm:$0xff] %v7472_v19  ;;  %v3239_v45 = vshll.u32 %v7448_v46, 16  ;;  %v3245_v32 = vshll.u32 %v7461_v62, 16  ;;  %v4925_v6 = vcombine.low %v3224_v63, %v3234_v18  ;;  %5670 = vmatprep.mubr.bf16.mxu1 %v4938_v29  ;;  %v3249_v53 = vshrl.u32 %v7461_v62, 16 }
 0x142   : > { %7967 = vst [vmem:[#allocation8_spill] sm:$0xff] %v7475_v47  ;;  %v3430_v34 = vsel %vm6146_vm5, %v3428_v31, %v7968_v0  ;;  %v5210_v21 = vpop.f32.mrf.mxu0  ;;  %v3255_v23 = vshll.u32 %v7469_v35, 16  ;;  %v2356_v59 = vpop.f32.mrf.mxu1  ;;  %v4892_v52 = vrot.slane %v4876_v25, 9  ;;  %v3433_v20 = vrot.slane %v7373_v15, 5  ;;  %v4877_v47 = vld [vmem:[%s5901_s8 + $0xb4] sm:$0xe] }
 0x143   : > { %v4939_v16 = vcombine.low %v3427_v22, %v3430_v34  ;;  %v3241_v50 = vrot.slane %v3239_v45, 5  ;;  %v3247_v5 = vrot.slane %v3245_v32, 5  ;;  %3995 = vmatprep.mubr.bf16.mxu0 %v4925_v6  ;;  %v3251_v0 = vrot.slane %v3249_v53, 4  ;;  %v7515_v53 = vld [vmem:[%s5901_s8 + $0xcc] sm:$0xf] }
 0x144   : > { %v7490_v31 = vpop.f32.mrf.mxu0  ;;  %v3257_v19 = vrot.slane %v3255_v23, 5  ;;  %v3436_v63 = vrot.slane %v7376_v10, 5  ;;  %v7494_v22 = vadd.f32 %v5580_v60, %v7101_v11  ;;  %v7496_v29 = vpop.f32.mrf.mxu1  ;;  %3996 = vmatmul.mubr.bf16.gmra.mxu0 %v4909_v55  ;;  %v3434_v15 = vsel %vm6146_vm5, %v4892_v52, %v3433_v20 }
 0x145   : > { %5671 = vmatmul.mubr.bf16.gmra.mxu1 %v4939_v16  ;;  %v3242_v18 = vor.u32 %v3241_v50, %v3238_v58  ;;  %v3435_v25 = vrot.slane %v3433_v20, 4  ;;  %v4910_v34 = vcombine.low %v7448_v46, %v7461_v62  ;;  %v3252_v32 = vor.u32 %v3251_v0, %v3247_v5  ;;  %v7522_v50 = vld [vmem:[%s5901_s8 + $0xd0] sm:$0xf]  ;;  %v7533_v20 = vld [vmem:[%s5901_s8 + $0xd4] sm:$0x1] }
 0x146   : > { %v7502_v45 = vpop.f32.mrf.mxu0  ;;  %v4893_v10 = vrot.slane %v4877_v47, 9  ;;  %v3440_v11 = vrot.slane %v7413_v48, 5  ;;  %v5208_v60 = vadd.f32 %v5207_v1, %v7450_v14  ;;  %v2369_v6 = vpop.f32.mrf.mxu1  ;;  %v7509_v58 = vadd.f32 %v7066_v30, %v2353_v39 }
 0x147   : > { %v3243_v16 = vrot.slane %v3242_v18, 4  ;;  %v3437_v55 = vsel %vm6146_vm5, %v3435_v25, %v3436_v63  ;;  %v7512_v46 = vadd.f32 %v5581_v43, %v7121_v41  ;;  %v3253_v47 = vrot.slane %v3252_v32, 4 }
 0x148   : > { %v7517_v23 = vpop.f32.mrf.mxu0  ;;  %v4940_v48 = vcombine.low %v3434_v15, %v3437_v55  ;;  %v3441_v14 = vsel %vm6146_vm5, %v4893_v10, %v3440_v11  ;;  %v3442_v1 = vrot.slane %v3440_v11, 4  ;;  %v5585_v52 = vpop.f32.mrf.mxu1  ;;  %v7527_v41 = vadd.f32 %v5208_v60, %v7422_v42 }
 0x149   : > { %v3248_v30 = vsel %vm5951_vm2, %v3243_v16, %v3247_v5  ;;  %v5211_v39 = vadd.f32 %v5210_v21, %v5209_v27  ;;  %v7530_v43 = vadd.f32 %v7079_v26, %v2356_v59  ;;  %v3258_v63 = vsel %vm5951_vm2, %v3253_v47, %v3257_v19  ;;  %v4878_v27 = vld [vmem:[%s5901_s8 + $0xc0] sm:$0xe] }
 0x14a   : > { %v5216_v0 = vpop.f32.mrf.mxu0  ;;  %5674 = vmatprep.mubr.bf16.mxu1 %v4940_v48  ;;  %v7969_v18 = vrot.slane %v7420_v7, 5  ;;  %v3260_v5 = vshrl.u32 %v7515_v53, 16  ;;  %v3263_v42 = vshll.u32 %v7515_v53, 16  ;;  %v2372_v21 = vpop.f32.mrf.mxu1  ;;  %v4926_v26 = vcombine.low %v3248_v30, %v3258_v63 }
 0x14b   : > { %v7545_v25 = vadd.f32 %v5211_v39, %v7444_v40  ;;  %v3269_v19 = vshll.u32 %v7522_v50, 16  ;;  %v3273_v11 = vshrl.u32 %v7522_v50, 16  ;;  %v3279_v60 = vshll.u32 %v7533_v20, 16 }
 0x14c   : > { %v3444_v15 = vsel %vm6146_vm5, %v3442_v1, %v7969_v18  ;;  %v7548_v32 = vpop.f32.mrf.mxu0  ;;  %v3262_v7 = vrot.slane %v3260_v5, 4  ;;  %v3265_v10 = vrot.slane %v3263_v42, 5  ;;  %v5282_v16 = vpop.f32.mrf.mxu1  ;;  %4003 = vmatprep.mubr.bf16.mxu0 %v4926_v26  ;;  %v4894_v47 = vrot.slane %v4878_v27, 9 }
 0x14d   : > { %v4941_v59 = vcombine.low %v3441_v14, %v3444_v15  ;;  %v3271_v55 = vrot.slane %v3269_v19, 5  ;;  %v3447_v48 = vrot.slane %v7461_v62, 5  ;;  %v4879_v14 = vld [vmem:[%s5901_s8 + $0xcc] sm:$0xe]  ;;  %4004 = vmatmul.mubr.bf16.gmra.mxu0 %v4910_v34  ;;  %v3275_v30 = vrot.slane %v3273_v11, 4  ;;  %s5002_s8 = sshll.u32 %s8014_s13, 7 }
 0x14e   : > { %v2723_v40 = vpop.f32.mrf.mxu0  ;;  %v3266_v1 = vor.u32 %v3265_v10, %v3262_v7  ;;  %v3457_v39 = vrot.slane %v7533_v20, 5  ;;  %v3450_v63 = vrot.slane %v7469_v35, 5  ;;  %v5283_v18 = vpop.f32.mrf.mxu1  ;;  %v3281_v15 = vrot.slane %v3279_v60, 5  ;;  %s7824_s19 = scalar_lea.vmem %s7951_s2, %s5002_s8 }
 0x14f   : > { %5675 = vmatmul.mubr.bf16.gmra.mxu1 %v4941_v59  ;;  %v3448_v5 = vsel %vm6146_vm5, %v4894_v47, %v3447_v48  ;;  %v3449_v42 = vrot.slane %v3447_v48, 4  ;;  %v7560_v27 = vadd.f32 %v7496_v29, %v7183_v36  ;;  %v3276_v59 = vor.u32 %v3275_v30, %v3271_v55 }
 0x150   : > { %v5605_v62 = vpop.f32.mrf.mxu0  ;;  %v3267_v26 = vrot.slane %v3266_v1, 4  ;;  %v4895_v34 = vrot.slane %v4879_v14, 9  ;;  %v3454_v19 = vrot.slane %v7522_v50, 5  ;;  %v5285_v7 = vpop.f32.mrf.mxu1  ;;  %v5214_v20 = vadd.f32 %v7502_v45, %v7490_v31 }
 0x151   : > { %v3451_v35 = vsel %vm6146_vm5, %v3449_v42, %v3450_v63  ;;  %v7568_v10 = vadd.f32 %v7141_v44, %v2369_v6  ;;  %v7571_v11 = vadd.f32 %v5585_v52, %v7199_v13  ;;  %v3277_v60 = vrot.slane %v3276_v59, 4 }
 0x152   : > { %v2726_v36 = vpop.f32.mrf.mxu0  ;;  %v3272_v29 = vsel %vm5951_vm2, %v3267_v26, %v3271_v55  ;;  %v4942_v47 = vcombine.low %v3448_v5, %v3451_v35  ;;  %v3455_v48 = vsel %vm6146_vm5, %v4895_v34, %v3454_v19  ;;  %v5286_v14 = vpop.f32.mrf.mxu1  ;;  %v3456_v1 = vrot.slane %v3454_v19, 4 }
 0x153   : > { %v7578_v30 = vadd.f32 %v7408_v33, %v5214_v20  ;;  %v5217_v44 = vadd.f32 %v5216_v0, %v7517_v23  ;;  %v7582_v31 = vadd.f32 %v7164_v51, %v2372_v21  ;;  %v3282_v45 = vsel %vm5951_vm2, %v3277_v60, %v3281_v15 }
 0x154   : > { %v5608_v13 = vpop.f32.mrf.mxu0  ;;  %5678 = vmatprep.mubr.bf16.mxu1 %v4942_v47  ;;  %v4911_v6 = vcombine.low %v7515_v53, %v7522_v50  ;;  %v5284_v52 = vadd.f32 %v5283_v18, %v5282_v16  ;;  %v5287_v55 = vadd.f32 %v5286_v14, %v5285_v7  ;;  %v5288_v63 = vpop.f32.mrf.mxu1  ;;  %v4927_v5 = vcombine.low %v3272_v29, %v3282_v45 }
 0x155   : > { %v3458_v33 = vsel %vm6146_vm5, %v3456_v1, %v3457_v39  ;;  %v7591_v23 = vadd.f32 %v7434_v9, %v5217_v44 }
 0x156   : > { %v2739_v51 = vpop.f32.mrf.mxu0  ;;  %v4943_v0 = vcombine.low %v3455_v48, %v3458_v33  ;;  %v2563_v21 = vadd.f32 %v5284_v52, %v7220_v4  ;;  %v2566_v37 = vadd.f32 %v5287_v55, %v7247_v38  ;;  %v5289_v15 = vpop.f32.mrf.mxu1  ;;  %4011 = vmatprep.mubr.bf16.mxu0 %v4927_v5 }
 0x157   : > { %v5290_v42 = vadd.f32 %v5289_v15, %v5288_v63  ;;  %4012 = vmatmul.mubr.bf16.gmra.mxu0 %v4911_v6 }
 0x158   : > { %v5609_v53 = vpop.f32.mrf.mxu0  ;;  %5679 = vmatmul.mubr.bf16.gmra.mxu1 %v4943_v0  ;;  %v7595_v50 = vadd.f32 %v2723_v40, %v2563_v21  ;;  %v7597_v16 = vadd.f32 %v2726_v36, %v2566_v37  ;;  %v5291_v61 = vpop.f32.mrf.mxu1 }
 0x159   : > { %v2571_v9 = vadd.f32 %v5290_v42, %v7208_v8 }
 0x15a   : > { %v2742_v39 = vpop.f32.mrf.mxu0  ;;  %v5292_v18 = vpop.f32.mrf.mxu1 }
 0x15b   : > { %v5293_v26 = vadd.f32 %v5292_v18, %v5291_v61  ;;  %v7601_v4 = vadd.f32 %v7548_v32, %v2571_v9 }
 0x15c   : > { %v5612_v59 = vpop.f32.mrf.mxu0  ;;  %v5294_v38 = vpop.f32.mrf.mxu1 }
 0x15d   : > { %v2574_v34 = vadd.f32 %v5293_v26, %v7227_v24 }
 0x15e   : > { %v2755_v19 = vpop.f32.mrf.mxu0  ;;  %v5295_v7 = vpop.f32.mrf.mxu1 }
 0x15f   : > { %v5296_v35 = vadd.f32 %v5295_v7, %v5294_v38  ;;  %v7604_v20 = vadd.f32 %v5605_v62, %v2574_v34 }
 0x160   : > { %v5613_v40 = vpop.f32.mrf.mxu0  ;;  %v5297_v36 = vpop.f32.mrf.mxu1 }
 0x161   : > { %v2579_v29 = vadd.f32 %v5296_v35, %v7268_v17 }
 0x162   : > { %v2758_v8 = vpop.f32.mrf.mxu0  ;;  %v5298_v60 = vpop.f32.mrf.mxu1 }
 0x163   : > { %v5299_v47 = vadd.f32 %v5298_v60, %v5297_v36  ;;  %v7609_v14 = vadd.f32 %v2739_v51, %v2579_v29 }
 0x164   : > { %v7607_v48 = vpop.f32.mrf.mxu0  ;;  %v5300_v32 = vpop.f32.mrf.mxu1 }
 0x165   : > { %v2582_v1 = vadd.f32 %v5299_v47, %v7284_v3 }
 0x166   : > { %v2771_v24 = vpop.f32.mrf.mxu0  ;;  %v5301_v44 = vpop.f32.mrf.mxu1 }
 0x167   : > { %v5302_v45 = vadd.f32 %v5301_v44, %v5300_v32  ;;  %v7614_v62 = vadd.f32 %v2742_v39, %v2582_v1 }
 0x168   : > { %v7612_v6 = vpop.f32.mrf.mxu0  ;;  %v5303_v52 = vpop.f32.mrf.mxu1 }
 0x169   : > { %v2587_v17 = vadd.f32 %v5302_v45, %v7260_v49  ;;  %v7971_v45 = vld [vmem:[#allocation2_spill] sm:$0xff] }
 0x16a   : > { %v2774_v55 = vpop.f32.mrf.mxu0  ;;  %v5304_v63 = vpop.f32.mrf.mxu1 }
 0x16b   : > { %v5305_v5 = vadd.f32 %v5304_v63, %v5303_v52  ;;  %v7619_v51 = vadd.f32 %v5608_v13, %v2587_v17 }
 0x16c   : > { %v7617_v33 = vpop.f32.mrf.mxu0  ;;  %v5306_v0 = vpop.f32.mrf.mxu1 }
 0x16d   : > { %v2590_v3 = vadd.f32 %v5305_v5, %v7281_v57 }
 0x16e   : > { %v7622_v21 = vpop.f32.mrf.mxu0  ;;  %v5307_v37 = vpop.f32.mrf.mxu1 }
 0x16f   : > { %v5308_v15 = vadd.f32 %v5307_v37, %v5306_v0  ;;  %v7626_v61 = vadd.f32 %v5609_v53, %v2590_v3 }
 0x170   : > { %v7624_v42 = vpop.f32.mrf.mxu0  ;;  %v5309_v9 = vpop.f32.mrf.mxu1 }
 0x171   : > { %v2595_v49 = vadd.f32 %v5308_v15, %v7312_v2 }
 0x172   : > { %v7629_v39 = vpop.f32.mrf.mxu0  ;;  %v5310_v18 = vpop.f32.mrf.mxu1 }
 0x173   : > { %v5311_v26 = vadd.f32 %v5310_v18, %v5309_v9  ;;  %v7633_v38 = vadd.f32 %v2755_v19, %v2595_v49 }
 0x174   : > { %v7631_v13 = vpop.f32.mrf.mxu0  ;;  %v5312_v57 = vpop.f32.mrf.mxu1 }
 0x175   : > { %v2598_v34 = vadd.f32 %v5311_v26, %v7336_v56 }
 0x176   : > { %v7636_v7 = vpop.f32.mrf.mxu0  ;;  %v5313_v35 = vpop.f32.mrf.mxu1 }
 0x177   : > { %v5314_v36 = vadd.f32 %v5313_v35, %v5312_v57  ;;  %v7640_v29 = vadd.f32 %v2758_v8, %v2598_v34 }
 0x178   : > { %v7638_v53 = vpop.f32.mrf.mxu0  ;;  %v5315_v2 = vpop.f32.mrf.mxu1 }
 0x179   : > { %v2603_v60 = vadd.f32 %v5314_v36, %v7304_v54 }
 0x17a   : > { %v7643_v47 = vpop.f32.mrf.mxu0  ;;  %v5316_v32 = vpop.f32.mrf.mxu1 }
 0x17b   : > { %v5317_v1 = vadd.f32 %v5316_v32, %v5315_v2  ;;  %v7647_v44 = vadd.f32 %v5612_v59, %v2603_v60  ;;  %v7976_v2 = vld [vmem:[#allocation3_spill] sm:$0xff] }
 0x17c   : > { %v7645_v19 = vpop.f32.mrf.mxu0  ;;  %v5318_v56 = vpop.f32.mrf.mxu1 }
 0x17d   : > { %7970 = vst [vmem:[#allocation9_spill] sm:$0xff] %v7645_v19  ;;  %v2606_v52 = vadd.f32 %v5317_v1, %v7971_v45 }
 0x17e   : > { %v7650_v17 = vpop.f32.mrf.mxu0  ;;  %v5319_v63 = vpop.f32.mrf.mxu1 }
 0x17f   : > { %v5320_v5 = vadd.f32 %v5319_v63, %v5318_v56  ;;  %v7654_v0 = vadd.f32 %v5613_v40, %v2606_v52 }
 0x180   : > { %v7652_v8 = vpop.f32.mrf.mxu0  ;;  %v5321_v54 = vpop.f32.mrf.mxu1 }
 0x181   : > { %7972 = vst [vmem:[#allocation2_spill] sm:$0xff] %v7652_v8  ;;  %v2611_v3 = vadd.f32 %v5320_v5, %v7359_v28 }
 0x182   : > { %v7657_v37 = vpop.f32.mrf.mxu0  ;;  %v5322_v15 = vpop.f32.mrf.mxu1 }
 0x183   : > { %v5323_v9 = vadd.f32 %v5322_v15, %v5321_v54  ;;  %v7661_v49 = vadd.f32 %v2771_v24, %v2611_v3 }
 0x184   : > { %v7659_v59 = vpop.f32.mrf.mxu0  ;;  %v5324_v18 = vpop.f32.mrf.mxu1 }
 0x185   : > { %7973 = vst [vmem:[#allocation10_spill] sm:$0xff] %v7659_v59  ;;  %v2614_v26 = vadd.f32 %v5323_v9, %v7385_v12  ;;  %v7977_v12 = vld [vmem:[#allocation4_spill] sm:$0xff]  ;;  %v7978_v9 = vld [vmem:[#allocation5_spill] sm:$0xff] }
 0x186   : > { %v7664_v57 = vpop.f32.mrf.mxu0  ;;  %v5325_v34 = vpop.f32.mrf.mxu1 }
 0x187   : > { %7974 = vst [vmem:[#allocation11_spill] sm:$0xff] %v7664_v57  ;;  %v5326_v35 = vadd.f32 %v5325_v34, %v5324_v18  ;;  %v7668_v36 = vadd.f32 %v2774_v55, %v2614_v26 }
 0x188   : > { %v7666_v40 = vpop.f32.mrf.mxu0  ;;  %v5327_v28 = vpop.f32.mrf.mxu1 }
 0x189   : > { %7975 = vst [vmem:[#allocation12_spill] sm:$0xff] %v7666_v40  ;;  %v2619_v60 = vadd.f32 %v5326_v35, %v7976_v2  ;;  %v7982_v40 = vld [vmem:[#allocation8_spill] sm:$0xff] }
 0x18a   : > { %v7671_v32 = vpop.f32.mrf.mxu0  ;;  %v5328_v1 = vpop.f32.mrf.mxu1 }
 0x18b   : > { %v5329_v56 = vadd.f32 %v5328_v1, %v5327_v28  ;;  %v7674_v24 = vadd.f32 %v7607_v48, %v2619_v60  ;;  %v7979_v60 = vld [vmem:[#allocation6_spill] sm:$0xff] }
 0x18c   : > { %v5330_v45 = vpop.f32.mrf.mxu1  ;;  %v7677_v63 = vpop.f32.mrf.mxu0 }
 0x18d   : > { %v2622_v52 = vadd.f32 %v5329_v56, %v7977_v12 }
 0x18e   : > { %v5331_v5 = vpop.f32.mrf.mxu1  ;;  %v7679_v3 = vpop.f32.mrf.mxu0 }
 0x18f   : > { %v5332_v54 = vadd.f32 %v5331_v5, %v5330_v45  ;;  %v7682_v55 = vadd.f32 %v7612_v6, %v2622_v52 }
 0x190   : > { %v5333_v15 = vpop.f32.mrf.mxu1  ;;  %v7685_v26 = vpop.f32.mrf.mxu0 }
 0x191   : > { %v2627_v18 = vadd.f32 %v5332_v54, %v7978_v9  ;;  %v7981_v54 = vld [vmem:[#allocation7_spill] sm:$0xff] }
 0x192   : > { %v5334_v34 = vpop.f32.mrf.mxu1  ;;  %v7687_v35 = vpop.f32.mrf.mxu0 }
 0x193   : > { %v5335_v48 = vadd.f32 %v5334_v34, %v5333_v15  ;;  %v7690_v28 = vadd.f32 %v7622_v21, %v2627_v18 }
 0x194   : > { %v5336_v2 = vpop.f32.mrf.mxu1  ;;  %v7693_v56 = vpop.f32.mrf.mxu0 }
 0x195   : > { %v2630_v1 = vadd.f32 %v5335_v48, %v7979_v60 }
 0x196   : > { %v5337_v45 = vpop.f32.mrf.mxu1  ;;  %v7695_v12 = vpop.f32.mrf.mxu0 }
 0x197   : > { %v5338_v6 = vadd.f32 %v5337_v45, %v5336_v2  ;;  %v7698_v52 = vadd.f32 %v7629_v39, %v2630_v1 }
 0x198   : > { %v5339_v5 = vpop.f32.mrf.mxu1  ;;  %v7701_v9 = vpop.f32.mrf.mxu0 }
 0x199   : > { %7980 = vst [vmem:[#allocation3_spill] sm:$0xff] %v7698_v52  ;;  %v2635_v15 = vadd.f32 %v5338_v6, %v7981_v54 }
 0x19a   : > { %v5340_v34 = vpop.f32.mrf.mxu1  ;;  %v7703_v18 = vpop.f32.mrf.mxu0 }
 0x19b   : > { %v5341_v21 = vadd.f32 %v5340_v34, %v5339_v5  ;;  %v7706_v48 = vadd.f32 %v7617_v33, %v2635_v15 }
 0x19c   : > { %v5342_v60 = vpop.f32.mrf.mxu1  ;;  %v7709_v59 = vpop.f32.mrf.mxu0 }
 0x19d   : > { %v2638_v2 = vadd.f32 %v5341_v21, %v7982_v40 }
 0x19e   : > { %v5343_v45 = vpop.f32.mrf.mxu1  ;;  %v7715_v57 = vpop.f32.mrf.mxu0 }
 0x19f   : > { %v5344_v39 = vadd.f32 %v5343_v45, %v5342_v60  ;;  %v7712_v1 = vadd.f32 %v7624_v42, %v2638_v2 }
 0x1a0   : > { %v5345_v6 = vpop.f32.mrf.mxu1  ;;  %v7717_v34 = vpop.f32.mrf.mxu0 }
 0x1a1   : > { %v2643_v54 = vadd.f32 %v5344_v39, %v7527_v41 }
 0x1a2   : > { %v5346_v5 = vpop.f32.mrf.mxu1  ;;  %v7723_v8 = vpop.f32.mrf.mxu0 }
 0x1a3   : > { %v5347_v33 = vadd.f32 %v5346_v5, %v5345_v6  ;;  %v7720_v15 = vadd.f32 %v7636_v7, %v2643_v54 }
 0x1a4   : > { %v5348_v40 = vpop.f32.mrf.mxu1 }
 0x1a5   : > { %7983 = vst [vmem:[#allocation4_spill] sm:$0xff] %v7720_v15  ;;  %v2646_v21 = vadd.f32 %v5347_v33, %v7545_v25 }
 0x1a6   : > { %v5349_v60 = vpop.f32.mrf.mxu1  ;;  %v7728_v45 = vpop.f32.mrf.mxu0 }
 0x1a7   : > { %v5350_v42 = vadd.f32 %v5349_v60, %v5348_v40  ;;  %v7726_v2 = vadd.f32 %v7643_v47, %v2646_v21 }
 0x1a8   : > { %v5351_v41 = vpop.f32.mrf.mxu1  ;;  %v7731_v6 = vpop.f32.mrf.mxu0 }
 0x1a9   : > { %7984 = vst [vmem:[#allocation5_spill] sm:$0xff] %v7726_v2  ;;  %v2651_v39 = vadd.f32 %v5350_v42, %v7578_v30 }
 0x1aa   : > { %v5352_v19 = vpop.f32.mrf.mxu1  ;;  %v7736_v25 = vpop.f32.mrf.mxu0 }
 0x1ab   : > { %v5353_v7 = vadd.f32 %v5352_v19, %v5351_v41  ;;  %v7734_v54 = vadd.f32 %v7631_v13, %v2651_v39 }
 0x1ac   : > { %v5354_v33 = vpop.f32.mrf.mxu1  ;;  %v7739_v40 = vpop.f32.mrf.mxu0 }
 0x1ad   : > { %7985 = vst [vmem:[#allocation6_spill] sm:$0xff] %v7734_v54  ;;  %v2654_v5 = vadd.f32 %v5353_v7, %v7591_v23 }
 0x1ae   : > { %v5355_v21 = vpop.f32.mrf.mxu1  ;;  %v7744_v30 = vpop.f32.mrf.mxu0 }
 0x1af   : > { %v7742_v47 = vadd.f32 %v7638_v53, %v2654_v5  ;;  %v5356_v60 = vadd.f32 %v5355_v21, %v5354_v33 }
 0x1b0   : > { %v5357_v42 = vpop.f32.mrf.mxu1  ;;  %v7747_v41 = vpop.f32.mrf.mxu0 }
 0x1b1   : > { %7986 = vst [vmem:[#allocation7_spill] sm:$0xff] %v7742_v47  ;;  %v2659_v19 = vadd.f32 %v5356_v60, %v7509_v58 }
 0x1b2   : > { %v5358_v13 = vpop.f32.mrf.mxu1  ;;  %v7752_v23 = vpop.f32.mrf.mxu0 }
 0x1b3   : > { %v5359_v39 = vadd.f32 %v5358_v13, %v5357_v42  ;;  %v7750_v2 = vadd.f32 %v7650_v17, %v2659_v19 }
 0x1b4   : > { %v7755_v5 = vpop.f32.mrf.mxu0 }
 0x1b5   : > { %7987 = vst [vmem:[#allocation8_spill] sm:$0xff] %v7750_v2  ;;  %v2662_v7 = vadd.f32 %v5359_v39, %v7530_v43  ;;  %v5360_v53 = vpop.f32.mrf.mxu1 }
 0x1b7   : > { %v5361_v33 = vpop.f32.mrf.mxu1  ;;  %v7758_v21 = vadd.f32 %v7657_v37, %v2662_v7 }
 0x1b8   : > { %v5362_v47 = vadd.f32 %v5361_v33, %v5360_v53 }
 0x1b9   : > { %7988 = vst [vmem:[#allocation13_spill] sm:$0xff] %v7758_v21  ;;  %v5363_v58 = vpop.f32.mrf.mxu1 }
 0x1ba   : > { %v7761_v60 = vadd.f32 %v5362_v47, %v7494_v22  ;;  %v7763_v42 = vpop.f32.mrf.mxu0 }
 0x1bb   : > { %v5364_v17 = vpop.f32.mrf.mxu1 }
 0x1bc   : > { %7989 = vst [vmem:[#allocation14_spill] sm:$0xff] %v7761_v60  ;;  %v5365_v19 = vadd.f32 %v5364_v17, %v5363_v58  ;;  %v7765_v13 = vpop.f32.mrf.mxu0 }
 0x1be   : > { %v7768_v43 = vadd.f32 %v5365_v19, %v7512_v46  ;;  %v7770_v39 = vpop.f32.mrf.mxu0 }
 0x1c0   : > { %7990 = vst [vmem:[#allocation15_spill] sm:$0xff] %v7768_v43  ;;  %v7772_v15 = vpop.f32.mrf.mxu0 }
 0x1c1   : > { %v5366_v2 = vpop.f32.mrf.mxu1 }
 0x1c3   : > { %v5367_v37 = vpop.f32.mrf.mxu1 }
 0x1c4   : > { %v5368_v7 = vadd.f32 %v5367_v37, %v5366_v2  ;;  %v7774_v33 = vpop.f32.mrf.mxu0 }
 0x1c5   : > { %v5369_v53 = vpop.f32.mrf.mxu1 }
 0x1c6   : > { %v7777_v22 = vadd.f32 %v5368_v7, %v7568_v10  ;;  %v7779_v58 = vpop.f32.mrf.mxu0 }
 0x1c7   : > { %v5370_v47 = vpop.f32.mrf.mxu1 }
 0x1c8   : > { %7991 = vst [vmem:[#allocation16_spill] sm:$0xff] %v7777_v22  ;;  %v5371_v17 = vadd.f32 %v5370_v47, %v5369_v53  ;;  %v7781_v21 = vpop.f32.mrf.mxu0 }
 0x1ca   : > { %v2678_v46 = vadd.f32 %v5371_v17, %v7582_v31  ;;  %v7784_v19 = vpop.f32.mrf.mxu0  ;;  %v5372_v43 = vpop.f32.mrf.mxu1 }
 0x1cc   : > { %v7787_v60 = vadd.f32 %v7671_v32, %v2678_v46  ;;  %v5373_v2 = vpop.f32.mrf.mxu1  ;;  %v5420_v32 = vadd.f32 %v7679_v3, %v7677_v63  ;;  %v5423_v63 = vadd.f32 %v7687_v35, %v7685_v26 }
 0x1cd   : > { %v5374_v37 = vadd.f32 %v5373_v2, %v5372_v43  ;;  %v5426_v43 = vadd.f32 %v7695_v12, %v7693_v56 }
 0x1ce   : > { %7992 = vst [vmem:[#allocation17_spill] sm:$0xff] %v7787_v60  ;;  %v5375_v10 = vpop.f32.mrf.mxu1 }
 0x1cf   : > { %v7789_v54 = vpop.f32.mrf.mxu0  ;;  %v7792_v7 = vadd.f32 %v5374_v37, %v7560_v27  ;;  %v5429_v37 = vadd.f32 %v7703_v18, %v7701_v9 }
 0x1d0   : > { %v5376_v53 = vpop.f32.mrf.mxu1 }
 0x1d1   : > { %7993 = vst [vmem:[#allocation18_spill] sm:$0xff] %v7792_v7  ;;  %v7794_v22 = vpop.f32.mrf.mxu0  ;;  %v5377_v47 = vadd.f32 %v5376_v53, %v5375_v10 }
 0x1d3   : > { %v7796_v31 = vpop.f32.mrf.mxu0  ;;  %v5652_v17 = vpop.f32.mrf.mxu1  ;;  %v7803_v46 = vadd.f32 %v5377_v47, %v7571_v11 }
 0x1d4   : > { %v4063_v60 = vadd.f32 %v5652_v17, %v5426_v43  ;;  %v5438_v43 = vadd.f32 %v7731_v6, %v7728_v45 }
 0x1d5   : > { %7994 = vst [vmem:[#allocation19_spill] sm:$0xff] %v7803_v46  ;;  %v7805_v2 = vpop.f32.mrf.mxu0  ;;  %v4054_v27 = vpop.f32.mrf.mxu1 }
 0x1d6   : > { %v4055_v10 = vadd.f32 %v5420_v32, %v4054_v27  ;;  %v4183_v12 = vadd.f32 %v4063_v60, %v7601_v4  ;;  %v5432_v4 = vadd.f32 %v7715_v57, %v7709_v59  ;;  %v5435_v59 = vadd.f32 %v7723_v8, %v7717_v34 }
 0x1d7   : > { %v7809_v53 = vpop.f32.mrf.mxu0  ;;  %v5653_v7 = vpop.f32.mrf.mxu1  ;;  %v5441_v57 = vadd.f32 %v7739_v40, %v7736_v25 }
 0x1d8   : > { %v4066_v3 = vadd.f32 %v5653_v7, %v5429_v37  ;;  %v4181_v47 = vadd.f32 %v4055_v10, %v7595_v50  ;;  %v4253_v10 = vmul.f32 %v4183_v12, %v4183_v12 }
 0x1d9   : > { %v7814_v56 = vpop.f32.mrf.mxu0  ;;  %v4057_v11 = vpop.f32.mrf.mxu1 }
 0x1da   : > { %v4184_v46 = vadd.f32 %v4066_v3, %v7604_v20  ;;  %v4058_v9 = vadd.f32 %v5423_v63, %v4057_v11  ;;  %v4251_v20 = vmul.f32 %v4181_v47, %v4181_v47 }
 0x1db   : > { %v7819_v18 = vpop.f32.mrf.mxu0 }
 0x1dc   : > { %v5043_v26 = vpack.c.bf16 %v4184_v46, %v4183_v12  ;;  %v4182_v35 = vadd.f32 %v4058_v9, %v7597_v16 }
 0x1dd   : > { %v7829_v60 = vpop.f32.mrf.mxu0 }
 0x1de   : > { %5115 = vst [vmem:[%s7824_s19 + $0x8] sm:$0xff] %v5043_v26   ;;  %v4213_v7 = vadd.f32 %v4182_v35, %v4181_v47  ;;  %v4252_v17 = vmul.f32 %v4182_v35, %v4182_v35  ;;  %v5038_v32 = vpack.c.bf16 %v4182_v35, %v4181_v47  ;;  %v4254_v26 = vmul.f32 %v4184_v46, %v4184_v46 }
 0x1df   : > { %v5656_v50 = vpop.f32.mrf.mxu1  ;;  %v7834_v27 = vpop.f32.mrf.mxu0 }
 0x1e0   : > { %v4214_v63 = vadd.f32 %v4213_v7, %v4183_v12  ;;  %v4283_v16 = vadd.f32 %v4252_v17, %v4251_v20  ;;  %5039 = vst [vmem:[%s7824_s19] sm:$0xff] %v5038_v32   ;;  %v4079_v11 = vadd.f32 %v5656_v50, %v5438_v43 }
 0x1e1   : > { %v4070_v37 = vpop.f32.mrf.mxu1  ;;  %v7841_v9 = vpop.f32.mrf.mxu0 }
 0x1e2   : > { %v4071_v3 = vadd.f32 %v5432_v4, %v4070_v37  ;;  %v4284_v45 = vadd.f32 %v4283_v16, %v4253_v10  ;;  %v4215_v35 = vadd.f32 %v4214_v63, %v4184_v46  ;;  %v4187_v34 = vadd.f32 %v4079_v11, %v7619_v51 }
 0x1e3   : > { %v5657_v47 = vpop.f32.mrf.mxu1  ;;  %v7844_v52 = vpop.f32.mrf.mxu0  ;;  %v5450_v37 = vadd.f32 %v7765_v13, %v7763_v42  ;;  %v5444_v51 = vadd.f32 %v7747_v41, %v7744_v30  ;;  %v5447_v42 = vadd.f32 %v7755_v5, %v7752_v23  ;;  %v5462_v5 = vadd.f32 %v7794_v22, %v7789_v54 }
 0x1e4   : > { %v4185_v6 = vadd.f32 %v4071_v3, %v7609_v14  ;;  %v4082_v12 = vadd.f32 %v5657_v47, %v5441_v57  ;;  %v4285_v17 = vadd.f32 %v4284_v45, %v4254_v26 }
 0x1e5   : > { %v4073_v20 = vpop.f32.mrf.mxu1  ;;  %v7848_v40 = vpop.f32.mrf.mxu0 }
 0x1e6   : > { %v4216_v4 = vadd.f32 %v4215_v35, %v4185_v6  ;;  %v4255_v7 = vmul.f32 %v4185_v6, %v4185_v6  ;;  %v4074_v8 = vadd.f32 %v5435_v59, %v4073_v20  ;;  %v4188_v25 = vadd.f32 %v4082_v12, %v7626_v61 }
 0x1e7   : > { %v5453_v61 = vadd.f32 %v7772_v15, %v7770_v39  ;;  %v4257_v59 = vmul.f32 %v4187_v34, %v4187_v34 }
 0x1e8   : > { %v4286_v50 = vadd.f32 %v4285_v17, %v4255_v7  ;;  %v4186_v32 = vadd.f32 %v4074_v8, %v7614_v62  ;;  %v5053_v14 = vpack.c.bf16 %v4188_v25, %v4187_v34  ;;  %v7851_v46 = vpop.f32.mrf.mxu0  ;;  %v4258_v30 = vmul.f32 %v4188_v25, %v4188_v25 }
 0x1ea   : > { %v5660_v43 = vpop.f32.mrf.mxu1  ;;  %v4217_v10 = vadd.f32 %v4216_v4, %v4186_v32  ;;  %v4256_v63 = vmul.f32 %v4186_v32, %v4186_v32  ;;  %v5048_v16 = vpack.c.bf16 %v4186_v32, %v4185_v6  ;;  %5117 = vst [vmem:[%s7824_s19 + $0x18] sm:$0xff] %v5053_v14   ;;  %v7860_v3 = vpop.f32.mrf.mxu0  ;;  %v5456_v32 = vadd.f32 %v7779_v58, %v7774_v33 }
 0x1eb   : > { %v4095_v47 = vadd.f32 %v5660_v43, %v5450_v37 }
 0x1ec   : > { %v4086_v62 = vpop.f32.mrf.mxu1  ;;  %v4218_v57 = vadd.f32 %v4217_v10, %v4187_v34  ;;  %v4287_v11 = vadd.f32 %v4286_v50, %v4256_v63  ;;  %5116 = vst [vmem:[%s7824_s19 + $0x10] sm:$0xff] %v5048_v16   ;;  %v7865_v26 = vpop.f32.mrf.mxu0 }
 0x1ed   : > { %v4087_v13 = vadd.f32 %v5444_v51, %v4086_v62  ;;  %v4191_v20 = vadd.f32 %v4095_v47, %v7647_v44 }
 0x1ee   : > { %v5661_v45 = vpop.f32.mrf.mxu1  ;;  %v4288_v41 = vadd.f32 %v4287_v11, %v4257_v59  ;;  %v4219_v6 = vadd.f32 %v4218_v57, %v4188_v25  ;;  %v7868_v35 = vpop.f32.mrf.mxu0 }
 0x1ef   : > { %v4098_v15 = vadd.f32 %v5661_v45, %v5453_v61  ;;  %v4189_v39 = vadd.f32 %v4087_v13, %v7633_v38  ;;  %v4261_v51 = vmul.f32 %v4191_v20, %v4191_v20 }
 0x1f0   : > { %v4089_v12 = vpop.f32.mrf.mxu1  ;;  %v4289_v4 = vadd.f32 %v4288_v41, %v4258_v30 }
 0x1f1   : > { %v4192_v7 = vadd.f32 %v4098_v15, %v7654_v0  ;;  %v4090_v23 = vadd.f32 %v5447_v42, %v4089_v12  ;;  %v4220_v17 = vadd.f32 %v4219_v6, %v4189_v39  ;;  %v4259_v8 = vmul.f32 %v4189_v39, %v4189_v39  ;;  %v7875_v38 = vpop.f32.mrf.mxu0 }
 0x1f2   : > { %v5664_v34 = vpop.f32.mrf.mxu1  ;;  %v5465_v0 = vadd.f32 %v7805_v2, %v7796_v31 }
 0x1f3   : > { %v5063_v25 = vpack.c.bf16 %v4192_v7, %v4191_v20  ;;  %v4190_v50 = vadd.f32 %v4090_v23, %v7640_v29  ;;  %v4290_v44 = vadd.f32 %v4289_v4, %v4259_v8  ;;  %v4111_v14 = vadd.f32 %v5664_v34, %v5462_v5  ;;  %v5485_v10 = vpop.f32.mrf.mxu0 }
 0x1f4   : > { %v4102_v43 = vpop.f32.mrf.mxu1  ;;  %v5459_v29 = vadd.f32 %v7784_v19, %v7781_v21  ;;  %v4262_v59 = vmul.f32 %v4192_v7, %v4192_v7  ;;  %v5468_v4 = vadd.f32 %v7814_v56, %v7809_v53 }
 0x1f5   : > { %5119 = vst [vmem:[%s7824_s19 + $0x28] sm:$0xff] %v5063_v25   ;;  %v4221_v54 = vadd.f32 %v4220_v17, %v4190_v50  ;;  %v4260_v22 = vmul.f32 %v4190_v50, %v4190_v50  ;;  %v5058_v37 = vpack.c.bf16 %v4190_v50, %v4189_v39  ;;  %v4103_v63 = vadd.f32 %v5456_v32, %v4102_v43  ;;  %v5487_v58 = vpop.f32.mrf.mxu0 }
 0x1f6   : > { %v5665_v16 = vpop.f32.mrf.mxu1  ;;  %v4195_v31 = vadd.f32 %v4111_v14, %v7674_v24 }
 0x1f7   : > { %v4222_v61 = vadd.f32 %v4221_v54, %v4191_v20  ;;  %v4291_v33 = vadd.f32 %v4290_v44, %v4260_v22  ;;  %5118 = vst [vmem:[%s7824_s19 + $0x20] sm:$0xff] %v5058_v37   ;;  %v4114_v62 = vadd.f32 %v5665_v16, %v5465_v0  ;;  %v4193_v2 = vadd.f32 %v4103_v63, %v7661_v49  ;;  %v5488_v21 = vpop.f32.mrf.mxu0  ;;  %v7995_v16 = vld [vmem:[#allocation3_spill] sm:$0xff] }
 0x1f8   : > { %v4105_v57 = vpop.f32.mrf.mxu1  ;;  %v5474_v49 = vadd.f32 %v7841_v9, %v7834_v27  ;;  %v4265_v5 = vmul.f32 %v4195_v31, %v4195_v31  ;;  %v5471_v27 = vadd.f32 %v7829_v60, %v7819_v18  ;;  %v5486_v18 = vadd.f32 %v5485_v10, %v7875_v38 }
 0x1f9   : > { %v4292_v11 = vadd.f32 %v4291_v33, %v4261_v51  ;;  %v4223_v47 = vadd.f32 %v4222_v61, %v4192_v7  ;;  %v4196_v42 = vadd.f32 %v4114_v62, %v7682_v55  ;;  %v4106_v19 = vadd.f32 %v5459_v29, %v4105_v57 }
 0x1fa   : > { %v4263_v45 = vmul.f32 %v4193_v2, %v4193_v2  ;;  %v5477_v7 = vadd.f32 %v7848_v40, %v7844_v52  ;;  %v5483_v10 = vadd.f32 %v7868_v35, %v7865_v26 }
 0x1fb   : > { %v4224_v13 = vadd.f32 %v4223_v47, %v4193_v2  ;;  %v4293_v30 = vadd.f32 %v4292_v11, %v4262_v59  ;;  %v5073_v41 = vpack.c.bf16 %v4196_v42, %v4195_v31  ;;  %v4194_v6 = vadd.f32 %v4106_v19, %v7668_v36  ;;  %v7890_v39 = vpop.f32.mrf.mxu0 }
 0x1fc   : > { %v4266_v32 = vmul.f32 %v4196_v42, %v4196_v42  ;;  %v5489_v59 = vadd.f32 %v5488_v21, %v5487_v58  ;;  %v7997_v58 = vld [vmem:[#allocation4_spill] sm:$0xff] }
 0x1fd   : > { %v4294_v15 = vadd.f32 %v4293_v30, %v4263_v45  ;;  %5121 = vst [vmem:[%s7824_s19 + $0x38] sm:$0xff] %v5073_v41   ;;  %v5668_v24 = vpop.f32.mrf.mxu1  ;;  %v4225_v12 = vadd.f32 %v4224_v13, %v4194_v6  ;;  %v4264_v20 = vmul.f32 %v4194_v6, %v4194_v6  ;;  %v5068_v55 = vpack.c.bf16 %v4194_v6, %v4193_v2  ;;  %v7898_v23 = vpop.f32.mrf.mxu0  ;;  %v7996_v45 = vld [vmem:[#allocation6_spill] sm:$0xff] }
 0x1fe   : > { %v4127_v34 = vadd.f32 %v5668_v24, %v5474_v49  ;;  %v7998_v24 = vld [vmem:[#allocation7_spill] sm:$0xff] }
 0x1ff   : > { %v4118_v36 = vpop.f32.mrf.mxu1  ;;  %v4226_v17 = vadd.f32 %v4225_v12, %v4195_v31  ;;  %v4295_v8 = vadd.f32 %v4294_v15, %v4264_v20  ;;  %5120 = vst [vmem:[%s7824_s19 + $0x30] sm:$0xff] %v5068_v55   ;;  %v7903_v25 = vpop.f32.mrf.mxu0 }
 0x200   : > { %v4119_v9 = vadd.f32 %v5468_v4, %v4118_v36  ;;  %v4199_v43 = vadd.f32 %v4127_v34, %v7706_v48  ;;  %v5492_v34 = vadd.f32 %v7898_v23, %v7890_v39 }
 0x201   : > { %v5669_v50 = vpop.f32.mrf.mxu1  ;;  %v4296_v53 = vadd.f32 %v4295_v8, %v4265_v5  ;;  %v4227_v56 = vadd.f32 %v4226_v17, %v4196_v42  ;;  %v5494_v40 = vpop.f32.mrf.mxu0  ;;  %v7999_v5 = vld [vmem:[#allocation5_spill] sm:$0xff] }
 0x202   : > { %v4130_v44 = vadd.f32 %v5669_v50, %v5477_v7  ;;  %v4197_v52 = vadd.f32 %v4119_v9, %v7690_v28  ;;  %v5480_v28 = vadd.f32 %v7860_v3, %v7851_v46  ;;  %v4269_v47 = vmul.f32 %v4199_v43, %v4199_v43 }
 0x203   : > { %v4121_v14 = vpop.f32.mrf.mxu1  ;;  %v4297_v0 = vadd.f32 %v4296_v53, %v4266_v32 }
 0x204   : > { %v4200_v54 = vadd.f32 %v4130_v44, %v7712_v1  ;;  %v4122_v22 = vadd.f32 %v5471_v27, %v4121_v14  ;;  %v4228_v60 = vadd.f32 %v4227_v56, %v4197_v52  ;;  %v4267_v37 = vmul.f32 %v4197_v52, %v4197_v52  ;;  %v5496_v61 = vpop.f32.mrf.mxu0 }
 0x205   : > { %v5672_v29 = vpop.f32.mrf.mxu1  ;;  %v5495_v14 = vadd.f32 %v5494_v40, %v7903_v25 }
 0x206   : > { %v5083_v63 = vpack.c.bf16 %v4200_v54, %v4199_v43  ;;  %v4198_v51 = vadd.f32 %v4122_v22, %v7995_v16  ;;  %v4298_v33 = vadd.f32 %v4297_v0, %v4267_v37  ;;  %v4143_v48 = vadd.f32 %v5672_v29, %v5486_v18  ;;  %v5497_v38 = vpop.f32.mrf.mxu0  ;;  %v8001_v0 = vld [vmem:[#allocation9_spill] sm:$0xff]  ;;  %v8002_v18 = vld [vmem:[#allocation15_spill] sm:$0xff] }
 0x207   : > { %v4134_v62 = vpop.f32.mrf.mxu1  ;;  %v4270_v13 = vmul.f32 %v4200_v54, %v4200_v54  ;;  %v5498_v12 = vadd.f32 %v5497_v38, %v5496_v61 }
 0x208   : > { %5123 = vst [vmem:[%s7824_s19 + $0x48] sm:$0xff] %v5083_v63   ;;  %v4229_v1 = vadd.f32 %v4228_v60, %v4198_v51  ;;  %v4268_v31 = vmul.f32 %v4198_v51, %v4198_v51  ;;  %v5078_v2 = vpack.c.bf16 %v4198_v51, %v4197_v52  ;;  %v4135_v57 = vadd.f32 %v5480_v28, %v4134_v62  ;;  %v5499_v46 = vpop.f32.mrf.mxu0  ;;  %v8003_v60 = vld [vmem:[#allocation2_spill] sm:$0xff] }
 0x209   : > { %v5673_v11 = vpop.f32.mrf.mxu1  ;;  %v4203_v30 = vadd.f32 %v4143_v48, %v7996_v45  ;;  %v2831_v37 = vadd.f32 %v8003_v60, %v8002_v18 }
 0x20a   : > { %v4230_v42 = vadd.f32 %v4229_v1, %v4199_v43  ;;  %v4299_v19 = vadd.f32 %v4298_v33, %v4268_v31  ;;  %5122 = vst [vmem:[%s7824_s19 + $0x40] sm:$0xff] %v5078_v2   ;;  %v4146_v3 = vadd.f32 %v5673_v11, %v5489_v59  ;;  %v4201_v21 = vadd.f32 %v4135_v57, %v7997_v58  ;;  %v5500_v26 = vpop.f32.mrf.mxu0  ;;  %v8000_v43 = vld [vmem:[#allocation14_spill] sm:$0xff]  ;;  %v8004_v33 = vld [vmem:[#allocation8_spill] sm:$0xff]  ;;  %v8005_v11 = vld [vmem:[#allocation13_spill] sm:$0xff] }
 0x20b   : > { %v4137_v41 = vpop.f32.mrf.mxu1  ;;  %v5501_v32 = vadd.f32 %v5500_v26, %v5499_v46  ;;  %v4273_v23 = vmul.f32 %v4203_v30, %v4203_v30 }
 0x20c   : > { %v4300_v6 = vadd.f32 %v4299_v19, %v4269_v47  ;;  %v4231_v15 = vadd.f32 %v4230_v42, %v4200_v54  ;;  %v4204_v49 = vadd.f32 %v4146_v3, %v7998_v24  ;;  %v4138_v35 = vadd.f32 %v5483_v10, %v4137_v41  ;;  %v8006_v41 = vld [vmem:[#allocation16_spill] sm:$0xff] }
 0x20d   : > { %v4271_v55 = vmul.f32 %v4201_v21, %v4201_v21  ;;  %v5502_v8 = vpop.f32.mrf.mxu0  ;;  %v2828_v54 = vadd.f32 %v8001_v0, %v8000_v43  ;;  %v8010_v0 = vld [vmem:[#allocation19_spill] sm:$0xff] }
 0x20e   : > { %v4232_v20 = vadd.f32 %v4231_v15, %v4201_v21  ;;  %v4301_v4 = vadd.f32 %v4300_v6, %v4270_v13  ;;  %v5093_v7 = vpack.c.bf16 %v4204_v49, %v4203_v30  ;;  %v4202_v17 = vadd.f32 %v4138_v35, %v7999_v5  ;;  %v8007_v6 = vld [vmem:[#allocation11_spill] sm:$0xff] }
 0x20f   : > { %v5676_v36 = vpop.f32.mrf.mxu1  ;;  %v5503_v52 = vpop.f32.mrf.mxu0  ;;  %v4274_v61 = vmul.f32 %v4204_v49, %v4204_v49  ;;  %v2836_v15 = vadd.f32 %v8007_v6, %v8006_v41 }
 0x210   : > { %v4302_v27 = vadd.f32 %v4301_v4, %v4271_v55  ;;  %5125 = vst [vmem:[%s7824_s19 + $0x58] sm:$0xff] %v5093_v7   ;;  %v4159_v9 = vadd.f32 %v5676_v36, %v5498_v12  ;;  %v4233_v53 = vadd.f32 %v4232_v20, %v4202_v17  ;;  %v4272_v56 = vmul.f32 %v4202_v17, %v4202_v17 }
 0x211   : > { %v4150_v50 = vpop.f32.mrf.mxu1  ;;  %v5088_v44 = vpack.c.bf16 %v4202_v17, %v4201_v21  ;;  %v5505_v16 = vpop.f32.mrf.mxu0  ;;  %v5504_v3 = vadd.f32 %v5503_v52, %v5502_v8 }
 0x212   : > { %v4151_v22 = vadd.f32 %v5492_v34, %v4150_v50  ;;  %v4234_v29 = vadd.f32 %v4233_v53, %v4203_v30  ;;  %v4303_v63 = vadd.f32 %v4302_v27, %v4272_v56  ;;  %v4207_v28 = vadd.f32 %v4159_v9, %v2828_v54  ;;  %v8008_v53 = vld [vmem:[#allocation18_spill] sm:$0xff]  ;;  %v8011_v54 = vld [vmem:[#allocation12_spill] sm:$0xff] }
 0x213   : > { %v5677_v39 = vpop.f32.mrf.mxu1  ;;  %5124 = vst [vmem:[%s7824_s19 + $0x50] sm:$0xff] %v5088_v44   ;;  %v5506_v1 = vpop.f32.mrf.mxu0  ;;  %v8009_v56 = vld [vmem:[#allocation10_spill] sm:$0xff] }
 0x214   : > { %v4162_v51 = vadd.f32 %v5677_v39, %v5501_v32  ;;  %v4205_v48 = vadd.f32 %v4151_v22, %v8004_v33  ;;  %v4304_v40 = vadd.f32 %v4303_v63, %v4273_v23  ;;  %v4235_v62 = vadd.f32 %v4234_v29, %v4204_v49 }
 0x215   : > { %v4153_v25 = vpop.f32.mrf.mxu1  ;;  %v4277_v58 = vmul.f32 %v4207_v28, %v4207_v28  ;;  %v5507_v17 = vadd.f32 %v5506_v1, %v5505_v16  ;;  %v2844_v44 = vadd.f32 %v8009_v56, %v8008_v53  ;;  %v2847_v22 = vadd.f32 %v8011_v54, %v8010_v0 }
 0x216   : > { %v4208_v59 = vadd.f32 %v4162_v51, %v2831_v37  ;;  %v4154_v31 = vadd.f32 %v5495_v14, %v4153_v25  ;;  %v4236_v2 = vadd.f32 %v4235_v62, %v4205_v48  ;;  %v4275_v38 = vmul.f32 %v4205_v48, %v4205_v48  ;;  %v8012_v37 = vld [vmem:[#allocation17_spill] sm:$0xff] }
 0x217   : > { %v4305_v10 = vadd.f32 %v4304_v40, %v4274_v61  ;;  %v5508_v19 = vpop.f32.mrf.mxu0 }
 0x218   : > { %v5103_v57 = vpack.c.bf16 %v4208_v59, %v4207_v28  ;;  %v4206_v47 = vadd.f32 %v4154_v31, %v8005_v11  ;;  %v5680_v46 = vpop.f32.mrf.mxu1  ;;  %v4278_v4 = vmul.f32 %v4208_v59, %v4208_v59 }
 0x219   : > { %v4306_v42 = vadd.f32 %v4305_v10, %v4275_v38  ;;  %v5509_v21 = vpop.f32.mrf.mxu0 }
 0x21a   : > { %5127 = vst [vmem:[%s7824_s19 + $0x68] sm:$0xff] %v5103_v57   ;;  %v4237_v13 = vadd.f32 %v4236_v2, %v4206_v47  ;;  %v4276_v45 = vmul.f32 %v4206_v47, %v4206_v47  ;;  %v5098_v30 = vpack.c.bf16 %v4206_v47, %v4205_v48  ;;  %v4166_v24 = vpop.f32.mrf.mxu1  ;;  %v5510_v35 = vadd.f32 %v5509_v21, %v5508_v19 }
 0x21b   : > { %v4167_v12 = vadd.f32 %v5504_v3, %v4166_v24  ;;  %v5511_v20 = vpop.f32.mrf.mxu0 }
 0x21c   : > { %v4238_v49 = vadd.f32 %v4237_v13, %v4207_v28  ;;  %v4307_v26 = vadd.f32 %v4306_v42, %v4276_v45  ;;  %5126 = vst [vmem:[%s7824_s19 + $0x60] sm:$0xff] %v5098_v30   ;;  %v5681_v55 = vpop.f32.mrf.mxu1  ;;  %v4175_v8 = vadd.f32 %v5680_v46, %v5510_v35 }
 0x21d   : > { %v4209_v36 = vadd.f32 %v4167_v12, %v2836_v15  ;;  %v5512_v34 = vpop.f32.mrf.mxu0 }
 0x21e   : > { %v4308_v7 = vadd.f32 %v4307_v26, %v4277_v58  ;;  %v4239_v5 = vadd.f32 %v4238_v49, %v4208_v59  ;;  %v4169_v27 = vpop.f32.mrf.mxu1  ;;  %v5513_v52 = vadd.f32 %v5512_v34, %v5511_v20  ;;  %v4211_v18 = vadd.f32 %v4175_v8, %v2844_v44 }
 0x21f   : > { %v4279_v50 = vmul.f32 %v4209_v36, %v4209_v36  ;;  %v4170_v14 = vadd.f32 %v5507_v17, %v4169_v27 }
 0x220   : > { %v4240_v9 = vadd.f32 %v4239_v5, %v4209_v36  ;;  %v4309_v32 = vadd.f32 %v4308_v7, %v4278_v4  ;;  %v4178_v60 = vadd.f32 %v5681_v55, %v5513_v52  ;;  %v4281_v51 = vmul.f32 %v4211_v18, %v4211_v18 }
 0x221   : > { %v4210_v39 = vadd.f32 %v4170_v14, %v8012_v37 }
 0x222   : > { %v4310_v43 = vadd.f32 %v4309_v32, %v4279_v50  ;;  %v4212_v23 = vadd.f32 %v4178_v60, %v2847_v22 }
 0x223   : > { %v4241_v29 = vadd.f32 %v4240_v9, %v4210_v39  ;;  %v4280_v63 = vmul.f32 %v4210_v39, %v4210_v39  ;;  %v5108_v16 = vpack.c.bf16 %v4210_v39, %v4209_v36 }
 0x224   : > { %v5113_v61 = vpack.c.bf16 %v4212_v23, %v4211_v18  ;;  %v4282_v48 = vmul.f32 %v4212_v23, %v4212_v23 }
 0x225   : > { %v4242_v28 = vadd.f32 %v4241_v29, %v4211_v18  ;;  %v4311_v33 = vadd.f32 %v4310_v43, %v4280_v63  ;;  %5128 = vst [vmem:[%s7824_s19 + $0x70] sm:$0xff] %v5108_v16  }
 0x226   : > { %5129 = vst [vmem:[%s7824_s19 + $0x78] sm:$0xff] %v5113_v61  }
 0x227   : > { %v4243_v25 = vadd.f32 %v4242_v28, %v4212_v23  ;;  %v4312_v40 = vadd.f32 %v4311_v33, %v4281_v51 }
 0x229   : > { %v4244_v62 = vrot.slane %v4243_v25, 4  ;;  %v4313_v59 = vadd.f32 %v4312_v40, %v4282_v48 }
 0x22b   : > { %v4245_v1 = vadd.f32 %v4244_v62, %v4243_v25  ;;  %v4314_v31 = vrot.slane %v4313_v59, 4 }
 0x22d   : > { %v4246_v2 = vrot.slane %v4245_v1, 2  ;;  %v4315_v38 = vadd.f32 %v4314_v31, %v4313_v59 }
 0x22f   : > { %v4247_v10 = vadd.f32 %v4246_v2, %v4245_v1  ;;  %v4316_v57 = vrot.slane %v4315_v38, 2 }
 0x231   : > { %v4248_v11 = vrot.slane %v4247_v10, 1  ;;  %v4317_v47 = vadd.f32 %v4316_v57, %v4315_v38 }
 0x233   : > { %v4249_v42 = vadd.f32 %v4248_v11, %v4247_v10  ;;  %v4318_v19 = vrot.slane %v4317_v47, 1 }
 0x235   : > { %4250 = vst [vmem:[%s181_s23] sm:$0x1] %v4249_v42  ;;  %v4319_v46 = vadd.f32 %v4318_v19, %v4317_v47 }
 0x237   : > { %4320 = vst [vmem:[%s181_s23 + $0x1] sm:$0x1] %v4319_v46 }
 0x238 PF: > { %s14_s12 = sadd.s32 1, %s5838_s12  }
 0x239   : > { %p11_p4 = scmp.ge.s32.totalorder %s14_s12, 4  }
 0x23b   :  { %13 = sbr.rel (!%p11_p4) target bundleno = 1 (0x1), region = 72 }

// kernel: resblock_forward.4
= control target key start
LH: loop header
LB: loop body
LE: loop exit
PB: predicated region body
PF: predicated region fallthrough
CT: control target
= control target key end

     0   :  { %s7332_s21 = smov 0   ;;  %s9805_s0 = inlined_call_operand.vmem [shape: bf16[2,18,18,128], index: 0, kind: input, shape index: {}]   ;;  %s9806_s1 = inlined_call_operand.vmem [shape: bf16[1152,128], index: 1, kind: input, shape index: {}]   ;;  %s9807_s2 = inlined_call_operand.vmem [shape: bf16[128,128], index: 2, kind: input, shape index: {}]   ;;  %s9808_s3 = inlined_call_operand.vmem [shape: bf16[2,256,128], index: 3, kind: output, shape index: {0}]   ;;  %s9809_s4 = inlined_call_operand.vmem [shape: bf16[2,256,128], index: 4, kind: output, shape index: {1}]   ;;  %s9810_s5 = inlined_call_operand.vmem [shape: f32[2,2,128], index: 5, kind: output, shape index: {2}]   ;;  %s9811_s6 = inlined_call_operand.vmem [shape: f32[2,2,128], index: 6, kind: output, shape index: {3}]  }
   0x1 LB: > { %s5723_s22 = sadd.s32 4294967295, %s7295_s21   ;;  %p5727_p0 = scmp.ge.s32.totalorder %s7295_s21, 1  ;;  %s7295_s21 = sphi %s7332_s21, %s17_s21  }
   0x2   : > { %p219_p1 = scmp.lt.s32.totalorder %s7295_s21, 3 }
   0x4   : > { %p220_p2 = pnand %p5727_p0, %p219_p1 }
   0x6   : > { %223 = sbr.rel (%p220_p2) target bundleno = 642 (0x282), region = 32 }
   0xb   : > { %v7154_v0 = vld [vmem:[%s9806_s1 + $0x138] sm:$0xff]   ;;  %v7157_v3 = vld [vmem:[%s9806_s1 + $0x130] sm:$0xff]   ;;  %v7160_v6 = vld [vmem:[%s9806_s1 + $0x128] sm:$0xff]   ;;  %p262_p3 = scmp.lt.s32.totalorder %s5723_s22, 1  ;;  %vm785_vm0 = vcmask 1042432   ;;  %vm786_vm1 = vcmask 1046532  }
   0xc   : > { %v7155_v1 = vld [vmem:[%s9806_s1 + $0x178] sm:$0xff]   ;;  %6521 = vmatprep.subr.bf16.mxu0 %v7154_v0  ;;  %v7158_v4 = vld [vmem:[%s9806_s1 + $0x170] sm:$0xff]   ;;  %v7161_v7 = vld [vmem:[%s9806_s1 + $0x168] sm:$0xff]   ;;  %vm334_vm2 = vsmask.f32 3328 }
   0xd   : > { %v7156_v2 = vld [vmem:[%s9806_s1 + $0xf8] sm:$0xff]   ;;  %6953 = vmatprep.subr.bf16.mxu1 %v7155_v1  ;;  %v7159_v5 = vld [vmem:[%s9806_s1 + $0xf0] sm:$0xff]   ;;  %v7162_v8 = vld [vmem:[%s9806_s1 + $0xe8] sm:$0xff]   ;;  %s9937_s22 = smov (!%p262_p3, %s5723_s22), 1  ;;  %vm335_vm3 = vsmask.f32 7440 }
   0xe   : > { %6522 = vmatpush3.bf16.msra.mxu0 %v7156_v2  ;;  %6954 = vmatpush3.bf16.msra.mxu1 %v7155_v1  ;;  %v7163_v9 = vld [vmem:[%s9806_s1 + $0x120] sm:$0xff]   ;;  %v7166_v12 = vld [vmem:[%s9806_s1 + $0x118] sm:$0xff]   ;;  %v7169_v15 = vld [vmem:[%s9806_s1 + $0x110] sm:$0xff]   ;;  %s7145_s11 = smul.u32 216, %s9937_s22  ;;  %s5733_s25 = sshll.u32 %s9937_s22, 1 }
   0xf   : > { %6523 = vmatprep.subr.bf16.mxu0 %v7157_v3  ;;  %6955 = vmatprep.subr.bf16.mxu1 %v7158_v4  ;;  %v7164_v10 = vld [vmem:[%s9806_s1 + $0x160] sm:$0xff]   ;;  %v7167_v13 = vld [vmem:[%s9806_s1 + $0x158] sm:$0xff]   ;;  %v7170_v16 = vld [vmem:[%s9806_s1 + $0x150] sm:$0xff]   ;;  %s280_s28 = scalar_lea.vmem %s9810_s5, %s5733_s25 }
  0x10   : > { %v7165_v11 = vld [vmem:[%s9806_s1 + $0xe0] sm:$0xff]   ;;  %v7168_v14 = vld [vmem:[%s9806_s1 + $0xd8] sm:$0xff]   ;;  %v7171_v17 = vld [vmem:[%s9806_s1 + $0xd0] sm:$0xff]   ;;  %s7410_s20 = scalar_lea.vmem %s9805_s0, %s7145_s11 }
  0x11   : > { %v7172_v18 = vld [vmem:[%s9806_s1 + $0x108] sm:$0xff]   ;;  %v7175_v21 = vld [vmem:[%s9806_s1 + $0x100] sm:$0xff]   ;;  %v7425_v24 = vld [vmem:[%s7410_s20 + $0x10] sm:$0xf] }
  0x12   : > { %6524 = vmatpush3.bf16.msra.mxu0 %v7159_v5  ;;  %6956 = vmatpush3.bf16.msra.mxu1 %v7158_v4  ;;  %v7173_v19 = vld [vmem:[%s9806_s1 + $0x148] sm:$0xff]   ;;  %v7176_v22 = vld [vmem:[%s9806_s1 + $0x140] sm:$0xff]   ;;  %v5831_v25 = vld [vmem:[%s7410_s20 + $0x14] sm:$0x1]  ;;  %v1215_v29 = vshll.u32 %v7425_v24, 16  ;;  %v1219_v30 = vshrl.u32 %v7425_v24, 16 }
  0x13   : > { %6525 = vmatprep.subr.bf16.mxu0 %v7160_v6  ;;  %6957 = vmatprep.subr.bf16.mxu1 %v7161_v7  ;;  %v7174_v20 = vld [vmem:[%s9806_s1 + $0xc8] sm:$0xff]   ;;  %v7177_v28 = vld [vmem:[%s9806_s1 + $0xc0] sm:$0xff]   ;;  %v1225_v31 = vshll.u32 %v5831_v25, 16  ;;  %vm7437_vm4 = vmor %vm785_vm0, %vm786_vm1  ;;  %v1655_v34 = vrot.slane %v7425_v24, 5  ;;  %v1658_v38 = vrot.slane %v5831_v25, 5 }
  0x14   : > { %v7422_v23 = vld [vmem:[%s7410_s20 + $0xc] sm:$0xf]  ;;  %v7444_v39 = vld [vmem:[%s7410_s20 + $0x1c] sm:$0xf]  ;;  %v1217_v40 = vrot.slane %v1215_v29, 5  ;;  %v1221_v41 = vrot.slane %v1219_v30, 4  ;;  %vm7456_vm5 = vmor %vm334_vm2, %vm335_vm3 }
  0x15   : > { %v1206_v26 = vshrl.u32 %v7422_v23, 16  ;;  %v1209_v27 = vshll.u32 %v7422_v23, 16  ;;  %v5847_v33 = vld [vmem:[%s7410_s20 + $0xc] sm:$0xe]  ;;  %v1227_v42 = vrot.slane %v1225_v31, 5  ;;  %v1657_v43 = vrot.slane %v1655_v34, 4 }
  0x16   : > { %6526 = vmatpush3.bf16.msra.mxu0 %v7162_v8  ;;  %6958 = vmatpush3.bf16.msra.mxu1 %v7161_v7  ;;  %v5863_v37 = vrot.slane %v5847_v33, 9  ;;  %v5832_v44 = vld [vmem:[%s7410_s20 + $0x20] sm:$0x1]  ;;  %v5848_v47 = vld [vmem:[%s7410_s20 + $0x18] sm:$0xe]  ;;  %v1662_v48 = vrot.slane %v7444_v39, 5  ;;  %v1222_v51 = vor.u32 %v1221_v41, %v1217_v40  ;;  %v5879_v61 = vcombine.low %v7422_v23, %v7425_v24 }
  0x17   : > { %6527 = vmatprep.subr.bf16.mxu0 %v7163_v9  ;;  %6959 = vmatprep.subr.bf16.mxu1 %v7164_v10  ;;  %v1208_v35 = vrot.slane %v1206_v26, 4  ;;  %v1211_v36 = vrot.slane %v1209_v27, 5  ;;  %v7179_v49 = vld [vmem:[%s9806_s1 + $0xb8] sm:$0xff]   ;;  %v1659_v52 = vsel %vm7437_vm4, %v1657_v43, %v1658_v38  ;;  %v5864_v53 = vrot.slane %v5848_v47, 9  ;;  %v7482_v5 = vld [vmem:[%s7410_s20 + $0x28] sm:$0xf] }
  0x18   : > { %v1656_v46 = vsel %vm7437_vm4, %v5863_v37, %v1655_v34  ;;  %v1665_v54 = vrot.slane %v5832_v44, 5  ;;  %v1664_v57 = vrot.slane %v1662_v48, 4  ;;  %v7180_v58 = vld [vmem:[%s9806_s1 + $0x78] sm:$0xff]   ;;  %v1223_v60 = vrot.slane %v1222_v51, 4  ;;  %v5850_v25 = vld [vmem:[%s7410_s20 + $0x30] sm:$0xe] }
  0x19   : > { %v1212_v45 = vor.u32 %v1211_v36, %v1208_v35  ;;  %v5911_v56 = vcombine.low %v1656_v46, %v1659_v52  ;;  %v7181_v59 = vld [vmem:[%s9806_s1 + $0x38] sm:$0xff]   ;;  %v1663_v62 = vsel %vm7437_vm4, %v5864_v53, %v1662_v48  ;;  %v1239_v63 = vshll.u32 %v7444_v39, 16  ;;  %v7184_v36 = vld [vmem:[%s9806_s1 + $0x30] sm:$0xff]   ;;  %v7518_v41 = vld [vmem:[%s7410_s20 + $0x24] sm:$0xf] }
  0x1a   : > { %6528 = vmatpush3.bf16.msra.mxu0 %v7165_v11  ;;  %6960 = vmatpush3.bf16.msra.mxu1 %v7164_v10  ;;  %v1666_v1 = vsel %vm7437_vm4, %v1664_v57, %v1665_v54  ;;  %v7478_v2 = vld [vmem:[%s7410_s20 + $0x18] sm:$0xf]  ;;  %v1243_v3 = vshrl.u32 %v7444_v39, 16  ;;  %v1249_v4 = vshll.u32 %v5832_v44, 16  ;;  %v1228_v6 = vsel %vm7456_vm5, %v1223_v60, %v1227_v42  ;;  %v7489_v10 = vld [vmem:[%s7410_s20 + $0x2c] sm:$0x1] }
  0x1b   : > { %6529 = vmatprep.subr.bf16.mxu0 %v7166_v12  ;;  %6961 = vmatprep.subr.bf16.mxu1 %v7167_v13  ;;  %v1213_v55 = vrot.slane %v1212_v45, 4  ;;  %v5912_v7 = vcombine.low %v1663_v62, %v1666_v1  ;;  %v1230_v8 = vshrl.u32 %v7478_v2, 16  ;;  %v1233_v9 = vshll.u32 %v7478_v2, 16  ;;  %v5849_v11 = vld [vmem:[%s7410_s20 + $0x24] sm:$0xe]  ;;  %v7187_v62 = vld [vmem:[%s9806_s1 + $0x68] sm:$0xff]  }
  0x1c   : > { %6969 = vmatprep.mubr.bf16.mxu1 %v5911_v56  ;;  %v1672_v24 = vrot.slane %v7489_v10, 5  ;;  %v5866_v30 = vrot.slane %v5850_v25, 9  ;;  %v5880_v33 = vcombine.low %v7478_v2, %v7444_v39  ;;  %v1263_v39 = vshll.u32 %v7482_v5, 16  ;;  %v7522_v42 = vld [vmem:[%s7410_s20 + $0x40] sm:$0xf] }
  0x1d   : > { %v1218_v0 = vsel %vm7456_vm5, %v1213_v55, %v1217_v40  ;;  %v1254_v46 = vshrl.u32 %v7518_v41, 16  ;;  %v7530_v47 = vld [vmem:[%s7410_s20 + $0x44] sm:$0x1]  ;;  %v5851_v48 = vld [vmem:[%s7410_s20 + $0x3c] sm:$0xe]  ;;  %v1257_v53 = vshll.u32 %v7518_v41, 16 }
  0x1e   : > { %6530 = vmatpush3.bf16.msra.mxu0 %v7168_v14  ;;  %6962 = vmatpush3.bf16.msra.mxu1 %v7167_v13  ;;  %v5895_v12 = vcombine.low %v1218_v0, %v1228_v6  ;;  %v1241_v13 = vrot.slane %v1239_v63, 5  ;;  %v1245_v14 = vrot.slane %v1243_v3, 4  ;;  %v1265_v54 = vrot.slane %v1263_v39, 5  ;;  %v7540_v55 = vld [vmem:[%s7410_s20 + $0x4c] sm:$0xf] }
  0x1f   : > { %6531 = vmatprep.subr.bf16.mxu0 %v7169_v15  ;;  %6963 = vmatprep.subr.bf16.mxu1 %v7170_v16  ;;  %v1251_v15 = vrot.slane %v1249_v4, 5  ;;  %v7543_v56 = vld [vmem:[%s7410_s20 + $0x50] sm:$0x1]  ;;  %v1273_v60 = vshll.u32 %v7489_v10, 16  ;;  %v1259_v63 = vrot.slane %v1257_v53, 5  ;;  %v5867_v0 = vrot.slane %v5851_v48, 9 }
  0x20   : > { %2197 = vmatprep.mubr.bf16.mxu0 %v5895_v12  ;;  %v1246_v23 = vor.u32 %v1245_v14, %v1241_v13  ;;  %v1683_v1 = vrot.slane %v7522_v42, 5  ;;  %v1686_v2 = vrot.slane %v7530_v47, 5  ;;  %v1693_v14 = vrot.slane %v7543_v56, 5  ;;  %v5854_v39 = vld [vmem:[%s7410_s20 + $0x60] sm:$0xe] }
  0x21   : > { %v1275_v4 = vrot.slane %v1273_v60, 5  ;;  %v7191_v48 = vld [vmem:[%s9806_s1 + $0x20] sm:$0xff]  }
  0x22   : > { %6532 = vmatpush3.bf16.msra.mxu0 %v7171_v17  ;;  %6964 = vmatpush3.bf16.msra.mxu1 %v7170_v16  ;;  %v7493_v16 = vld [vmem:[%s7410_s20 + $0x34] sm:$0xf]  ;;  %v1247_v31 = vrot.slane %v1246_v23, 4  ;;  %v1685_v10 = vrot.slane %v1683_v1, 4  ;;  %v7571_v23 = vld [vmem:[%s7410_s20 + $0x58] sm:$0xf] }
  0x23   : > { %6533 = vmatprep.subr.bf16.mxu0 %v7172_v18  ;;  %6965 = vmatprep.subr.bf16.mxu1 %v7173_v19  ;;  %v7183_v17 = vld [vmem:[%s9806_s1 + $0x70] sm:$0xff]   ;;  %v1232_v18 = vrot.slane %v1230_v8, 4  ;;  %v1676_v26 = vrot.slane %v7493_v16, 5 }
  0x24   : > { %v1252_v43 = vsel %vm7456_vm5, %v1247_v31, %v1251_v15  ;;  %v1287_v15 = vshll.u32 %v7493_v16, 16 }
  0x25   : > { %v1678_v34 = vrot.slane %v1676_v26, 4  ;;  %v1677_v40 = vsel %vm7437_vm4, %v5866_v30, %v1676_v26 }
  0x26   : > { %6534 = vmatpush3.bf16.msra.mxu0 %v7174_v20  ;;  %6966 = vmatpush3.bf16.msra.mxu1 %v7173_v19  ;;  %v1235_v19 = vrot.slane %v1233_v9, 5  ;;  %v5865_v20 = vrot.slane %v5849_v11, 9  ;;  %v1684_v9 = vsel %vm7437_vm4, %v5867_v0, %v1683_v1  ;;  %v1690_v11 = vrot.slane %v7540_v55, 5  ;;  %v7194_v0 = vld [vmem:[%s9806_s1 + $0x58] sm:$0xff]  }
  0x27   : > { %6535 = vmatprep.subr.bf16.mxu0 %v7175_v21  ;;  %6967 = vmatprep.subr.bf16.mxu1 %v7176_v22  ;;  %v1669_v21 = vrot.slane %v7482_v5, 5  ;;  %v1289_v31 = vrot.slane %v1287_v15, 5 }
  0x28   : > { %v1236_v27 = vor.u32 %v1235_v19, %v1232_v18  ;;  %v1687_v18 = vsel %vm7437_vm4, %v1685_v10, %v1686_v2 }
  0x29   : > { %v1671_v29 = vrot.slane %v1669_v21, 4 }
  0x2a   : > { %6536 = vmatpush3.bf16.msra.mxu0 %v7177_v28  ;;  %6968 = vmatpush3.bf16.msra.mxu1 %v7176_v22  ;;  %v7500_v22 = vld [vmem:[%s7410_s20 + $0x38] sm:$0x1]  ;;  %v1670_v28 = vsel %vm7437_vm4, %v5865_v20, %v1669_v21  ;;  %v1237_v37 = vrot.slane %v1236_v27, 4  ;;  %v1692_v20 = vrot.slane %v1690_v11, 4  ;;  %v7568_v21 = vld [vmem:[%s7410_s20 + $0x30] sm:$0xf] }
  0x2b   : > { %7001 = vmatprep.subr.bf16.mxu0 %v7179_v49  ;;  %6657 = vmatprep.subr.bf16.mxu1 %v7180_v58  ;;  %v1679_v35 = vrot.slane %v7500_v22, 5  ;;  %v1673_v38 = vsel %vm7437_vm4, %v1671_v29, %v1672_v24  ;;  %v1256_v58 = vrot.slane %v1254_v46, 4  ;;  %v5915_v24 = vcombine.low %v1684_v9, %v1687_v18  ;;  %v7576_v27 = vld [vmem:[%s7410_s20 + $0x5c] sm:$0x1] }
  0x2c   : > { %v5913_v44 = vcombine.low %v1670_v28, %v1673_v38  ;;  %v1242_v51 = vsel %vm7456_vm5, %v1237_v37, %v1241_v13  ;;  %v5881_v13 = vcombine.low %v7518_v41, %v7482_v5  ;;  %v1278_v25 = vshrl.u32 %v7568_v21, 16  ;;  %v7190_v28 = vld [vmem:[%s9806_s1 + $0x60] sm:$0xff]   ;;  %v7593_v41 = vld [vmem:[%s7410_s20 + $0x68] sm:$0x1] }
  0x2d   : > { %6970 = vmatmul.mubr.bf16.vlgmr.msra.gmra.mxu1 %v5912_v7  ;;  %2198 = vmatmul.mubr.bf16.vlgmr.msra.gmra.mxu0 %v5879_v61  ;;  %v1680_v45 = vsel %vm7437_vm4, %v1678_v34, %v1679_v35  ;;  %v5896_v57 = vcombine.low %v1242_v51, %v1252_v43  ;;  %v5852_v61 = vld [vmem:[%s7410_s20 + $0x48] sm:$0xe]  ;;  %v1260_v8 = vor.u32 %v1259_v63, %v1256_v58  ;;  %v1281_v26 = vshll.u32 %v7568_v21, 16  ;;  %v5853_v34 = vld [vmem:[%s7410_s20 + $0x54] sm:$0xe] }
  0x2e   : > { %6658 = vmatpush3.bf16.msra.mxu1 %v7181_v59  ;;  %7002 = vmatpush3.bf16.msra.mxu0 %v7179_v49  ;;  %v7186_v49 = vld [vmem:[%s9806_s1 + $0xb0] sm:$0xff]   ;;  %v5914_v52 = vcombine.low %v1677_v40, %v1680_v45  ;;  %v1267_v59 = vshrl.u32 %v7482_v5, 16  ;;  %v5868_v6 = vrot.slane %v5852_v61, 9  ;;  %v7188_v7 = vld [vmem:[%s9806_s1 + $0x28] sm:$0xff]   ;;  %v1694_v30 = vsel %vm7437_vm4, %v1692_v20, %v1693_v14  ;;  %v7588_v35 = vld [vmem:[%s7410_s20 + $0x64] sm:$0xf] }
  0x2f   : > { %6659 = vmatprep.subr.bf16.mxu1 %v7183_v17  ;;  %6973 = vmatprep.mubr.bf16.mxu1 %v5913_v44  ;;  %v1261_v17 = vrot.slane %v1260_v8, 4  ;;  %v1280_v38 = vrot.slane %v1278_v25, 4  ;;  %v1283_v40 = vrot.slane %v1281_v26, 5  ;;  %v1297_v45 = vshll.u32 %v7500_v22, 16  ;;  %v7612_v63 = vld [vmem:[%s7410_s20 + $0x3c] sm:$0xf] }
  0x30   : > { %7003 = vmatprep.subr.bf16.mxu0 %v7186_v49  ;;  %2205 = vmatprep.mubr.bf16.mxu0 %v5896_v57  ;;  %v1269_v3 = vrot.slane %v1267_v59, 4  ;;  %v1691_v19 = vsel %vm7437_vm4, %v5868_v6, %v1690_v11  ;;  %v5869_v46 = vrot.slane %v5853_v34, 9  ;;  %v1697_v51 = vrot.slane %v7571_v23, 5  ;;  %v7193_v59 = vld [vmem:[%s9806_s1 + $0xa8] sm:$0xff]   ;;  %v7621_v6 = vld [vmem:[%s7410_s20 + $0x70] sm:$0xf] }
  0x31   : > { %v1266_v29 = vsel %vm7456_vm5, %v1261_v17, %v1265_v54  ;;  %v5916_v37 = vcombine.low %v1691_v19, %v1694_v30  ;;  %v5882_v53 = vcombine.low %v7568_v21, %v7493_v16  ;;  %v1299_v57 = vrot.slane %v1297_v45, 5  ;;  %v7641_v19 = vld [vmem:[%s7410_s20 + $0x7c] sm:$0xf]  ;;  %v7644_v20 = vld [vmem:[%s7410_s20 + $0x80] sm:$0x1]  ;;  %v7197_v21 = vld [vmem:[%s9806_s1 + $0x50] sm:$0xff]  }
  0x32   : > { %6660 = vmatpush3.bf16.msra.mxu1 %v7184_v36  ;;  %7004 = vmatpush3.bf16.msra.mxu0 %v7186_v49  ;;  %v1270_v12 = vor.u32 %v1269_v3, %v1265_v54  ;;  %v1284_v49 = vor.u32 %v1283_v40, %v1280_v38  ;;  %v5870_v22 = vrot.slane %v5854_v39, 9  ;;  %v1704_v58 = vrot.slane %v7588_v35, 5 }
  0x33   : > { %6661 = vmatprep.subr.bf16.mxu1 %v7187_v62  ;;  %v1698_v61 = vsel %vm7437_vm4, %v5869_v46, %v1697_v51  ;;  %v1699_v62 = vrot.slane %v1697_v51, 4  ;;  %7005 = vmatprep.subr.bf16.mxu0 %v7193_v59  ;;  %v1305_v10 = vshll.u32 %v7612_v63, 16  ;;  %v1311_v11 = vshll.u32 %v7522_v42, 16 }
  0x34   : > { %v1271_v5 = vrot.slane %v1270_v12, 4  ;;  %v1285_v60 = vrot.slane %v1284_v49, 4  ;;  %v1705_v2 = vsel %vm7437_vm4, %v5870_v22, %v1704_v58  ;;  %v1706_v3 = vrot.slane %v1704_v58, 4  ;;  %v7633_v12 = vld [vmem:[%s7410_s20 + $0x74] sm:$0x1] }
  0x35   : > { %6974 = vmatmul.mubr.bf16.gmra.mxu1 %v5914_v52  ;;  %2206 = vmatmul.mubr.bf16.gmra.mxu0 %v5880_v33  ;;  %v1291_v33 = vshrl.u32 %v7493_v16, 16  ;;  %v1700_v52 = vrot.slane %v7576_v27, 5  ;;  %v1707_v16 = vrot.slane %v7593_v41, 5  ;;  %v1307_v25 = vrot.slane %v1305_v10, 5  ;;  %v7201_v10 = vld [vmem:[%s9806_s1 + $0x48] sm:$0xff]  }
  0x36   : > { %6662 = vmatpush3.bf16.msra.mxu1 %v7188_v7  ;;  %v1276_v36 = vsel %vm7456_vm5, %v1271_v5, %v1275_v4  ;;  %6977 = vmatprep.mubr.bf16.mxu1 %v5915_v24  ;;  %v1302_v4 = vshrl.u32 %v7612_v63, 16  ;;  %v7195_v7 = vld [vmem:[%s9806_s1 + $0x18] sm:$0xff]   ;;  %v1290_v8 = vsel %vm7456_vm5, %v1285_v60, %v1289_v31  ;;  %v1313_v26 = vrot.slane %v1311_v11, 5 }
  0x37   : > { %6663 = vmatprep.subr.bf16.mxu1 %v7190_v28  ;;  %v5897_v43 = vcombine.low %v1266_v29, %v1276_v36  ;;  %v1293_v44 = vrot.slane %v1291_v33, 4  ;;  %v1701_v9 = vsel %vm7437_vm4, %v1699_v62, %v1700_v52  ;;  %7006 = vmatpush3.bf16.msra.mxu0 %v7193_v59  ;;  %v1708_v17 = vsel %vm7437_vm4, %v1706_v3, %v1707_v16  ;;  %v5856_v28 = vld [vmem:[%s7410_s20 + $0x78] sm:$0xe]  ;;  %v7667_v52 = vld [vmem:[%s7410_s20 + $0x48] sm:$0xf]  ;;  %v7200_v16 = vld [vmem:[%s9806_s1 + $0xa0] sm:$0xff]  }
  0x38   : > { %v5917_v15 = vcombine.low %v1698_v61, %v1701_v9  ;;  %v1304_v18 = vrot.slane %v1302_v4, 4  ;;  %v5918_v24 = vcombine.low %v1705_v2, %v1708_v17  ;;  %v1315_v29 = vshrl.u32 %v7522_v42, 16  ;;  %v7679_v61 = vld [vmem:[%s7410_s20 + $0x8c] sm:$0x1]  ;;  %v5857_v62 = vld [vmem:[%s7410_s20 + $0x84] sm:$0xe]  ;;  %7007 = vmatprep.subr.bf16.mxu0 %v7200_v16 }
  0x39   : > { %2213 = vmatprep.mubr.bf16.mxu0 %v5897_v43  ;;  %v1294_v54 = vor.u32 %v1293_v44, %v1289_v31  ;;  %v1321_v30 = vshll.u32 %v7530_v47, 16  ;;  %v1711_v33 = vrot.slane %v7621_v6, 5  ;;  %v1714_v36 = vrot.slane %v7633_v12, 5  ;;  %v7198_v44 = vld [vmem:[%s9806_s1 + $0x10] sm:$0xff]   ;;  %v7693_v9 = vld [vmem:[%s7410_s20 + $0x98] sm:$0x1] }
  0x3a   : > { %6664 = vmatpush3.bf16.msra.mxu1 %v7191_v48  ;;  %v1308_v34 = vor.u32 %v1307_v25, %v1304_v18  ;;  %v5872_v38 = vrot.slane %v5856_v28, 9  ;;  %v1317_v40 = vrot.slane %v1315_v29, 4  ;;  %v1718_v46 = vrot.slane %v7641_v19, 5  ;;  %v7688_v2 = vld [vmem:[%s7410_s20 + $0x94] sm:$0xf] }
  0x3b   : > { %v1295_v1 = vrot.slane %v1294_v54, 4  ;;  %6665 = vmatprep.subr.bf16.mxu1 %v7194_v0  ;;  %v1323_v39 = vrot.slane %v1321_v30, 5  ;;  %v1713_v43 = vrot.slane %v1711_v33, 4  ;;  %v1335_v48 = vshll.u32 %v7540_v55, 16  ;;  %v5858_v17 = vld [vmem:[%s7410_s20 + $0x90] sm:$0xe]  ;;  %7008 = vmatpush3.bf16.msra.mxu0 %v7200_v16 }
  0x3c   : > { %v1309_v45 = vrot.slane %v1308_v34, 4  ;;  %v1318_v49 = vor.u32 %v1317_v40, %v1313_v26  ;;  %v1339_v54 = vshrl.u32 %v7540_v55, 16  ;;  %v1719_v59 = vsel %vm7437_vm4, %v5872_v38, %v1718_v46  ;;  %v7707_v30 = vld [vmem:[%s7410_s20 + $0x54] sm:$0xf]  ;;  %v7202_v38 = vld [vmem:[%s9806_s1 + $0x8] sm:$0xff]  }
  0x3d   : > { %6978 = vmatmul.mubr.bf16.gmra.mxu1 %v5916_v37  ;;  %2214 = vmatmul.mubr.bf16.gmra.mxu0 %v5881_v13  ;;  %v5855_v13 = vld [vmem:[%s7410_s20 + $0x6c] sm:$0xe]  ;;  %v1300_v14 = vsel %vm7456_vm5, %v1295_v1, %v1299_v57  ;;  %v5883_v37 = vcombine.low %v7612_v63, %v7522_v42  ;;  %v1721_v42 = vrot.slane %v7644_v20, 5  ;;  %v1715_v51 = vsel %vm7437_vm4, %v1713_v43, %v1714_v36  ;;  %v7672_v57 = vld [vmem:[%s7410_s20 + $0x88] sm:$0xf] }
  0x3e   : > { %6666 = vmatpush3.bf16.msra.mxu1 %v7195_v7  ;;  %v5898_v5 = vcombine.low %v1290_v8, %v1300_v14  ;;  %6981 = vmatprep.mubr.bf16.mxu1 %v5917_v15  ;;  %v5871_v31 = vrot.slane %v5855_v13, 9  ;;  %v1314_v22 = vsel %vm7456_vm5, %v1309_v45, %v1313_v26  ;;  %v1720_v60 = vrot.slane %v1718_v46, 4  ;;  %v7719_v43 = vld [vmem:[%s7410_s20 + $0xa0] sm:$0xf] }
  0x3f   : > { %6667 = vmatprep.subr.bf16.mxu1 %v7197_v21  ;;  %v1326_v63 = vshrl.u32 %v7667_v52, 16  ;;  %v1329_v0 = vshll.u32 %v7667_v52, 16  ;;  %v1337_v1 = vrot.slane %v1335_v48, 5  ;;  %v1341_v4 = vrot.slane %v1339_v54, 4  ;;  %v7731_v48 = vld [vmem:[%s7410_s20 + $0xa4] sm:$0x1] }
  0x40   : > { %2221 = vmatprep.mubr.bf16.mxu0 %v5898_v5  ;;  %v1712_v47 = vsel %vm7437_vm4, %v5871_v31, %v1711_v33  ;;  %v1722_v3 = vsel %vm7437_vm4, %v1720_v60, %v1721_v42  ;;  %v5873_v8 = vrot.slane %v5857_v62, 9  ;;  %v1725_v5 = vrot.slane %v7672_v57, 5  ;;  %v7205_v60 = vld [vmem:[%s9806_s1] sm:$0xff]  }
  0x41   : > { %v5919_v58 = vcombine.low %v1712_v47, %v1715_v51  ;;  %v5920_v13 = vcombine.low %v1719_v59, %v1722_v3  ;;  %v1328_v14 = vrot.slane %v1326_v63, 4  ;;  %v1331_v15 = vrot.slane %v1329_v0, 5  ;;  %v5860_v59 = vld [vmem:[%s7410_s20 + $0xa8] sm:$0xe] }
  0x42   : > { %6668 = vmatpush3.bf16.msra.mxu1 %v7198_v44  ;;  %v1342_v21 = vor.u32 %v1341_v4, %v1337_v1  ;;  %v5884_v26 = vcombine.low %v7667_v52, %v7540_v55  ;;  %v5874_v28 = vrot.slane %v5858_v17, 9  ;;  %v1732_v29 = vrot.slane %v7688_v2, 5  ;;  %v7204_v44 = vld [vmem:[%s9806_s1 + $0x40] sm:$0xff]   ;;  %v7208_v17 = vld [vmem:[%s9806_s1 + $0x98] sm:$0xff]  }
  0x43   : > { %6669 = vmatprep.subr.bf16.mxu1 %v7201_v10  ;;  %v1332_v25 = vor.u32 %v1331_v15, %v1328_v14  ;;  %v1726_v33 = vsel %vm7437_vm4, %v5873_v8, %v1725_v5  ;;  %v1727_v34 = vrot.slane %v1725_v5, 4  ;;  %v1735_v36 = vrot.slane %v7693_v9, 5  ;;  %7009 = vmatprep.subr.bf16.mxu0 %v7208_v17 }
  0x44   : > { %v1343_v31 = vrot.slane %v1342_v21, 4  ;;  %v1733_v40 = vsel %vm7437_vm4, %v5874_v28, %v1732_v29  ;;  %v1350_v47 = vshrl.u32 %v7707_v30, 16  ;;  %v1353_v46 = vshll.u32 %v7707_v30, 16  ;;  %7010 = vmatpush3.bf16.msra.mxu0 %v7208_v17 }
  0x45   : > { %6982 = vmatmul.mubr.bf16.gmra.mxu1 %v5918_v24  ;;  %2222 = vmatmul.mubr.bf16.gmra.mxu0 %v5882_v53  ;;  %v1345_v53 = vshll.u32 %v7543_v56, 16  ;;  %v1319_v56 = vrot.slane %v1318_v49, 4  ;;  %v1728_v24 = vrot.slane %v7679_v61, 5  ;;  %v1333_v55 = vrot.slane %v1332_v25, 4  ;;  %v5859_v49 = vld [vmem:[%s7410_s20 + $0x9c] sm:$0xe] }
  0x46   : > { %6985 = vmatprep.mubr.bf16.mxu1 %v5919_v58  ;;  %v1359_v42 = vshll.u32 %v7571_v23, 16  ;;  %6670 = vmatpush3.bf16.msra.mxu1 %v7202_v38  ;;  %v7742_v58 = vld [vmem:[%s7410_s20 + $0xb0] sm:$0x1]  ;;  %v1363_v0 = vshrl.u32 %v7571_v23, 16  ;;  %v5875_v3 = vrot.slane %v5859_v49, 9  ;;  %v1739_v4 = vrot.slane %v7719_v43, 5 }
  0x47   : > { %v1347_v7 = vrot.slane %v1345_v53, 5  ;;  %v1324_v11 = vsel %vm7456_vm5, %v1319_v56, %v1323_v39  ;;  %v1734_v39 = vrot.slane %v1732_v29, 4  ;;  %v1338_v51 = vsel %vm7456_vm5, %v1333_v55, %v1337_v1  ;;  %6671 = vmatprep.subr.bf16.mxu1 %v7204_v44  ;;  %v7789_v49 = vld [vmem:[%s7410_s20 + $0xc8] sm:$0x1] }
  0x48   : > { %v5899_v18 = vcombine.low %v1314_v22, %v1324_v11  ;;  %v1352_v53 = vrot.slane %v1350_v47, 4  ;;  %v7739_v22 = vld [vmem:[%s7410_s20 + $0xac] sm:$0xf]  ;;  %v1355_v56 = vrot.slane %v1353_v46, 5  ;;  %v1361_v63 = vrot.slane %v1359_v42, 5  ;;  %v7783_v47 = vld [vmem:[%s9806_s1 + $0x238] sm:$0xff]  }
  0x49   : > { %v1348_v45 = vsel %vm7456_vm5, %v1343_v31, %v1347_v7  ;;  %v1736_v54 = vsel %vm7437_vm4, %v1734_v39, %v1735_v36  ;;  %v1369_v1 = vshll.u32 %v7576_v27, 16  ;;  %v1742_v8 = vrot.slane %v7731_v48, 5  ;;  %v5861_v39 = vld [vmem:[%s7410_s20 + $0xb4] sm:$0xe]  ;;  %v7786_v42 = vld [vmem:[%s7410_s20 + $0xc4] sm:$0xf] }
  0x4a   : > { %2229 = vmatprep.mubr.bf16.mxu0 %v5899_v18  ;;  %v5900_v62 = vcombine.low %v1338_v51, %v1348_v45  ;;  %v5922_v16 = vcombine.low %v1733_v40, %v1736_v54  ;;  %v1356_v7 = vor.u32 %v1355_v56, %v1352_v53  ;;  %v5885_v10 = vcombine.low %v7707_v30, %v7571_v23  ;;  %v7777_v40 = vld [vmem:[%s7410_s20 + $0xbc] sm:$0x1]  ;;  %v7831_v30 = vld [vmem:[%s7410_s20 + $0x4] sm:$0xf] }
  0x4b   : > { %v5876_v11 = vrot.slane %v5860_v59, 9  ;;  %6672 = vmatpush3.bf16.msra.mxu1 %v7205_v60  ;;  %v1371_v14 = vrot.slane %v1369_v1, 5  ;;  %v1740_v27 = vsel %vm7437_vm4, %v5875_v3, %v1739_v4  ;;  %v1741_v15 = vrot.slane %v1739_v4, 4  ;;  %v5862_v59 = vld [vmem:[%s7410_s20 + $0xc0] sm:$0xe]  ;;  %v7214_v60 = vld [vmem:[%s9806_s1 + $0x90] sm:$0xff]  }
  0x4c   : > { %v1357_v18 = vrot.slane %v1356_v7, 4  ;;  %v1746_v21 = vrot.slane %v7739_v22, 5  ;;  %v1749_v5 = vrot.slane %v7742_v58, 5  ;;  %v1383_v25 = vshll.u32 %v7588_v35, 16  ;;  %7049 = vmatprep.subr.bf16.mxu1 %v7783_v47  ;;  %7011 = vmatprep.subr.bf16.mxu0 %v7214_v60  ;;  %v7220_v4 = vld [vmem:[%s9806_s1 + $0x88] sm:$0xff]  }
  0x4d   : > { %6986 = vmatmul.mubr.bf16.gmra.mxu1 %v5920_v13  ;;  %2230 = vmatmul.mubr.bf16.gmra.mxu0 %v5883_v37  ;;  %v1729_v37 = vsel %vm7437_vm4, %v1727_v34, %v1728_v24  ;;  %v1365_v13 = vrot.slane %v1363_v0, 4  ;;  %v7762_v24 = vld [vmem:[%s7410_s20 + $0x60] sm:$0xf]  ;;  %v1743_v29 = vsel %vm7437_vm4, %v1741_v15, %v1742_v8  ;;  %v7770_v34 = vld [vmem:[%s7410_s20 + $0xb8] sm:$0xf]  ;;  %v1393_v54 = vshll.u32 %v7593_v41, 16 }
  0x4e   : > { %v5921_v52 = vcombine.low %v1726_v33, %v1729_v37  ;;  %2237 = vmatprep.mubr.bf16.mxu0 %v5900_v62  ;;  %v1374_v31 = vshrl.u32 %v7762_v24, 16  ;;  %v1377_v33 = vshll.u32 %v7762_v24, 16  ;;  %v1362_v36 = vsel %vm7456_vm5, %v1357_v18, %v1361_v63  ;;  %7012 = vmatpush3.bf16.msra.mxu0 %v7214_v60 }
  0x4f   : > { %v1366_v28 = vor.u32 %v1365_v13, %v1361_v63  ;;  %v5923_v38 = vcombine.low %v1740_v27, %v1743_v29  ;;  %v1748_v55 = vrot.slane %v1746_v21, 4  ;;  %v1385_v46 = vrot.slane %v1383_v25, 5  ;;  %7013 = vmatprep.subr.bf16.mxu0 %v7220_v4  ;;  %v7826_v25 = vld [vmem:[%s7410_s20] sm:$0xf] }
  0x50   : > { %6989 = vmatprep.mubr.bf16.mxu1 %v5921_v52  ;;  %v1376_v45 = vrot.slane %v1374_v31, 4  ;;  %v1379_v37 = vrot.slane %v1377_v33, 5  ;;  %v1387_v52 = vshrl.u32 %v7588_v35, 16  ;;  %v5877_v53 = vrot.slane %v5861_v39, 9 }
  0x51   : > { %v1367_v44 = vrot.slane %v1366_v28, 4  ;;  %v1750_v51 = vsel %vm7437_vm4, %v1748_v55, %v1749_v5  ;;  %v1753_v63 = vrot.slane %v7770_v34, 5  ;;  %v1395_v3 = vrot.slane %v1393_v54, 5  ;;  %v7226_v54 = vld [vmem:[%s9806_s1 + $0x80] sm:$0xff]  }
  0x52   : > { %v1380_v56 = vor.u32 %v1379_v37, %v1376_v45  ;;  %v1389_v1 = vrot.slane %v1387_v52, 4  ;;  %v1756_v41 = vrot.slane %v7777_v40, 5  ;;  %v5886_v13 = vcombine.low %v7762_v24, %v7588_v35  ;;  %7014 = vmatpush3.bf16.msra.mxu0 %v7220_v4 }
  0x53   : > { %v1372_v62 = vsel %vm7456_vm5, %v1367_v44, %v1371_v14  ;;  %v1754_v8 = vsel %vm7437_vm4, %v5877_v53, %v1753_v63  ;;  %v7812_v14 = vld [vmem:[%s7410_s20 + $0x6c] sm:$0xf]  ;;  %v5878_v15 = vrot.slane %v5862_v59, 9  ;;  %v1760_v17 = vrot.slane %v7786_v42, 5  ;;  %v7841_v44 = vld [vmem:[%s7410_s20 + $0x8] sm:$0x1]  ;;  %7015 = vmatprep.subr.bf16.mxu0 %v7226_v54 }
  0x54   : > { %v5901_v0 = vcombine.low %v1362_v36, %v1372_v62  ;;  %v1381_v7 = vrot.slane %v1380_v56, 4  ;;  %v1390_v27 = vor.u32 %v1389_v1, %v1385_v46  ;;  %v1763_v18 = vrot.slane %v7789_v49, 5 }
  0x55   : > { %6990 = vmatmul.mubr.bf16.gmra.mxu1 %v5922_v16  ;;  %2238 = vmatmul.mubr.bf16.gmra.mxu0 %v5884_v26  ;;  %v1747_v26 = vsel %vm7437_vm4, %v5876_v11, %v1746_v21  ;;  %v1755_v11 = vrot.slane %v1753_v63, 4  ;;  %v1398_v5 = vshrl.u32 %v7812_v14, 16  ;;  %v1401_v24 = vshll.u32 %v7812_v14, 16 }
  0x56   : > { %6993 = vmatprep.mubr.bf16.mxu1 %v5923_v38  ;;  %v5924_v16 = vcombine.low %v1747_v26, %v1750_v51  ;;  %2245 = vmatprep.mubr.bf16.mxu0 %v5901_v0  ;;  %v1386_v21 = vsel %vm7456_vm5, %v1381_v7, %v1385_v46  ;;  %v1391_v28 = vrot.slane %v1390_v27, 4  ;;  %v1761_v31 = vsel %vm7437_vm4, %v5878_v15, %v1760_v17  ;;  %v7852_v0 = vld [vmem:[%s7410_s20 + $0x78] sm:$0xf]  ;;  %v7861_v15 = vld [vmem:[%s7410_s20 + $0xc] sm:$0xf] }
  0x57   : > { %v1757_v35 = vsel %vm7437_vm4, %v1755_v11, %v1756_v41  ;;  %v1762_v23 = vrot.slane %v1760_v17, 4  ;;  %v1403_v33 = vrot.slane %v1401_v24, 5  ;;  %v1407_v36 = vshll.u32 %v7621_v6, 16  ;;  %v7231_v17 = vld [vmem:[%s9806_s1 + $0x1f8] sm:$0xff]   ;;  %7016 = vmatpush3.bf16.msra.mxu0 %v7226_v54 }
  0x58   : > { %v5925_v29 = vcombine.low %v1754_v8, %v1757_v35  ;;  %v1411_v38 = vshrl.u32 %v7621_v6, 16  ;;  %v1396_v26 = vsel %vm7456_vm5, %v1391_v28, %v1395_v3  ;;  %v1417_v39 = vshll.u32 %v7633_v12, 16  ;;  %v7869_v35 = vld [vmem:[%s7410_s20 + $0x10] sm:$0xf]  ;;  %6793 = vmatprep.subr.bf16.mxu0 %v7231_v17 }
  0x59   : > { %v1764_v55 = vsel %vm7437_vm4, %v1762_v23, %v1763_v18  ;;  %v338_v45 = vshrl.u32 %v7826_v25, 16  ;;  %v5902_v37 = vcombine.low %v1386_v21, %v1396_v26  ;;  %v1409_v52 = vrot.slane %v1407_v36, 5 }
  0x5a   : > { %v5926_v46 = vcombine.low %v1761_v31, %v1764_v55  ;;  %v1413_v53 = vrot.slane %v1411_v38, 4  ;;  %v1419_v59 = vrot.slane %v1417_v39, 5  ;;  %v341_v62 = vshll.u32 %v7826_v25, 16 }
  0x5b   : > { %v340_v60 = vrot.slane %v338_v45, 4  ;;  %v351_v56 = vshrl.u32 %v7831_v30, 16  ;;  %v357_v63 = vshll.u32 %v7841_v44, 16  ;;  %v5887_v41 = vcombine.low %v7812_v14, %v7621_v6  ;;  %v7879_v45 = vld [vmem:[%s7410_s20 + $0x14] sm:$0x1] }
  0x5c   : > { %v1414_v1 = vor.u32 %v1413_v53, %v1409_v52  ;;  %v343_v3 = vrot.slane %v341_v62, 5  ;;  %v5751_v4 = vcombine.low %v7826_v25, %v7831_v30  ;;  %v1422_v6 = vshrl.u32 %v7852_v0, 16  ;;  %v7215_v62 = vld [vmem:[%s9806_s1 + $0x230] sm:$0xff]  }
  0x5d   : > { %6994 = vmatmul.mubr.bf16.gmra.mxu1 %v5924_v16  ;;  %2246 = vmatmul.mubr.bf16.gmra.mxu0 %v5885_v10  ;;  %v1400_v10 = vrot.slane %v1398_v5, 4  ;;  %v347_v16 = vshll.u32 %v7831_v30, 16  ;;  %v353_v11 = vrot.slane %v351_v56, 4  ;;  %v359_v27 = vrot.slane %v357_v63, 5 }
  0x5e   : > { %6997 = vmatprep.mubr.bf16.mxu1 %v5925_v29  ;;  %2253 = vmatprep.mubr.bf16.mxu0 %v5902_v37  ;;  %v1415_v18 = vrot.slane %v1414_v1, 4  ;;  %v344_v21 = vor.u32 %v343_v3, %v340_v60  ;;  %v1425_v14 = vshll.u32 %v7852_v0, 16  ;;  %v1431_v5 = vshll.u32 %v7641_v19, 16  ;;  %v7892_v1 = vld [vmem:[%s7410_s20 + $0x84] sm:$0xf] }
  0x5f   : > { %v1404_v51 = vor.u32 %v1403_v33, %v1400_v10  ;;  %v349_v8 = vrot.slane %v347_v16, 5  ;;  %v1435_v24 = vshrl.u32 %v7641_v19, 16  ;;  %v1441_v25 = vshll.u32 %v7644_v20, 16 }
  0x60   : > { %v1420_v28 = vsel %vm7456_vm5, %v1415_v18, %v1419_v59  ;;  %v345_v29 = vrot.slane %v344_v21, 4  ;;  %v1424_v31 = vrot.slane %v1422_v6, 4  ;;  %v1427_v23 = vrot.slane %v1425_v14, 5 }
  0x61   : > { %v1405_v12 = vrot.slane %v1404_v51, 4  ;;  %v1433_v36 = vrot.slane %v1431_v5, 5  ;;  %v1437_v38 = vrot.slane %v1435_v24, 4  ;;  %v1443_v39 = vrot.slane %v1441_v25, 5 }
  0x62   : > { %v350_v26 = vsel %vm7456_vm5, %v345_v29, %v349_v8  ;;  %v1428_v55 = vor.u32 %v1427_v23, %v1424_v31  ;;  %v362_v20 = vshrl.u32 %v7861_v15, 16  ;;  %v365_v51 = vshll.u32 %v7861_v15, 16  ;;  %v7916_v29 = vld [vmem:[%s7410_s20 + $0x1c] sm:$0xf] }
  0x63   : > { %v1410_v7 = vsel %vm7456_vm5, %v1405_v12, %v1409_v52  ;;  %v371_v52 = vshll.u32 %v7869_v35, 16  ;;  %v375_v60 = vshrl.u32 %v7869_v35, 16  ;;  %v381_v63 = vshll.u32 %v7879_v45, 16 }
  0x64   : > { %v5903_v10 = vcombine.low %v1410_v7, %v1420_v28  ;;  %v1429_v53 = vrot.slane %v1428_v55, 4  ;;  %v364_v59 = vrot.slane %v362_v20, 4  ;;  %v367_v16 = vrot.slane %v365_v51, 5 }
  0x65   : > { %6998 = vmatmul.mubr.bf16.gmra.mxu1 %v5926_v46  ;;  %2254 = vmatmul.mubr.bf16.gmra.mxu0 %v5886_v13  ;;  %v354_v13 = vor.u32 %v353_v11, %v349_v8  ;;  %v1438_v46 = vor.u32 %v1437_v38, %v1433_v36  ;;  %v373_v56 = vrot.slane %v371_v52, 5  ;;  %v377_v7 = vrot.slane %v375_v60, 4  ;;  %v7930_v52 = vld [vmem:[%s7410_s20 + $0x90] sm:$0xf] }
  0x66   : > { %2261 = vmatprep.mubr.bf16.mxu0 %v5903_v10  ;;  %v1434_v3 = vsel %vm7456_vm5, %v1429_v53, %v1433_v36  ;;  %v800_v8 = vrot.slane %v7879_v45, 5  ;;  %v5888_v11 = vcombine.low %v7852_v0, %v7641_v19  ;;  %v368_v17 = vor.u32 %v367_v16, %v364_v59  ;;  %v7922_v36 = vld [vmem:[%s7410_s20 + $0x20] sm:$0x1] }
  0x67   : > { %v355_v33 = vrot.slane %v354_v13, 4  ;;  %v1439_v12 = vrot.slane %v1438_v46, 4  ;;  %v383_v18 = vrot.slane %v381_v63, 5  ;;  %v5752_v21 = vcombine.low %v7861_v15, %v7869_v35  ;;  %v7221_v15 = vld [vmem:[%s9806_s1 + $0x228] sm:$0xff]  }
  0x68   : > { %v378_v14 = vor.u32 %v377_v7, %v373_v56  ;;  %v1446_v13 = vshrl.u32 %v7892_v1, 16  ;;  %v1449_v19 = vshll.u32 %v7892_v1, 16  ;;  %v369_v0 = vrot.slane %v368_v17, 4 }
  0x69   : > { %v360_v37 = vsel %vm7456_vm5, %v355_v33, %v359_v27  ;;  %v7900_v27 = vld [vmem:[%s7410_s20 + $0x18] sm:$0xf]  ;;  %v1459_v5 = vshrl.u32 %v7672_v57, 16  ;;  %v1465_v24 = vshll.u32 %v7679_v61, 16  ;;  %v395_v46 = vshll.u32 %v7916_v29, 16 }
  0x6a   : > { %v5767_v54 = vcombine.low %v350_v26, %v360_v37  ;;  %v1448_v25 = vrot.slane %v1446_v13, 4  ;;  %v1451_v28 = vrot.slane %v1449_v19, 5  ;;  %v386_v31 = vshrl.u32 %v7900_v27, 16  ;;  %v7952_v19 = vld [vmem:[%s7410_s20 + $0x28] sm:$0xf] }
  0x6b   : > { %v374_v23 = vsel %vm7456_vm5, %v369_v0, %v373_v56  ;;  %v1461_v33 = vrot.slane %v1459_v5, 4  ;;  %v1467_v61 = vrot.slane %v1465_v24, 5  ;;  %v399_v51 = vshrl.u32 %v7916_v29, 16  ;;  %v7233_v0 = vld [vmem:[%s9806_s1 + $0x218] sm:$0xff]  }
  0x6c   : > { %2663 = vmatprep.mubr.bf16.mxu1 %v5767_v54  ;;  %v1452_v26 = vor.u32 %v1451_v28, %v1448_v25  ;;  %v388_v55 = vrot.slane %v386_v31, 4  ;;  %v405_v59 = vshll.u32 %v7922_v36, 16  ;;  %v5889_v60 = vcombine.low %v7892_v1, %v7672_v57  ;;  %v7961_v28 = vld [vmem:[%s7410_s20 + $0x2c] sm:$0x1] }
  0x6d   : > { %2262 = vmatmul.mubr.bf16.gmra.mxu0 %v5887_v41  ;;  %2664 = vmatmul.mubr.bf16.vlgmr.msra.gmra.mxu1 %v5751_v4  ;;  %v1444_v41 = vsel %vm7456_vm5, %v1439_v12, %v1443_v39  ;;  %v1455_v4 = vshll.u32 %v7672_v57, 16  ;;  %v389_v39 = vshll.u32 %v7900_v27, 16  ;;  %v397_v16 = vrot.slane %v395_v46, 5 }
  0x6e   : > { %7050 = vmatpush3.bf16.msra.mxu1 %v7783_v47  ;;  %v5904_v6 = vcombine.low %v1434_v3, %v1444_v41  ;;  %v379_v47 = vrot.slane %v378_v14, 4  ;;  %v1453_v54 = vrot.slane %v1452_v26, 4  ;;  %v401_v56 = vrot.slane %v399_v51, 4 }
  0x6f   : > { %7051 = vmatprep.subr.bf16.mxu1 %v7215_v62  ;;  %v1457_v10 = vrot.slane %v1455_v4, 5  ;;  %v391_v53 = vrot.slane %v389_v39, 5  ;;  %v5753_v63 = vcombine.low %v7900_v27, %v7916_v29  ;;  %v1470_v57 = vshrl.u32 %v7930_v52, 16 }
  0x70   : > { %2269 = vmatprep.mubr.bf16.mxu0 %v5904_v6  ;;  %v384_v38 = vsel %vm7456_vm5, %v379_v47, %v383_v18  ;;  %v402_v41 = vor.u32 %v401_v56, %v397_v16  ;;  %v1473_v17 = vshll.u32 %v7930_v52, 16  ;;  %v1479_v18 = vshll.u32 %v7688_v2, 16  ;;  %v7948_v6 = vld [vmem:[%s7410_s20 + $0x24] sm:$0xf] }
  0x71   : > { %v5768_v20 = vcombine.low %v374_v23, %v384_v38  ;;  %v1462_v37 = vor.u32 %v1461_v33, %v1457_v10  ;;  %v1458_v3 = vsel %vm7456_vm5, %v1453_v54, %v1457_v10  ;;  %v392_v7 = vor.u32 %v391_v53, %v388_v55  ;;  %v7240_v53 = vld [vmem:[%s9806_s1 + $0x210] sm:$0xff]  }
  0x72   : > { %7052 = vmatpush3.bf16.msra.mxu1 %v7215_v62  ;;  %v7227_v62 = vld [vmem:[%s9806_s1 + $0x220] sm:$0xff]   ;;  %v1472_v14 = vrot.slane %v1470_v57, 4  ;;  %v1483_v13 = vshrl.u32 %v7688_v2, 16  ;;  %v403_v4 = vrot.slane %v402_v41, 4  ;;  %v1475_v5 = vrot.slane %v1473_v17, 5 }
  0x73   : > { %7053 = vmatprep.subr.bf16.mxu1 %v7221_v15  ;;  %2671 = vmatprep.mubr.bf16.mxu1 %v5768_v20  ;;  %v1463_v12 = vrot.slane %v1462_v37, 4  ;;  %v1481_v24 = vrot.slane %v1479_v18, 5  ;;  %v1489_v47 = vshll.u32 %v7693_v9, 16  ;;  %v410_v31 = vshrl.u32 %v7948_v6, 16  ;;  %v7969_v20 = vld [vmem:[%s7410_s20 + $0x9c] sm:$0xf] }
  0x74   : > { %v1485_v25 = vrot.slane %v1483_v13, 4  ;;  %v413_v23 = vshll.u32 %v7948_v6, 16  ;;  %v1476_v33 = vor.u32 %v1475_v5, %v1472_v14  ;;  %v419_v9 = vshll.u32 %v7952_v19, 16  ;;  %v7987_v57 = vld [vmem:[%s7410_s20 + $0x34] sm:$0xf] }
  0x75   : > { %2270 = vmatmul.mubr.bf16.gmra.mxu0 %v5888_v11  ;;  %2672 = vmatmul.mubr.bf16.gmra.mxu1 %v5752_v21  ;;  %v407_v11 = vrot.slane %v405_v59, 5  ;;  %v1468_v1 = vsel %vm7456_vm5, %v1463_v12, %v1467_v61  ;;  %v393_v21 = vrot.slane %v392_v7, 4  ;;  %v1491_v61 = vrot.slane %v1489_v47, 5 }
  0x76   : > { %7054 = vmatpush3.bf16.msra.mxu1 %v7221_v15  ;;  %v5905_v27 = vcombine.low %v1458_v3, %v1468_v1  ;;  %v1486_v26 = vor.u32 %v1485_v25, %v1481_v24  ;;  %v412_v55 = vrot.slane %v410_v31, 4  ;;  %v415_v39 = vrot.slane %v413_v23, 5  ;;  %v8003_v31 = vld [vmem:[%s7410_s20 + $0x38] sm:$0x1] }
  0x77   : > { %7055 = vmatprep.subr.bf16.mxu1 %v7227_v62  ;;  %v398_v15 = vsel %vm7456_vm5, %v393_v21, %v397_v16  ;;  %v408_v10 = vsel %vm7456_vm5, %v403_v4, %v407_v11  ;;  %v1477_v37 = vrot.slane %v1476_v33, 4  ;;  %v421_v46 = vrot.slane %v419_v9, 5  ;;  %v7981_v16 = vld [vmem:[%s7410_s20 + $0x30] sm:$0xf] }
  0x78   : > { %2277 = vmatprep.mubr.bf16.mxu0 %v5905_v27  ;;  %v5769_v38 = vcombine.low %v398_v15, %v408_v10  ;;  %v423_v51 = vshrl.u32 %v7952_v19, 16  ;;  %v429_v54 = vshll.u32 %v7961_v28, 16  ;;  %v1487_v59 = vrot.slane %v1486_v26, 4 }
  0x79   : > { %v5754_v12 = vcombine.low %v7948_v6, %v7952_v19  ;;  %v1482_v56 = vsel %vm7456_vm5, %v1477_v37, %v1481_v24  ;;  %v1494_v11 = vshrl.u32 %v7969_v20, 16  ;;  %v1507_v27 = vshrl.u32 %v7719_v43, 16 }
  0x7a   : > { %7056 = vmatpush3.bf16.msra.mxu1 %v7227_v62  ;;  %2679 = vmatprep.mubr.bf16.mxu1 %v5769_v38  ;;  %v5890_v62 = vcombine.low %v7930_v52, %v7688_v2  ;;  %v425_v3 = vrot.slane %v423_v51, 4  ;;  %v431_v7 = vrot.slane %v429_v54, 5  ;;  %v1492_v1 = vsel %vm7456_vm5, %v1487_v59, %v1491_v61  ;;  %v8010_v38 = vld [vmem:[%s7410_s20 + $0xa8] sm:$0xf] }
  0x7b   : > { %7057 = vmatprep.subr.bf16.mxu1 %v7233_v0  ;;  %v1497_v2 = vshll.u32 %v7969_v20, 16  ;;  %v1503_v52 = vshll.u32 %v7719_v43, 16  ;;  %v5906_v17 = vcombine.low %v1482_v56, %v1492_v1  ;;  %v1496_v6 = vrot.slane %v1494_v11, 4 }
  0x7c   : > { %v426_v18 = vor.u32 %v425_v3, %v421_v46  ;;  %v1513_v4 = vshll.u32 %v7731_v48, 16  ;;  %v1509_v5 = vrot.slane %v1507_v27, 4  ;;  %v434_v24 = vshrl.u32 %v7981_v16, 16 }
  0x7d   : > { %2278 = vmatmul.mubr.bf16.gmra.mxu0 %v5889_v60  ;;  %v416_v60 = vor.u32 %v415_v39, %v412_v55  ;;  %2680 = vmatmul.mubr.bf16.gmra.mxu1 %v5753_v63  ;;  %v7247_v63 = vld [vmem:[%s9806_s1 + $0x208] sm:$0xff]   ;;  %v1499_v14 = vrot.slane %v1497_v2, 5  ;;  %v1505_v13 = vrot.slane %v1503_v52, 5  ;;  %v437_v47 = vshll.u32 %v7981_v16, 16 }
  0x7e   : > { %7058 = vmatpush3.bf16.msra.mxu1 %v7233_v0  ;;  %2285 = vmatprep.mubr.bf16.mxu0 %v5906_v17  ;;  %v427_v0 = vrot.slane %v426_v18, 4  ;;  %v1515_v25 = vrot.slane %v1513_v4, 5  ;;  %v443_v23 = vshll.u32 %v7987_v57, 16  ;;  %v447_v10 = vshrl.u32 %v7987_v57, 16  ;;  %v8031_v17 = vld [vmem:[%s7410_s20 + $0x40] sm:$0xf] }
  0x7f   : > { %v417_v41 = vrot.slane %v416_v60, 4  ;;  %7059 = vmatprep.subr.bf16.mxu1 %v7240_v53  ;;  %v1500_v15 = vor.u32 %v1499_v14, %v1496_v6  ;;  %v1510_v33 = vor.u32 %v1509_v5, %v1505_v13  ;;  %v436_v61 = vrot.slane %v434_v24, 4  ;;  %v8048_v5 = vld [vmem:[%s7410_s20 + $0xb4] sm:$0xf] }
  0x80   : > { %v432_v48 = vsel %vm7456_vm5, %v427_v0, %v431_v7  ;;  %v439_v9 = vrot.slane %v437_v47, 5  ;;  %v445_v39 = vrot.slane %v443_v23, 5  ;;  %v449_v37 = vrot.slane %v447_v10, 4 }
  0x81   : > { %v422_v21 = vsel %vm7456_vm5, %v417_v41, %v421_v46  ;;  %v1501_v55 = vrot.slane %v1500_v15, 4  ;;  %v7254_v46 = vld [vmem:[%s9806_s1 + $0x200] sm:$0xff]   ;;  %v1511_v51 = vrot.slane %v1510_v33, 4  ;;  %v5891_v59 = vcombine.low %v7969_v20, %v7719_v43  ;;  %v8027_v20 = vld [vmem:[%s7410_s20 + $0x3c] sm:$0xf] }
  0x82   : > { %7060 = vmatpush3.bf16.msra.mxu1 %v7240_v53  ;;  %v5770_v26 = vcombine.low %v422_v21, %v432_v48  ;;  %v440_v54 = vor.u32 %v439_v9, %v436_v61  ;;  %v453_v53 = vshll.u32 %v8003_v31, 16  ;;  %v5755_v56 = vcombine.low %v7981_v16, %v7987_v57  ;;  %v8041_v21 = vld [vmem:[%s7410_s20 + $0x44] sm:$0x1] }
  0x83   : > { %7061 = vmatprep.subr.bf16.mxu1 %v7247_v63  ;;  %v1506_v60 = vsel %vm7456_vm5, %v1501_v55, %v1505_v13  ;;  %v1518_v3 = vshrl.u32 %v8010_v38, 16  ;;  %v1516_v7 = vsel %vm7456_vm5, %v1511_v51, %v1515_v25  ;;  %v1521_v43 = vshll.u32 %v8010_v38, 16 }
  0x84   : > { %2687 = vmatprep.mubr.bf16.mxu1 %v5770_v26  ;;  %v441_v11 = vrot.slane %v440_v54, 4  ;;  %v455_v1 = vrot.slane %v453_v53, 5  ;;  %v5907_v41 = vcombine.low %v1506_v60, %v1516_v7  ;;  %v1527_v16 = vshll.u32 %v7739_v22, 16 }
  0x85   : > { %2286 = vmatmul.mubr.bf16.gmra.mxu0 %v5890_v62  ;;  %v450_v62 = vor.u32 %v449_v37, %v445_v39  ;;  %2688 = vmatmul.mubr.bf16.gmra.mxu1 %v5754_v12  ;;  %v1520_v52 = vrot.slane %v1518_v3, 4  ;;  %v7259_v12 = vld [vmem:[%s9807_s2 + $0x38] sm:$0xff]   ;;  %v1523_v18 = vrot.slane %v1521_v43, 5  ;;  %v1531_v6 = vshrl.u32 %v7739_v22, 16  ;;  %v8063_v3 = vld [vmem:[%s7410_s20 + $0x48] sm:$0xf] }
  0x86   : > { %7062 = vmatpush3.bf16.msra.mxu1 %v7247_v63  ;;  %v446_v63 = vsel %vm7456_vm5, %v441_v11, %v445_v39  ;;  %v1537_v27 = vshll.u32 %v7742_v58, 16  ;;  %2293 = vmatprep.mubr.bf16.mxu0 %v5907_v41  ;;  %v1529_v13 = vrot.slane %v1527_v16, 5  ;;  %v458_v4 = vshrl.u32 %v8027_v20, 16  ;;  %v8070_v43 = vld [vmem:[%s7410_s20 + $0x4c] sm:$0xf] }
  0x87   : > { %7063 = vmatprep.subr.bf16.mxu1 %v7254_v46  ;;  %v451_v2 = vrot.slane %v450_v62, 4  ;;  %v461_v0 = vshll.u32 %v8027_v20, 16  ;;  %v1524_v47 = vor.u32 %v1523_v18, %v1520_v52  ;;  %v1533_v15 = vrot.slane %v1531_v6, 4  ;;  %v8075_v16 = vld [vmem:[%s7410_s20 + $0x50] sm:$0x1] }
  0x88   : > { %v1539_v25 = vrot.slane %v1537_v27, 5  ;;  %v460_v58 = vrot.slane %v458_v4, 4  ;;  %v467_v10 = vshll.u32 %v8031_v17, 16  ;;  %v471_v48 = vshrl.u32 %v8031_v17, 16 }
  0x89   : > { %v456_v14 = vsel %vm7456_vm5, %v451_v2, %v455_v1  ;;  %v463_v23 = vrot.slane %v461_v0, 5  ;;  %v1525_v33 = vrot.slane %v1524_v47, 4  ;;  %v1534_v61 = vor.u32 %v1533_v15, %v1529_v13  ;;  %v8084_v15 = vld [vmem:[%s7410_s20 + $0xc0] sm:$0xf] }
  0x8a   : > { %7064 = vmatpush3.bf16.msra.mxu1 %v7254_v46  ;;  %v5771_v24 = vcombine.low %v446_v63, %v456_v14  ;;  %v477_v9 = vshll.u32 %v8041_v21, 16  ;;  %v5892_v26 = vcombine.low %v8010_v38, %v7739_v22  ;;  %v469_v39 = vrot.slane %v467_v10, 5 }
  0x8b   : > { %7097 = vmatprep.subr.bf16.mxu1 %v7259_v12  ;;  %v464_v55 = vor.u32 %v463_v23, %v460_v58  ;;  %v473_v37 = vrot.slane %v471_v48, 4  ;;  %v5756_v46 = vcombine.low %v8027_v20, %v8031_v17  ;;  %v1530_v51 = vsel %vm7456_vm5, %v1525_v33, %v1529_v13 }
  0x8c   : > { %2695 = vmatprep.mubr.bf16.mxu1 %v5771_v24  ;;  %v1535_v54 = vrot.slane %v1534_v61, 4  ;;  %v479_v53 = vrot.slane %v477_v9, 5  ;;  %v1545_v22 = vshll.u32 %v8048_v5, 16  ;;  %v1551_v38 = vshll.u32 %v7770_v34, 16 }
  0x8d   : > { %2294 = vmatmul.mubr.bf16.gmra.mxu0 %v5891_v59  ;;  %2696 = vmatmul.mubr.bf16.gmra.mxu1 %v5755_v56  ;;  %v1542_v59 = vshrl.u32 %v8048_v5, 16  ;;  %v465_v60 = vrot.slane %v464_v55, 4  ;;  %v474_v62 = vor.u32 %v473_v37, %v469_v39  ;;  %v1555_v11 = vshrl.u32 %v7770_v34, 16 }
  0x8e   : > { %v1540_v7 = vsel %vm7456_vm5, %v1535_v54, %v1539_v25  ;;  %v1561_v1 = vshll.u32 %v7777_v40, 16  ;;  %v1547_v52 = vrot.slane %v1545_v22, 5  ;;  %v1553_v12 = vrot.slane %v1551_v38, 5  ;;  %v8098_v54 = vld [vmem:[%s7410_s20 + $0x58] sm:$0xf] }
  0x8f   : > { %v1544_v56 = vrot.slane %v1542_v59, 4  ;;  %v5908_v20 = vcombine.low %v1530_v51, %v1540_v7  ;;  %v470_v41 = vsel %vm7456_vm5, %v465_v60, %v469_v39  ;;  %v475_v2 = vrot.slane %v474_v62, 4 }
  0x90   : > { %v1557_v63 = vrot.slane %v1555_v11, 4  ;;  %v1563_v18 = vrot.slane %v1561_v1, 5  ;;  %v482_v6 = vshrl.u32 %v8063_v3, 16  ;;  %v485_v14 = vshll.u32 %v8063_v3, 16 }
  0x91   : > { %2301 = vmatprep.mubr.bf16.mxu0 %v5908_v20  ;;  %v480_v40 = vsel %vm7456_vm5, %v475_v2, %v479_v53  ;;  %v1548_v27 = vor.u32 %v1547_v52, %v1544_v56  ;;  %v491_v13 = vshll.u32 %v8070_v43, 16  ;;  %v495_v47 = vshrl.u32 %v8070_v43, 16  ;;  %v8109_v20 = vld [vmem:[%s7410_s20 + $0x5c] sm:$0x1] }
  0x92   : > { %v5772_v4 = vcombine.low %v470_v41, %v480_v40  ;;  %v1558_v0 = vor.u32 %v1557_v63, %v1553_v12  ;;  %v484_v24 = vrot.slane %v482_v6, 4  ;;  %v487_v58 = vrot.slane %v485_v14, 5  ;;  %v8117_v14 = vld [vmem:[%s7410_s20 + $0x60] sm:$0xf] }
  0x93   : > { %v1549_v25 = vrot.slane %v1548_v27, 4  ;;  %v493_v23 = vrot.slane %v491_v13, 5  ;;  %v501_v10 = vshll.u32 %v8075_v16, 16  ;;  %v497_v33 = vrot.slane %v495_v47, 4  ;;  %v8120_v13 = vld [vmem:[%s7410_s20 + $0x64] sm:$0xf] }
  0x94   : > { %2703 = vmatprep.mubr.bf16.mxu1 %v5772_v4  ;;  %v1559_v48 = vrot.slane %v1558_v0, 4  ;;  %v5893_v61 = vcombine.low %v8048_v5, %v7770_v34  ;;  %v5757_v9 = vcombine.low %v8063_v3, %v8070_v43  ;;  %v488_v39 = vor.u32 %v487_v58, %v484_v24 }
  0x95   : > { %2302 = vmatmul.mubr.bf16.gmra.mxu0 %v5892_v26  ;;  %v8092_v26 = vld [vmem:[%s7410_s20 + $0x54] sm:$0xf]  ;;  %2704 = vmatmul.mubr.bf16.gmra.mxu1 %v5756_v46  ;;  %v1554_v55 = vsel %vm7456_vm5, %v1549_v25, %v1553_v12  ;;  %v503_v37 = vrot.slane %v501_v10, 5  ;;  %v1566_v51 = vshrl.u32 %v8084_v15, 16  ;;  %v498_v34 = vor.u32 %v497_v33, %v493_v23  ;;  %v8125_v25 = vld [vmem:[%s7410_s20 + $0x68] sm:$0x1] }
  0x96   : > { %v1564_v53 = vsel %vm7456_vm5, %v1559_v48, %v1563_v18  ;;  %v1569_v5 = vshll.u32 %v8084_v15, 16  ;;  %v1575_v59 = vshll.u32 %v7786_v42, 16  ;;  %v489_v46 = vrot.slane %v488_v39, 4 }
  0x97   : > { %v5909_v60 = vcombine.low %v1554_v55, %v1564_v53  ;;  %v1568_v62 = vrot.slane %v1566_v51, 4  ;;  %v1579_v22 = vshrl.u32 %v7786_v42, 16  ;;  %v499_v38 = vrot.slane %v498_v34, 4 }
  0x98   : > { %v1571_v3 = vrot.slane %v1569_v5, 5  ;;  %v1577_v7 = vrot.slane %v1575_v59, 5  ;;  %v1585_v56 = vshll.u32 %v7789_v49, 16  ;;  %v494_v11 = vsel %vm7456_vm5, %v489_v46, %v493_v23 }
  0x99   : > { %2309 = vmatprep.mubr.bf16.mxu0 %v5909_v60  ;;  %v1581_v1 = vrot.slane %v1579_v22, 4  ;;  %v506_v41 = vshrl.u32 %v8092_v26, 16  ;;  %v509_v2 = vshll.u32 %v8092_v26, 16  ;;  %v504_v52 = vsel %vm7456_vm5, %v499_v38, %v503_v37  ;;  %v722_v22 = vld [vmem:[%s7410_s20 + $0xc] sm:$0xe] }
  0x9a   : > { %v1572_v12 = vor.u32 %v1571_v3, %v1568_v62  ;;  %v1587_v49 = vrot.slane %v1585_v56, 5  ;;  %v515_v63 = vshll.u32 %v8098_v54, 16  ;;  %v5773_v18 = vcombine.low %v494_v11, %v504_v52  ;;  %v8146_v11 = vld [vmem:[%s7410_s20 + $0x6c] sm:$0xf] }
  0x9b   : > { %v1582_v6 = vor.u32 %v1581_v1, %v1577_v7  ;;  %v508_v40 = vrot.slane %v506_v41, 4  ;;  %v511_v27 = vrot.slane %v509_v2, 5  ;;  %v519_v24 = vshrl.u32 %v8098_v54, 16 }
  0x9c   : > { %v1573_v4 = vrot.slane %v1572_v12, 4  ;;  %v517_v0 = vrot.slane %v515_v63, 5  ;;  %v525_v47 = vshll.u32 %v8109_v20, 16  ;;  %2711 = vmatprep.mubr.bf16.mxu1 %v5773_v18  ;;  %v5894_v10 = vcombine.low %v8084_v15, %v7786_v42  ;;  %v721_v15 = vld [vmem:[%s7410_s20] sm:$0xe] }
  0x9d   : > { %2310 = vmatmul.mubr.bf16.gmra.mxu0 %v5893_v61  ;;  %v1583_v58 = vrot.slane %v1582_v6, 4  ;;  %v512_v23 = vor.u32 %v511_v27, %v508_v40  ;;  %v5758_v48 = vcombine.low %v8092_v26, %v8098_v54  ;;  %2712 = vmatmul.mubr.bf16.gmra.mxu1 %v5757_v9  ;;  %v521_v61 = vrot.slane %v519_v24, 4  ;;  %v8152_v12 = vld [vmem:[%s7410_s20 + $0x70] sm:$0xf]  ;;  %v8159_v6 = vld [vmem:[%s7410_s20 + $0x74] sm:$0x1] }
  0x9e   : > { %v1578_v33 = vsel %vm7456_vm5, %v1573_v4, %v1577_v7  ;;  %v527_v55 = vrot.slane %v525_v47, 5  ;;  %v530_v39 = vshrl.u32 %v8117_v14, 16  ;;  %v533_v53 = vshll.u32 %v8117_v14, 16 }
  0x9f   : > { %v1588_v37 = vsel %vm7456_vm5, %v1583_v58, %v1587_v49  ;;  %v513_v51 = vrot.slane %v512_v23, 4  ;;  %v539_v42 = vshll.u32 %v8120_v13, 16  ;;  %v522_v9 = vor.u32 %v521_v61, %v517_v0 }
  0xa0   : > { %v5910_v26 = vcombine.low %v1578_v33, %v1588_v37  ;;  %v532_v34 = vrot.slane %v530_v39, 4  ;;  %v543_v5 = vshrl.u32 %v8120_v13, 16  ;;  %v535_v60 = vrot.slane %v533_v53, 5  ;;  %v7232_v39 = vld [vmem:[%s9806_s1 + $0x1b8] sm:$0xff]  }
  0xa1   : > { %v518_v59 = vsel %vm7456_vm5, %v513_v51, %v517_v0  ;;  %v541_v46 = vrot.slane %v539_v42, 5  ;;  %v549_v62 = vshll.u32 %v8125_v25, 16  ;;  %v523_v38 = vrot.slane %v522_v9, 4  ;;  %v7235_v42 = vld [vmem:[%s9806_s1 + $0x1f0] sm:$0xff]  }
  0xa2   : > { %2317 = vmatprep.mubr.bf16.mxu0 %v5910_v26  ;;  %v545_v3 = vrot.slane %v543_v5, 4  ;;  %v5735_v7 = vrot.slane %v721_v15, 9  ;;  %v790_v56 = vrot.slane %v7831_v30, 5  ;;  %v536_v1 = vor.u32 %v535_v60, %v532_v34  ;;  %v724_v34 = vld [vmem:[%s7410_s20 + $0x24] sm:$0xe] }
  0xa3   : > { %v551_v41 = vrot.slane %v549_v62, 5  ;;  %v793_v2 = vrot.slane %v7841_v44, 5  ;;  %v5759_v52 = vcombine.low %v8117_v14, %v8120_v13  ;;  %v528_v49 = vsel %vm7456_vm5, %v523_v38, %v527_v55  ;;  %v8188_v5 = vld [vmem:[%s7410_s20 + $0x78] sm:$0xf] }
  0xa4   : > { %v546_v63 = vor.u32 %v545_v3, %v541_v46  ;;  %v791_v18 = vsel %vm7437_vm4, %v5735_v7, %v790_v56  ;;  %v792_v30 = vrot.slane %v790_v56, 4  ;;  %v5774_v40 = vcombine.low %v518_v59, %v528_v49 }
  0xa5   : > { %2318 = vmatmul.mubr.bf16.gmra.mxu0 %v5894_v10  ;;  %v537_v27 = vrot.slane %v536_v1, 4  ;;  %v5736_v4 = vrot.slane %v722_v22, 9  ;;  %v797_v44 = vrot.slane %v7869_v35, 5  ;;  %v554_v47 = vshrl.u32 %v8146_v11, 16  ;;  %v723_v35 = vld [vmem:[%s7410_s20 + $0x18] sm:$0xe] }
  0xa6   : > { %v547_v0 = vrot.slane %v546_v63, 4  ;;  %v794_v24 = vsel %vm7437_vm4, %v792_v30, %v793_v2  ;;  %v557_v58 = vshll.u32 %v8146_v11, 16  ;;  %2719 = vmatprep.mubr.bf16.mxu1 %v5774_v40  ;;  %v563_v53 = vshll.u32 %v8152_v12, 16  ;;  %v8191_v22 = vld [vmem:[%s7410_s20 + $0x7c] sm:$0xf] }
  0xa7   : > { %v542_v23 = vsel %vm7456_vm5, %v537_v27, %v541_v46  ;;  %v5783_v10 = vcombine.low %v791_v18, %v794_v24  ;;  %v798_v33 = vsel %vm7437_vm4, %v5736_v4, %v797_v44  ;;  %v799_v61 = vrot.slane %v797_v44, 4  ;;  %2720 = vmatmul.mubr.bf16.gmra.mxu1 %v5758_v48  ;;  %v8209_v40 = vld [vmem:[%s7410_s20 + $0x80] sm:$0x1] }
  0xa8   : > { %v552_v55 = vsel %vm7456_vm5, %v547_v0, %v551_v41  ;;  %v556_v37 = vrot.slane %v554_v47, 4  ;;  %v559_v51 = vrot.slane %v557_v58, 5  ;;  %v567_v26 = vshrl.u32 %v8152_v12, 16  ;;  %v725_v47 = vld [vmem:[%s7410_s20 + $0x30] sm:$0xe] }
  0xa9   : > { %v5775_v15 = vcombine.low %v542_v23, %v552_v55  ;;  %7017 = vmatprep.mubr.bf16.mxu0 %v5783_v10  ;;  %v801_v48 = vsel %vm7437_vm4, %v799_v61, %v800_v8  ;;  %v573_v9 = vshll.u32 %v8159_v6, 16  ;;  %v565_v46 = vrot.slane %v563_v53, 5  ;;  %v726_v61 = vld [vmem:[%s7410_s20 + $0x3c] sm:$0xe] }
  0xaa   : > { %v5784_v59 = vcombine.low %v798_v33, %v801_v48  ;;  %v560_v60 = vor.u32 %v559_v51, %v556_v37  ;;  %v5737_v62 = vrot.slane %v723_v35, 9  ;;  %v569_v38 = vrot.slane %v567_v26, 4  ;;  %v7239_v35 = vld [vmem:[%s9806_s1 + $0x1a8] sm:$0xff]  }
  0xab   : > { %2727 = vmatprep.mubr.bf16.mxu1 %v5775_v15  ;;  %v575_v3 = vrot.slane %v573_v9, 5  ;;  %v804_v45 = vrot.slane %v7916_v29, 5  ;;  %v807_v8 = vrot.slane %v7922_v36, 5  ;;  %v5760_v56 = vcombine.low %v8146_v11, %v8152_v12  ;;  %v7236_v36 = vld [vmem:[%s9806_s1 + $0x1b0] sm:$0xff]   ;;  %v7242_v15 = vld [vmem:[%s9806_s1 + $0x1e0] sm:$0xff]   ;;  %v7246_v11 = vld [vmem:[%s9806_s1 + $0x198] sm:$0xff]  }
  0xac   : > { %v561_v7 = vrot.slane %v560_v60, 4  ;;  %v5738_v1 = vrot.slane %v724_v34, 9  ;;  %v811_v41 = vrot.slane %v7952_v19, 5  ;;  %v570_v2 = vor.u32 %v569_v38, %v565_v46 }
  0xad   : > { %7018 = vmatmul.mubr.bf16.vlgmr.msra.gmra.mxu0 %v5784_v59  ;;  %v805_v49 = vsel %vm7437_vm4, %v5737_v62, %v804_v45  ;;  %v806_v63 = vrot.slane %v804_v45, 4  ;;  %v814_v29 = vrot.slane %v7961_v28, 5  ;;  %v578_v27 = vshrl.u32 %v8188_v5, 16  ;;  %v7238_v28 = vld [vmem:[%s9806_s1 + $0x1e8] sm:$0xff]   ;;  %v8241_v59 = vld [vmem:[%s7410_s20 + $0x84] sm:$0xf] }
  0xae   : > { %6794 = vmatpush3.bf16.msra.mxu0 %v7232_v39  ;;  %v566_v18 = vsel %vm7456_vm5, %v561_v7, %v565_v46  ;;  %v812_v30 = vsel %vm7437_vm4, %v5738_v1, %v811_v41  ;;  %v813_v19 = vrot.slane %v811_v41, 4  ;;  %v571_v4 = vrot.slane %v570_v2, 4  ;;  %v7243_v7 = vld [vmem:[%s9806_s1 + $0x1a0] sm:$0xff]   ;;  %v8256_v2 = vld [vmem:[%s7410_s20 + $0x8c] sm:$0x1] }
  0xaf   : > { %6795 = vmatprep.subr.bf16.mxu0 %v7235_v42  ;;  %v808_v44 = vsel %vm7437_vm4, %v806_v63, %v807_v8  ;;  %v581_v0 = vshll.u32 %v8188_v5, 16  ;;  %v587_v24 = vshll.u32 %v8191_v22, 16  ;;  %2728 = vmatmul.mubr.bf16.gmra.mxu1 %v5759_v52  ;;  %v580_v10 = vrot.slane %v578_v27, 4 }
  0xb0   : > { %v5785_v58 = vcombine.low %v805_v49, %v808_v44  ;;  %v815_v23 = vsel %vm7437_vm4, %v813_v19, %v814_v29  ;;  %v591_v33 = vshrl.u32 %v8191_v22, 16  ;;  %v576_v55 = vsel %vm7456_vm5, %v571_v4, %v575_v3  ;;  %v8245_v3 = vld [vmem:[%s7410_s20 + $0x88] sm:$0xf]  ;;  %v728_v44 = vld [vmem:[%s7410_s20 + $0x54] sm:$0xe] }
  0xb1   : > { %v5786_v39 = vcombine.low %v812_v30, %v815_v23  ;;  %v583_v14 = vrot.slane %v581_v0, 5  ;;  %v589_v52 = vrot.slane %v587_v24, 5  ;;  %v5776_v37 = vcombine.low %v566_v18, %v576_v55  ;;  %v727_v30 = vld [vmem:[%s7410_s20 + $0x48] sm:$0xe] }
  0xb2   : > { %6796 = vmatpush3.bf16.msra.mxu0 %v7236_v36  ;;  %7021 = vmatprep.mubr.bf16.mxu0 %v5785_v58  ;;  %v593_v51 = vrot.slane %v591_v33, 4  ;;  %v597_v53 = vshll.u32 %v8209_v40, 16  ;;  %v5739_v42 = vrot.slane %v725_v47, 9  ;;  %v818_v26 = vrot.slane %v7987_v57, 5 }
  0xb3   : > { %6797 = vmatprep.subr.bf16.mxu0 %v7238_v28  ;;  %v584_v48 = vor.u32 %v583_v14, %v580_v10  ;;  %v821_v9 = vrot.slane %v8003_v31, 5  ;;  %v5761_v34 = vcombine.low %v8188_v5, %v8191_v22  ;;  %2735 = vmatprep.mubr.bf16.mxu1 %v5776_v37  ;;  %v5740_v62 = vrot.slane %v726_v61, 9  ;;  %v8293_v37 = vld [vmem:[%s7410_s20 + $0x94] sm:$0xf]  ;;  %v7253_v5 = vld [vmem:[%s9806_s1 + $0x188] sm:$0xff]  }
  0xb4   : > { %v594_v60 = vor.u32 %v593_v51, %v589_v52  ;;  %v599_v46 = vrot.slane %v597_v53, 5  ;;  %v825_v38 = vrot.slane %v8031_v17, 5  ;;  %v819_v57 = vsel %vm7437_vm4, %v5739_v42, %v818_v26  ;;  %v7250_v51 = vld [vmem:[%s9806_s1 + $0x190] sm:$0xff]  }
  0xb5   : > { %7022 = vmatmul.mubr.bf16.gmra.mxu0 %v5786_v39  ;;  %v585_v45 = vrot.slane %v584_v48, 4  ;;  %v820_v31 = vrot.slane %v818_v26, 4  ;;  %v828_v8 = vrot.slane %v8041_v21, 5  ;;  %v602_v49 = vshrl.u32 %v8241_v59, 16  ;;  %v7245_v21 = vld [vmem:[%s9806_s1 + $0x1d8] sm:$0xff]  }
  0xb6   : > { %6798 = vmatpush3.bf16.msra.mxu0 %v7239_v35  ;;  %v595_v1 = vrot.slane %v594_v60, 4  ;;  %v826_v41 = vsel %vm7437_vm4, %v5740_v62, %v825_v38  ;;  %v827_v17 = vrot.slane %v825_v38, 4  ;;  %v605_v36 = vshll.u32 %v8241_v59, 16  ;;  %v8287_v35 = vld [vmem:[%s7410_s20 + $0x90] sm:$0xf] }
  0xb7   : > { %6799 = vmatprep.subr.bf16.mxu0 %v7242_v15  ;;  %v590_v63 = vsel %vm7456_vm5, %v585_v45, %v589_v52  ;;  %v822_v29 = vsel %vm7437_vm4, %v820_v31, %v821_v9  ;;  %v611_v18 = vshll.u32 %v8245_v3, 16  ;;  %2736 = vmatmul.mubr.bf16.gmra.mxu1 %v5760_v56  ;;  %v604_v4 = vrot.slane %v602_v49, 4  ;;  %v7249_v56 = vld [vmem:[%s9806_s1 + $0x1d0] sm:$0xff]   ;;  %v8301_v48 = vld [vmem:[%s7410_s20 + $0x98] sm:$0x1] }
  0xb8   : > { %v600_v19 = vsel %vm7456_vm5, %v595_v1, %v599_v46  ;;  %v5787_v27 = vcombine.low %v819_v57, %v822_v29  ;;  %v829_v28 = vsel %vm7437_vm4, %v827_v17, %v828_v8  ;;  %v607_v47 = vrot.slane %v605_v36, 5  ;;  %v729_v31 = vld [vmem:[%s7410_s20 + $0x60] sm:$0xe] }
  0xb9   : > { %v5777_v0 = vcombine.low %v590_v63, %v600_v19  ;;  %v5788_v24 = vcombine.low %v826_v41, %v829_v28  ;;  %v613_v58 = vrot.slane %v611_v18, 5  ;;  %v615_v23 = vshrl.u32 %v8245_v3, 16  ;;  %v8333_v28 = vld [vmem:[%s7410_s20 + $0x9c] sm:$0xf] }
  0xba   : > { %6800 = vmatpush3.bf16.msra.mxu0 %v7243_v7  ;;  %7025 = vmatprep.mubr.bf16.mxu0 %v5787_v27  ;;  %v621_v10 = vshll.u32 %v8256_v2, 16  ;;  %v5741_v33 = vrot.slane %v727_v30, 9  ;;  %v832_v61 = vrot.slane %v8070_v43, 5  ;;  %v608_v55 = vor.u32 %v607_v47, %v604_v4  ;;  %v730_v27 = vld [vmem:[%s7410_s20 + $0x6c] sm:$0xe]  ;;  %v7256_v4 = vld [vmem:[%s9806_s1 + $0x1c0] sm:$0xff]  }
  0xbb   : > { %6801 = vmatprep.subr.bf16.mxu0 %v7245_v21  ;;  %2743 = vmatprep.mubr.bf16.mxu1 %v5777_v0  ;;  %v835_v39 = vrot.slane %v8075_v16, 5  ;;  %v5762_v14 = vcombine.low %v8241_v59, %v8245_v3  ;;  %v5742_v52 = vrot.slane %v728_v44, 9  ;;  %v617_v43 = vrot.slane %v615_v23, 4  ;;  %v7252_v16 = vld [vmem:[%s9806_s1 + $0x1c8] sm:$0xff]  }
  0xbc   : > { %v623_v53 = vrot.slane %v621_v10, 5  ;;  %v833_v42 = vsel %vm7437_vm4, %v5741_v33, %v832_v61  ;;  %v834_v15 = vrot.slane %v832_v61, 4  ;;  %v609_v26 = vrot.slane %v608_v55, 4  ;;  %v8346_v55 = vld [vmem:[%s7410_s20 + $0xa0] sm:$0xf] }
  0xbd   : > { %7026 = vmatmul.mubr.bf16.gmra.mxu0 %v5788_v24  ;;  %v839_v9 = vrot.slane %v8098_v54, 5  ;;  %v842_v60 = vrot.slane %v8109_v20, 5  ;;  %v626_v46 = vshrl.u32 %v8287_v35, 16  ;;  %v618_v62 = vor.u32 %v617_v43, %v613_v58 }
  0xbe   : > { %6802 = vmatpush3.bf16.msra.mxu0 %v7246_v11  ;;  %v836_v38 = vsel %vm7437_vm4, %v834_v15, %v835_v39  ;;  %v629_v45 = vshll.u32 %v8287_v35, 16  ;;  %v635_v57 = vshll.u32 %v8293_v37, 16  ;;  %v614_v8 = vsel %vm7456_vm5, %v609_v26, %v613_v58 }
  0xbf   : > { %6803 = vmatprep.subr.bf16.mxu0 %v7249_v56  ;;  %v5789_v7 = vcombine.low %v833_v42, %v836_v38  ;;  %v840_v54 = vsel %vm7437_vm4, %v5742_v52, %v839_v9  ;;  %v841_v20 = vrot.slane %v839_v9, 4  ;;  %2744 = vmatmul.mubr.bf16.gmra.mxu1 %v5761_v34  ;;  %v619_v1 = vrot.slane %v618_v62, 4  ;;  %v8356_v52 = vld [vmem:[%s7410_s20 + $0xa4] sm:$0x1] }
  0xc0   : > { %v628_v41 = vrot.slane %v626_v46, 4  ;;  %v631_v17 = vrot.slane %v629_v45, 5  ;;  %v637_v49 = vrot.slane %v635_v57, 5  ;;  %v639_v63 = vshrl.u32 %v8293_v37, 16  ;;  %v732_v46 = vld [vmem:[%s7410_s20 + $0x84] sm:$0xe] }
  0xc1   : > { %7029 = vmatprep.mubr.bf16.mxu0 %v5789_v7  ;;  %v843_v21 = vsel %vm7437_vm4, %v841_v20, %v842_v60  ;;  %v645_v29 = vshll.u32 %v8301_v48, 16  ;;  %v5743_v36 = vrot.slane %v729_v31, 9  ;;  %v624_v34 = vsel %vm7456_vm5, %v619_v1, %v623_v53 }
  0xc2   : > { %6804 = vmatpush3.bf16.msra.mxu0 %v7250_v51  ;;  %v5790_v18 = vcombine.low %v840_v54, %v843_v21  ;;  %v632_v30 = vor.u32 %v631_v17, %v628_v41  ;;  %v846_v19 = vrot.slane %v8120_v13, 5  ;;  %v5778_v44 = vcombine.low %v614_v8, %v624_v34  ;;  %v731_v51 = vld [vmem:[%s7410_s20 + $0x78] sm:$0xe]  ;;  %v8377_v41 = vld [vmem:[%s7410_s20 + $0xa8] sm:$0xf] }
  0xc3   : > { %6805 = vmatprep.subr.bf16.mxu0 %v7252_v16  ;;  %v641_v0 = vrot.slane %v639_v63, 4  ;;  %v647_v24 = vrot.slane %v645_v29, 5  ;;  %v849_v47 = vrot.slane %v8125_v25, 5  ;;  %v5763_v56 = vcombine.low %v8287_v35, %v8293_v37  ;;  %v7257_v25 = vld [vmem:[%s9806_s1 + $0x180] sm:$0xff]   ;;  %v8383_v29 = vld [vmem:[%s7410_s20 + $0xac] sm:$0xf] }
  0xc4   : > { %v633_v58 = vrot.slane %v632_v30, 4  ;;  %v847_v13 = vsel %vm7437_vm4, %v5743_v36, %v846_v19  ;;  %v848_v11 = vrot.slane %v846_v19, 4  ;;  %2751 = vmatprep.mubr.bf16.mxu1 %v5778_v44  ;;  %v5744_v10 = vrot.slane %v730_v27, 9  ;;  %v8389_v34 = vld [vmem:[%s7410_s20 + $0xb0] sm:$0x1] }
  0xc5   : > { %7030 = vmatmul.mubr.bf16.gmra.mxu0 %v5790_v18  ;;  %v642_v23 = vor.u32 %v641_v0, %v637_v49  ;;  %v853_v33 = vrot.slane %v8152_v12, 5  ;;  %v856_v61 = vrot.slane %v8159_v6, 5  ;;  %v650_v12 = vshrl.u32 %v8333_v28, 16  ;;  %v733_v27 = vld [vmem:[%s7410_s20 + $0x90] sm:$0xe] }
  0xc6   : > { %6806 = vmatpush3.bf16.msra.mxu0 %v7253_v5  ;;  %v638_v39 = vsel %vm7456_vm5, %v633_v58, %v637_v49  ;;  %v850_v35 = vsel %vm7437_vm4, %v848_v11, %v849_v47  ;;  %v653_v6 = vshll.u32 %v8333_v28, 16  ;;  %v659_v9 = vshll.u32 %v8346_v55, 16 }
  0xc7   : > { %6807 = vmatprep.subr.bf16.mxu0 %v7256_v4  ;;  %v643_v43 = vrot.slane %v642_v23, 4  ;;  %v5791_v53 = vcombine.low %v847_v13, %v850_v35  ;;  %v854_v42 = vsel %vm7437_vm4, %v5744_v10, %v853_v33  ;;  %v855_v15 = vrot.slane %v853_v33, 4  ;;  %2752 = vmatmul.mubr.bf16.gmra.mxu1 %v5762_v14  ;;  %v734_v33 = vld [vmem:[%s7410_s20 + $0x9c] sm:$0xe] }
  0xc8   : > { %v652_v16 = vrot.slane %v650_v12, 4  ;;  %v655_v26 = vrot.slane %v653_v6, 5  ;;  %v663_v60 = vshrl.u32 %v8346_v55, 16  ;;  %v669_v45 = vshll.u32 %v8356_v52, 16 }
  0xc9   : > { %v648_v62 = vsel %vm7456_vm5, %v643_v43, %v647_v24  ;;  %7033 = vmatprep.mubr.bf16.mxu0 %v5791_v53  ;;  %v857_v38 = vsel %vm7437_vm4, %v855_v15, %v856_v61  ;;  %v5745_v57 = vrot.slane %v731_v51, 9  ;;  %v661_v8 = vrot.slane %v659_v9, 5  ;;  %v8413_v43 = vld [vmem:[%s7410_s20 + $0xb4] sm:$0xf]  ;;  %v8416_v53 = vld [vmem:[%s7410_s20 + $0xb8] sm:$0xf] }
  0xca   : > { %6808 = vmatpush3.bf16.msra.mxu0 %v7257_v25  ;;  %v5779_v59 = vcombine.low %v638_v39, %v648_v62  ;;  %v5792_v14 = vcombine.low %v854_v42, %v857_v38  ;;  %v656_v31 = vor.u32 %v655_v26, %v652_v16  ;;  %v665_v7 = vrot.slane %v663_v60, 4 }
  0xcb   : > { %v671_v54 = vrot.slane %v669_v45, 5  ;;  %v860_v20 = vrot.slane %v8191_v22, 5  ;;  %v863_v1 = vrot.slane %v8209_v40, 5  ;;  %v5764_v49 = vcombine.low %v8333_v28, %v8346_v55 }
  0xcc   : > { %2759 = vmatprep.mubr.bf16.mxu1 %v5779_v59  ;;  %v657_v17 = vrot.slane %v656_v31, 4  ;;  %v5746_v21 = vrot.slane %v732_v46, 9  ;;  %v867_v63 = vrot.slane %v8245_v3, 5  ;;  %v666_v36 = vor.u32 %v665_v7, %v661_v8  ;;  %v333_v59 = vld [vmem:[%s7410_s20 + $0xbc] sm:$0x1] }
  0xcd   : > { %7034 = vmatmul.mubr.bf16.gmra.mxu0 %v5792_v14  ;;  %v861_v22 = vsel %vm7437_vm4, %v5745_v57, %v860_v20  ;;  %v862_v5 = vrot.slane %v860_v20, 4  ;;  %v870_v40 = vrot.slane %v8256_v2, 5  ;;  %v674_v3 = vshrl.u32 %v8377_v41, 16  ;;  %v735_v31 = vld [vmem:[%s7410_s20 + $0xa8] sm:$0xe] }
  0xce   : > { %v662_v18 = vsel %vm7456_vm5, %v657_v17, %v661_v8  ;;  %v868_v30 = vsel %vm7437_vm4, %v5746_v21, %v867_v63  ;;  %v869_v19 = vrot.slane %v867_v63, 4  ;;  %v667_v28 = vrot.slane %v666_v36, 4 }
  0xcf   : > { %v864_v4 = vsel %vm7437_vm4, %v862_v5, %v863_v1  ;;  %v677_v44 = vshll.u32 %v8377_v41, 16  ;;  %v683_v2 = vshll.u32 %v8383_v29, 16  ;;  %2760 = vmatmul.mubr.bf16.gmra.mxu1 %v5763_v56  ;;  %v676_v47 = vrot.slane %v674_v3, 4  ;;  %v736_v1 = vld [vmem:[%s7410_s20 + $0xb4] sm:$0xe] }
  0xd0   : > { %v5793_v0 = vcombine.low %v861_v22, %v864_v4  ;;  %v871_v24 = vsel %vm7437_vm4, %v869_v19, %v870_v40  ;;  %v687_v58 = vshrl.u32 %v8383_v29, 16  ;;  %v672_v13 = vsel %vm7456_vm5, %v667_v28, %v671_v54  ;;  %v8439_v22 = vld [vmem:[%s7410_s20 + $0x18] sm:$0xf]  ;;  %v8447_v28 = vld [vmem:[%s7410_s20 + $0x1c] sm:$0xf] }
  0xd1   : > { %v5794_v11 = vcombine.low %v868_v30, %v871_v24  ;;  %v679_v23 = vrot.slane %v677_v44, 5  ;;  %v685_v10 = vrot.slane %v683_v2, 5  ;;  %v5780_v61 = vcombine.low %v662_v18, %v672_v13 }
  0xd2   : > { %7037 = vmatprep.mubr.bf16.mxu0 %v5793_v0  ;;  %v689_v25 = vrot.slane %v687_v58, 4  ;;  %v693_v56 = vshll.u32 %v8389_v34, 16  ;;  %v5747_v39 = vrot.slane %v733_v27, 9  ;;  %v874_v12 = vrot.slane %v8293_v37, 5 }
  0xd3   : > { %v680_v35 = vor.u32 %v679_v23, %v676_v47  ;;  %v877_v6 = vrot.slane %v8301_v48, 5  ;;  %v5765_v51 = vcombine.low %v8377_v41, %v8383_v29  ;;  %2767 = vmatprep.mubr.bf16.mxu1 %v5780_v61  ;;  %v5748_v16 = vrot.slane %v734_v33, 9  ;;  %v6007_v23 = vld [vmem:[%s7410_s20 + $0x20] sm:$0x1]  ;;  %v6023_v61 = vld [vmem:[%s7410_s20 + $0x18] sm:$0xe] }
  0xd4   : > { %v690_v42 = vor.u32 %v689_v25, %v685_v10  ;;  %v695_v15 = vrot.slane %v693_v56, 5  ;;  %v881_v26 = vrot.slane %v8346_v55, 5  ;;  %v875_v37 = vsel %vm7437_vm4, %v5747_v39, %v874_v12 }
  0xd5   : > { %7038 = vmatmul.mubr.bf16.gmra.mxu0 %v5794_v11  ;;  %v681_v9 = vrot.slane %v680_v35, 4  ;;  %v876_v48 = vrot.slane %v874_v12, 4  ;;  %v884_v60 = vrot.slane %v8356_v52, 5  ;;  %v698_v45 = vshrl.u32 %v8413_v43, 16 }
  0xd6   : > { %v691_v46 = vrot.slane %v690_v42, 4  ;;  %v882_v62 = vsel %vm7437_vm4, %v5748_v16, %v881_v26  ;;  %v883_v38 = vrot.slane %v881_v26, 4  ;;  %v701_v14 = vshll.u32 %v8413_v43, 16 }
  0xd7   : > { %v686_v57 = vsel %vm7456_vm5, %v681_v9, %v685_v10  ;;  %v878_v55 = vsel %vm7437_vm4, %v876_v48, %v877_v6  ;;  %v707_v52 = vshll.u32 %v8416_v53, 16  ;;  %2768 = vmatmul.mubr.bf16.gmra.mxu1 %v5764_v49  ;;  %v700_v20 = vrot.slane %v698_v45, 4  ;;  %v8470_v48 = vld [vmem:[%s7410_s20 + $0x28] sm:$0xf] }
  0xd8   : > { %v696_v8 = vsel %vm7456_vm5, %v691_v46, %v695_v15  ;;  %v5795_v7 = vcombine.low %v875_v37, %v878_v55  ;;  %v885_v54 = vsel %vm7437_vm4, %v883_v38, %v884_v60  ;;  %v703_v63 = vrot.slane %v701_v14, 5  ;;  %v6024_v38 = vld [vmem:[%s7410_s20 + $0x24] sm:$0xe] }
  0xd9   : > { %v5781_v17 = vcombine.low %v686_v57, %v696_v8  ;;  %v5796_v21 = vcombine.low %v882_v62, %v885_v54  ;;  %v709_v36 = vrot.slane %v707_v52, 5  ;;  %v711_v5 = vshrl.u32 %v8416_v53, 16  ;;  %v6008_v62 = vld [vmem:[%s7410_s20 + $0x2c] sm:$0x1]  ;;  %v8480_v14 = vld [vmem:[%s7410_s20 + $0x24] sm:$0xf] }
  0xda   : > { %7041 = vmatprep.mubr.bf16.mxu0 %v5795_v7  ;;  %v717_v49 = vshll.u32 %v333_v59, 16  ;;  %v5749_v40 = vrot.slane %v735_v31, 9  ;;  %v888_v18 = vrot.slane %v8383_v29, 5  ;;  %v704_v30 = vor.u32 %v703_v63, %v700_v20 }
  0xdb   : > { %2775 = vmatprep.mubr.bf16.mxu1 %v5781_v17  ;;  %v891_v19 = vrot.slane %v8389_v34, 5  ;;  %v5766_v3 = vcombine.low %v8413_v43, %v8416_v53  ;;  %v5750_v27 = vrot.slane %v736_v1, 9  ;;  %v713_v4 = vrot.slane %v711_v5, 4 }
  0xdc   : > { %v719_v44 = vrot.slane %v717_v49, 5  ;;  %v889_v2 = vsel %vm7437_vm4, %v5749_v40, %v888_v18  ;;  %v890_v0 = vrot.slane %v888_v18, 4  ;;  %v705_v24 = vrot.slane %v704_v30, 4 }
  0xdd   : > { %7042 = vmatmul.mubr.bf16.gmra.mxu0 %v5796_v21  ;;  %v895_v47 = vrot.slane %v8416_v53, 5  ;;  %v898_v58 = vrot.slane %v333_v59, 5  ;;  %v3003_v34 = vshrl.u32 %v8439_v22, 16  ;;  %v714_v13 = vor.u32 %v713_v4, %v709_v36 }
  0xde   : > { %v892_v11 = vsel %vm7437_vm4, %v890_v0, %v891_v19  ;;  %v3006_v10 = vshll.u32 %v8439_v22, 16  ;;  %v3012_v33 = vshll.u32 %v8447_v28, 16  ;;  %v710_v25 = vsel %vm7456_vm5, %v705_v24, %v709_v36 }
  0xdf   : > { %v5797_v56 = vcombine.low %v889_v2, %v892_v11  ;;  %v896_v39 = vsel %vm7437_vm4, %v5750_v27, %v895_v47  ;;  %v897_v35 = vrot.slane %v895_v47, 4  ;;  %2776 = vmatmul.mubr.bf16.gmra.mxu1 %v5765_v51  ;;  %v715_v12 = vrot.slane %v714_v13, 4  ;;  %v6025_v11 = vld [vmem:[%s7410_s20 + $0x30] sm:$0xe] }
  0xe0   : > { %v3005_v6 = vrot.slane %v3003_v34, 4  ;;  %v3008_v42 = vrot.slane %v3006_v10, 5  ;;  %v3014_v15 = vrot.slane %v3012_v33, 5  ;;  %v3016_v26 = vshrl.u32 %v8447_v28, 16 }
  0xe1   : > { %7045 = vmatprep.mubr.bf16.mxu0 %v5797_v56  ;;  %v899_v16 = vsel %vm7437_vm4, %v897_v35, %v898_v58  ;;  %v3022_v9 = vshll.u32 %v6007_v23, 16  ;;  %v6039_v37 = vrot.slane %v6023_v61, 9  ;;  %v720_v41 = vsel %vm7456_vm5, %v715_v12, %v719_v44  ;;  %v8502_v58 = vld [vmem:[%s7410_s20 + $0x34] sm:$0xf]  ;;  %v6026_v35 = vld [vmem:[%s7410_s20 + $0x3c] sm:$0xe] }
  0xe2   : > { %v5798_v29 = vcombine.low %v896_v39, %v899_v16  ;;  %v3009_v51 = vor.u32 %v3008_v42, %v3005_v6  ;;  %v3452_v60 = vrot.slane %v8447_v28, 5  ;;  %v5782_v45 = vcombine.low %v710_v25, %v720_v41  ;;  %v8518_v39 = vld [vmem:[%s7410_s20 + $0x40] sm:$0xf]  ;;  %v8522_v16 = vld [vmem:[%s7410_s20 + $0x44] sm:$0x1] }
  0xe3   : > { %v3018_v57 = vrot.slane %v3016_v26, 4  ;;  %v3024_v55 = vrot.slane %v3022_v9, 5  ;;  %v3455_v59 = vrot.slane %v6007_v23, 5  ;;  %v6055_v54 = vcombine.low %v8439_v22, %v8447_v28 }
  0xe4   : > { %v3010_v52 = vrot.slane %v3009_v51, 4  ;;  %v3453_v31 = vsel %vm7437_vm4, %v6039_v37, %v3452_v60  ;;  %v3454_v8 = vrot.slane %v3452_v60, 4  ;;  %2783 = vmatprep.mubr.bf16.mxu1 %v5782_v45  ;;  %v6040_v17 = vrot.slane %v6024_v38, 9  ;;  %v8529_v60 = vld [vmem:[%s7410_s20 + $0x30] sm:$0xf] }
  0xe5   : > { %7046 = vmatmul.mubr.bf16.gmra.mxu0 %v5798_v29  ;;  %v3019_v1 = vor.u32 %v3018_v57, %v3014_v15  ;;  %v3459_v21 = vrot.slane %v8470_v48, 5  ;;  %v3462_v63 = vrot.slane %v6008_v62, 5  ;;  %v3027_v18 = vshrl.u32 %v8480_v14, 16 }
  0xe6   : > { %v3015_v36 = vsel %vm7456_vm5, %v3010_v52, %v3014_v15  ;;  %v3456_v5 = vsel %vm7437_vm4, %v3454_v8, %v3455_v59  ;;  %v3030_v22 = vshll.u32 %v8480_v14, 16  ;;  %v3036_v47 = vshll.u32 %v8470_v48, 16 }
  0xe7   : > { %v3020_v30 = vrot.slane %v3019_v1, 4  ;;  %v6087_v19 = vcombine.low %v3453_v31, %v3456_v5  ;;  %v3460_v27 = vsel %vm7437_vm4, %v6040_v17, %v3459_v21  ;;  %v3461_v28 = vrot.slane %v3459_v21, 4  ;;  %2784 = vmatmul.mubr.bf16.gmra.mxu1 %v5766_v3  ;;  %v8510_v3 = vld [vmem:[%s7410_s20 + $0x38] sm:$0x1] }
  0xe8   : > { %v3029_v0 = vrot.slane %v3027_v18, 4  ;;  %v3032_v24 = vrot.slane %v3030_v22, 5  ;;  %v3040_v43 = vshrl.u32 %v8470_v48, 16  ;;  %v3046_v53 = vshll.u32 %v6008_v62, 16  ;;  %v7282_v18 = vld [vmem:[%s9807_s2 + $0x38] sm:$0xff]  }
  0xe9   : > { %v3025_v34 = vsel %vm7456_vm5, %v3020_v30, %v3024_v55  ;;  %7065 = vmatprep.mubr.bf16.mxu1 %v6087_v19  ;;  %v3463_v13 = vsel %vm7437_vm4, %v3461_v28, %v3462_v63  ;;  %v3038_v6 = vrot.slane %v3036_v47, 5  ;;  %v6041_v9 = vrot.slane %v6025_v11, 9  ;;  %v8563_v28 = vld [vmem:[%s7410_s20 + $0x4c] sm:$0xf] }
  0xea   : > { %v6071_v23 = vcombine.low %v3015_v36, %v3025_v34  ;;  %v6088_v10 = vcombine.low %v3460_v27, %v3463_v13  ;;  %v3033_v25 = vor.u32 %v3032_v24, %v3029_v0  ;;  %v3042_v42 = vrot.slane %v3040_v43, 4  ;;  %v8570_v34 = vld [vmem:[%s7410_s20 + $0x50] sm:$0x1] }
  0xeb   : > { %v3048_v15 = vrot.slane %v3046_v53, 5  ;;  %v3466_v37 = vrot.slane %v8502_v58, 5  ;;  %v3469_v41 = vrot.slane %v8510_v3, 5  ;;  %v6056_v45 = vcombine.low %v8480_v14, %v8470_v48 }
  0xec   : > { %3994 = vmatprep.mubr.bf16.mxu0 %v6071_v23  ;;  %v3034_v26 = vrot.slane %v3033_v25, 4  ;;  %v3043_v38 = vor.u32 %v3042_v42, %v3038_v6  ;;  %v6042_v57 = vrot.slane %v6026_v35, 9  ;;  %v3473_v31 = vrot.slane %v8518_v39, 5  ;;  %v6028_v42 = vld [vmem:[%s7410_s20 + $0x54] sm:$0xe] }
  0xed   : > { %v8475_v46 = vpop.f32.mrf.mxu1  ;;  %v6537_v7 = vpop.f32.mrf.mxu0  ;;  %3995 = vmatmul.mubr.bf16.vlgmr.msra.gmra.mxu0 %v6055_v54  ;;  %v3467_v59 = vsel %vm7437_vm4, %v6041_v9, %v3466_v37  ;;  %v3468_v52 = vrot.slane %v3466_v37, 4  ;;  %v3476_v48 = vrot.slane %v8522_v16, 5  ;;  %v3051_v1 = vshrl.u32 %v8529_v60, 16 }
  0xee   : > { %v3039_v55 = vsel %vm7456_vm5, %v3034_v26, %v3038_v6  ;;  %v3474_v21 = vsel %vm7437_vm4, %v6042_v57, %v3473_v31  ;;  %v3475_v63 = vrot.slane %v3473_v31, 4  ;;  %v3060_v47 = vshll.u32 %v8502_v58, 16 }
  0xef   : > { %v2360_v20 = vpop.f32.mrf.mxu1  ;;  %v6538_v49 = vpop.f32.mrf.mxu0  ;;  %7066 = vmatmul.mubr.bf16.vlgmr.msra.gmra.mxu1 %v6088_v10  ;;  %v3470_v17 = vsel %vm7437_vm4, %v3468_v52, %v3469_v41  ;;  %v3053_v27 = vrot.slane %v3051_v1, 4  ;;  %v3064_v53 = vshrl.u32 %v8502_v58, 16  ;;  %v3070_v11 = vshll.u32 %v8510_v3, 16  ;;  %v8580_v10 = vld [vmem:[%s7410_s20 + $0x58] sm:$0xf] }
  0xf0   : > { %v6539_v4 = vadd.f32 %v6538_v49, %v6537_v7  ;;  %v7261_v7 = vld [vmem:[%s9807_s2 + $0x30] sm:$0xff]   ;;  %v3054_v49 = vshll.u32 %v8529_v60, 16  ;;  %7098 = vmatpush3.bf16.msra.mxu1 %v7282_v18  ;;  %v6089_v30 = vcombine.low %v3467_v59, %v3470_v17  ;;  %v3062_v35 = vrot.slane %v3060_v47, 5 }
  0xf1   : > { %v8491_v40 = vpop.f32.mrf.mxu1  ;;  %v6540_v44 = vpop.f32.mrf.mxu0  ;;  %7099 = vmatprep.subr.bf16.mxu1 %v7261_v7  ;;  %v3480_v6 = vrot.slane %v8563_v28, 5  ;;  %v3066_v3 = vrot.slane %v3064_v53, 4  ;;  %v3072_v26 = vrot.slane %v3070_v11, 5  ;;  %v3483_v9 = vrot.slane %v8570_v34, 5 }
  0xf2   : > { %v8513_v33 = vadd.f32 %v6539_v4, %v2360_v20  ;;  %v3044_v20 = vrot.slane %v3043_v38, 4  ;;  %v6027_v4 = vld [vmem:[%s7410_s20 + $0x48] sm:$0xe]  ;;  %v3056_v24 = vrot.slane %v3054_v49, 5  ;;  %7069 = vmatprep.mubr.bf16.mxu1 %v6089_v30  ;;  %v6044_v52 = vrot.slane %v6028_v42, 9 }
  0xf3   : > { %v2363_v2 = vpop.f32.mrf.mxu1  ;;  %v6541_v61 = vpop.f32.mrf.mxu0  ;;  %v3067_v59 = vor.u32 %v3066_v3, %v3062_v35  ;;  %v3487_v31 = vrot.slane %v8580_v10, 5  ;;  %v3094_v47 = vshll.u32 %v8522_v16, 16 }
  0xf4   : > { %9816 = vst [vmem:[#allocation2_spill] sm:$0xff] %v8513_v33  ;;  %v6542_v12 = vadd.f32 %v6541_v61, %v6540_v44  ;;  %v3049_v22 = vsel %vm7456_vm5, %v3044_v20, %v3048_v15  ;;  %v8583_v61 = vld [vmem:[%s7410_s20 + $0x5c] sm:$0x1]  ;;  %v3057_v25 = vor.u32 %v3056_v24, %v3053_v27  ;;  %7100 = vmatpush3.bf16.msra.mxu1 %v7261_v7  ;;  %v3084_v27 = vshll.u32 %v8518_v39, 16  ;;  %v6169_v33 = vld [vmem:[%s7410_s20 + $0x34] sm:$0xf] }
  0xf5   : > { %v8515_v56 = vpop.f32.mrf.mxu1  ;;  %v6543_v29 = vpop.f32.mrf.mxu0  ;;  %v6072_v44 = vcombine.low %v3039_v55, %v3049_v22  ;;  %v3482_v55 = vrot.slane %v3480_v6, 4  ;;  %v3068_v1 = vrot.slane %v3067_v59, 4  ;;  %v3088_v24 = vshrl.u32 %v8518_v39, 16 }
  0xf6   : > { %v8531_v62 = vadd.f32 %v6542_v12, %v2363_v2  ;;  %v3477_v2 = vsel %vm7437_vm4, %v3475_v63, %v3476_v48  ;;  %v6043_v12 = vrot.slane %v6027_v4, 9  ;;  %v3058_v38 = vrot.slane %v3057_v25, 4  ;;  %v6029_v4 = vld [vmem:[%s7410_s20 + $0x60] sm:$0xe] }
  0xf7   : > { %v8526_v51 = vpop.f32.mrf.mxu1  ;;  %v6544_v8 = vpop.f32.mrf.mxu0  ;;  %v6090_v13 = vcombine.low %v3474_v21, %v3477_v2  ;;  %4002 = vmatprep.mubr.bf16.mxu0 %v6072_v44  ;;  %v3488_v21 = vsel %vm7437_vm4, %v6044_v52, %v3487_v31  ;;  %v3489_v63 = vrot.slane %v3487_v31, 4  ;;  %v7267_v44 = vld [vmem:[%s9807_s2 + $0x18] sm:$0xff]   ;;  %v3073_v2 = vsel %vm7456_vm5, %v3068_v1, %v3072_v26  ;;  %v7269_v31 = vld [vmem:[%s9807_s2 + $0x10] sm:$0xff]  }
  0xf8   : > { %9817 = vst [vmem:[#allocation3_spill] sm:$0xff] %v8531_v62  ;;  %v6545_v14 = vadd.f32 %v6544_v8, %v6543_v29  ;;  %4003 = vmatmul.mubr.bf16.gmra.mxu0 %v6056_v45  ;;  %v8594_v29 = vld [vmem:[%s7410_s20 + $0x3c] sm:$0xf]  ;;  %v3481_v57 = vsel %vm7437_vm4, %v6043_v12, %v3480_v6  ;;  %v6057_v45 = vcombine.low %v8529_v60, %v8502_v58  ;;  %v3490_v8 = vrot.slane %v8583_v61, 5  ;;  %v8640_v12 = vld [vmem:[%s7410_s20 + $0x70] sm:$0xf] }
  0xf9   : > { %v8543_v54 = vpop.f32.mrf.mxu1  ;;  %v6546_v36 = vpop.f32.mrf.mxu0  ;;  %7070 = vmatmul.mubr.bf16.gmra.mxu1 %v6090_v13  ;;  %v3063_v48 = vsel %vm7456_vm5, %v3058_v38, %v3062_v35  ;;  %v3484_v58 = vsel %vm7437_vm4, %v3482_v55, %v3483_v9  ;;  %v3078_v30 = vshll.u32 %v8594_v29, 16  ;;  %v8635_v13 = vld [vmem:[%s7410_s20 + $0x68] sm:$0x1]  ;;  %v6030_v6 = vld [vmem:[%s7410_s20 + $0x6c] sm:$0xe]  ;;  %v3086_v42 = vrot.slane %v3084_v27, 5 }
  0xfa   : > { %v8560_v19 = vadd.f32 %v8475_v46, %v6545_v14  ;;  %v7263_v46 = vld [vmem:[%s9807_s2 + $0x28] sm:$0xff]   ;;  %v3075_v14 = vshrl.u32 %v8594_v29, 16  ;;  %v6091_v17 = vcombine.low %v3481_v57, %v3484_v58  ;;  %v6073_v53 = vcombine.low %v3063_v48, %v3073_v2  ;;  %v8644_v38 = vld [vmem:[%s7410_s20 + $0x74] sm:$0x1] }
  0xfb   : > { %v8551_v5 = vpop.f32.mrf.mxu1  ;;  %v6547_v0 = vpop.f32.mrf.mxu0  ;;  %7101 = vmatprep.subr.bf16.mxu1 %v7263_v46  ;;  %v3080_v35 = vrot.slane %v3078_v30, 5  ;;  %v3090_v3 = vrot.slane %v3088_v24, 4  ;;  %v3096_v26 = vrot.slane %v3094_v47, 5  ;;  %v6045_v9 = vrot.slane %v6029_v4, 9 }
  0xfc   : > { %9818 = vst [vmem:[#allocation4_spill] sm:$0xff] %v8560_v19  ;;  %v6548_v43 = vadd.f32 %v6547_v0, %v6546_v36  ;;  %7102 = vmatpush3.bf16.msra.mxu1 %v7263_v46  ;;  %v3077_v22 = vrot.slane %v3075_v14, 4  ;;  %7073 = vmatprep.mubr.bf16.mxu1 %v6091_v17  ;;  %v8632_v46 = vld [vmem:[%s7410_s20 + $0x64] sm:$0xf]  ;;  %v3497_v52 = vrot.slane %v8635_v13, 5  ;;  %v3501_v48 = vrot.slane %v8640_v12, 5 }
  0xfd   : > { %v8577_v23 = vpop.f32.mrf.mxu1  ;;  %v6549_v37 = vpop.f32.mrf.mxu0  ;;  %4010 = vmatprep.mubr.bf16.mxu0 %v6073_v53  ;;  %v3494_v59 = vrot.slane %v8632_v46, 5 }
  0xfe   : > { %v8588_v15 = vadd.f32 %v8491_v40, %v6548_v43  ;;  %v7265_v40 = vld [vmem:[%s9807_s2 + $0x20] sm:$0xff]   ;;  %v3081_v55 = vor.u32 %v3080_v35, %v3077_v22  ;;  %v6031_v35 = vld [vmem:[%s7410_s20 + $0x78] sm:$0xe] }
  0xff   : > { %v8591_v41 = vpop.f32.mrf.mxu1  ;;  %v6550_v7 = vpop.f32.mrf.mxu0  ;;  %7103 = vmatprep.subr.bf16.mxu1 %v7265_v40  ;;  %v3495_v1 = vsel %vm7437_vm4, %v6045_v9, %v3494_v59  ;;  %v3496_v17 = vrot.slane %v3494_v59, 4  ;;  %v3112_v59 = vshrl.u32 %v8563_v28, 16 }
 0x100   : > { %9819 = vst [vmem:[#allocation5_spill] sm:$0xff] %v8588_v15  ;;  %v6551_v60 = vadd.f32 %v6550_v7, %v6549_v37  ;;  %7104 = vmatpush3.bf16.msra.mxu1 %v7265_v40  ;;  %4011 = vmatmul.mubr.bf16.gmra.mxu0 %v6057_v45  ;;  %v6058_v7 = vcombine.low %v8594_v29, %v8518_v39  ;;  %v6046_v40 = vrot.slane %v6030_v6, 9  ;;  %v3082_v14 = vrot.slane %v3081_v55, 4 }
 0x101   : > { %v8605_v20 = vpop.f32.mrf.mxu1  ;;  %v6552_v36 = vpop.f32.mrf.mxu0  ;;  %7105 = vmatprep.subr.bf16.mxu1 %v7267_v44  ;;  %v3504_v45 = vrot.slane %v8644_v38, 5  ;;  %v3503_v29 = vrot.slane %v3501_v48, 4  ;;  %v3498_v27 = vsel %vm7437_vm4, %v3496_v17, %v3497_v52  ;;  %v3118_v52 = vshll.u32 %v8570_v34, 16  ;;  %v8709_v17 = vld [vmem:[%s7410_s20 + $0x8c] sm:$0x1]  ;;  %v7273_v34 = vld [vmem:[%s9807_s2] sm:$0xff]  }
 0x102   : > { %v8617_v18 = vadd.f32 %v6551_v60, %v8526_v51  ;;  %v3491_v51 = vsel %vm7437_vm4, %v3489_v63, %v3490_v8  ;;  %v3091_v8 = vor.u32 %v3090_v3, %v3086_v42  ;;  %v8662_v60 = vld [vmem:[%s7410_s20 + $0x48] sm:$0xf]  ;;  %v3502_v39 = vsel %vm7437_vm4, %v6046_v40, %v3501_v48 }
 0x103   : > { %v8614_v49 = vpop.f32.mrf.mxu1  ;;  %v6553_v0 = vpop.f32.mrf.mxu0  ;;  %v6092_v11 = vcombine.low %v3488_v21, %v3491_v51  ;;  %v3087_v30 = vsel %vm7456_vm5, %v3082_v14, %v3086_v42  ;;  %v3099_v4 = vshrl.u32 %v8662_v60, 16  ;;  %v3102_v2 = vshll.u32 %v8662_v60, 16  ;;  %v7271_v51 = vld [vmem:[%s9807_s2 + $0x8] sm:$0xff]  }
 0x104   : > { %9820 = vst [vmem:[#allocation6_spill] sm:$0xff] %v8617_v18  ;;  %v6554_v25 = vadd.f32 %v6553_v0, %v6552_v36  ;;  %v3092_v21 = vrot.slane %v3091_v8, 4  ;;  %7106 = vmatpush3.bf16.msra.mxu1 %v7267_v44  ;;  %v6093_v44 = vcombine.low %v3495_v1, %v3498_v27  ;;  %v3505_v24 = vsel %vm7437_vm4, %v3503_v29, %v3504_v45  ;;  %v6032_v8 = vld [vmem:[%s7410_s20 + $0x84] sm:$0xe]  ;;  %v8717_v29 = vld [vmem:[%s7410_s20 + $0x54] sm:$0xf] }
 0x105   : > { %v8637_v43 = vpop.f32.mrf.mxu1  ;;  %v6555_v37 = vpop.f32.mrf.mxu0  ;;  %7074 = vmatmul.mubr.bf16.gmra.mxu1 %v6092_v11  ;;  %7107 = vmatprep.subr.bf16.mxu1 %v7269_v31  ;;  %v8688_v11 = vld [vmem:[%s7410_s20 + $0x7c] sm:$0xf]  ;;  %v6094_v42 = vcombine.low %v3502_v39, %v3505_v24  ;;  %v3101_v9 = vrot.slane %v3099_v4, 4  ;;  %v3104_v55 = vrot.slane %v3102_v2, 5  ;;  %v6047_v48 = vrot.slane %v6031_v35, 9 }
 0x106   : > { %v8649_v57 = vadd.f32 %v6554_v25, %v8551_v5  ;;  %v3097_v0 = vsel %vm7456_vm5, %v3092_v21, %v3096_v26  ;;  %v8691_v25 = vld [vmem:[%s7410_s20 + $0x80] sm:$0x1]  ;;  %7077 = vmatprep.mubr.bf16.mxu1 %v6093_v44  ;;  %v3120_v39 = vrot.slane %v3118_v52, 5  ;;  %v6048_v27 = vrot.slane %v6032_v8, 9 }
 0x107   : > { %v8646_v16 = vpop.f32.mrf.mxu1  ;;  %v6556_v5 = vpop.f32.mrf.mxu0  ;;  %v6074_v6 = vcombine.low %v3087_v30, %v3097_v0  ;;  %v3511_v14 = vrot.slane %v8691_v25, 5  ;;  %v6059_v30 = vcombine.low %v8662_v60, %v8563_v28  ;;  %v3518_v24 = vrot.slane %v8709_v17, 5 }
 0x108   : > { %9821 = vst [vmem:[#allocation7_spill] sm:$0xff] %v8649_v57  ;;  %v6557_v63 = vadd.f32 %v6556_v5, %v6555_v37  ;;  %v8697_v37 = vld [vmem:[%s7410_s20 + $0x88] sm:$0xf]  ;;  %7108 = vmatpush3.bf16.msra.mxu1 %v7269_v31  ;;  %v3508_v5 = vrot.slane %v8688_v11, 5  ;;  %v3105_v31 = vor.u32 %v3104_v55, %v3101_v9  ;;  %v3126_v60 = vshll.u32 %v8717_v29, 16 }
 0x109   : > { %v8659_v58 = vpop.f32.mrf.mxu1  ;;  %v6558_v36 = vpop.f32.mrf.mxu0  ;;  %4018 = vmatprep.mubr.bf16.mxu0 %v6074_v6  ;;  %7109 = vmatprep.subr.bf16.mxu1 %v7271_v51  ;;  %v3515_v44 = vrot.slane %v8697_v37, 5  ;;  %v3204_v32 = vshll.u32 %v8688_v11, 16 }
 0x10a   : > { %v8685_v47 = vadd.f32 %v8515_v56, %v6557_v63  ;;  %v3108_v56 = vshll.u32 %v8563_v28, 16  ;;  %4019 = vmatmul.mubr.bf16.gmra.mxu0 %v6058_v7  ;;  %v3509_v63 = vsel %vm7437_vm4, %v6047_v48, %v3508_v5  ;;  %v3106_v0 = vrot.slane %v3105_v31, 4 }
 0x10b   : > { %v8669_v22 = vpop.f32.mrf.mxu1  ;;  %v6559_v53 = vpop.f32.mrf.mxu0  ;;  %v3123_v28 = vshrl.u32 %v8717_v29, 16  ;;  %v3128_v48 = vrot.slane %v3126_v60, 5  ;;  %v3132_v31 = vshll.u32 %v8580_v10, 16  ;;  %v8766_v60 = vld [vmem:[%s7410_s20 + $0xa4] sm:$0x1] }
 0x10c   : > { %9822 = vst [vmem:[#allocation8_spill] sm:$0xff] %v8685_v47  ;;  %v6560_v3 = vadd.f32 %v6559_v53, %v6558_v36  ;;  %v3110_v21 = vrot.slane %v3108_v56, 5  ;;  %v3510_v36 = vrot.slane %v3508_v5, 4  ;;  %7110 = vmatpush3.bf16.msra.mxu1 %v7271_v51  ;;  %v3516_v51 = vsel %vm7437_vm4, %v6048_v27, %v3515_v44  ;;  %v6022_v47 = vld [vmem:[%s7410_s20 + $0xd4] sm:$0x1] }
 0x10d   : > { %v8694_v26 = vpop.f32.mrf.mxu1  ;;  %v6561_v1 = vpop.f32.mrf.mxu0  ;;  %7078 = vmatmul.mubr.bf16.gmra.mxu1 %v6094_v42  ;;  %7111 = vmatprep.subr.bf16.mxu1 %v7273_v34  ;;  %v3517_v56 = vrot.slane %v3515_v44, 4  ;;  %v3125_v8 = vrot.slane %v3123_v28, 4  ;;  %v8763_v28 = vld [vmem:[%s7410_s20 + $0xa0] sm:$0xf] }
 0x10e   : > { %v8704_v40 = vadd.f32 %v8543_v54, %v6560_v3  ;;  %v3114_v54 = vrot.slane %v3112_v59, 4  ;;  %v3512_v53 = vsel %vm7437_vm4, %v3510_v36, %v3511_v14  ;;  %v3111_v3 = vsel %vm7456_vm5, %v3106_v0, %v3110_v21 }
 0x10f   : > { %v8711_v45 = vpop.f32.mrf.mxu1  ;;  %v6562_v4 = vpop.f32.mrf.mxu0  ;;  %v6095_v55 = vcombine.low %v3509_v63, %v3512_v53  ;;  %v3519_v36 = vsel %vm7437_vm4, %v3517_v56, %v3518_v24  ;;  %v3129_v27 = vor.u32 %v3128_v48, %v3125_v8  ;;  %v6060_v8 = vcombine.low %v8717_v29, %v8580_v10 }
 0x110   : > { %9823 = vst [vmem:[#allocation9_spill] sm:$0xff] %v8704_v40  ;;  %v3115_v7 = vor.u32 %v3114_v54, %v3110_v21  ;;  %v6563_v35 = vadd.f32 %v6562_v4, %v6561_v1  ;;  %v3136_v21 = vshrl.u32 %v8580_v10, 16  ;;  %v8747_v54 = vld [vmem:[%s7410_s20 + $0x94] sm:$0xf]  ;;  %7112 = vmatpush3.bf16.msra.mxu1 %v7273_v34  ;;  %v3142_v4 = vshll.u32 %v8583_v61, 16 }
 0x111   : > { %v8723_v2 = vpop.f32.mrf.mxu1  ;;  %v6564_v6 = vpop.f32.mrf.mxu0  ;;  %7081 = vmatprep.mubr.bf16.mxu1 %v6095_v55  ;;  %v6096_v53 = vcombine.low %v3516_v51, %v3519_v36  ;;  %v3130_v24 = vrot.slane %v3129_v27, 4  ;;  %v3532_v36 = vrot.slane %v8766_v60, 5  ;;  %v6038_v40 = vld [vmem:[%s7410_s20 + $0xcc] sm:$0xe] }
 0x112   : > { %v3116_v9 = vrot.slane %v3115_v7, 4  ;;  %v8738_v59 = vadd.f32 %v6563_v35, %v8591_v41  ;;  %v6033_v41 = vld [vmem:[%s7410_s20 + $0x90] sm:$0xe]  ;;  %v6034_v7 = vld [vmem:[%s7410_s20 + $0x9c] sm:$0xe]  ;;  %v3138_v34 = vrot.slane %v3136_v21, 4 }
 0x113   : > { %v8729_v42 = vpop.f32.mrf.mxu1  ;;  %v6565_v52 = vpop.f32.mrf.mxu0  ;;  %v3144_v61 = vrot.slane %v3142_v4, 5  ;;  %v6050_v48 = vrot.slane %v6034_v7, 9  ;;  %v3529_v21 = vrot.slane %v8763_v28, 5 }
 0x114   : > { %9824 = vst [vmem:[#allocation10_spill] sm:$0xff] %v8738_v59  ;;  %v3121_v14 = vsel %vm7456_vm5, %v3116_v9, %v3120_v39  ;;  %v6566_v1 = vadd.f32 %v6565_v52, %v6564_v6  ;;  %v8754_v39 = vld [vmem:[%s7410_s20 + $0x98] sm:$0x1]  ;;  %v3134_v6 = vrot.slane %v3132_v31, 5  ;;  %v3522_v9 = vrot.slane %v8747_v54, 5 }
 0x115   : > { %v8740_v5 = vpop.f32.mrf.mxu1  ;;  %v6075_v63 = vcombine.low %v3111_v3, %v3121_v14  ;;  %v6567_v0 = vpop.f32.mrf.mxu0  ;;  %v6049_v3 = vrot.slane %v6033_v41, 9  ;;  %v8772_v52 = vld [vmem:[%s7410_s20 + $0x60] sm:$0xf]  ;;  %7082 = vmatmul.mubr.bf16.gmra.mxu1 %v6096_v53  ;;  %v3525_v51 = vrot.slane %v8754_v39, 5  ;;  %v3530_v4 = vsel %vm7437_vm4, %v6050_v48, %v3529_v21 }
 0x116   : > { %v8760_v35 = vadd.f32 %v6566_v1, %v8614_v49  ;;  %v3139_v49 = vor.u32 %v3138_v34, %v3134_v6  ;;  %v3135_v14 = vsel %vm7456_vm5, %v3130_v24, %v3134_v6  ;;  %v3524_v31 = vrot.slane %v3522_v9, 4 }
 0x117   : > { %v8757_v44 = vpop.f32.mrf.mxu1  ;;  %4026 = vmatprep.mubr.bf16.mxu0 %v6075_v63  ;;  %v6568_v55 = vpop.f32.mrf.mxu0  ;;  %v3523_v1 = vsel %vm7437_vm4, %v6049_v3, %v3522_v9  ;;  %v3147_v10 = vshrl.u32 %v8772_v52, 16  ;;  %v3531_v7 = vrot.slane %v3529_v21, 4  ;;  %v3150_v6 = vshll.u32 %v8772_v52, 16 }
 0x118   : > { %9825 = vst [vmem:[#allocation11_spill] sm:$0xff] %v8760_v35  ;;  %4027 = vmatmul.mubr.bf16.gmra.mxu0 %v6059_v30  ;;  %v3140_v63 = vrot.slane %v3139_v49, 4  ;;  %v6569_v27 = vadd.f32 %v6568_v55, %v6567_v0  ;;  %v3526_v29 = vsel %vm7437_vm4, %v3524_v31, %v3525_v51  ;;  %v8799_v55 = vld [vmem:[%s7410_s20 + $0xac] sm:$0xf]  ;;  %v6035_v49 = vld [vmem:[%s7410_s20 + $0xa8] sm:$0xe] }
 0x119   : > { %v8769_v56 = vpop.f32.mrf.mxu1  ;;  %v6570_v41 = vpop.f32.mrf.mxu0  ;;  %v6097_v3 = vcombine.low %v3523_v1, %v3526_v29  ;;  %v3533_v48 = vsel %vm7437_vm4, %v3531_v7, %v3532_v36  ;;  %v3149_v31 = vrot.slane %v3147_v10, 4  ;;  %v3152_v21 = vrot.slane %v3150_v6, 5  ;;  %v8805_v35 = vld [vmem:[%s7410_s20 + $0xb0] sm:$0x1]  ;;  %v6020_v36 = vld [vmem:[%s7410_s20 + $0xbc] sm:$0x1] }
 0x11a   : > { %v3145_v24 = vsel %vm7456_vm5, %v3140_v63, %v3144_v61  ;;  %v8796_v0 = vadd.f32 %v8577_v23, %v6569_v27  ;;  %v6098_v23 = vcombine.low %v3530_v4, %v3533_v48  ;;  %v3156_v63 = vshll.u32 %v8632_v46, 16  ;;  %v8815_v27 = vld [vmem:[%s7410_s20 + $0xb8] sm:$0xf]  ;;  %v6036_v6 = vld [vmem:[%s7410_s20 + $0xb4] sm:$0xe] }
 0x11b   : > { %v8782_v30 = vpop.f32.mrf.mxu1  ;;  %v6571_v53 = vpop.f32.mrf.mxu0  ;;  %v6076_v51 = vcombine.low %v3135_v14, %v3145_v24  ;;  %7085 = vmatprep.mubr.bf16.mxu1 %v6097_v3  ;;  %v3160_v14 = vshrl.u32 %v8632_v46, 16  ;;  %v3153_v10 = vor.u32 %v3152_v21, %v3149_v31  ;;  %v3166_v29 = vshll.u32 %v8635_v13, 16 }
 0x11c   : > { %9826 = vst [vmem:[#allocation12_spill] sm:$0xff] %v8796_v0  ;;  %v6572_v9 = vadd.f32 %v6571_v53, %v6570_v41  ;;  %v6051_v7 = vrot.slane %v6035_v49, 9  ;;  %v3536_v53 = vrot.slane %v8799_v55, 5  ;;  %v6061_v48 = vcombine.low %v8772_v52, %v8632_v46 }
 0x11d   : > { %v8791_v34 = vpop.f32.mrf.mxu1  ;;  %v6573_v61 = vpop.f32.mrf.mxu0  ;;  %4034 = vmatprep.mubr.bf16.mxu0 %v6076_v51  ;;  %7086 = vmatmul.mubr.bf16.gmra.mxu1 %v6098_v23  ;;  %v3162_v3 = vrot.slane %v3160_v14, 4  ;;  %v8827_v51 = vld [vmem:[%s7410_s20 + $0x6c] sm:$0xf]  ;;  %v3154_v31 = vrot.slane %v3153_v10, 4  ;;  %v3168_v13 = vrot.slane %v3166_v29, 5  ;;  %v6052_v23 = vrot.slane %v6036_v6, 9 }
 0x11e   : > { %v8810_v41 = vadd.f32 %v8605_v20, %v6572_v9  ;;  %v3158_v20 = vrot.slane %v3156_v63, 5  ;;  %v3539_v9 = vrot.slane %v8805_v35, 5  ;;  %v3537_v49 = vsel %vm7437_vm4, %v6051_v7, %v3536_v53 }
 0x11f   : > { %v8807_v1 = vpop.f32.mrf.mxu1  ;;  %v6574_v4 = vpop.f32.mrf.mxu0  ;;  %v3538_v21 = vrot.slane %v3536_v53, 4  ;;  %v3543_v63 = vrot.slane %v8815_v27, 5  ;;  %v3546_v14 = vrot.slane %v6020_v36, 5  ;;  %v3171_v7 = vshrl.u32 %v8827_v51, 16 }
 0x120   : > { %9827 = vst [vmem:[#allocation13_spill] sm:$0xff] %v8810_v41  ;;  %4035 = vmatmul.mubr.bf16.gmra.mxu0 %v6060_v8  ;;  %v3163_v8 = vor.u32 %v3162_v3, %v3158_v20  ;;  %v3159_v46 = vsel %vm7456_vm5, %v3154_v31, %v3158_v20  ;;  %v6575_v10 = vadd.f32 %v6574_v4, %v6573_v61  ;;  %v3174_v61 = vshll.u32 %v8827_v51, 16  ;;  %v6037_v4 = vld [vmem:[%s7410_s20 + $0xc0] sm:$0xe] }
 0x121   : > { %v8821_v24 = vpop.f32.mrf.mxu1  ;;  %v6576_v41 = vpop.f32.mrf.mxu0  ;;  %v3540_v52 = vsel %vm7437_vm4, %v3538_v21, %v3539_v9  ;;  %v3544_v6 = vsel %vm7437_vm4, %v6052_v23, %v3543_v63  ;;  %v3545_v36 = vrot.slane %v3543_v63, 4  ;;  %v3173_v31 = vrot.slane %v3171_v7, 4  ;;  %v6004_v23 = vld [vmem:[%s7410_s20 + $0xc4] sm:$0xf]  ;;  %v6021_v63 = vld [vmem:[%s7410_s20 + $0xc8] sm:$0x1] }
 0x122   : > { %v3164_v0 = vrot.slane %v3163_v8, 4  ;;  %v6099_v3 = vcombine.low %v3537_v49, %v3540_v52  ;;  %v8844_v57 = vadd.f32 %v6575_v10, %v8646_v16  ;;  %v3180_v16 = vshll.u32 %v8640_v12, 16 }
 0x123   : > { %v8831_v59 = vpop.f32.mrf.mxu1  ;;  %v6577_v29 = vpop.f32.mrf.mxu0  ;;  %v3547_v8 = vsel %vm7437_vm4, %v3545_v36, %v3546_v14  ;;  %v3176_v7 = vrot.slane %v3174_v61, 5  ;;  %v3190_v36 = vshll.u32 %v8644_v38, 16  ;;  %v6053_v18 = vrot.slane %v6037_v4, 9 }
 0x124   : > { %9829 = vst [vmem:[#allocation15_spill] sm:$0xff] %v8844_v57  ;;  %v6578_v20 = vadd.f32 %v6577_v29, %v6576_v41  ;;  %v3169_v49 = vsel %vm7456_vm5, %v3164_v0, %v3168_v13  ;;  %7089 = vmatprep.mubr.bf16.mxu1 %v6099_v3  ;;  %v3184_v41 = vshrl.u32 %v8640_v12, 16  ;;  %v6100_v10 = vcombine.low %v3544_v6, %v3547_v8  ;;  %v6006_v57 = vld [vmem:[%s7410_s20 + $0xd0] sm:$0xf] }
 0x125   : > { %v8839_v53 = vpop.f32.mrf.mxu1  ;;  %v6579_v9 = vpop.f32.mrf.mxu0  ;;  %v6077_v52 = vcombine.low %v3159_v46, %v3169_v49  ;;  %v3182_v3 = vrot.slane %v3180_v16, 5  ;;  %v3177_v46 = vor.u32 %v3176_v7, %v3173_v31  ;;  %v3550_v6 = vrot.slane %v6004_v23, 5 }
 0x126   : > { %9828 = vst [vmem:[#allocation14_spill] sm:$0xff] %v8839_v53  ;;  %v8859_v29 = vadd.f32 %v6578_v20, %v8669_v22  ;;  %v3186_v14 = vrot.slane %v3184_v41, 4  ;;  %7090 = vmatmul.mubr.bf16.gmra.mxu1 %v6100_v10  ;;  %v3553_v49 = vrot.slane %v6021_v63, 5  ;;  %v6062_v22 = vcombine.low %v8827_v51, %v8640_v12  ;;  %v8870_v41 = vld [vmem:[%s7410_s20 + $0x78] sm:$0xf] }
 0x127   : > { %v8848_v21 = vpop.f32.mrf.mxu1  ;;  %v6580_v0 = vpop.f32.mrf.mxu0  ;;  %4042 = vmatprep.mubr.bf16.mxu0 %v6077_v52  ;;  %v3192_v8 = vrot.slane %v3190_v36, 5  ;;  %v3557_v16 = vrot.slane %v6006_v57, 5  ;;  %v3551_v38 = vsel %vm7437_vm4, %v6053_v18, %v3550_v6  ;;  %v3552_v4 = vrot.slane %v3550_v6, 4 }
 0x128   : > { %9830 = vst [vmem:[#allocation16_spill] sm:$0xff] %v8859_v29  ;;  %4043 = vmatmul.mubr.bf16.gmra.mxu0 %v6061_v48  ;;  %v3187_v61 = vor.u32 %v3186_v14, %v3182_v3  ;;  %v3178_v29 = vrot.slane %v3177_v46, 4  ;;  %v3560_v52 = vrot.slane %v6022_v47, 5  ;;  %v3195_v47 = vshrl.u32 %v8870_v41, 16 }
 0x129   : > { %v8863_v13 = vpop.f32.mrf.mxu1  ;;  %v6582_v20 = vpop.f32.mrf.mxu0  ;;  %v3559_v51 = vrot.slane %v3557_v16, 4  ;;  %v3554_v63 = vsel %vm7437_vm4, %v3552_v4, %v3553_v49 }
 0x12a   : > { %9831 = vst [vmem:[#allocation17_spill] sm:$0xff] %v8863_v13  ;;  %v6054_v13 = vrot.slane %v6038_v40, 9  ;;  %v3188_v12 = vrot.slane %v3187_v61, 4  ;;  %v6581_v40 = vadd.f32 %v6580_v0, %v6579_v9  ;;  %v3183_v57 = vsel %vm7456_vm5, %v3178_v29, %v3182_v3  ;;  %v6159_v29 = vld [vmem:[%s7410_s20 + $0xc] sm:$0xf] }
 0x12b   : > { %v6583_v31 = vpop.f32.mrf.mxu0  ;;  %v8874_v23 = vpop.f32.mrf.mxu1  ;;  %v6101_v14 = vcombine.low %v3551_v38, %v3554_v63  ;;  %v6160_v0 = vld [vmem:[%s7410_s20 + $0x10] sm:$0xf]  ;;  %v3197_v6 = vrot.slane %v3195_v47, 4  ;;  %v3198_v61 = vshll.u32 %v8870_v41, 16  ;;  %v4633_v38 = vshrl.u32 %v6159_v29, 16 }
 0x12c   : > { %9832 = vst [vmem:[#allocation18_spill] sm:$0xff] %v8874_v23  ;;  %v3558_v48 = vsel %vm7437_vm4, %v6054_v13, %v3557_v16  ;;  %v6584_v18 = vadd.f32 %v6583_v31, %v6582_v20  ;;  %v3193_v7 = vsel %vm7456_vm5, %v3188_v12, %v3192_v8  ;;  %v3561_v13 = vsel %vm7437_vm4, %v3559_v51, %v3560_v52  ;;  %v6161_v16 = vld [vmem:[%s7410_s20 + $0x14] sm:$0x1]  ;;  %v6162_v63 = vld [vmem:[%s7410_s20 + $0x18] sm:$0xf] }
 0x12d   : > { %v8883_v10 = vpop.f32.mrf.mxu0  ;;  %v8890_v9 = vadd.f32 %v8637_v43, %v6581_v40  ;;  %v6078_v3 = vcombine.low %v3183_v57, %v3193_v7  ;;  %v6102_v36 = vcombine.low %v3558_v48, %v3561_v13  ;;  %v8897_v49 = vpop.f32.mrf.mxu1  ;;  %7093 = vmatprep.mubr.bf16.mxu1 %v6101_v14  ;;  %v3208_v43 = vshrl.u32 %v8688_v11, 16  ;;  %v6163_v14 = vld [vmem:[%s7410_s20 + $0x1c] sm:$0xf] }
 0x12e   : > { %v8895_v46 = vadd.f32 %v8659_v58, %v6584_v18  ;;  %v3214_v8 = vshll.u32 %v8691_v25, 16  ;;  %v4636_v58 = vshll.u32 %v6159_v29, 16  ;;  %v4642_v4 = vshll.u32 %v6160_v0, 16 }
 0x12f   : > { %9833 = vst [vmem:[#allocation19_spill] sm:$0xff] %v8890_v9  ;;  %v6586_v20 = vpop.f32.mrf.mxu0  ;;  %4050 = vmatprep.mubr.bf16.mxu0 %v6078_v3  ;;  %7094 = vmatmul.mubr.bf16.gmra.mxu1 %v6102_v36  ;;  %v4646_v52 = vshrl.u32 %v6160_v0, 16  ;;  %v6674_v31 = vpop.f32.mrf.mxu1  ;;  %v3200_v48 = vrot.slane %v3198_v61, 5  ;;  %v3206_v51 = vrot.slane %v3204_v32, 5  ;;  %v3210_v40 = vrot.slane %v3208_v43, 4 }
 0x130   : > { %9834 = vst [vmem:[#allocation20_spill] sm:$0xff] %v8895_v46  ;;  %4051 = vmatmul.mubr.bf16.gmra.mxu0 %v6062_v22  ;;  %v3216_v57 = vrot.slane %v3214_v8, 5  ;;  %v4635_v18 = vrot.slane %v4633_v38, 4  ;;  %v4638_v47 = vrot.slane %v4636_v58, 5  ;;  %v4644_v7 = vrot.slane %v4642_v4, 5 }
 0x131   : > { %v6588_v12 = vpop.f32.mrf.mxu0  ;;  %v4648_v25 = vrot.slane %v4646_v52, 4  ;;  %v8906_v13 = vpop.f32.mrf.mxu1  ;;  %v3201_v36 = vor.u32 %v3200_v48, %v3197_v6  ;;  %v3211_v29 = vor.u32 %v3210_v40, %v3206_v51  ;;  %v4652_v0 = vshll.u32 %v6161_v16, 16  ;;  %v6164_v40 = vld [vmem:[%s7410_s20 + $0x20] sm:$0x1] }
 0x132   : > { %v6063_v22 = vcombine.low %v8870_v41, %v8688_v11  ;;  %v4639_v61 = vor.u32 %v4638_v47, %v4635_v18  ;;  %v4657_v43 = vshrl.u32 %v6162_v63, 16  ;;  %v4660_v8 = vshll.u32 %v6162_v63, 16 }
 0x133   : > { %v6589_v3 = vpop.f32.mrf.mxu0  ;;  %v4649_v32 = vor.u32 %v4648_v25, %v4644_v7  ;;  %v8910_v46 = vpop.f32.mrf.mxu1  ;;  %v3202_v58 = vrot.slane %v3201_v36, 4  ;;  %v3212_v4 = vrot.slane %v3211_v29, 4  ;;  %v4654_v52 = vrot.slane %v4652_v0, 5 }
 0x134   : > { %v4666_v9 = vshll.u32 %v6163_v14, 16  ;;  %v4640_v6 = vrot.slane %v4639_v61, 4  ;;  %v4659_v16 = vrot.slane %v4657_v43, 4  ;;  %v4662_v62 = vrot.slane %v4660_v8, 5  ;;  %v8928_v61 = vld [vmem:[%s7410_s20 + $0x84] sm:$0xf] }
 0x135   : > { %v8912_v38 = vpop.f32.mrf.mxu0  ;;  %v4650_v48 = vrot.slane %v4649_v32, 4  ;;  %v3207_v11 = vsel %vm7456_vm5, %v3202_v58, %v3206_v51  ;;  %v3217_v41 = vsel %vm7456_vm5, %v3212_v4, %v3216_v57  ;;  %v4670_v18 = vshrl.u32 %v6163_v14, 16  ;;  %v8921_v47 = vpop.f32.mrf.mxu1 }
 0x136   : > { %v4668_v63 = vrot.slane %v4666_v9, 5  ;;  %v6079_v25 = vcombine.low %v3207_v11, %v3217_v41  ;;  %v4645_v36 = vsel %vm7456_vm5, %v4640_v6, %v4644_v7  ;;  %v4663_v0 = vor.u32 %v4662_v62, %v4659_v16 }
 0x137   : > { %v8915_v15 = vpop.f32.mrf.mxu0  ;;  %v4655_v29 = vsel %vm7456_vm5, %v4650_v48, %v4654_v52  ;;  %v4672_v43 = vrot.slane %v4670_v18, 4  ;;  %v4676_v57 = vshll.u32 %v6164_v40, 16  ;;  %v6587_v9 = vadd.f32 %v6586_v20, %v8883_v10  ;;  %v8933_v14 = vpop.f32.mrf.mxu1  ;;  %v6165_v20 = vld [vmem:[%s7410_s20 + $0x24] sm:$0xf] }
 0x138   : > { %v6207_v51 = vcombine.low %v4645_v36, %v4655_v29  ;;  %4058 = vmatprep.mubr.bf16.mxu0 %v6079_v25  ;;  %v4664_v8 = vrot.slane %v4663_v0, 4  ;;  %v8936_v7 = vadd.f32 %v6674_v31, %v8897_v49  ;;  %v6590_v58 = vadd.f32 %v6589_v3, %v6588_v12 }
 0x139   : > { %v8930_v32 = vpop.f32.mrf.mxu0  ;;  %4059 = vmatmul.mubr.bf16.gmra.mxu0 %v6063_v22  ;;  %v4673_v4 = vor.u32 %v4672_v43, %v4668_v63  ;;  %v4678_v52 = vrot.slane %v4676_v57, 5  ;;  %v8941_v6 = vadd.f32 %v6587_v9, %v8711_v45  ;;  %v3219_v10 = vshrl.u32 %v8928_v61, 16  ;;  %v8945_v48 = vpop.f32.mrf.mxu1  ;;  %v6166_v22 = vld [vmem:[%s7410_s20 + $0x28] sm:$0xf] }
 0x13a   : > { %9835 = vst [vmem:[#allocation21_spill] sm:$0xff] %v8936_v7  ;;  %7113 = vmatprep.mubr.bf16.mxu1 %v6207_v51  ;;  %v4669_v49 = vsel %vm7456_vm5, %v4664_v8, %v4668_v63  ;;  %v8950_v31 = vadd.f32 %v6590_v58, %v8729_v42  ;;  %v3222_v12 = vshll.u32 %v8928_v61, 16  ;;  %v3228_v3 = vshll.u32 %v8697_v37, 16  ;;  %v6167_v42 = vld [vmem:[%s7410_s20 + $0x2c] sm:$0x1] }
 0x13b   : > { %v8938_v62 = vpop.f32.mrf.mxu0  ;;  %9836 = vst [vmem:[#allocation22_spill] sm:$0xff] %v8941_v6  ;;  %v4674_v45 = vrot.slane %v4673_v4, 4  ;;  %v3221_v16 = vrot.slane %v3219_v10, 4  ;;  %v3232_v11 = vshrl.u32 %v8697_v37, 16  ;;  %v3238_v41 = vshll.u32 %v8709_v17, 16  ;;  %v8959_v18 = vpop.f32.mrf.mxu1 }
 0x13c   : > { %9837 = vst [vmem:[#allocation23_spill] sm:$0xff] %v8950_v31  ;;  %v3224_v63 = vrot.slane %v3222_v12, 5  ;;  %v3230_v25 = vrot.slane %v3228_v3, 5  ;;  %v4681_v36 = vshrl.u32 %v6165_v20, 16  ;;  %v4684_v29 = vshll.u32 %v6165_v20, 16 }
 0x13d   : > { %v8955_v40 = vpop.f32.mrf.mxu0  ;;  %v4679_v51 = vsel %vm7456_vm5, %v4674_v45, %v4678_v52  ;;  %v3234_v43 = vrot.slane %v3232_v11, 4  ;;  %v3240_v57 = vrot.slane %v3238_v41, 5  ;;  %v4690_v9 = vshll.u32 %v6166_v22, 16  ;;  %v6168_v8 = vld [vmem:[%s7410_s20 + $0x30] sm:$0xf]  ;;  %v8967_v31 = vpop.f32.mrf.mxu1 }
 0x13e   : > { %v6208_v58 = vcombine.low %v4669_v49, %v4679_v51  ;;  %v3225_v4 = vor.u32 %v3224_v63, %v3221_v16  ;;  %v4683_v17 = vrot.slane %v4681_v36, 4  ;;  %v4686_v10 = vrot.slane %v4684_v29, 5  ;;  %v6170_v51 = vld [vmem:[%s7410_s20 + $0x38] sm:$0x1] }
 0x13f   : > { %v8962_v0 = vpop.f32.mrf.mxu0  ;;  %v3235_v20 = vor.u32 %v3234_v43, %v3230_v25  ;;  %v4692_v3 = vrot.slane %v4690_v9, 5  ;;  %v4694_v6 = vshrl.u32 %v6166_v22, 16  ;;  %v4700_v7 = vshll.u32 %v6167_v42, 16  ;;  %v8974_v16 = vpop.f32.mrf.mxu1 }
 0x140   : > { %7114 = vmatmul.mubr.bf16.vlgmr.msra.gmra.mxu1 %v6208_v58  ;;  %v3226_v52 = vrot.slane %v3225_v4, 4  ;;  %v4687_v45 = vor.u32 %v4686_v10, %v4683_v17  ;;  %v6064_v11 = vcombine.low %v8928_v61, %v8697_v37  ;;  %v4705_v49 = vshrl.u32 %v6168_v8, 16 }
 0x141   : > { %v8969_v12 = vpop.f32.mrf.mxu0  ;;  %v3236_v63 = vrot.slane %v3235_v20, 4  ;;  %v4696_v36 = vrot.slane %v4694_v6, 4  ;;  %v4702_v29 = vrot.slane %v4700_v7, 5  ;;  %v4708_v43 = vshll.u32 %v6168_v8, 16  ;;  %v8981_v4 = vpop.f32.mrf.mxu1 }
 0x142   : > { %v3231_v22 = vsel %vm7456_vm5, %v3226_v52, %v3230_v25  ;;  %v4688_v42 = vrot.slane %v4687_v45, 4  ;;  %v4707_v9 = vrot.slane %v4705_v49, 4  ;;  %v4714_v58 = vshll.u32 %v6169_v33, 16 }
 0x143   : > { %v8976_v41 = vpop.f32.mrf.mxu0  ;;  %v3241_v37 = vsel %vm7456_vm5, %v3236_v63, %v3240_v57  ;;  %v4697_v61 = vor.u32 %v4696_v36, %v4692_v3  ;;  %v4710_v17 = vrot.slane %v4708_v43, 5  ;;  %v4718_v10 = vshrl.u32 %v6169_v33, 16  ;;  %v8989_v52 = vpop.f32.mrf.mxu1  ;;  %v8994_v63 = vld [vmem:[%s7410_s20 + $0x90] sm:$0xf] }
 0x144   : > { %v6080_v7 = vcombine.low %v3231_v22, %v3241_v37  ;;  %v4693_v6 = vsel %vm7456_vm5, %v4688_v42, %v4692_v3  ;;  %v4716_v8 = vrot.slane %v4714_v58, 5  ;;  %v4724_v25 = vshll.u32 %v6170_v51, 16  ;;  %v6172_v58 = vld [vmem:[%s7410_s20 + $0x40] sm:$0xf] }
 0x145   : > { %v8985_v20 = vpop.f32.mrf.mxu0  ;;  %v4698_v45 = vrot.slane %v4697_v61, 4  ;;  %v4711_v49 = vor.u32 %v4710_v17, %v4707_v9  ;;  %v4720_v53 = vrot.slane %v4718_v10, 4  ;;  %v6593_v57 = vadd.f32 %v8915_v15, %v8912_v38  ;;  %v6173_v10 = vld [vmem:[%s7410_s20 + $0x44] sm:$0x1] }
 0x146   : > { %v9000_v36 = vadd.f32 %v8910_v46, %v8906_v13  ;;  %4066 = vmatprep.mubr.bf16.mxu0 %v6080_v7  ;;  %v4726_v3 = vrot.slane %v4724_v25, 5  ;;  %v9004_v51 = vadd.f32 %v8933_v14, %v8921_v47  ;;  %v6596_v43 = vadd.f32 %v8938_v62, %v8930_v32  ;;  %v6171_v46 = vld [vmem:[%s7410_s20 + $0x3c] sm:$0xf]  ;;  %v9021_v62 = vpop.f32.mrf.mxu1 }
 0x147   : > { %v8996_v33 = vpop.f32.mrf.mxu0  ;;  %v4703_v15 = vsel %vm7456_vm5, %v4698_v45, %v4702_v29  ;;  %4067 = vmatmul.mubr.bf16.gmra.mxu0 %v6064_v11  ;;  %v4712_v38 = vrot.slane %v4711_v49, 4  ;;  %v4721_v22 = vor.u32 %v4720_v53, %v4716_v8  ;;  %v9011_v42 = vadd.f32 %v8694_v26, %v6593_v57  ;;  %v6174_v57 = vld [vmem:[%s7410_s20 + $0x48] sm:$0xf] }
 0x148   : > { %9838 = vst [vmem:[#allocation24_spill] sm:$0xff] %v9000_v36  ;;  %9839 = vst [vmem:[#allocation25_spill] sm:$0xff] %v9004_v51  ;;  %v6209_v9 = vcombine.low %v4693_v6, %v4703_v15  ;;  %v9017_v47 = vadd.f32 %v8723_v2, %v6596_v43  ;;  %v3243_v32 = vshrl.u32 %v8994_v63, 16  ;;  %v3246_v14 = vshll.u32 %v8994_v63, 16  ;;  %v9032_v6 = vpop.f32.mrf.mxu1 }
 0x149   : > { %9840 = vst [vmem:[#allocation26_spill] sm:$0xff] %v9011_v42  ;;  %v9014_v13 = vpop.f32.mrf.mxu0  ;;  %v4717_v53 = vsel %vm7456_vm5, %v4712_v38, %v4716_v8  ;;  %v4722_v11 = vrot.slane %v4721_v22, 4  ;;  %v3252_v26 = vshll.u32 %v8747_v54, 16  ;;  %v3256_v29 = vshrl.u32 %v8747_v54, 16 }
 0x14a   : > { %9841 = vst [vmem:[#allocation27_spill] sm:$0xff] %v9017_v47  ;;  %7117 = vmatprep.mubr.bf16.mxu1 %v6209_v9  ;;  %v3245_v2 = vrot.slane %v3243_v32, 4  ;;  %v3248_v61 = vrot.slane %v3246_v14, 5  ;;  %v3262_v17 = vshll.u32 %v8754_v39, 16  ;;  %v4729_v7 = vshrl.u32 %v6171_v46, 16  ;;  %v9037_v9 = vpop.f32.mrf.mxu1 }
 0x14b   : > { %v9028_v37 = vpop.f32.mrf.mxu0  ;;  %v4727_v8 = vsel %vm7456_vm5, %v4722_v11, %v4726_v3  ;;  %v3254_v25 = vrot.slane %v3252_v26, 5  ;;  %v3258_v45 = vrot.slane %v3256_v29, 4  ;;  %v4732_v49 = vshll.u32 %v6171_v46, 16  ;;  %v6175_v26 = vld [vmem:[%s7410_s20 + $0x4c] sm:$0xf] }
 0x14c   : > { %v6210_v43 = vcombine.low %v4717_v53, %v4727_v8  ;;  %v3249_v15 = vor.u32 %v3248_v61, %v3245_v2  ;;  %v3264_v38 = vrot.slane %v3262_v17, 5  ;;  %v4731_v22 = vrot.slane %v4729_v7, 4  ;;  %v9044_v29 = vpop.f32.mrf.mxu1 }
 0x14d   : > { %v9039_v32 = vpop.f32.mrf.mxu0  ;;  %v3259_v39 = vor.u32 %v3258_v45, %v3254_v25  ;;  %v4734_v14 = vrot.slane %v4732_v49, 5  ;;  %v4738_v47 = vshll.u32 %v6172_v58, 16  ;;  %v4742_v42 = vshrl.u32 %v6172_v58, 16  ;;  %v6176_v45 = vld [vmem:[%s7410_s20 + $0x50] sm:$0x1] }
 0x14e   : > { %7118 = vmatmul.mubr.bf16.gmra.mxu1 %v6210_v43  ;;  %v3250_v3 = vrot.slane %v3249_v15, 4  ;;  %v4748_v11 = vshll.u32 %v6173_v10, 16  ;;  %v6065_v46 = vcombine.low %v8994_v63, %v8747_v54  ;;  %v4753_v53 = vshrl.u32 %v6174_v57, 16  ;;  %v9051_v15 = vpop.f32.mrf.mxu1 }
 0x14f   : > { %v9046_v2 = vpop.f32.mrf.mxu0  ;;  %v3260_v61 = vrot.slane %v3259_v39, 4  ;;  %v4735_v17 = vor.u32 %v4734_v14, %v4731_v22  ;;  %v4740_v7 = vrot.slane %v4738_v47, 5  ;;  %v4744_v8 = vrot.slane %v4742_v42, 4 }
 0x150   : > { %v3255_v58 = vsel %vm7456_vm5, %v3250_v3, %v3254_v25  ;;  %v4750_v49 = vrot.slane %v4748_v11, 5  ;;  %v4755_v43 = vrot.slane %v4753_v53, 4  ;;  %v4756_v10 = vshll.u32 %v6174_v57, 16  ;;  %v9057_v19 = vpop.f32.mrf.mxu1 }
 0x151   : > { %v9053_v54 = vpop.f32.mrf.mxu0  ;;  %v3265_v63 = vsel %vm7456_vm5, %v3260_v61, %v3264_v38  ;;  %v4736_v36 = vrot.slane %v4735_v17, 4  ;;  %v4745_v39 = vor.u32 %v4744_v8, %v4740_v7  ;;  %v4762_v22 = vshll.u32 %v6175_v26, 16  ;;  %v9066_v38 = vld [vmem:[%s7410_s20 + $0x9c] sm:$0xf] }
 0x152   : > { %v6081_v47 = vcombine.low %v3255_v58, %v3265_v63  ;;  %v4758_v42 = vrot.slane %v4756_v10, 5  ;;  %v4766_v14 = vshrl.u32 %v6175_v26, 16  ;;  %v4772_v51 = vshll.u32 %v6176_v45, 16 }
 0x153   : > { %v9059_v25 = vpop.f32.mrf.mxu0  ;;  %v4741_v57 = vsel %vm7456_vm5, %v4736_v36, %v4740_v7  ;;  %v4746_v3 = vrot.slane %v4745_v39, 4  ;;  %v4764_v11 = vrot.slane %v4762_v22, 5  ;;  %v6599_v53 = vadd.f32 %v8962_v0, %v8955_v40  ;;  %v9076_v36 = vpop.f32.mrf.mxu1 }
 0x154   : > { %v9070_v61 = vadd.f32 %v8959_v18, %v8945_v48  ;;  %4074 = vmatprep.mubr.bf16.mxu0 %v6081_v47  ;;  %v4759_v26 = vor.u32 %v4758_v42, %v4755_v43  ;;  %v4768_v17 = vrot.slane %v4766_v14, 4  ;;  %v9074_v8 = vadd.f32 %v8974_v16, %v8967_v31  ;;  %v6177_v16 = vld [vmem:[%s7410_s20 + $0x54] sm:$0xf] }
 0x155   : > { %v4751_v7 = vsel %vm7456_vm5, %v4746_v3, %v4750_v49  ;;  %4075 = vmatmul.mubr.bf16.gmra.mxu0 %v6065_v46  ;;  %v4774_v40 = vrot.slane %v4772_v51, 5  ;;  %v9081_v0 = vadd.f32 %v6599_v53, %v8757_v44  ;;  %v6602_v48 = vadd.f32 %v8976_v41, %v8969_v12  ;;  %v9087_v43 = vpop.f32.mrf.mxu1  ;;  %v9089_v10 = vpop.f32.mrf.mxu0  ;;  %v6178_v41 = vld [vmem:[%s7410_s20 + $0x58] sm:$0xf] }
 0x156   : > { %9842 = vst [vmem:[#allocation28_spill] sm:$0xff] %v9070_v61  ;;  %9843 = vst [vmem:[#allocation29_spill] sm:$0xff] %v9074_v8  ;;  %v6211_v18 = vcombine.low %v4741_v57, %v4751_v7  ;;  %v4760_v45 = vrot.slane %v4759_v26, 4  ;;  %v4769_v58 = vor.u32 %v4768_v17, %v4764_v11  ;;  %v3267_v31 = vshrl.u32 %v9066_v38, 16  ;;  %v6179_v57 = vld [vmem:[%s7410_s20 + $0x5c] sm:$0x1] }
 0x157   : > { %9844 = vst [vmem:[#allocation30_spill] sm:$0xff] %v9081_v0  ;;  %v9092_v46 = vadd.f32 %v6602_v48, %v8782_v30  ;;  %v3270_v44 = vshll.u32 %v9066_v38, 16  ;;  %v3276_v51 = vshll.u32 %v8763_v28, 16  ;;  %v3280_v12 = vshrl.u32 %v8763_v28, 16  ;;  %v9101_v47 = vpop.f32.mrf.mxu0  ;;  %v9104_v53 = vpop.f32.mrf.mxu1  ;;  %v6180_v48 = vld [vmem:[%s7410_s20 + $0x60] sm:$0xf] }
 0x158   : > { %7121 = vmatprep.mubr.bf16.mxu1 %v6211_v18  ;;  %v4765_v49 = vsel %vm7456_vm5, %v4760_v45, %v4764_v11  ;;  %v4770_v63 = vrot.slane %v4769_v58, 4  ;;  %v3269_v39 = vrot.slane %v3267_v31, 4  ;;  %v3286_v22 = vshll.u32 %v8766_v60, 16  ;;  %v6181_v8 = vld [vmem:[%s7410_s20 + $0x64] sm:$0xf] }
 0x159   : > { %9845 = vst [vmem:[#allocation31_spill] sm:$0xff] %v9092_v46  ;;  %v3272_v30 = vrot.slane %v3270_v44, 5  ;;  %v3278_v42 = vrot.slane %v3276_v51, 5  ;;  %v3282_v14 = vrot.slane %v3280_v12, 4  ;;  %v4777_v3 = vshrl.u32 %v6177_v16, 16  ;;  %v9109_v18 = vpop.f32.mrf.mxu0  ;;  %v9111_v44 = vpop.f32.mrf.mxu1 }
 0x15a   : > { %v4775_v26 = vsel %vm7456_vm5, %v4770_v63, %v4774_v40  ;;  %v3288_v17 = vrot.slane %v3286_v22, 5  ;;  %v4780_v7 = vshll.u32 %v6177_v16, 16  ;;  %v4786_v11 = vshll.u32 %v6178_v41, 16 }
 0x15b   : > { %v6212_v60 = vcombine.low %v4765_v49, %v4775_v26  ;;  %v3273_v45 = vor.u32 %v3272_v30, %v3269_v39  ;;  %v3283_v58 = vor.u32 %v3282_v14, %v3278_v42  ;;  %v4779_v31 = vrot.slane %v4777_v3, 4  ;;  %v9114_v61 = vpop.f32.mrf.mxu0  ;;  %v9118_v39 = vpop.f32.mrf.mxu1  ;;  %v6182_v3 = vld [vmem:[%s7410_s20 + $0x68] sm:$0x1] }
 0x15c   : > { %v4782_v51 = vrot.slane %v4780_v7, 5  ;;  %v4788_v12 = vrot.slane %v4786_v11, 5  ;;  %v4790_v46 = vshrl.u32 %v6178_v41, 16  ;;  %v4796_v0 = vshll.u32 %v6179_v57, 16 }
 0x15d   : > { %7122 = vmatmul.mubr.bf16.gmra.mxu1 %v6212_v60  ;;  %v3274_v40 = vrot.slane %v3273_v45, 4  ;;  %v3284_v16 = vrot.slane %v3283_v58, 4  ;;  %v6066_v63 = vcombine.low %v9066_v38, %v8763_v28  ;;  %v4801_v49 = vshrl.u32 %v6180_v48, 16  ;;  %v9121_v41 = vpop.f32.mrf.mxu0  ;;  %v9127_v28 = vpop.f32.mrf.mxu1 }
 0x15e   : > { %v4783_v22 = vor.u32 %v4782_v51, %v4779_v31  ;;  %v4792_v30 = vrot.slane %v4790_v46, 4  ;;  %v4798_v14 = vrot.slane %v4796_v0, 5  ;;  %v4804_v26 = vshll.u32 %v6180_v48, 16 }
 0x15f   : > { %v3279_v57 = vsel %vm7456_vm5, %v3274_v40, %v3278_v42  ;;  %v3289_v7 = vsel %vm7456_vm5, %v3284_v16, %v3288_v17  ;;  %v4803_v11 = vrot.slane %v4801_v49, 4  ;;  %v4810_v60 = vshll.u32 %v6181_v8, 16  ;;  %v9129_v0 = vpop.f32.mrf.mxu0  ;;  %v9134_v42 = vld [vmem:[%s7410_s20 + $0xa8] sm:$0xf] }
 0x160   : > { %v6082_v38 = vcombine.low %v3279_v57, %v3289_v7  ;;  %v4784_v45 = vrot.slane %v4783_v22, 4  ;;  %v4793_v58 = vor.u32 %v4792_v30, %v4788_v12  ;;  %v4806_v46 = vrot.slane %v4804_v26, 5  ;;  %v9142_v22 = vpop.f32.mrf.mxu1  ;;  %v6183_v57 = vld [vmem:[%s7410_s20 + $0x6c] sm:$0xf] }
 0x161   : > { %v4812_v48 = vrot.slane %v4810_v60, 5  ;;  %v4814_v31 = vshrl.u32 %v6181_v8, 16  ;;  %v4820_v51 = vshll.u32 %v6182_v3, 16  ;;  %v6605_v23 = vadd.f32 %v8996_v33, %v8985_v20  ;;  %v9144_v8 = vpop.f32.mrf.mxu0 }
 0x162   : > { %4082 = vmatprep.mubr.bf16.mxu0 %v6082_v38  ;;  %v4789_v17 = vsel %vm7456_vm5, %v4784_v45, %v4788_v12  ;;  %v4794_v40 = vrot.slane %v4793_v58, 4  ;;  %v4807_v16 = vor.u32 %v4806_v46, %v4803_v11  ;;  %v9140_v49 = vadd.f32 %v9032_v6, %v9021_v62 }
 0x163   : > { %v9148_v20 = vadd.f32 %v8989_v52, %v8981_v4  ;;  %4083 = vmatmul.mubr.bf16.gmra.mxu0 %v6066_v63  ;;  %v4816_v33 = vrot.slane %v4814_v31, 4  ;;  %v4822_v30 = vrot.slane %v4820_v51, 5  ;;  %v9151_v12 = vadd.f32 %v8740_v5, %v6605_v23  ;;  %v9161_v4 = vpop.f32.mrf.mxu1  ;;  %v9163_v52 = vpop.f32.mrf.mxu0 }
 0x164   : > { %9846 = vst [vmem:[#allocation32_spill] sm:$0xff] %v9140_v49  ;;  %v4799_v3 = vsel %vm7456_vm5, %v4794_v40, %v4798_v14  ;;  %v4808_v62 = vrot.slane %v4807_v16, 4  ;;  %v9157_v6 = vadd.f32 %v9028_v37, %v9014_v13  ;;  %v3291_v26 = vshrl.u32 %v9134_v42, 16  ;;  %v6184_v14 = vld [vmem:[%s7410_s20 + $0x70] sm:$0xf] }
 0x165   : > { %9847 = vst [vmem:[#allocation33_spill] sm:$0xff] %v9148_v20  ;;  %9848 = vst [vmem:[#allocation34_spill] sm:$0xff] %v9151_v12  ;;  %v6213_v63 = vcombine.low %v4789_v17, %v4799_v3  ;;  %v4817_v7 = vor.u32 %v4816_v33, %v4812_v48  ;;  %v9167_v5 = vadd.f32 %v9044_v29, %v9037_v9  ;;  %v3294_v23 = vshll.u32 %v9134_v42, 16  ;;  %v9175_v38 = vpop.f32.mrf.mxu1  ;;  %v9178_v46 = vpop.f32.mrf.mxu0 }
 0x166   : > { %v4813_v13 = vsel %vm7456_vm5, %v4808_v62, %v4812_v48  ;;  %v3293_v37 = vrot.slane %v3291_v26, 4  ;;  %v3300_v11 = vshll.u32 %v8799_v55, 16  ;;  %v3304_v60 = vshrl.u32 %v8799_v55, 16  ;;  %9850 = vst [vmem:[#allocation36_spill] sm:$0xff] %v9178_v46  ;;  %v6185_v48 = vld [vmem:[%s7410_s20 + $0x74] sm:$0x1] }
 0x167   : > { %9849 = vst [vmem:[#allocation35_spill] sm:$0xff] %v9167_v5  ;;  %7125 = vmatprep.mubr.bf16.mxu1 %v6213_v63  ;;  %v4818_v45 = vrot.slane %v4817_v7, 4  ;;  %v3296_v58 = vrot.slane %v3294_v23, 5  ;;  %v3310_v9 = vshll.u32 %v8805_v35, 16  ;;  %v4825_v29 = vshrl.u32 %v6183_v57, 16  ;;  %v9181_v16 = vpop.f32.mrf.mxu1  ;;  %v9186_v7 = vpop.f32.mrf.mxu0 }
 0x168   : > { %v3302_v31 = vrot.slane %v3300_v11, 5  ;;  %v3306_v51 = vrot.slane %v3304_v60, 4  ;;  %v4828_v17 = vshll.u32 %v6183_v57, 16  ;;  %v4834_v40 = vshll.u32 %v6184_v14, 16  ;;  %v6186_v63 = vld [vmem:[%s7410_s20 + $0x78] sm:$0xf] }
 0x169   : > { %v4823_v33 = vsel %vm7456_vm5, %v4818_v45, %v4822_v30  ;;  %v3297_v3 = vor.u32 %v3296_v58, %v3293_v37  ;;  %v3312_v62 = vrot.slane %v3310_v9, 5  ;;  %v4827_v26 = vrot.slane %v4825_v29, 4  ;;  %v6187_v60 = vld [vmem:[%s7410_s20 + $0x7c] sm:$0xf]  ;;  %v9191_v46 = vpop.f32.mrf.mxu0  ;;  %v9193_v9 = vpop.f32.mrf.mxu1 }
 0x16a   : > { %v6214_v35 = vcombine.low %v4813_v13, %v4823_v33  ;;  %v3307_v23 = vor.u32 %v3306_v51, %v3302_v31  ;;  %v4830_v12 = vrot.slane %v4828_v17, 5  ;;  %v4836_v11 = vrot.slane %v4834_v40, 5  ;;  %v6188_v17 = vld [vmem:[%s7410_s20 + $0x80] sm:$0x1] }
 0x16b   : > { %v3298_v20 = vrot.slane %v3297_v3, 4  ;;  %v4838_v57 = vshrl.u32 %v6184_v14, 16  ;;  %v4844_v5 = vshll.u32 %v6185_v48, 16  ;;  %v6067_v49 = vcombine.low %v9134_v42, %v8799_v55  ;;  %v9198_v48 = vpop.f32.mrf.mxu0  ;;  %v9202_v33 = vpop.f32.mrf.mxu1 }
 0x16c   : > { %7126 = vmatmul.mubr.bf16.gmra.mxu1 %v6214_v35  ;;  %v3308_v30 = vrot.slane %v3307_v23, 4  ;;  %v4831_v37 = vor.u32 %v4830_v12, %v4827_v26  ;;  %v4849_v45 = vshrl.u32 %v6186_v63, 16  ;;  %v4852_v58 = vshll.u32 %v6186_v63, 16 }
 0x16d   : > { %v3303_v13 = vsel %vm7456_vm5, %v3298_v20, %v3302_v31  ;;  %v4840_v29 = vrot.slane %v4838_v57, 4  ;;  %v4846_v51 = vrot.slane %v4844_v5, 5  ;;  %v4858_v14 = vshll.u32 %v6187_v60, 16  ;;  %v9209_v57 = vld [vmem:[%s7410_s20 + $0xb4] sm:$0xf] }
 0x16e   : > { %v3313_v55 = vsel %vm7456_vm5, %v3308_v30, %v3312_v62  ;;  %v4832_v42 = vrot.slane %v4831_v37, 4  ;;  %v4851_v40 = vrot.slane %v4849_v45, 4  ;;  %v4854_v12 = vrot.slane %v4852_v58, 5  ;;  %v9211_v62 = vpop.f32.mrf.mxu1  ;;  %v9213_v30 = vpop.f32.mrf.mxu0 }
 0x16f   : > { %v6083_v3 = vcombine.low %v3303_v13, %v3313_v55  ;;  %v4841_v26 = vor.u32 %v4840_v29, %v4836_v11  ;;  %v4860_v63 = vrot.slane %v4858_v14, 5  ;;  %v4862_v35 = vshrl.u32 %v6187_v60, 16  ;;  %v6190_v14 = vld [vmem:[%s7410_s20 + $0x88] sm:$0xf] }
 0x170   : > { %v4837_v20 = vsel %vm7456_vm5, %v4832_v42, %v4836_v11  ;;  %v4855_v5 = vor.u32 %v4854_v12, %v4851_v40  ;;  %v4868_v31 = vshll.u32 %v6188_v17, 16  ;;  %v6611_v23 = vadd.f32 %v9046_v2, %v9039_v32  ;;  %v9231_v29 = vpop.f32.mrf.mxu1  ;;  %v9252_v40 = vld [vmem:[%s7410_s20 + $0xb8] sm:$0xf] }
 0x171   : > { %4090 = vmatprep.mubr.bf16.mxu0 %v6083_v3  ;;  %v4842_v37 = vrot.slane %v4841_v26, 4  ;;  %v4864_v45 = vrot.slane %v4862_v35, 4  ;;  %v9217_v60 = vadd.f32 %v9057_v19, %v9051_v15  ;;  %v9221_v11 = vadd.f32 %v9059_v25, %v9053_v54  ;;  %v9233_v19 = vpop.f32.mrf.mxu0  ;;  %v7284_v3 = vld [vmem:[%s7410_s20 + $0xbc] sm:$0x1] }
 0x172   : > { %v9225_v32 = vadd.f32 %v8769_v56, %v9157_v6  ;;  %4091 = vmatmul.mubr.bf16.gmra.mxu0 %v6067_v49  ;;  %v4856_v2 = vrot.slane %v4855_v5, 4  ;;  %v4870_v58 = vrot.slane %v4868_v31, 5  ;;  %v9229_v13 = vadd.f32 %v9087_v43, %v9076_v36  ;;  %v6189_v49 = vld [vmem:[%s7410_s20 + $0x84] sm:$0xf]  ;;  %v9247_v55 = vpop.f32.mrf.mxu1 }
 0x173   : > { %9851 = vst [vmem:[#allocation37_spill] sm:$0xff] %v9217_v60  ;;  %v4847_v15 = vsel %vm7456_vm5, %v4842_v37, %v4846_v51  ;;  %v4865_v54 = vor.u32 %v4864_v45, %v4860_v63  ;;  %v9238_v56 = vadd.f32 %v6611_v23, %v8807_v1  ;;  %v3315_v25 = vshrl.u32 %v9209_v57, 16  ;;  %v9249_v51 = vpop.f32.mrf.mxu0 }
 0x174   : > { %9852 = vst [vmem:[#allocation38_spill] sm:$0xff] %v9225_v32  ;;  %9853 = vst [vmem:[#allocation39_spill] sm:$0xff] %v9229_v13  ;;  %v6215_v6 = vcombine.low %v4837_v20, %v4847_v15  ;;  %v4861_v36 = vsel %vm7456_vm5, %v4856_v2, %v4860_v63  ;;  %v3318_v43 = vshll.u32 %v9209_v57, 16  ;;  %v3324_v17 = vshll.u32 %v8815_v27, 16  ;;  %v6191_v20 = vld [vmem:[%s7410_s20 + $0x8c] sm:$0x1]  ;;  %v9257_v31 = vpop.f32.mrf.mxu1 }
 0x175   : > { %9854 = vst [vmem:[#allocation40_spill] sm:$0xff] %v9238_v56  ;;  %v4866_v42 = vrot.slane %v4865_v54, 4  ;;  %v3317_v1 = vrot.slane %v3315_v25, 4  ;;  %v3328_v12 = vshrl.u32 %v9252_v40, 16  ;;  %v3334_v26 = vshll.u32 %v7284_v3, 16  ;;  %v9259_v23 = vpop.f32.mrf.mxu0 }
 0x176   : > { %7129 = vmatprep.mubr.bf16.mxu1 %v6215_v6  ;;  %v3320_v63 = vrot.slane %v3318_v43, 5  ;;  %v3326_v35 = vrot.slane %v3324_v17, 5  ;;  %v4873_v5 = vshrl.u32 %v6189_v49, 16  ;;  %v4876_v27 = vshll.u32 %v6189_v49, 16  ;;  %9855 = vst [vmem:[#allocation41_spill] sm:$0xff] %v9259_v23  ;;  %v9264_v17 = vpop.f32.mrf.mxu1 }
 0x177   : > { %v4871_v37 = vsel %vm7456_vm5, %v4866_v42, %v4870_v58  ;;  %v3330_v45 = vrot.slane %v3328_v12, 4  ;;  %v3336_v2 = vrot.slane %v3334_v26, 5  ;;  %v4882_v15 = vshll.u32 %v6190_v14, 16  ;;  %v6192_v54 = vld [vmem:[%s7410_s20 + $0x90] sm:$0xf]  ;;  %v9266_v56 = vpop.f32.mrf.mxu0 }
 0x178   : > { %v6216_v25 = vcombine.low %v4861_v36, %v4871_v37  ;;  %v3321_v3 = vor.u32 %v3320_v63, %v3317_v1  ;;  %v4875_v6 = vrot.slane %v4873_v5, 4  ;;  %v4878_v43 = vrot.slane %v4876_v27, 5  ;;  %v6193_v23 = vld [vmem:[%s7410_s20 + $0x94] sm:$0xf]  ;;  %v9271_v1 = vpop.f32.mrf.mxu1  ;;  %v6194_v37 = vld [vmem:[%s7410_s20 + $0x98] sm:$0x1] }
 0x179   : > { %v3331_v49 = vor.u32 %v3330_v45, %v3326_v35  ;;  %v4884_v32 = vrot.slane %v4882_v15, 5  ;;  %v4886_v13 = vshrl.u32 %v6190_v14, 16  ;;  %v4892_v60 = vshll.u32 %v6191_v20, 16  ;;  %v9273_v26 = vpop.f32.mrf.mxu0 }
 0x17a   : > { %7130 = vmatmul.mubr.bf16.gmra.mxu1 %v6216_v25  ;;  %v3322_v58 = vrot.slane %v3321_v3, 4  ;;  %v4879_v42 = vor.u32 %v4878_v43, %v4875_v6  ;;  %v6068_v12 = vcombine.low %v9209_v57, %v9252_v40  ;;  %v4897_v36 = vshrl.u32 %v6192_v54, 16  ;;  %9856 = vst [vmem:[#allocation42_spill] sm:$0xff] %v9273_v26  ;;  %v9278_v3 = vpop.f32.mrf.mxu1 }
 0x17b   : > { %v3332_v63 = vrot.slane %v3331_v49, 4  ;;  %v4888_v5 = vrot.slane %v4886_v13, 4  ;;  %v4894_v27 = vrot.slane %v4892_v60, 5  ;;  %v4900_v45 = vshll.u32 %v6192_v54, 16  ;;  %v9280_v57 = vpop.f32.mrf.mxu0 }
 0x17c   : > { %v3327_v14 = vsel %vm7456_vm5, %v3322_v58, %v3326_v35  ;;  %v4880_v20 = vrot.slane %v4879_v42, 4  ;;  %v4899_v15 = vrot.slane %v4897_v36, 4  ;;  %v4906_v25 = vshll.u32 %v6193_v23, 16  ;;  %9857 = vst [vmem:[#allocation43_spill] sm:$0xff] %v9280_v57  ;;  %v9286_v58 = vpop.f32.mrf.mxu1 }
 0x17d   : > { %v3337_v40 = vsel %vm7456_vm5, %v3332_v63, %v3336_v2  ;;  %v4889_v6 = vor.u32 %v4888_v5, %v4884_v32  ;;  %v4902_v43 = vrot.slane %v4900_v45, 5  ;;  %v4910_v13 = vshrl.u32 %v6193_v23, 16  ;;  %v9288_v42 = vpop.f32.mrf.mxu0  ;;  %v9293_v63 = vld [vmem:[%s7410_s20 + $0xc0] sm:$0xf]  ;;  %v6195_v45 = vld [vmem:[%s7410_s20 + $0x9c] sm:$0xf] }
 0x17e   : > { %v6084_v60 = vcombine.low %v3327_v14, %v3337_v40  ;;  %v4885_v54 = vsel %vm7456_vm5, %v4880_v20, %v4884_v32  ;;  %v4908_v49 = vrot.slane %v4906_v25, 5  ;;  %v4916_v35 = vshll.u32 %v6194_v37, 16  ;;  %v6196_v25 = vld [vmem:[%s7410_s20 + $0xa0] sm:$0xf] }
 0x17f   : > { %v4890_v36 = vrot.slane %v4889_v6, 4  ;;  %v4903_v26 = vor.u32 %v4902_v43, %v4899_v15  ;;  %v4912_v57 = vrot.slane %v4910_v13, 4  ;;  %v6617_v2 = vadd.f32 %v9101_v47, %v9089_v10  ;;  %v9311_v10 = vpop.f32.mrf.mxu1  ;;  %v9313_v47 = vpop.f32.mrf.mxu0  ;;  %v7286_v6 = vld [vmem:[%s7410_s20 + $0xc8] sm:$0x1]  ;;  %v6197_v13 = vld [vmem:[%s7410_s20 + $0xa4] sm:$0x1] }
 0x180   : > { %v9297_v23 = vadd.f32 %v9221_v11, %v8831_v59  ;;  %4098 = vmatprep.mubr.bf16.mxu0 %v6084_v60  ;;  %v9301_v32 = vadd.f32 %v9111_v44, %v9104_v53  ;;  %v9305_v5 = vadd.f32 %v9114_v61, %v9109_v18  ;;  %v9309_v37 = vadd.f32 %v9127_v28, %v9118_v39 }
 0x181   : > { %9859 = vst [vmem:[#allocation45_spill] sm:$0xff] %v9313_v47  ;;  %v4895_v59 = vsel %vm7456_vm5, %v4890_v36, %v4894_v27  ;;  %4099 = vmatmul.mubr.bf16.gmra.mxu0 %v6068_v12  ;;  %v4904_v53 = vrot.slane %v4903_v26, 4  ;;  %v4913_v44 = vor.u32 %v4912_v57, %v4908_v49  ;;  %v4918_v11 = vrot.slane %v4916_v35, 5  ;;  %v9323_v14 = vpop.f32.mrf.mxu1  ;;  %v9325_v20 = vpop.f32.mrf.mxu0  ;;  %v9330_v27 = vld [vmem:[%s7410_s20 + $0xc4] sm:$0xf] }
 0x182   : > { %9858 = vst [vmem:[#allocation44_spill] sm:$0xff] %v9297_v23  ;;  %v6217_v61 = vcombine.low %v4885_v54, %v4895_v59  ;;  %v9319_v18 = vadd.f32 %v8791_v34, %v6617_v2  ;;  %v3339_v39 = vshrl.u32 %v9293_v63, 16  ;;  %v3342_v28 = vshll.u32 %v9293_v63, 16  ;;  %9861 = vst [vmem:[#allocation47_spill] sm:$0xff] %v9325_v20 }
 0x183   : > { %v4909_v12 = vsel %vm7456_vm5, %v4904_v53, %v4908_v49  ;;  %v4914_v26 = vrot.slane %v4913_v44, 4  ;;  %v3348_v15 = vshll.u32 %v9330_v27, 16  ;;  %v3352_v34 = vshrl.u32 %v9330_v27, 16  ;;  %v9337_v54 = vpop.f32.mrf.mxu1  ;;  %v9339_v35 = vpop.f32.mrf.mxu0  ;;  %v6198_v53 = vld [vmem:[%s7410_s20 + $0xa8] sm:$0xf] }
 0x184   : > { %9860 = vst [vmem:[#allocation46_spill] sm:$0xff] %v9319_v18  ;;  %7133 = vmatprep.mubr.bf16.mxu1 %v6217_v61  ;;  %v3341_v57 = vrot.slane %v3339_v39, 4  ;;  %v3344_v40 = vrot.slane %v3342_v28, 5  ;;  %v3358_v43 = vshll.u32 %v7286_v6, 16  ;;  %v4921_v60 = vshrl.u32 %v6195_v45, 16  ;;  %9862 = vst [vmem:[#allocation48_spill] sm:$0xff] %v9339_v35 }
 0x185   : > { %v4919_v49 = vsel %vm7456_vm5, %v4914_v26, %v4918_v11  ;;  %v3350_v36 = vrot.slane %v3348_v15, 5  ;;  %v3354_v2 = vrot.slane %v3352_v34, 4  ;;  %v4924_v59 = vshll.u32 %v6195_v45, 16  ;;  %v9344_v23 = vpop.f32.mrf.mxu1  ;;  %v9346_v6 = vpop.f32.mrf.mxu0  ;;  %v6199_v15 = vld [vmem:[%s7410_s20 + $0xac] sm:$0xf] }
 0x186   : > { %v6218_v44 = vcombine.low %v4909_v12, %v4919_v49  ;;  %v3345_v61 = vor.u32 %v3344_v40, %v3341_v57  ;;  %v3360_v39 = vrot.slane %v3358_v43, 5  ;;  %v4923_v28 = vrot.slane %v4921_v60, 4  ;;  %9863 = vst [vmem:[#allocation49_spill] sm:$0xff] %v9346_v6 }
 0x187   : > { %v3355_v18 = vor.u32 %v3354_v2, %v3350_v36  ;;  %v4926_v20 = vrot.slane %v4924_v59, 5  ;;  %v4930_v35 = vshll.u32 %v6196_v25, 16  ;;  %v4934_v47 = vshrl.u32 %v6196_v25, 16  ;;  %v9351_v34 = vpop.f32.mrf.mxu1  ;;  %v9353_v57 = vpop.f32.mrf.mxu0  ;;  %v6200_v2 = vld [vmem:[%s7410_s20 + $0xb0] sm:$0x1] }
 0x188   : > { %7134 = vmatmul.mubr.bf16.gmra.mxu1 %v6218_v44  ;;  %v3346_v11 = vrot.slane %v3345_v61, 4  ;;  %v4940_v26 = vshll.u32 %v6197_v13, 16  ;;  %v6069_v45 = vcombine.low %v9293_v63, %v9330_v27  ;;  %v4945_v12 = vshrl.u32 %v6198_v53, 16  ;;  %9864 = vst [vmem:[#allocation50_spill] sm:$0xff] %v9351_v34  ;;  %9865 = vst [vmem:[#allocation51_spill] sm:$0xff] %v9353_v57 }
 0x189   : > { %v3356_v40 = vrot.slane %v3355_v18, 4  ;;  %v4927_v43 = vor.u32 %v4926_v20, %v4923_v28  ;;  %v4932_v60 = vrot.slane %v4930_v35, 5  ;;  %v4936_v49 = vrot.slane %v4934_v47, 4  ;;  %v9358_v61 = vpop.f32.mrf.mxu1  ;;  %v9360_v63 = vpop.f32.mrf.mxu0 }
 0x18a   : > { %v3351_v25 = vsel %vm7456_vm5, %v3346_v11, %v3350_v36  ;;  %v4942_v59 = vrot.slane %v4940_v26, 5  ;;  %v4947_v44 = vrot.slane %v4945_v12, 4  ;;  %v4948_v13 = vshll.u32 %v6198_v53, 16  ;;  %9866 = vst [vmem:[#allocation52_spill] sm:$0xff] %v9360_v63 }
 0x18b   : > { %v3361_v27 = vsel %vm7456_vm5, %v3356_v40, %v3360_v39  ;;  %v4928_v57 = vrot.slane %v4927_v43, 4  ;;  %v4937_v18 = vor.u32 %v4936_v49, %v4932_v60  ;;  %v4954_v20 = vshll.u32 %v6199_v15, 16  ;;  %v9364_v34 = vpop.f32.mrf.mxu1  ;;  %v9366_v36 = vpop.f32.mrf.mxu0  ;;  %v9373_v39 = vld [vmem:[%s7410_s20 + $0xcc] sm:$0xf] }
 0x18c   : > { %v6085_v35 = vcombine.low %v3351_v25, %v3361_v27  ;;  %v4950_v47 = vrot.slane %v4948_v13, 5  ;;  %v4958_v28 = vshrl.u32 %v6199_v15, 16  ;;  %v4964_v6 = vshll.u32 %v6200_v2, 16  ;;  %9867 = vst [vmem:[#allocation53_spill] sm:$0xff] %v9366_v36  ;;  %v6205_v36 = vld [vmem:[%s7410_s20 + $0xc4] sm:$0xf] }
 0x18d   : > { %v4933_v53 = vsel %vm7456_vm5, %v4928_v57, %v4932_v60  ;;  %v4938_v11 = vrot.slane %v4937_v18, 4  ;;  %v4956_v26 = vrot.slane %v4954_v20, 5  ;;  %v6623_v12 = vadd.f32 %v9129_v0, %v9121_v41  ;;  %v9383_v57 = vpop.f32.mrf.mxu1  ;;  %v9385_v60 = vpop.f32.mrf.mxu0 }
 0x18e   : > { %v9377_v40 = vadd.f32 %v8821_v24, %v9305_v5  ;;  %4106 = vmatprep.mubr.bf16.mxu0 %v6085_v35  ;;  %v4951_v15 = vor.u32 %v4950_v47, %v4947_v44  ;;  %v4960_v43 = vrot.slane %v4958_v28, 4  ;;  %v9381_v49 = vadd.f32 %v9161_v4, %v9142_v22  ;;  %9869 = vst [vmem:[#allocation55_spill] sm:$0xff] %v9385_v60  ;;  %v6201_v44 = vld [vmem:[%s7410_s20 + $0xb4] sm:$0xf] }
 0x18f   : > { %v4943_v41 = vsel %vm7456_vm5, %v4938_v11, %v4942_v59  ;;  %4107 = vmatmul.mubr.bf16.gmra.mxu0 %v6069_v45  ;;  %v4966_v24 = vrot.slane %v4964_v6, 5  ;;  %v9391_v0 = vadd.f32 %v9163_v52, %v9144_v8  ;;  %v9395_v5 = vadd.f32 %v9181_v16, %v9175_v38  ;;  %v9399_v13 = vpop.f32.mrf.mxu1  ;;  %v9401_v45 = vpop.f32.mrf.mxu0  ;;  %v9408_v52 = vld [vmem:[%s7410_s20 + $0xd0] sm:$0xf]  ;;  %v6202_v59 = vld [vmem:[%s7410_s20 + $0xb8] sm:$0xf] }
 0x190   : > { %9868 = vst [vmem:[#allocation54_spill] sm:$0xff] %v9377_v40  ;;  %v6219_v22 = vcombine.low %v4933_v53, %v4943_v41  ;;  %v4952_v4 = vrot.slane %v4951_v15, 4  ;;  %v4961_v2 = vor.u32 %v4960_v43, %v4956_v26  ;;  %v3363_v25 = vshrl.u32 %v9373_v39, 16  ;;  %9870 = vst [vmem:[#allocation56_spill] sm:$0xff] %v9401_v45  ;;  %v7288_v35 = vld [vmem:[%s7410_s20 + $0xd4] sm:$0x1] }
 0x191   : > { %v9404_v6 = vadd.f32 %v6623_v12, %v8848_v21  ;;  %v3366_v8 = vshll.u32 %v9373_v39, 16  ;;  %v3372_v38 = vshll.u32 %v9408_v52, 16  ;;  %v3376_v16 = vshrl.u32 %v9408_v52, 16  ;;  %v9416_v47 = vpop.f32.mrf.mxu1  ;;  %v9418_v28 = vpop.f32.mrf.mxu0  ;;  %v6203_v15 = vld [vmem:[%s7410_s20 + $0xbc] sm:$0x1] }
 0x192   : > { %7137 = vmatprep.mubr.bf16.mxu1 %v6219_v22  ;;  %v4957_v27 = vsel %vm7456_vm5, %v4952_v4, %v4956_v26  ;;  %v4962_v18 = vrot.slane %v4961_v2, 4  ;;  %v3365_v20 = vrot.slane %v3363_v25, 4  ;;  %v3382_v21 = vshll.u32 %v7288_v35, 16  ;;  %9872 = vst [vmem:[#allocation58_spill] sm:$0xff] %v9418_v28  ;;  %v6204_v2 = vld [vmem:[%s7410_s20 + $0xc0] sm:$0xf] }
 0x193   : > { %9871 = vst [vmem:[#allocation57_spill] sm:$0xff] %v9404_v6  ;;  %v3368_v53 = vrot.slane %v3366_v8, 5  ;;  %v3374_v11 = vrot.slane %v3372_v38, 5  ;;  %v3378_v12 = vrot.slane %v3376_v16, 4  ;;  %v4969_v43 = vshrl.u32 %v6201_v44, 16  ;;  %v9424_v25 = vpop.f32.mrf.mxu1  ;;  %v9426_v35 = vpop.f32.mrf.mxu0 }
 0x194   : > { %v4967_v41 = vsel %vm7456_vm5, %v4962_v18, %v4966_v24  ;;  %v3384_v22 = vrot.slane %v3382_v21, 5  ;;  %v4972_v26 = vshll.u32 %v6201_v44, 16  ;;  %v4978_v4 = vshll.u32 %v6202_v59, 16  ;;  %9873 = vst [vmem:[#allocation59_spill] sm:$0xff] %v9426_v35 }
 0x195   : > { %v6220_v6 = vcombine.low %v4957_v27, %v4967_v41  ;;  %v3369_v40 = vor.u32 %v3368_v53, %v3365_v20  ;;  %v3379_v28 = vor.u32 %v3378_v12, %v3374_v11  ;;  %v4971_v8 = vrot.slane %v4969_v43, 4  ;;  %v9429_v63 = vpop.f32.mrf.mxu1  ;;  %v9431_v24 = vpop.f32.mrf.mxu0  ;;  %v6206_v43 = vld [vmem:[%s7410_s20 + $0xc8] sm:$0x1]  ;;  %s6265_s20 = sshll.u32 %s9937_s22, 7  ;;  %s284_s22 = scalar_lea.vmem %s9811_s6, %s5733_s25 }
 0x196   : > { %v4974_v38 = vrot.slane %v4972_v26, 5  ;;  %v4980_v16 = vrot.slane %v4978_v4, 5  ;;  %v4982_v45 = vshrl.u32 %v6202_v59, 16  ;;  %v4988_v60 = vshll.u32 %v6203_v15, 16  ;;  %9874 = vst [vmem:[#allocation60_spill] sm:$0xff] %v9431_v24  ;;  %s9658_s18 = scalar_lea.vmem %s9808_s3, %s6265_s20  ;;  %s9740_s24 = scalar_lea.vmem %s9809_s4, %s6265_s20 }
 0x197   : > { %7138 = vmatmul.mubr.bf16.gmra.mxu1 %v6220_v6  ;;  %v3370_v44 = vrot.slane %v3369_v40, 4  ;;  %v3380_v18 = vrot.slane %v3379_v28, 4  ;;  %v6070_v21 = vcombine.low %v9373_v39, %v9408_v52  ;;  %v4993_v27 = vshrl.u32 %v6204_v2, 16  ;;  %v9436_v26 = vpop.f32.mrf.mxu1  ;;  %v9438_v59 = vpop.f32.mrf.mxu0 }
 0x198   : > { %v4975_v20 = vor.u32 %v4974_v38, %v4971_v8  ;;  %v4984_v53 = vrot.slane %v4982_v45, 4  ;;  %v4990_v12 = vrot.slane %v4988_v60, 5  ;;  %v4996_v41 = vshll.u32 %v6204_v2, 16  ;;  %9875 = vst [vmem:[#allocation61_spill] sm:$0xff] %v9438_v59  ;;  %v9876_v59 = vld [vmem:[#allocation36_spill] sm:$0xff] }
 0x199   : > { %v3375_v15 = vsel %vm7456_vm5, %v3370_v44, %v3374_v11  ;;  %v3385_v40 = vsel %vm7456_vm5, %v3380_v18, %v3384_v22  ;;  %v4995_v6 = vrot.slane %v4993_v27, 4  ;;  %v5002_v28 = vshll.u32 %v6205_v36, 16  ;;  %v9444_v45 = vpop.f32.mrf.mxu1  ;;  %v9446_v60 = vpop.f32.mrf.mxu0 }
 0x19a   : > { %v6086_v4 = vcombine.low %v3375_v15, %v3385_v40  ;;  %v4976_v39 = vrot.slane %v4975_v20, 4  ;;  %v4985_v52 = vor.u32 %v4984_v53, %v4980_v16  ;;  %v4998_v8 = vrot.slane %v4996_v41, 5  ;;  %v9877_v53 = vld [vmem:[#allocation18_spill] sm:$0xff]  ;;  %v9879_v15 = vld [vmem:[#allocation25_spill] sm:$0xff] }
 0x19b   : > { %v5004_v2 = vrot.slane %v5002_v28, 5  ;;  %v5006_v38 = vshrl.u32 %v6205_v36, 16  ;;  %v5012_v24 = vshll.u32 %v6206_v43, 16  ;;  %v6629_v35 = vadd.f32 %v9186_v7, %v9876_v59  ;;  %v9454_v27 = vpop.f32.mrf.mxu1  ;;  %v9456_v20 = vpop.f32.mrf.mxu0  ;;  %v9880_v28 = vld [vmem:[#allocation14_spill] sm:$0xff] }
 0x19c   : > { %4114 = vmatprep.mubr.bf16.mxu0 %v6086_v4  ;;  %v4981_v11 = vsel %vm7456_vm5, %v4976_v39, %v4980_v16  ;;  %v4986_v22 = vrot.slane %v4985_v52, 4  ;;  %v4999_v44 = vor.u32 %v4998_v8, %v4995_v6  ;;  %v6717_v18 = vadd.f32 %v9202_v33, %v9193_v9  ;;  %v9878_v33 = vld [vmem:[#allocation4_spill] sm:$0xff]  ;;  %v9883_v52 = vld [vmem:[#allocation5_spill] sm:$0xff] }
 0x19d   : > { %v9460_v36 = vadd.f32 %v9391_v0, %v9877_v53  ;;  %4115 = vmatmul.mubr.bf16.gmra.mxu0 %v6070_v21  ;;  %v5008_v43 = vrot.slane %v5006_v38, 4  ;;  %v5014_v7 = vrot.slane %v5012_v24, 5  ;;  %v9464_v41 = vadd.f32 %v9198_v48, %v9191_v46  ;;  %v9472_v6 = vpop.f32.mrf.mxu1  ;;  %v9474_v0 = vpop.f32.mrf.mxu0  ;;  %v9884_v8 = vld [vmem:[#allocation28_spill] sm:$0xff] }
 0x19e   : > { %v4991_v16 = vsel %vm7456_vm5, %v4986_v22, %v4990_v12  ;;  %v5000_v59 = vrot.slane %v4999_v44, 4  ;;  %v6720_v9 = vadd.f32 %v9231_v29, %v9211_v62  ;;  %v2674_v40 = vadd.f32 %v9879_v15, %v9878_v33  ;;  %v9881_v29 = vld [vmem:[#allocation2_spill] sm:$0xff]  ;;  %v9882_v12 = vld [vmem:[#allocation21_spill] sm:$0xff]  ;;  %v9888_v53 = vld [vmem:[#allocation32_spill] sm:$0xff] }
 0x19f   : > { %v6221_v21 = vcombine.low %v4981_v11, %v4991_v16  ;;  %v5009_v24 = vor.u32 %v5008_v43, %v5004_v2  ;;  %v9477_v4 = vadd.f32 %v9880_v28, %v6629_v35  ;;  %v6723_v46 = vadd.f32 %v9257_v31, %v9247_v55  ;;  %v9490_v11 = vpop.f32.mrf.mxu1  ;;  %v9492_v22 = vpop.f32.mrf.mxu0  ;;  %v9885_v31 = vld [vmem:[#allocation3_spill] sm:$0xff]  ;;  %v9889_v15 = vld [vmem:[#allocation6_spill] sm:$0xff]  ;;  %v9891_v28 = vld [vmem:[#allocation41_spill] sm:$0xff] }
 0x1a0   : > { %v5005_v48 = vsel %vm7456_vm5, %v5000_v59, %v5004_v2  ;;  %v9484_v62 = vadd.f32 %v9213_v30, %v2674_v40  ;;  %v2666_v39 = vadd.f32 %v9882_v12, %v9881_v29  ;;  %v2677_v38 = vadd.f32 %v9884_v8, %v9883_v52  ;;  %v9886_v2 = vld [vmem:[#allocation24_spill] sm:$0xff]  ;;  %v9890_v40 = vld [vmem:[#allocation29_spill] sm:$0xff]  ;;  %v9893_v12 = vld [vmem:[#allocation35_spill] sm:$0xff] }
 0x1a1   : > { %7141 = vmatprep.mubr.bf16.mxu1 %v6221_v21  ;;  %v5010_v35 = vrot.slane %v5009_v24, 4  ;;  %v6726_v55 = vadd.f32 %v9271_v1, %v9264_v17  ;;  %v2669_v44 = vadd.f32 %v9886_v2, %v9885_v31  ;;  %v9887_v30 = vld [vmem:[#allocation8_spill] sm:$0xff]  ;;  %v6729_v33 = vadd.f32 %v9286_v58, %v9278_v3  ;;  %v6755_v24 = vpop.f32.mrf.mxu1  ;;  %v9510_v17 = vpop.f32.mrf.mxu0  ;;  %v9894_v3 = vld [vmem:[#allocation42_spill] sm:$0xff]  ;;  %v9896_v31 = vld [vmem:[#allocation33_spill] sm:$0xff] }
 0x1a2   : > { %v2690_v43 = vadd.f32 %v9888_v53, %v9887_v30  ;;  %v9501_v16 = vadd.f32 %v9233_v19, %v2666_v39  ;;  %v9504_v59 = vadd.f32 %v9249_v51, %v2677_v38  ;;  %v2682_v21 = vadd.f32 %v9890_v40, %v9889_v15  ;;  %v9892_v51 = vld [vmem:[#allocation9_spill] sm:$0xff]  ;;  %v9895_v38 = vld [vmem:[#allocation7_spill] sm:$0xff]  ;;  %v9899_v53 = vld [vmem:[#allocation10_spill] sm:$0xff] }
 0x1a3   : > { %v5015_v1 = vsel %vm7456_vm5, %v5010_v35, %v5014_v7  ;;  %v9515_v29 = vadd.f32 %v9891_v28, %v2669_v44  ;;  %v2693_v39 = vadd.f32 %v9893_v12, %v9892_v51  ;;  %v6732_v8 = vadd.f32 %v9323_v14, %v9311_v10  ;;  %v6757_v7 = vpop.f32.mrf.mxu1  ;;  %v9529_v35 = vpop.f32.mrf.mxu0  ;;  %v9897_v2 = vld [vmem:[#allocation43_spill] sm:$0xff]  ;;  %v9901_v14 = vld [vmem:[#allocation13_spill] sm:$0xff] }
 0x1a4   : > { %v9518_v19 = vadd.f32 %v9266_v56, %v2690_v43  ;;  %v6222_v52 = vcombine.low %v5005_v48, %v5015_v1  ;;  %v9523_v58 = vadd.f32 %v9894_v3, %v2682_v21  ;;  %v2685_v50 = vadd.f32 %v9896_v31, %v9895_v38  ;;  %v9898_v56 = vld [vmem:[#allocation12_spill] sm:$0xff]  ;;  %v9900_v43 = vld [vmem:[#allocation37_spill] sm:$0xff]  ;;  %v9902_v21 = vld [vmem:[#allocation50_spill] sm:$0xff] }
 0x1a5   : > { %v9532_v44 = vadd.f32 %v9897_v2, %v2693_v39  ;;  %v2706_v30 = vadd.f32 %v9301_v32, %v9898_v56  ;;  %v6735_v48 = vadd.f32 %v9344_v23, %v9337_v54  ;;  %v2698_v15 = vadd.f32 %v9900_v43, %v9899_v53  ;;  %v9903_v28 = vld [vmem:[#allocation11_spill] sm:$0xff]  ;;  %v6758_v32 = vpop.f32.mrf.mxu1  ;;  %v2925_v39 = vpop.f32.mrf.mxu0  ;;  %v9905_v3 = vld [vmem:[#allocation45_spill] sm:$0xff]  ;;  %v9911_v43 = vld [vmem:[#allocation20_spill] sm:$0xff] }
 0x1a6   : > { %7142 = vmatmul.mubr.bf16.gmra.mxu1 %v6222_v52  ;;  %v9541_v10 = vadd.f32 %v9288_v42, %v2685_v50  ;;  %v2709_v40 = vadd.f32 %v9309_v37, %v9901_v14  ;;  %v6738_v1 = vadd.f32 %v9358_v61, %v9902_v21  ;;  %v9904_v51 = vld [vmem:[#allocation39_spill] sm:$0xff]  ;;  %v6741_v31 = vadd.f32 %v9383_v57, %v9364_v34  ;;  %v9908_v37 = vld [vmem:[#allocation48_spill] sm:$0xff]  ;;  %v9909_v61 = vld [vmem:[#allocation49_spill] sm:$0xff] }
 0x1a7   : > { %v2701_v12 = vadd.f32 %v9904_v51, %v9903_v28  ;;  %v9550_v23 = vadd.f32 %v9905_v3, %v2706_v30  ;;  %v9906_v54 = vld [vmem:[#allocation47_spill] sm:$0xff]  ;;  %v2725_v30 = vadd.f32 %v6720_v9, %v9911_v43  ;;  %v6760_v14 = vpop.f32.mrf.mxu1  ;;  %v7047_v21 = vpop.f32.mrf.mxu0  ;;  %v9913_v34 = vld [vmem:[#allocation16_spill] sm:$0xff]  ;;  %v6747_v9 = vadd.f32 %v9429_v63, %v9424_v25  ;;  %v9923_v25 = vld [vmem:[#allocation34_spill] sm:$0xff] }
 0x1a8   : > { %v9553_v38 = vadd.f32 %v9906_v54, %v2698_v15  ;;  %v9907_v52 = vld [vmem:[#allocation19_spill] sm:$0xff]  ;;  %v9559_v50 = vadd.f32 %v9908_v37, %v2709_v40  ;;  %v2717_v57 = vadd.f32 %v9395_v5, %v9913_v34  ;;  %v9914_v40 = vld [vmem:[#allocation26_spill] sm:$0xff]  ;;  %v9916_v54 = vld [vmem:[#allocation53_spill] sm:$0xff] }
 0x1a9   : > { %v2722_v42 = vadd.f32 %v6717_v18, %v9907_v52  ;;  %v9562_v2 = vadd.f32 %v9909_v61, %v2701_v12  ;;  %v9910_v56 = vld [vmem:[#allocation15_spill] sm:$0xff]  ;;  %v6744_v18 = vadd.f32 %v9416_v47, %v9399_v13  ;;  %v2738_v51 = vadd.f32 %v6729_v33, %v9914_v40  ;;  %v9915_v12 = vld [vmem:[#allocation52_spill] sm:$0xff]  ;;  %v9917_v52 = vld [vmem:[#allocation22_spill] sm:$0xff]  ;;  %v6761_v37 = vpop.f32.mrf.mxu1  ;;  %v2938_v61 = vpop.f32.mrf.mxu0 }
 0x1aa   : > { %v2714_v53 = vadd.f32 %v9381_v49, %v9910_v56  ;;  %v9912_v15 = vld [vmem:[#allocation51_spill] sm:$0xff]  ;;  %v9579_v49 = vadd.f32 %v9916_v54, %v2725_v30  ;;  %v9919_v47 = vld [vmem:[#allocation56_spill] sm:$0xff]  ;;  %v9921_v30 = vld [vmem:[#allocation58_spill] sm:$0xff]  ;;  %v6753_v40 = vadd.f32 %v9472_v6, %v9454_v27 }
 0x1ab   : > { %v9568_v28 = vadd.f32 %v9912_v15, %v2722_v42  ;;  %v2730_v42 = vadd.f32 %v6723_v46, %v9917_v52  ;;  %v9918_v56 = vld [vmem:[#allocation55_spill] sm:$0xff]  ;;  %v9588_v5 = vadd.f32 %v9919_v47, %v2738_v51  ;;  %v2754_v46 = vadd.f32 %v6741_v31, %v9923_v25  ;;  %v9925_v52 = vld [vmem:[#allocation30_spill] sm:$0xff] }
 0x1ac   : > { %v9576_v3 = vadd.f32 %v9915_v12, %v2714_v53  ;;  %v9585_v13 = vadd.f32 %v9918_v56, %v2717_v57  ;;  %v9920_v33 = vld [vmem:[#allocation27_spill] sm:$0xff]  ;;  %v6750_v53 = vadd.f32 %v9444_v45, %v9436_v26  ;;  %v6763_v57 = vpop.f32.mrf.mxu1  ;;  %v7048_v12 = vpop.f32.mrf.mxu0  ;;  %v9926_v56 = vld [vmem:[#allocation38_spill] sm:$0xff]  ;;  %v6756_v26 = vadd.f32 %v6755_v24, %v9490_v11  ;;  %v9927_v45 = vld [vmem:[#allocation60_spill] sm:$0xff] }
 0x1ad   : > { %v2741_v43 = vadd.f32 %v6732_v8, %v9920_v33  ;;  %v9594_v15 = vadd.f32 %v9921_v30, %v2730_v42  ;;  %v9922_v34 = vld [vmem:[#allocation23_spill] sm:$0xff]  ;;  %v2746_v8 = vadd.f32 %v6735_v48, %v9925_v52  ;;  %v2757_v47 = vadd.f32 %v6744_v18, %v9926_v56  ;;  %v9930_v27 = vld [vmem:[#allocation46_spill] sm:$0xff]  ;;  %v9931_v11 = vld [vmem:[#allocation40_spill] sm:$0xff] }
 0x1ae   : > { %v2733_v63 = vadd.f32 %v6726_v55, %v9922_v34  ;;  %v9924_v54 = vld [vmem:[#allocation59_spill] sm:$0xff]  ;;  %v9928_v55 = vld [vmem:[#allocation61_spill] sm:$0xff]  ;;  %v2770_v6 = vadd.f32 %v6753_v40, %v9930_v27  ;;  %v6764_v34 = vpop.f32.mrf.mxu1  ;;  %v2941_v25 = vpop.f32.mrf.mxu0  ;;  %v6759_v18 = vadd.f32 %v6758_v32, %v6757_v7  ;;  %v2762_v24 = vadd.f32 %v6747_v9, %v9931_v11 }
 0x1af   : > { %v9601_v51 = vadd.f32 %v9924_v54, %v2741_v43  ;;  %v9610_v33 = vadd.f32 %v9928_v55, %v2754_v46  ;;  %v9929_v31 = vld [vmem:[#allocation31_spill] sm:$0xff]  ;;  %v9615_v43 = vadd.f32 %v9446_v60, %v2746_v8  ;;  %v9618_v48 = vadd.f32 %v9456_v20, %v2757_v47  ;;  %v9933_v60 = vld [vmem:[#allocation44_spill] sm:$0xff]  ;;  %v9934_v47 = vld [vmem:[#allocation57_spill] sm:$0xff] }
 0x1b0   : > { %v9607_v42 = vadd.f32 %v9927_v45, %v2733_v63  ;;  %v2749_v30 = vadd.f32 %v6738_v1, %v9929_v31  ;;  %v9625_v46 = vadd.f32 %v9492_v22, %v2770_v6  ;;  %v9932_v1 = vld [vmem:[#allocation54_spill] sm:$0xff]  ;;  %v6762_v40 = vadd.f32 %v6761_v37, %v6760_v14  ;;  %v6766_v52 = vpop.f32.mrf.mxu1  ;;  %v6809_v32 = vpop.f32.mrf.mxu0  ;;  %v9935_v9 = vld [vmem:[#allocation17_spill] sm:$0xff] }
 0x1b1   : > { %v2773_v54 = vadd.f32 %v6756_v26, %v9932_v1  ;;  %v9629_v56 = vadd.f32 %v9510_v17, %v2762_v24  ;;  %v2765_v8 = vadd.f32 %v6750_v53, %v9933_v60  ;;  %v6765_v20 = vadd.f32 %v6764_v34, %v6763_v57 }
 0x1b2   : > { %v9622_v63 = vadd.f32 %v9474_v0, %v2749_v30  ;;  %v2778_v7 = vadd.f32 %v6759_v18, %v9934_v47  ;;  %v2484_v0 = vadd.f32 %v9935_v9, %v9464_v41  ;;  %v6767_v22 = vpop.f32.mrf.mxu1  ;;  %v2781_v26 = vadd.f32 %v6762_v40, %v9460_v36  ;;  %v6810_v57 = vpop.f32.mrf.mxu0 }
 0x1b3   : > { %v9636_v45 = vadd.f32 %v9529_v35, %v2773_v54  ;;  %v9639_v14 = vadd.f32 %v2925_v39, %v2765_v8  ;;  %v2786_v17 = vadd.f32 %v6765_v20, %v9477_v4  ;;  %v6768_v53 = vadd.f32 %v6767_v22, %v6766_v52 }
 0x1b4   : > { %v9642_v37 = vadd.f32 %v2938_v61, %v2778_v7  ;;  %v9644_v55 = vadd.f32 %v2941_v25, %v2781_v26  ;;  %v7067_v31 = vpop.f32.mrf.mxu1  ;;  %v6811_v30 = vadd.f32 %v6810_v57, %v6809_v32  ;;  %v6812_v27 = vpop.f32.mrf.mxu0 }
 0x1b5   : > { %v9646_v41 = vadd.f32 %v7047_v21, %v2786_v17  ;;  %v2789_v35 = vadd.f32 %v6768_v53, %v2484_v0 }
 0x1b6   : > { %v4157_v6 = vpop.f32.mrf.mxu1  ;;  %v6813_v34 = vpop.f32.mrf.mxu0 }
 0x1b7   : > { %v9648_v36 = vadd.f32 %v7048_v12, %v2789_v35  ;;  %v4158_v39 = vadd.f32 %v6811_v30, %v4157_v6  ;;  %v6814_v61 = vadd.f32 %v6813_v34, %v6812_v27 }
 0x1b8   : > { %v7068_v4 = vpop.f32.mrf.mxu1  ;;  %v6815_v18 = vpop.f32.mrf.mxu0 }
 0x1b9   : > { %v4284_v24 = vadd.f32 %v4158_v39, %v9501_v16 }
 0x1ba   : > { %v4160_v11 = vpop.f32.mrf.mxu1  ;;  %v6816_v1 = vpop.f32.mrf.mxu0 }
 0x1bb   : > { %v4161_v25 = vadd.f32 %v6814_v61, %v4160_v11  ;;  %v6817_v21 = vadd.f32 %v6816_v1, %v6815_v18  ;;  %v4354_v8 = vmul.f32 %v4284_v24, %v4284_v24 }
 0x1bc   : > { %v7071_v54 = vpop.f32.mrf.mxu1  ;;  %v6818_v52 = vpop.f32.mrf.mxu0 }
 0x1bd   : > { %v4285_v40 = vadd.f32 %v4161_v25, %v9515_v29  ;;  %v4166_v12 = vadd.f32 %v7067_v31, %v6817_v21 }
 0x1be   : > { %v4173_v60 = vpop.f32.mrf.mxu1  ;;  %v6819_v7 = vpop.f32.mrf.mxu0 }
 0x1bf   : > { %v4316_v20 = vadd.f32 %v4285_v40, %v4284_v24  ;;  %v4355_v16 = vmul.f32 %v4285_v40, %v4285_v40  ;;  %v6334_v47 = vpack.c.bf16 %v4285_v40, %v4284_v24  ;;  %v4286_v32 = vadd.f32 %v4166_v12, %v9484_v62 }
 0x1c0   : > { %v7072_v9 = vpop.f32.mrf.mxu1  ;;  %v6820_v0 = vadd.f32 %v6819_v7, %v6818_v52  ;;  %v6821_v57 = vpop.f32.mrf.mxu0 }
 0x1c1   : > { %v4386_v29 = vadd.f32 %v4355_v16, %v4354_v8  ;;  %6335 = vst [vmem:[%s9658_s18] sm:$0xff] %v6334_v47   ;;  %v4317_v22 = vadd.f32 %v4316_v20, %v4286_v32  ;;  %v4356_v26 = vmul.f32 %v4286_v32, %v4286_v32 }
 0x1c2   : > { %v4169_v17 = vadd.f32 %v7068_v4, %v6820_v0  ;;  %v4176_v53 = vpop.f32.mrf.mxu1  ;;  %v6822_v27 = vpop.f32.mrf.mxu0 }
 0x1c3   : > { %v4387_v30 = vadd.f32 %v4386_v29, %v4356_v26  ;;  %v6823_v62 = vadd.f32 %v6822_v27, %v6821_v57 }
 0x1c4   : > { %v4287_v31 = vadd.f32 %v4169_v17, %v9504_v59  ;;  %v6824_v18 = vpop.f32.mrf.mxu0 }
 0x1c5   : > { %v9663_v35 = vpop.f32.mrf.mxu1  ;;  %v4174_v24 = vadd.f32 %v6823_v62, %v4173_v60 }
 0x1c6   : > { %v4318_v6 = vadd.f32 %v4317_v22, %v4287_v31  ;;  %v4357_v39 = vmul.f32 %v4287_v31, %v4287_v31  ;;  %v6339_v34 = vpack.c.bf16 %v4287_v31, %v4286_v32  ;;  %v6825_v4 = vpop.f32.mrf.mxu0 }
 0x1c7   : > { %v4189_v61 = vpop.f32.mrf.mxu1  ;;  %v4288_v1 = vadd.f32 %v4174_v24, %v9523_v58  ;;  %v6826_v21 = vadd.f32 %v6825_v4, %v6824_v18 }
 0x1c8   : > { %v4388_v11 = vadd.f32 %v4387_v30, %v4357_v39  ;;  %6491 = vst [vmem:[%s9658_s18 + $0x8] sm:$0xff] %v6339_v34  }
 0x1c9   : > { %v9666_v25 = vpop.f32.mrf.mxu1  ;;  %v4319_v52 = vadd.f32 %v4318_v6, %v4288_v1  ;;  %v4358_v12 = vmul.f32 %v4288_v1, %v4288_v1  ;;  %v4177_v8 = vadd.f32 %v6826_v21, %v4176_v53 }
 0x1ca   : > { %v6827_v59 = vpop.f32.mrf.mxu0 }
 0x1cb   : > { %v4192_v40 = vpop.f32.mrf.mxu1  ;;  %v4389_v47 = vadd.f32 %v4388_v11, %v4358_v12  ;;  %v4289_v7 = vadd.f32 %v4177_v8, %v9541_v10 }
 0x1cc   : > { %v6828_v16 = vpop.f32.mrf.mxu0 }
 0x1cd   : > { %v9669_v20 = vpop.f32.mrf.mxu1  ;;  %v6829_v32 = vadd.f32 %v6828_v16, %v6827_v59  ;;  %v4320_v29 = vadd.f32 %v4319_v52, %v4289_v7  ;;  %v4359_v22 = vmul.f32 %v4289_v7, %v4289_v7  ;;  %v6344_v58 = vpack.c.bf16 %v4289_v7, %v4288_v1 }
 0x1ce   : > { %v6830_v0 = vpop.f32.mrf.mxu0 }
 0x1cf   : > { %v9672_v60 = vpop.f32.mrf.mxu1  ;;  %v4182_v26 = vadd.f32 %v7071_v54, %v6829_v32  ;;  %v4390_v30 = vadd.f32 %v4389_v47, %v4359_v22  ;;  %6492 = vst [vmem:[%s9658_s18 + $0x10] sm:$0xff] %v6344_v58  }
 0x1d0   : > { %v6831_v57 = vpop.f32.mrf.mxu0 }
 0x1d1   : > { %v9674_v17 = vpop.f32.mrf.mxu1  ;;  %v4290_v53 = vadd.f32 %v4182_v26, %v9518_v19  ;;  %v6832_v31 = vadd.f32 %v6831_v57, %v6830_v0 }
 0x1d3   : > { %v9678_v27 = vpop.f32.mrf.mxu1  ;;  %v4321_v6 = vadd.f32 %v4320_v29, %v4290_v53  ;;  %v4360_v10 = vmul.f32 %v4290_v53, %v4290_v53  ;;  %v4185_v39 = vadd.f32 %v7072_v9, %v6832_v31 }
 0x1d5   : > { %v9680_v62 = vpop.f32.mrf.mxu1  ;;  %v4391_v18 = vadd.f32 %v4390_v30, %v4360_v10  ;;  %v4291_v54 = vadd.f32 %v4185_v39, %v9532_v44 }
 0x1d7   : > { %v9683_v24 = vpop.f32.mrf.mxu1  ;;  %v4322_v4 = vadd.f32 %v4321_v6, %v4291_v54  ;;  %v4361_v1 = vmul.f32 %v4291_v54, %v4291_v54  ;;  %v6349_v21 = vpack.c.bf16 %v4291_v54, %v4290_v53 }
 0x1d8   : > { %v6833_v34 = vpop.f32.mrf.mxu0 }
 0x1d9   : > { %v9685_v52 = vpop.f32.mrf.mxu1  ;;  %v4392_v12 = vadd.f32 %v4391_v18, %v4361_v1  ;;  %6493 = vst [vmem:[%s9658_s18 + $0x18] sm:$0xff] %v6349_v21  }
 0x1da   : > { %v6834_v11 = vpop.f32.mrf.mxu0 }
 0x1db   : > { %v6835_v19 = vadd.f32 %v6834_v11, %v6833_v34  ;;  %v9688_v16 = vpop.f32.mrf.mxu1 }
 0x1dc   : > { %v6836_v59 = vpop.f32.mrf.mxu0 }
 0x1dd   : > { %v4190_v8 = vadd.f32 %v6835_v19, %v4189_v61  ;;  %v9691_v32 = vpop.f32.mrf.mxu1 }
 0x1de   : > { %v6837_v9 = vpop.f32.mrf.mxu0 }
 0x1df   : > { %v4292_v47 = vadd.f32 %v4190_v8, %v9553_v38  ;;  %v6838_v7 = vadd.f32 %v6837_v9, %v6836_v59  ;;  %v9693_v26 = vpop.f32.mrf.mxu1 }
 0x1e0   : > { %v6839_v44 = vpop.f32.mrf.mxu0 }
 0x1e1   : > { %v4323_v0 = vadd.f32 %v4322_v4, %v4292_v47  ;;  %v4362_v29 = vmul.f32 %v4292_v47, %v4292_v47  ;;  %v4193_v22 = vadd.f32 %v6838_v7, %v4192_v40  ;;  %v9696_v31 = vpop.f32.mrf.mxu1 }
 0x1e2   : > { %v6840_v58 = vpop.f32.mrf.mxu0 }
 0x1e3   : > { %v4393_v57 = vadd.f32 %v4392_v12, %v4362_v29  ;;  %v4293_v30 = vadd.f32 %v4193_v22, %v9562_v2  ;;  %v6841_v61 = vadd.f32 %v6840_v58, %v6839_v44  ;;  %v9699_v18 = vpop.f32.mrf.mxu1 }
 0x1e4   : > { %v6842_v53 = vpop.f32.mrf.mxu0 }
 0x1e5   : > { %v4324_v6 = vadd.f32 %v4323_v0, %v4293_v30  ;;  %v4363_v38 = vmul.f32 %v4293_v30, %v4293_v30  ;;  %v6354_v10 = vpack.c.bf16 %v4293_v30, %v4292_v47  ;;  %v4198_v39 = vadd.f32 %v9663_v35, %v6841_v61 }
 0x1e6   : > { %v6843_v34 = vpop.f32.mrf.mxu0  ;;  %v9704_v21 = vpop.f32.mrf.mxu1 }
 0x1e7   : > { %v4394_v54 = vadd.f32 %v4393_v57, %v4363_v38  ;;  %6494 = vst [vmem:[%s9658_s18 + $0x20] sm:$0xff] %v6354_v10   ;;  %v4294_v40 = vadd.f32 %v4198_v39, %v9550_v23  ;;  %v6844_v11 = vadd.f32 %v6843_v34, %v6842_v53 }
 0x1e8   : > { %v6845_v19 = vpop.f32.mrf.mxu0  ;;  %v9707_v35 = vpop.f32.mrf.mxu1 }
 0x1e9   : > { %v4325_v4 = vadd.f32 %v4324_v6, %v4294_v40  ;;  %v4364_v2 = vmul.f32 %v4294_v40, %v4294_v40  ;;  %v4201_v1 = vadd.f32 %v9666_v25, %v6844_v11 }
 0x1ea   : > { %v6846_v8 = vpop.f32.mrf.mxu0  ;;  %v9709_v23 = vpop.f32.mrf.mxu1 }
 0x1eb   : > { %v4395_v59 = vadd.f32 %v4394_v54, %v4364_v2  ;;  %v4295_v12 = vadd.f32 %v4201_v1, %v9559_v50  ;;  %v6847_v44 = vadd.f32 %v6846_v8, %v6845_v19 }
 0x1ec   : > { %v6848_v0 = vpop.f32.mrf.mxu0  ;;  %v9713_v22 = vpop.f32.mrf.mxu1 }
 0x1ed   : > { %v4326_v9 = vadd.f32 %v4325_v4, %v4295_v12  ;;  %v4365_v47 = vmul.f32 %v4295_v12, %v4295_v12  ;;  %v6359_v7 = vpack.c.bf16 %v4295_v12, %v4294_v40  ;;  %v4206_v25 = vadd.f32 %v6847_v44, %v9672_v60 }
 0x1ee   : > { %v6849_v58 = vpop.f32.mrf.mxu0 }
 0x1ef   : > { %v4396_v29 = vadd.f32 %v4395_v59, %v4365_v47  ;;  %6495 = vst [vmem:[%s9658_s18 + $0x28] sm:$0xff] %v6359_v7   ;;  %v4296_v57 = vadd.f32 %v4206_v25, %v9576_v3  ;;  %v6850_v50 = vadd.f32 %v6849_v58, %v6848_v0  ;;  %v9717_v38 = vpop.f32.mrf.mxu1 }
 0x1f0   : > { %v6851_v30 = vpop.f32.mrf.mxu0 }
 0x1f1   : > { %v4327_v61 = vadd.f32 %v4326_v9, %v4296_v57  ;;  %v4366_v53 = vmul.f32 %v4296_v57, %v4296_v57  ;;  %v4209_v6 = vadd.f32 %v6850_v50, %v9678_v27  ;;  %v9721_v2 = vpop.f32.mrf.mxu1 }
 0x1f2   : > { %v6852_v10 = vpop.f32.mrf.mxu0 }
 0x1f3   : > { %v4397_v39 = vadd.f32 %v4396_v29, %v4366_v53  ;;  %v4297_v34 = vadd.f32 %v4209_v6, %v9585_v13  ;;  %v6853_v54 = vadd.f32 %v6852_v10, %v6851_v30  ;;  %v9725_v9 = vpop.f32.mrf.mxu1 }
 0x1f4   : > { %v6854_v60 = vpop.f32.mrf.mxu0 }
 0x1f5   : > { %v4328_v40 = vadd.f32 %v4327_v61, %v4297_v34  ;;  %v4367_v11 = vmul.f32 %v4297_v34, %v4297_v34  ;;  %v6364_v4 = vpack.c.bf16 %v4297_v34, %v4296_v57  ;;  %v4214_v3 = vadd.f32 %v9669_v20, %v6853_v54  ;;  %v9729_v58 = vpop.f32.mrf.mxu1 }
 0x1f6   : > { %v6855_v1 = vpop.f32.mrf.mxu0 }
 0x1f7   : > { %v4398_v19 = vadd.f32 %v4397_v39, %v4367_v11  ;;  %6496 = vst [vmem:[%s9658_s18 + $0x30] sm:$0xff] %v6364_v4   ;;  %v4298_v27 = vadd.f32 %v4214_v3, %v9568_v28  ;;  %v6856_v59 = vadd.f32 %v6855_v1, %v6854_v60 }
 0x1f9   : > { %v4329_v12 = vadd.f32 %v4328_v40, %v4298_v27  ;;  %v4368_v8 = vmul.f32 %v4298_v27, %v4298_v27  ;;  %v4217_v13 = vadd.f32 %v9674_v17, %v6856_v59  ;;  %v6857_v47 = vpop.f32.mrf.mxu0 }
 0x1fb   : > { %v4399_v7 = vadd.f32 %v4398_v19, %v4368_v8  ;;  %v4299_v44 = vadd.f32 %v4217_v13, %v9579_v49  ;;  %v6858_v20 = vpop.f32.mrf.mxu0 }
 0x1fc   : > { %v6859_v28 = vadd.f32 %v6858_v20, %v6857_v47 }
 0x1fd   : > { %v4330_v0 = vadd.f32 %v4329_v12, %v4299_v44  ;;  %v4369_v29 = vmul.f32 %v4299_v44, %v4299_v44  ;;  %v6369_v25 = vpack.c.bf16 %v4299_v44, %v4298_v27  ;;  %v6860_v57 = vpop.f32.mrf.mxu0 }
 0x1fe   : > { %v4222_v30 = vadd.f32 %v6859_v28, %v9683_v24 }
 0x1ff   : > { %v4400_v50 = vadd.f32 %v4399_v7, %v4369_v29  ;;  %6497 = vst [vmem:[%s9658_s18 + $0x38] sm:$0xff] %v6369_v25   ;;  %v6861_v61 = vpop.f32.mrf.mxu0 }
 0x200   : > { %v7115_v53 = vpop.f32.mrf.mxu1  ;;  %v4300_v17 = vadd.f32 %v4222_v30, %v9594_v15  ;;  %v6862_v6 = vadd.f32 %v6861_v61, %v6860_v57 }
 0x201   : > { %v5345_v8 = vmul.f32 %v7115_v53, %v7115_v53 }
 0x202   : > { %v4331_v10 = vadd.f32 %v4330_v0, %v4300_v17  ;;  %v4370_v49 = vmul.f32 %v4300_v17, %v4300_v17  ;;  %v5178_v39 = vpop.f32.mrf.mxu1  ;;  %v4225_v34 = vadd.f32 %v6862_v6, %v9688_v16 }
 0x203   : > { %v5343_v1 = vmul.f32 %v5178_v39, %v5178_v39 }
 0x204   : > { %v4401_v54 = vadd.f32 %v4400_v50, %v4370_v49  ;;  %v7116_v24 = vpop.f32.mrf.mxu1  ;;  %v4301_v60 = vadd.f32 %v4225_v34, %v9607_v42 }
 0x205   : > { %v6419_v40 = vpack.c.bf16 %v7116_v24, %v7115_v53  ;;  %v5346_v29 = vmul.f32 %v7116_v24, %v7116_v24 }
 0x206   : > { %v4332_v15 = vadd.f32 %v4331_v10, %v4301_v60  ;;  %v4371_v11 = vmul.f32 %v4301_v60, %v4301_v60  ;;  %v6374_v4 = vpack.c.bf16 %v4301_v60, %v4300_v17  ;;  %v5181_v3 = vpop.f32.mrf.mxu1 }
 0x207   : > { %6506 = vst [vmem:[%s9740_s24 + $0x8] sm:$0xff] %v6419_v40   ;;  %v5305_v16 = vadd.f32 %v5181_v3, %v5178_v39  ;;  %v5344_v19 = vmul.f32 %v5181_v3, %v5181_v3  ;;  %v6414_v27 = vpack.c.bf16 %v5181_v3, %v5178_v39  ;;  %v6863_v59 = vpop.f32.mrf.mxu0 }
 0x208   : > { %v4402_v12 = vadd.f32 %v4401_v54, %v4371_v11  ;;  %6498 = vst [vmem:[%s9658_s18 + $0x40] sm:$0xff] %v6374_v4  }
 0x209   : > { %v5306_v13 = vadd.f32 %v7115_v53, %v5305_v16  ;;  %v5375_v47 = vadd.f32 %v5344_v19, %v5343_v1  ;;  %6415 = vst [vmem:[%s9740_s24] sm:$0xff] %v6414_v27   ;;  %v6864_v7 = vpop.f32.mrf.mxu0 }
 0x20a   : > { %v6865_v42 = vadd.f32 %v6864_v7, %v6863_v59 }
 0x20b   : > { %v5376_v44 = vadd.f32 %v5375_v47, %v5345_v8  ;;  %v6866_v20 = vpop.f32.mrf.mxu0  ;;  %v5307_v25 = vadd.f32 %v7116_v24, %v5306_v13 }
 0x20c   : > { %v4230_v0 = vadd.f32 %v9680_v62, %v6865_v42 }
 0x20d   : > { %v6867_v28 = vpop.f32.mrf.mxu0  ;;  %v5377_v61 = vadd.f32 %v5376_v44, %v5346_v29 }
 0x20e   : > { %v7119_v57 = vpop.f32.mrf.mxu1  ;;  %v4302_v50 = vadd.f32 %v4230_v0, %v9588_v5  ;;  %v6868_v30 = vadd.f32 %v6867_v28, %v6866_v20 }
 0x20f   : > { %v5349_v59 = vmul.f32 %v7119_v57, %v7119_v57 }
 0x210   : > { %v4333_v17 = vadd.f32 %v4332_v15, %v4302_v50  ;;  %v4372_v6 = vmul.f32 %v4302_v50, %v4302_v50  ;;  %v5194_v53 = vpop.f32.mrf.mxu1  ;;  %v4233_v10 = vadd.f32 %v9685_v52, %v6868_v30 }
 0x211   : > { %v5308_v49 = vadd.f32 %v5307_v25, %v5194_v53  ;;  %v5347_v39 = vmul.f32 %v5194_v53, %v5194_v53 }
 0x212   : > { %v4403_v34 = vadd.f32 %v4402_v12, %v4372_v6  ;;  %v7120_v54 = vpop.f32.mrf.mxu1  ;;  %v4303_v62 = vadd.f32 %v4233_v10, %v9601_v51 }
 0x213   : > { %v5378_v24 = vadd.f32 %v5377_v61, %v5347_v39  ;;  %v6429_v60 = vpack.c.bf16 %v7120_v54, %v7119_v57  ;;  %v5350_v42 = vmul.f32 %v7120_v54, %v7120_v54 }
 0x214   : > { %v4334_v40 = vadd.f32 %v4333_v17, %v4303_v62  ;;  %v4373_v5 = vmul.f32 %v4303_v62, %v4303_v62  ;;  %v6379_v11 = vpack.c.bf16 %v4303_v62, %v4302_v50  ;;  %v5197_v4 = vpop.f32.mrf.mxu1 }
 0x215   : > { %6508 = vst [vmem:[%s9740_s24 + $0x18] sm:$0xff] %v6429_v60   ;;  %v5309_v15 = vadd.f32 %v5308_v49, %v5197_v4  ;;  %v5348_v3 = vmul.f32 %v5197_v4, %v5197_v4  ;;  %v6424_v1 = vpack.c.bf16 %v5197_v4, %v5194_v53  ;;  %v6869_v16 = vpop.f32.mrf.mxu0 }
 0x216   : > { %v4404_v52 = vadd.f32 %v4403_v34, %v4373_v5  ;;  %6499 = vst [vmem:[%s9658_s18 + $0x48] sm:$0xff] %v6379_v11  }
 0x217   : > { %v5379_v19 = vadd.f32 %v5378_v24, %v5348_v3  ;;  %6507 = vst [vmem:[%s9740_s24 + $0x10] sm:$0xff] %v6424_v1   ;;  %v6870_v27 = vpop.f32.mrf.mxu0  ;;  %v5310_v12 = vadd.f32 %v7119_v57, %v5309_v15 }
 0x218   : > { %v6871_v8 = vadd.f32 %v6870_v27, %v6869_v16 }
 0x219   : > { %v6872_v51 = vpop.f32.mrf.mxu0  ;;  %v5380_v13 = vadd.f32 %v5379_v19, %v5349_v59  ;;  %v5311_v20 = vadd.f32 %v7120_v54, %v5310_v12 }
 0x21a   : > { %v4238_v47 = vadd.f32 %v6871_v8, %v9693_v26 }
 0x21b   : > { %v6873_v7 = vpop.f32.mrf.mxu0  ;;  %v5381_v50 = vadd.f32 %v5380_v13, %v5350_v42 }
 0x21c   : > { %v4304_v44 = vadd.f32 %v4238_v47, %v9615_v43  ;;  %v6874_v0 = vadd.f32 %v6873_v7, %v6872_v51 }
 0x21d   : > { %v7123_v29 = vpop.f32.mrf.mxu1 }
 0x21e   : > { %v4335_v25 = vadd.f32 %v4334_v40, %v4304_v44  ;;  %v4374_v28 = vmul.f32 %v4304_v44, %v4304_v44  ;;  %v4241_v30 = vadd.f32 %v6874_v0, %v9699_v18 }
 0x21f   : > { %v5210_v61 = vpop.f32.mrf.mxu1 }
 0x220   : > { %v4405_v57 = vadd.f32 %v4404_v52, %v4374_v28  ;;  %v5312_v17 = vadd.f32 %v5311_v20, %v5210_v61  ;;  %v5351_v6 = vmul.f32 %v5210_v61, %v5210_v61  ;;  %v4305_v26 = vadd.f32 %v4241_v30, %v9622_v63 }
 0x221   : > { %v7124_v53 = vpop.f32.mrf.mxu1  ;;  %v5353_v63 = vmul.f32 %v7123_v29, %v7123_v29 }
 0x222   : > { %v5382_v10 = vadd.f32 %v5381_v50, %v5351_v6  ;;  %v6439_v43 = vpack.c.bf16 %v7124_v53, %v7123_v29  ;;  %v4336_v49 = vadd.f32 %v4335_v25, %v4305_v26  ;;  %v4375_v39 = vmul.f32 %v4305_v26, %v4305_v26 }
 0x223   : > { %v6384_v34 = vpack.c.bf16 %v4305_v26, %v4304_v44  ;;  %v5213_v54 = vpop.f32.mrf.mxu1  ;;  %v6875_v62 = vpop.f32.mrf.mxu0  ;;  %v5354_v59 = vmul.f32 %v7124_v53, %v7124_v53 }
 0x224   : > { %6510 = vst [vmem:[%s9740_s24 + $0x28] sm:$0xff] %v6439_v43   ;;  %v5313_v24 = vadd.f32 %v5312_v17, %v5213_v54  ;;  %v5352_v60 = vmul.f32 %v5213_v54, %v5213_v54  ;;  %v6434_v18 = vpack.c.bf16 %v5213_v54, %v5210_v61  ;;  %v4406_v40 = vadd.f32 %v4405_v57, %v4375_v39 }
 0x225   : > { %6500 = vst [vmem:[%s9658_s18 + $0x50] sm:$0xff] %v6384_v34   ;;  %v6876_v5 = vpop.f32.mrf.mxu0 }
 0x226   : > { %v5383_v11 = vadd.f32 %v5382_v10, %v5352_v60  ;;  %6509 = vst [vmem:[%s9740_s24 + $0x20] sm:$0xff] %v6434_v18   ;;  %v6877_v4 = vadd.f32 %v6876_v5, %v6875_v62  ;;  %v5314_v15 = vadd.f32 %v7123_v29, %v5313_v24 }
 0x227   : > { %v6878_v3 = vpop.f32.mrf.mxu0 }
 0x228   : > { %v4246_v1 = vadd.f32 %v9691_v32, %v6877_v4  ;;  %v5384_v16 = vadd.f32 %v5383_v11, %v5353_v63  ;;  %v5315_v12 = vadd.f32 %v7124_v53, %v5314_v15 }
 0x229   : > { %v6879_v52 = vpop.f32.mrf.mxu0 }
 0x22a   : > { %v4306_v19 = vadd.f32 %v4246_v1, %v9610_v33  ;;  %v6880_v27 = vadd.f32 %v6879_v52, %v6878_v3  ;;  %v5385_v7 = vadd.f32 %v5384_v16, %v5354_v59 }
 0x22c   : > { %v7127_v8 = vpop.f32.mrf.mxu1  ;;  %v4337_v51 = vadd.f32 %v4336_v49, %v4306_v19  ;;  %v4376_v13 = vmul.f32 %v4306_v19, %v4306_v19  ;;  %v4249_v47 = vadd.f32 %v9696_v31, %v6880_v27 }
 0x22d   : > { %v5357_v10 = vmul.f32 %v7127_v8, %v7127_v8 }
 0x22e   : > { %v4407_v42 = vadd.f32 %v4406_v40, %v4376_v13  ;;  %v5226_v44 = vpop.f32.mrf.mxu1  ;;  %v4307_v20 = vadd.f32 %v4249_v47, %v9618_v48 }
 0x22f   : > { %v5316_v32 = vadd.f32 %v5315_v12, %v5226_v44  ;;  %v5355_v0 = vmul.f32 %v5226_v44, %v5226_v44 }
 0x230   : > { %v7128_v29 = vpop.f32.mrf.mxu1  ;;  %v4338_v25 = vadd.f32 %v4337_v51, %v4307_v20  ;;  %v4377_v33 = vmul.f32 %v4307_v20, %v4307_v20  ;;  %v6389_v28 = vpack.c.bf16 %v4307_v20, %v4306_v19 }
 0x231   : > { %v5386_v50 = vadd.f32 %v5385_v7, %v5355_v0  ;;  %v6449_v30 = vpack.c.bf16 %v7128_v29, %v7127_v8  ;;  %v5358_v24 = vmul.f32 %v7128_v29, %v7128_v29 }
 0x232   : > { %v4408_v61 = vadd.f32 %v4407_v42, %v4377_v33  ;;  %6501 = vst [vmem:[%s9658_s18 + $0x58] sm:$0xff] %v6389_v28   ;;  %v5229_v57 = vpop.f32.mrf.mxu1  ;;  %v6881_v17 = vpop.f32.mrf.mxu0 }
 0x233   : > { %6512 = vst [vmem:[%s9740_s24 + $0x38] sm:$0xff] %v6449_v30   ;;  %v5317_v31 = vadd.f32 %v5316_v32, %v5229_v57  ;;  %v5356_v6 = vmul.f32 %v5229_v57, %v5229_v57  ;;  %v6444_v26 = vpack.c.bf16 %v5229_v57, %v5226_v44 }
 0x234   : > { %v6882_v53 = vpop.f32.mrf.mxu0 }
 0x235   : > { %v5318_v48 = vadd.f32 %v7127_v8, %v5317_v31  ;;  %v5387_v43 = vadd.f32 %v5386_v50, %v5356_v6  ;;  %6511 = vst [vmem:[%s9740_s24 + $0x30] sm:$0xff] %v6444_v26   ;;  %v6883_v49 = vadd.f32 %v6882_v53, %v6881_v17 }
 0x236   : > { %v6884_v39 = vpop.f32.mrf.mxu0 }
 0x237   : > { %v5388_v34 = vadd.f32 %v5387_v43, %v5357_v10  ;;  %v4254_v54 = vadd.f32 %v6883_v49, %v9707_v35  ;;  %v5319_v18 = vadd.f32 %v7128_v29, %v5318_v48 }
 0x238   : > { %v6885_v62 = vpop.f32.mrf.mxu0 }
 0x239   : > { %v4308_v60 = vadd.f32 %v4254_v54, %v9629_v56  ;;  %v6886_v40 = vadd.f32 %v6885_v62, %v6884_v39  ;;  %v5389_v63 = vadd.f32 %v5388_v34, %v5358_v24 }
 0x23a   : > { %v7131_v5 = vpop.f32.mrf.mxu1 }
 0x23b   : > { %v4339_v11 = vadd.f32 %v4338_v25, %v4308_v60  ;;  %v4378_v4 = vmul.f32 %v4308_v60, %v4308_v60  ;;  %v4257_v15 = vadd.f32 %v6886_v40, %v9713_v22  ;;  %v5361_v44 = vmul.f32 %v7131_v5, %v7131_v5 }
 0x23c   : > { %v5242_v3 = vpop.f32.mrf.mxu1 }
 0x23d   : > { %v4409_v1 = vadd.f32 %v4408_v61, %v4378_v4  ;;  %v5320_v16 = vadd.f32 %v5319_v18, %v5242_v3  ;;  %v5359_v52 = vmul.f32 %v5242_v3, %v5242_v3  ;;  %v4309_v35 = vadd.f32 %v4257_v15, %v9639_v14 }
 0x23e   : > { %v7132_v19 = vpop.f32.mrf.mxu1 }
 0x23f   : > { %v5390_v27 = vadd.f32 %v5389_v63, %v5359_v52  ;;  %v6459_v56 = vpack.c.bf16 %v7132_v19, %v7131_v5  ;;  %v4340_v59 = vadd.f32 %v4339_v11, %v4309_v35  ;;  %v4379_v12 = vmul.f32 %v4309_v35, %v4309_v35 }
 0x240   : > { %v6394_v8 = vpack.c.bf16 %v4309_v35, %v4308_v60  ;;  %v5245_v51 = vpop.f32.mrf.mxu1  ;;  %v5362_v28 = vmul.f32 %v7132_v19, %v7132_v19 }
 0x241   : > { %6514 = vst [vmem:[%s9740_s24 + $0x48] sm:$0xff] %v6459_v56   ;;  %v5321_v13 = vadd.f32 %v5320_v16, %v5245_v51  ;;  %v5360_v47 = vmul.f32 %v5245_v51, %v5245_v51  ;;  %v6454_v7 = vpack.c.bf16 %v5245_v51, %v5242_v3  ;;  %v6887_v22 = vpop.f32.mrf.mxu0  ;;  %v4410_v42 = vadd.f32 %v4409_v1, %v4379_v12 }
 0x242   : > { %6502 = vst [vmem:[%s9658_s18 + $0x60] sm:$0xff] %v6394_v8  }
 0x243   : > { %v5322_v20 = vadd.f32 %v7131_v5, %v5321_v13  ;;  %v5391_v32 = vadd.f32 %v5390_v27, %v5360_v47  ;;  %6513 = vst [vmem:[%s9740_s24 + $0x40] sm:$0xff] %v6454_v7   ;;  %v6888_v14 = vpop.f32.mrf.mxu0 }
 0x244   : > { %v6889_v0 = vadd.f32 %v6888_v14, %v6887_v22 }
 0x245   : > { %v5392_v29 = vadd.f32 %v5391_v32, %v5361_v44  ;;  %v6890_v25 = vpop.f32.mrf.mxu0  ;;  %v5323_v50 = vadd.f32 %v7132_v19, %v5322_v20 }
 0x246   : > { %v4262_v33 = vadd.f32 %v9704_v21, %v6889_v0 }
 0x247   : > { %v6891_v30 = vpop.f32.mrf.mxu0  ;;  %v5393_v31 = vadd.f32 %v5392_v29, %v5362_v28 }
 0x248   : > { %v7135_v61 = vpop.f32.mrf.mxu1  ;;  %v4310_v57 = vadd.f32 %v4262_v33, %v9625_v46  ;;  %v6892_v17 = vadd.f32 %v6891_v30, %v6890_v25 }
 0x249   : > { %v5365_v15 = vmul.f32 %v7135_v61, %v7135_v61 }
 0x24a   : > { %v4341_v6 = vadd.f32 %v4340_v59, %v4310_v57  ;;  %v4380_v26 = vmul.f32 %v4310_v57, %v4310_v57  ;;  %v5258_v53 = vpop.f32.mrf.mxu1  ;;  %v4265_v10 = vadd.f32 %v9709_v23, %v6892_v17 }
 0x24b   : > { %v5324_v48 = vadd.f32 %v5323_v50, %v5258_v53  ;;  %v5363_v43 = vmul.f32 %v5258_v53, %v5258_v53 }
 0x24c   : > { %v4411_v49 = vadd.f32 %v4410_v42, %v4380_v26  ;;  %v7136_v39 = vpop.f32.mrf.mxu1  ;;  %v4311_v21 = vadd.f32 %v4265_v10, %v9636_v45 }
 0x24d   : > { %v5394_v34 = vadd.f32 %v5393_v31, %v5363_v43  ;;  %v6469_v54 = vpack.c.bf16 %v7136_v39, %v7135_v61  ;;  %v5366_v19 = vmul.f32 %v7136_v39, %v7136_v39 }
 0x24e   : > { %v4342_v62 = vadd.f32 %v4341_v6, %v4311_v21  ;;  %v4381_v46 = vmul.f32 %v4311_v21, %v4311_v21  ;;  %v6399_v24 = vpack.c.bf16 %v4311_v21, %v4310_v57  ;;  %v5261_v60 = vpop.f32.mrf.mxu1 }
 0x24f   : > { %6516 = vst [vmem:[%s9740_s24 + $0x58] sm:$0xff] %v6469_v54   ;;  %v5325_v18 = vadd.f32 %v5324_v48, %v5261_v60  ;;  %v5364_v40 = vmul.f32 %v5261_v60, %v5261_v60  ;;  %v6464_v5 = vpack.c.bf16 %v5261_v60, %v5258_v53  ;;  %v6893_v11 = vpop.f32.mrf.mxu0 }
 0x250   : > { %v4412_v23 = vadd.f32 %v4411_v49, %v4381_v46  ;;  %6503 = vst [vmem:[%s9658_s18 + $0x68] sm:$0xff] %v6399_v24  }
 0x251   : > { %v5395_v4 = vadd.f32 %v5394_v34, %v5364_v40  ;;  %6515 = vst [vmem:[%s9740_s24 + $0x50] sm:$0xff] %v6464_v5   ;;  %v6894_v63 = vpop.f32.mrf.mxu0  ;;  %v5326_v3 = vadd.f32 %v7135_v61, %v5325_v18 }
 0x252   : > { %v6895_v1 = vadd.f32 %v6894_v63, %v6893_v11 }
 0x253   : > { %v6896_v45 = vpop.f32.mrf.mxu0  ;;  %v5396_v16 = vadd.f32 %v5395_v4, %v5365_v15  ;;  %v5327_v56 = vadd.f32 %v7136_v39, %v5326_v3 }
 0x254   : > { %v4270_v52 = vadd.f32 %v6895_v1, %v9721_v2 }
 0x255   : > { %v6897_v35 = vpop.f32.mrf.mxu0  ;;  %v5397_v13 = vadd.f32 %v5396_v16, %v5366_v19 }
 0x256   : > { %v4312_v27 = vadd.f32 %v4270_v52, %v9642_v37  ;;  %v6898_v59 = vadd.f32 %v6897_v35, %v6896_v45 }
 0x257   : > { %v7139_v12 = vpop.f32.mrf.mxu1 }
 0x258   : > { %v4343_v8 = vadd.f32 %v4342_v62, %v4312_v27  ;;  %v4382_v51 = vmul.f32 %v4312_v27, %v4312_v27  ;;  %v4273_v47 = vadd.f32 %v6898_v59, %v9729_v58 }
 0x259   : > { %v5274_v7 = vpop.f32.mrf.mxu1 }
 0x25a   : > { %v4413_v22 = vadd.f32 %v4412_v23, %v4382_v51  ;;  %v5328_v42 = vadd.f32 %v5327_v56, %v5274_v7  ;;  %v5367_v44 = vmul.f32 %v5274_v7, %v5274_v7  ;;  %v4313_v2 = vadd.f32 %v4273_v47, %v9644_v55 }
 0x25b   : > { %v7140_v20 = vpop.f32.mrf.mxu1  ;;  %v5369_v55 = vmul.f32 %v7139_v12, %v7139_v12 }
 0x25c   : > { %v5398_v32 = vadd.f32 %v5397_v13, %v5367_v44  ;;  %v6479_v37 = vpack.c.bf16 %v7140_v20, %v7139_v12  ;;  %v4344_v14 = vadd.f32 %v4343_v8, %v4313_v2  ;;  %v4383_v0 = vmul.f32 %v4313_v2, %v4313_v2 }
 0x25d   : > { %v6404_v29 = vpack.c.bf16 %v4313_v2, %v4312_v27  ;;  %v5277_v25 = vpop.f32.mrf.mxu1  ;;  %v6899_v33 = vpop.f32.mrf.mxu0  ;;  %v5370_v49 = vmul.f32 %v7140_v20, %v7140_v20 }
 0x25e   : > { %6518 = vst [vmem:[%s9740_s24 + $0x68] sm:$0xff] %v6479_v37   ;;  %v5329_v28 = vadd.f32 %v5328_v42, %v5277_v25  ;;  %v5368_v50 = vmul.f32 %v5277_v25, %v5277_v25  ;;  %v6474_v58 = vpack.c.bf16 %v5277_v25, %v5274_v7  ;;  %v4414_v30 = vadd.f32 %v4413_v22, %v4383_v0 }
 0x25f   : > { %6504 = vst [vmem:[%s9658_s18 + $0x70] sm:$0xff] %v6404_v29   ;;  %v6900_v61 = vpop.f32.mrf.mxu0 }
 0x260   : > { %v5399_v57 = vadd.f32 %v5398_v32, %v5368_v50  ;;  %6517 = vst [vmem:[%s9740_s24 + $0x60] sm:$0xff] %v6474_v58   ;;  %v6901_v17 = vadd.f32 %v6900_v61, %v6899_v33  ;;  %v5330_v31 = vadd.f32 %v7139_v12, %v5329_v28 }
 0x261   : > { %v6902_v6 = vpop.f32.mrf.mxu0 }
 0x262   : > { %v4278_v26 = vadd.f32 %v9717_v38, %v6901_v17  ;;  %v5400_v53 = vadd.f32 %v5399_v57, %v5369_v55  ;;  %v5331_v39 = vadd.f32 %v7140_v20, %v5330_v31 }
 0x263   : > { %v6903_v10 = vpop.f32.mrf.mxu0 }
 0x264   : > { %v4314_v48 = vadd.f32 %v4278_v26, %v9646_v41  ;;  %v6904_v43 = vadd.f32 %v6903_v10, %v6902_v6  ;;  %v5401_v46 = vadd.f32 %v5400_v53, %v5370_v49 }
 0x266   : > { %v7143_v21 = vpop.f32.mrf.mxu1  ;;  %v4345_v34 = vadd.f32 %v4344_v14, %v4314_v48  ;;  %v4384_v54 = vmul.f32 %v4314_v48, %v4314_v48  ;;  %v4281_v62 = vadd.f32 %v9725_v9, %v6904_v43 }
 0x268   : > { %v4415_v24 = vadd.f32 %v4414_v30, %v4384_v54  ;;  %v5290_v60 = vpop.f32.mrf.mxu1  ;;  %v4315_v18 = vadd.f32 %v4281_v62, %v9648_v36  ;;  %v5373_v36 = vmul.f32 %v7143_v21, %v7143_v21 }
 0x269   : > { %v5332_v38 = vadd.f32 %v5331_v39, %v5290_v60  ;;  %v5371_v40 = vmul.f32 %v5290_v60, %v5290_v60 }
 0x26a   : > { %v7144_v5 = vpop.f32.mrf.mxu1  ;;  %v4346_v11 = vadd.f32 %v4345_v34, %v4315_v18  ;;  %v4385_v41 = vmul.f32 %v4315_v18, %v4315_v18  ;;  %v6409_v23 = vpack.c.bf16 %v4315_v18, %v4314_v48 }
 0x26b   : > { %v5402_v4 = vadd.f32 %v5401_v46, %v5371_v40  ;;  %v6489_v63 = vpack.c.bf16 %v7144_v5, %v7143_v21  ;;  %v5374_v12 = vmul.f32 %v7144_v5, %v7144_v5 }
 0x26c   : > { %v4347_v15 = vrot.slane %v4346_v11, 4  ;;  %v4416_v3 = vadd.f32 %v4415_v24, %v4385_v41  ;;  %6505 = vst [vmem:[%s9658_s18 + $0x78] sm:$0xff] %v6409_v23   ;;  %v5293_v1 = vpop.f32.mrf.mxu1 }
 0x26d   : > { %6520 = vst [vmem:[%s9740_s24 + $0x78] sm:$0xff] %v6489_v63   ;;  %v5333_v9 = vadd.f32 %v5332_v38, %v5293_v1  ;;  %v5372_v45 = vmul.f32 %v5293_v1, %v5293_v1  ;;  %v6484_v16 = vpack.c.bf16 %v5293_v1, %v5290_v60 }
 0x26e   : > { %v4348_v52 = vadd.f32 %v4347_v15, %v4346_v11  ;;  %v4417_v35 = vrot.slane %v4416_v3, 4 }
 0x26f   : > { %v5334_v19 = vadd.f32 %v7143_v21, %v5333_v9  ;;  %v5403_v27 = vadd.f32 %v5402_v4, %v5372_v45  ;;  %6519 = vst [vmem:[%s9740_s24 + $0x70] sm:$0xff] %v6484_v16  }
 0x270   : > { %v4349_v56 = vrot.slane %v4348_v52, 2  ;;  %v4418_v59 = vadd.f32 %v4417_v35, %v4416_v3 }
 0x271   : > { %v5335_v8 = vadd.f32 %v7144_v5, %v5334_v19  ;;  %v5404_v51 = vadd.f32 %v5403_v27, %v5373_v36 }
 0x272   : > { %v4350_v13 = vadd.f32 %v4349_v56, %v4348_v52  ;;  %v4419_v47 = vrot.slane %v4418_v59, 2 }
 0x273   : > { %v5336_v7 = vrot.slane %v5335_v8, 4  ;;  %v5405_v22 = vadd.f32 %v5404_v51, %v5374_v12 }
 0x274   : > { %v4351_v42 = vrot.slane %v4350_v13, 1  ;;  %v4420_v44 = vadd.f32 %v4419_v47, %v4418_v59 }
 0x275   : > { %v5337_v2 = vadd.f32 %v5336_v7, %v5335_v8  ;;  %v5406_v20 = vrot.slane %v5405_v22, 4 }
 0x276   : > { %v4352_v32 = vadd.f32 %v4351_v42, %v4350_v13  ;;  %v4421_v37 = vrot.slane %v4420_v44, 1 }
 0x277   : > { %v5338_v14 = vrot.slane %v5337_v2, 2  ;;  %v5407_v0 = vadd.f32 %v5406_v20, %v5405_v22 }
 0x278   : > { %v4422_v29 = vadd.f32 %v4421_v37, %v4420_v44  ;;  %4353 = vst [vmem:[%s280_s28] sm:$0x1] %v4352_v32 }
 0x279   : > { %v5339_v25 = vadd.f32 %v5338_v14, %v5337_v2  ;;  %v5408_v33 = vrot.slane %v5407_v0, 2 }
 0x27a   : > { %4423 = vst [vmem:[%s280_s28 + $0x1] sm:$0x1] %v4422_v29 }
 0x27b   : > { %v5340_v28 = vrot.slane %v5339_v25, 1  ;;  %v5409_v50 = vadd.f32 %v5408_v33, %v5407_v0 }
 0x27d   : > { %v5341_v58 = vadd.f32 %v5340_v28, %v5339_v25  ;;  %v5410_v30 = vrot.slane %v5409_v50, 1 }
 0x27f   : > { %5342 = vst [vmem:[%s284_s22] sm:$0x1] %v5341_v58  ;;  %v5411_v61 = vadd.f32 %v5410_v30, %v5409_v50 }
 0x281   : > { %5412 = vst [vmem:[%s284_s22 + $0x1] sm:$0x1] %v5411_v61 }
 0x282 PF: > { %s17_s21 = sadd.s32 1, %s7295_s21  }
 0x283   : > { %p14_p4 = scmp.ge.s32.totalorder %s17_s21, 4  }
 0x285   :  { %16 = sbr.rel (!%p14_p4) target bundleno = 1 (0x1), region = 100 }

</bundles_post_ra>
